<compile_context>
chip_gen: v7x
topology: tpu7x:2x2x1
jax: 0.10.0
libtpu: 0.0.40
codegen_flags: <defaults>
</compile_context>

<pallas_src>
import functools

import jax
import jax.numpy as jnp
from jax import lax
from jax.experimental import pallas as pl
from jax.experimental.pallas import tpu as pltpu

BN_EPS = 1e-5
LEAKY_SLOPE = 0.3
KPAD = 128                         # padded contraction width (one MXU K pass)


def _vmem_limit_bytes():
    # Budget against the actual chip (review items 8/9): ~48 MiB on v7x
    # (64 MiB VMEM/TC), ~96 MiB on v5e/v6e (128 MiB VMEM).
    try:
        cap = int(pltpu.get_tpu_info().vmem_capacity_bytes)
    except Exception:
        cap = 64 * 1024 * 1024
    return int(min(cap * 3 // 4, 100 * 1024 * 1024))


VMEM_LIMIT = _vmem_limit_bytes()


def _resident(shape):
    """BlockSpec for an operand that stays fully resident across the 1-D grid."""
    nd = len(shape)
    return pl.BlockSpec(shape, lambda n, _nd=nd: (0,) * _nd)


# ---------------------------------------------------------------------------
# BatchNorm batch statistics for x: per-channel mean (row 0) and
# 1/sqrt(var + eps) (row 1), packed in a (16, C) array.
# Grid over 512-row tiles of the flattened [N*H*W, C] activation.
# ---------------------------------------------------------------------------
def _bn_stats_kernel(x_ref, stats_ref, *, count):
    i = pl.program_id(0)

    @pl.when(i == 0)
    def _():
        stats_ref[...] = jnp.zeros_like(stats_ref)

    tile, C = x_ref.shape
    x = x_ref[...]
    # Sublane-shaped (8, C) partial sums: no per-step cross-sublane reduce and
    # no partial-sublane read-modify-write in the hot loop (review item 6).
    stats_ref[0:8, :] += jnp.sum(x.reshape(tile // 8, 8, C), axis=0)
    stats_ref[8:16, :] += jnp.sum((x * x).reshape(tile // 8, 8, C), axis=0)

    @pl.when(i == pl.num_programs(0) - 1)
    def _():
        # TODO(synk): single-pass E[x^2]-E[x]^2; switch to Welford/compensated
        #             sums if N*H*W grows large enough for cancellation.
        inv_n = 1.0 / count
        s = jnp.sum(stats_ref[0:8, :], axis=0, keepdims=True)
        ss = jnp.sum(stats_ref[8:16, :], axis=0, keepdims=True)
        m = s * inv_n
        v = jnp.maximum(ss * inv_n - m * m, 0.0)
        stats_ref[0:1, :] = m
        stats_ref[1:2, :] = 1.0 / jnp.sqrt(v + BN_EPS)


def bn_batch_stats(x_flat, count):
    P, C = x_flat.shape
    tile = min(512, ((P + 7) // 8) * 8)
    pad = (-P) % tile
    if pad:  # zero rows do not perturb sum / sum-of-squares; mean uses true count
        x_flat = jnp.pad(x_flat, ((0, pad), (0, 0)))
    grid = x_flat.shape[0] // tile
    return pl.pallas_call(
        functools.partial(_bn_stats_kernel, count=float(count)),
        grid=(grid,),
        in_specs=[pl.BlockSpec((tile, C), lambda i: (i, 0))],
        out_specs=pl.BlockSpec((16, C), lambda i: (0, 0)),
        out_shape=jax.ShapeDtypeStruct((16, C), jnp.float32),
        compiler_params=pltpu.CompilerParams(
            dimension_semantics=("arbitrary",),
            vmem_limit_bytes=VMEM_LIMIT),
    )(x_flat)


# ---------------------------------------------------------------------------
# Shared body: BN(batch stats) apply + leaky_relu(0.3) + zero halo + im2col.
# Fills patch_ref lanes [0, 9*Cin) so the 3x3 conv becomes one MXU matmul.
# ---------------------------------------------------------------------------
def _fill_conv_patch(src, stats_ref, gamma_ref, beta_ref, pad_ref, patch_ref):
    H, W, cin = src.shape
    mean = stats_ref[0:1, :]                        # (1, Cin)
    inv_std = stats_ref[1:2, :]
    scale = inv_std * gamma_ref[...]
    shift = beta_ref[...] - mean * scale
    a = src * scale.reshape(1, 1, cin) + shift.reshape(1, 1, cin)
    a = jnp.maximum(a, LEAKY_SLOPE * a)             # leaky_relu, slope < 1

    # conv_0 / conv_1 zero-pad AFTER bn+act: zero-ringed scratch, interior only
    pad_ref[...] = jnp.zeros_like(pad_ref)
    pad_ref[1:H + 1, 1:W + 1, :] = a

    # im2col: the 9 taps' real channels packed along the contraction lanes;
    # unused lanes stay zero (their packed weight rows are zero too).
    patch_ref[...] = jnp.zeros_like(patch_ref)
    t = 0
    for dy in range(3):
        for dxx in range(3):
            patch_ref[:, :, t * cin:(t + 1) * cin] = pad_ref[dy:dy + H, dxx:dxx + W, :]
            t += 1


# ---------------------------------------------------------------------------
# conv0 kernel: bn0 + act + 3x3 conv_0 (+ bias), and fused BN1 partial stats.
# ---------------------------------------------------------------------------
def _conv0_kernel(stats0_ref, gamma0_ref, beta0_ref, w0_ref, bias0_ref, x_ref,
                  h_ref, stats1_ref, pad_ref, patch_ref, *, count):
    n = pl.program_id(0)

    @pl.when(n == 0)
    def _():
        stats1_ref[...] = jnp.zeros_like(stats1_ref)

    _, H, W, _ = x_ref.shape
    fh = h_ref.shape[3]

    _fill_conv_patch(x_ref[0], stats0_ref, gamma0_ref, beta0_ref, pad_ref, patch_ref)
    patch = patch_ref[...].reshape(H * W, KPAD)
    h = jnp.dot(patch, w0_ref[...], preferred_element_type=jnp.float32)[:, :fh]
    h = h + bias0_ref[...]                           # (H*W, fh)
    h_ref[0] = h.reshape(H, W, fh)

    # Fused BN1 batch-statistics partials (sublane-shaped, reduced at finalize).
    stats1_ref[0:8, :] += jnp.sum(h.reshape(H * W // 8, 8, fh), axis=0)
    stats1_ref[8:16, :] += jnp.sum((h * h).reshape(H * W // 8, 8, fh), axis=0)

    @pl.when(n == pl.num_programs(0) - 1)
    def _():
        inv_n = 1.0 / count
        s = jnp.sum(stats1_ref[0:8, :], axis=0, keepdims=True)
        ss = jnp.sum(stats1_ref[8:16, :], axis=0, keepdims=True)
        m = s * inv_n
        v = jnp.maximum(ss * inv_n - m * m, 0.0)
        stats1_ref[0:1, :] = m
        stats1_ref[1:2, :] = 1.0 / jnp.sqrt(v + BN_EPS)


def bn_act_conv0(x, stats0, gamma0, beta0, w0, bias0):
    N, H, W, cin = x.shape
    fh = bias0.shape[1]
    return pl.pallas_call(
        functools.partial(_conv0_kernel, count=float(N * H * W)),
        grid=(N,),
        in_specs=[
            _resident(stats0.shape), _resident(gamma0.shape), _resident(beta0.shape),
            _resident(w0.shape), _resident(bias0.shape),
            pl.BlockSpec((1, H, W, cin), lambda n: (n, 0, 0, 0)),
        ],
        out_specs=[
            pl.BlockSpec((1, H, W, fh), lambda n: (n, 0, 0, 0)),
            pl.BlockSpec((16, fh), lambda n: (0, 0)),   # resident stats accumulator
        ],
        out_shape=[
            jax.ShapeDtypeStruct((N, H, W, fh), jnp.float32),
            jax.ShapeDtypeStruct((16, fh), jnp.float32),
        ],
        scratch_shapes=[
            pltpu.VMEM((H + 2, W + 2, cin), jnp.float32),   # zero-ringed halo
            pltpu.VMEM((H, W, KPAD), jnp.float32),          # im2col patch
        ],
        compiler_params=pltpu.CompilerParams(
            # batch axis is a reduction axis for the fused BN1-stats accumulator
            dimension_semantics=("arbitrary",),
            vmem_limit_bytes=VMEM_LIMIT),
    )(stats0, gamma0, beta0, w0, bias0, x)


# ---------------------------------------------------------------------------
# conv1 kernel: bn1 + act + 3x3 conv_1, with the 1x1/identity shortcut and the
# `x_s + 0.1*dx` residual fused into the SAME matmul (raw x channels occupy
# spare contraction lanes; conv_1 weights/bias pre-scaled by 0.1 at pack time).
# ---------------------------------------------------------------------------
def _conv1_kernel(stats1_ref, gamma1_ref, beta1_ref, w1_ref, bias1_ref,
                  h_ref, x_ref, out_ref, pad_ref, patch_ref):
    _, H, W, fin = x_ref.shape
    fh = h_ref.shape[3]
    fout = out_ref.shape[3]
    fh9 = 9 * fh

    _fill_conv_patch(h_ref[0], stats1_ref, gamma1_ref, beta1_ref, pad_ref, patch_ref)
    patch_ref[:, :, fh9:fh9 + fin] = x_ref[0]        # shortcut input lanes
    patch = patch_ref[...].reshape(H * W, KPAD)
    out = jnp.dot(patch, w1_ref[...], preferred_element_type=jnp.float32)[:, :fout]
    out_ref[0] = (out + bias1_ref[...]).reshape(H, W, fout)


def bn_act_conv1_residual(h, x, stats1, gamma1, beta1, w1, bias1):
    N, H, W, fh = h.shape
    fin = x.shape[3]
    fout = bias1.shape[1]
    return pl.pallas_call(
        _conv1_kernel,
        grid=(N,),
        in_specs=[
            _resident(stats1.shape), _resident(gamma1.shape), _resident(beta1.shape),
            _resident(w1.shape), _resident(bias1.shape),
            pl.BlockSpec((1, H, W, fh), lambda n: (n, 0, 0, 0)),
            pl.BlockSpec((1, H, W, fin), lambda n: (n, 0, 0, 0)),
        ],
        out_specs=pl.BlockSpec((1, H, W, fout), lambda n: (n, 0, 0, 0)),
        out_shape=jax.ShapeDtypeStruct((N, H, W, fout), jnp.float32),
        scratch_shapes=[
            pltpu.VMEM((H + 2, W + 2, fh), jnp.float32),
            pltpu.VMEM((H, W, KPAD), jnp.float32),
        ],
        compiler_params=pltpu.CompilerParams(
            dimension_semantics=("parallel",),
            vmem_limit_bytes=VMEM_LIMIT),
    )(stats1, gamma1, beta1, w1, bias1, h, x)


# ---------------------------------------------------------------------------
# Full ResnetBlock forward (NCHW in / NCHW out, like the PyTorch module).
# ---------------------------------------------------------------------------
def resnet_block_forward(x_nchw, params):
    N, fin, H, W = x_nchw.shape
    assert (H * W) % 8 == 0, "H*W must be a multiple of 8"
    # The only wrapper-side layout ops are the NCHW<->NHWC transposes
    # (no channel pad, no halo pad -> no extra HBM round trips).
    x = jnp.transpose(x_nchw, (0, 2, 3, 1))                     # NHWC

    stats0 = bn_batch_stats(x.reshape(N * H * W, fin), N * H * W)
    h, stats1 = bn_act_conv0(x, stats0, params["bn0_g"], params["bn0_b"],
                             params["w0"], params["b0"])
    out = bn_act_conv1_residual(h, x, stats1, params["bn1_g"], params["bn1_b"],
                                params["w1"], params["b1"])
    return jnp.transpose(out, (0, 3, 1, 2))                     # back to NCHW


# ---------------------------------------------------------------------------
# Parameter construction / packing and a plain-JAX reference.
# ---------------------------------------------------------------------------
def make_raw_params(key, fin, fout, fhidden=None):
    if fhidden is None:
        fhidden = min(fin, fout)
    learned_shortcut = fin != fout
    ks = jax.random.split(key, 8)

    def conv_w(k, cout, cin, kh, kw):
        lim = 1.0 / jnp.sqrt(cin * kh * kw)
        return jax.random.uniform(k, (cout, cin, kh, kw), jnp.float32, -lim, lim)

    def conv_b(k, cout, cin, kh, kw):
        lim = 1.0 / jnp.sqrt(cin * kh * kw)
        return jax.random.uniform(k, (cout,), jnp.float32, -lim, lim)

    raw = {
        "w0": conv_w(ks[0], fhidden, fin, 3, 3),
        "b0": conv_b(ks[1], fhidden, fin, 3, 3),
        "w1": conv_w(ks[2], fout, fhidden, 3, 3),
        "b1": conv_b(ks[3], fout, fhidden, 3, 3),
        "bn0_g": jax.random.uniform(ks[4], (fin,), jnp.float32, 0.5, 1.5),
        "bn0_b": jax.random.uniform(ks[5], (fin,), jnp.float32, -0.5, 0.5),
        "bn1_g": jax.random.uniform(ks[6], (fhidden,), jnp.float32, 0.5, 1.5),
        "bn1_b": jax.random.uniform(ks[7], (fhidden,), jnp.float32, -0.5, 0.5),
        "ws": (conv_w(jax.random.fold_in(key, 99), fout, fin, 1, 1)
               if learned_shortcut else None),
    }
    return raw, fhidden, learned_shortcut


def pack_params(raw, fin, fout, fhidden, learned_shortcut):
    assert 9 * fin <= KPAD and 9 * fhidden + fin <= KPAD
    assert fhidden <= KPAD and fout <= KPAD
    # TODO(synk): larger channel counts need a K-tiled contraction (loop over
    #             128-wide K chunks); not required for this block's sizes.

    def tap_pack(w_oihw):                      # OIHW -> [(dy*3+dx)*Cin + ci, o]
        o, i = w_oihw.shape[0], w_oihw.shape[1]
        return jnp.transpose(w_oihw, (2, 3, 1, 0)).reshape(9 * i, o)

    w0 = jnp.zeros((KPAD, KPAD), jnp.float32)
    w0 = w0.at[:9 * fin, :fhidden].set(tap_pack(raw["w0"]))
    b0 = raw["b0"].reshape(1, fhidden)

    # conv_1 + shortcut + residual fused into one matmul:
    #   lanes [0, 9*fh)           : bn1+act taps of h, weights scaled by 0.1
    #   lanes [9*fh, 9*fh + fin)  : raw x, 1x1 shortcut (or identity) weights
    w1 = jnp.zeros((KPAD, KPAD), jnp.float32)
    w1 = w1.at[:9 * fhidden, :fout].set(0.1 * tap_pack(raw["w1"]))
    if learned_shortcut:
        ws = jnp.transpose(raw["ws"][:, :, 0, 0], (1, 0))          # (fin, fout)
    else:
        ws = jnp.eye(fin, dtype=jnp.float32)                       # identity shortcut
    w1 = w1.at[9 * fhidden:9 * fhidden + fin, :fout].set(ws)
    b1 = 0.1 * raw["b1"].reshape(1, fout)

    return {
        "w0": w0, "b0": b0, "w1": w1, "b1": b1,
        "bn0_g": raw["bn0_g"].reshape(1, fin), "bn0_b": raw["bn0_b"].reshape(1, fin),
        "bn1_g": raw["bn1_g"].reshape(1, fhidden), "bn1_b": raw["bn1_b"].reshape(1, fhidden),
    }


def reference_forward(x, raw, learned_shortcut):
    def bn(t, g, b):
        m = t.mean(axis=(0, 2, 3), keepdims=True)
        v = ((t - m) ** 2).mean(axis=(0, 2, 3), keepdims=True)
        return ((t - m) / jnp.sqrt(v + BN_EPS)) * g.reshape(1, -1, 1, 1) \
            + b.reshape(1, -1, 1, 1)

    def act(t):
        return jnp.where(t >= 0, t, LEAKY_SLOPE * t)

    def conv(t, w, b=None, pad=1):
        o = lax.conv_general_dilated(t, w, (1, 1), [(pad, pad), (pad, pad)],
                                     dimension_numbers=("NCHW", "OIHW", "NCHW"))
        if b is not None:
            o = o + b.reshape(1, -1, 1, 1)
        return o

    x_s = conv(x, raw["ws"], pad=0) if learned_shortcut else x
    dx = conv(act(bn(x, raw["bn0_g"], raw["bn0_b"])), raw["w0"], raw["b0"])
    dx = conv(act(bn(dx, raw["bn1_g"], raw["bn1_b"])), raw["w1"], raw["b1"])
    return x_s + 0.1 * dx


if __name__ == "__main__":
    # ResnetBlock(fin=4, fout=8) -> fhidden = min(4, 8) = 4, learned_shortcut=True
    N, FIN, FOUT, H, W = 2, 4, 8, 16, 16

    key = jax.random.PRNGKey(0)
    kx, kp = jax.random.split(key)
    x = jax.random.normal(kx, (N, FIN, H, W), jnp.float32)

    raw, fhidden, learned = make_raw_params(kp, FIN, FOUT)
    params = pack_params(raw, FIN, FOUT, fhidden, learned)

    fwd = jax.jit(resnet_block_forward)
    out = jax.block_until_ready(fwd(x, params))

    ref = reference_forward(x, raw, learned)
    assert out.shape == ref.shape, (out.shape, ref.shape)
    err = float(jnp.abs(out - ref).max())
    assert jnp.allclose(out, ref, atol=1e-4, rtol=1e-4), f"max abs err {err}"

    print("KERNEL_OK")
</pallas_src>

<mosaic_0001>
module attributes {stable_mosaic.version = 11 : i64} {
  func.func @_bn_stats_kernel(%arg0: i32, %arg1: memref<512x4xf32, #tpu.memory_space<vmem>>, %arg2: memref<16x4xf32, #tpu.memory_space<vmem>>) attributes {dimension_semantics = [#tpu.dimension_semantics<arbitrary>], iteration_bounds = array<i64: 1>, scalar_prefetch = 0 : i64, scratch_operands = 0 : i64, tpu.core_type = #tpu.core_type<tc>, window_params = [{transform_indices = @transform_0, window_bounds = array<i64: 512, 4>}, {pipeline_mode = #tpu.pipeline_mode<synchronous>, transform_indices = @transform_1, window_bounds = array<i64: 16, 4>}]} {
    %c0_i32 = arith.constant 0 : i32
    %0 = arith.cmpi eq, %arg0, %c0_i32 : i32
    %1 = arith.extui %0 : i1 to i32
    %c0_i32_0 = arith.constant 0 : i32
    %2 = arith.cmpi ne, %1, %c0_i32_0 : i32
    scf.if %2 {
      %cst_12 = arith.constant 0.000000e+00 : f32
      %18 = vector.broadcast %cst_12 : f32 to vector<16x4xf32>
      %c0_13 = arith.constant 0 : index
      %c0_14 = arith.constant 0 : index
      %19 = vector.load %arg2[%c0_13, %c0_14] : memref<16x4xf32, #tpu.memory_space<vmem>>, vector<16x4xf32>
      tpu.vector_store %arg2[%c0_13, %c0_14], %18 {strides = array<i32>} : memref<16x4xf32, #tpu.memory_space<vmem>>, vector<16x4xf32>,
    } else {
    }
    %c0 = arith.constant 0 : index
    %c0_1 = arith.constant 0 : index
    %3 = vector.load %arg1[%c0, %c0_1] : memref<512x4xf32, #tpu.memory_space<vmem>>, vector<512x4xf32>
    %c0_2 = arith.constant 0 : index
    %c0_3 = arith.constant 0 : index
    %4 = vector.load %arg2[%c0_2, %c0_3] : memref<16x4xf32, #tpu.memory_space<vmem>>, vector<8x4xf32>
    %5 = vector.shape_cast %3 : vector<512x4xf32> to vector<64x8x4xf32>
    %cst = arith.constant dense<0.000000e+00> : vector<8x4xf32>
    %6 = vector.multi_reduction <add>, %5, %cst [0] : vector<64x8x4xf32> to vector<8x4xf32>
    %7 = arith.addf %4, %6 : vector<8x4xf32>
    %c0_4 = arith.constant 0 : index
    %c0_5 = arith.constant 0 : index
    %8 = vector.load %arg2[%c0_4, %c0_5] : memref<16x4xf32, #tpu.memory_space<vmem>>, vector<8x4xf32>
    tpu.vector_store %arg2[%c0_4, %c0_5], %7 {strides = array<i32>} : memref<16x4xf32, #tpu.memory_space<vmem>>, vector<8x4xf32>,
    %c8 = arith.constant 8 : index
    %c0_6 = arith.constant 0 : index
    %9 = vector.load %arg2[%c8, %c0_6] : memref<16x4xf32, #tpu.memory_space<vmem>>, vector<8x4xf32>
    %10 = arith.mulf %3, %3 : vector<512x4xf32>
    %11 = vector.shape_cast %10 : vector<512x4xf32> to vector<64x8x4xf32>
    %cst_7 = arith.constant dense<0.000000e+00> : vector<8x4xf32>
    %12 = vector.multi_reduction <add>, %11, %cst_7 [0] : vector<64x8x4xf32> to vector<8x4xf32>
    %13 = arith.addf %9, %12 : vector<8x4xf32>
    %c8_8 = arith.constant 8 : index
    %c0_9 = arith.constant 0 : index
    %14 = vector.load %arg2[%c8_8, %c0_9] : memref<16x4xf32, #tpu.memory_space<vmem>>, vector<8x4xf32>
    tpu.vector_store %arg2[%c8_8, %c0_9], %13 {strides = array<i32>} : memref<16x4xf32, #tpu.memory_space<vmem>>, vector<8x4xf32>,
    %c0_i32_10 = arith.constant 0 : i32
    %15 = arith.cmpi eq, %arg0, %c0_i32_10 : i32
    %16 = arith.extui %15 : i1 to i32
    %c0_i32_11 = arith.constant 0 : i32
    %17 = arith.cmpi ne, %16, %c0_i32_11 : i32
    scf.if %17 {
      %c0_12 = arith.constant 0 : index
      %c0_13 = arith.constant 0 : index
      %18 = vector.load %arg2[%c0_12, %c0_13] : memref<16x4xf32, #tpu.memory_space<vmem>>, vector<8x4xf32>
      %cst_14 = arith.constant dense<0.000000e+00> : vector<4xf32>
      %19 = vector.multi_reduction <add>, %18, %cst_14 [0] : vector<8x4xf32> to vector<4xf32>
      %20 = vector.shape_cast %19 : vector<4xf32> to vector<1x4xf32>
      %c8_15 = arith.constant 8 : index
      %c0_16 = arith.constant 0 : index
      %21 = vector.load %arg2[%c8_15, %c0_16] : memref<16x4xf32, #tpu.memory_space<vmem>>, vector<8x4xf32>
      %cst_17 = arith.constant dense<0.000000e+00> : vector<4xf32>
      %22 = vector.multi_reduction <add>, %21, %cst_17 [0] : vector<8x4xf32> to vector<4xf32>
      %23 = vector.shape_cast %22 : vector<4xf32> to vector<1x4xf32>
      %cst_18 = arith.constant 0.001953125 : f32
      %24 = vector.broadcast %cst_18 : f32 to vector<1x4xf32>
      %25 = arith.mulf %20, %24 : vector<1x4xf32>
      %cst_19 = arith.constant 0.001953125 : f32
      %26 = vector.broadcast %cst_19 : f32 to vector<1x4xf32>
      %27 = arith.mulf %23, %26 : vector<1x4xf32>
      %28 = arith.mulf %25, %25 : vector<1x4xf32>
      %29 = arith.subf %27, %28 : vector<1x4xf32>
      %cst_20 = arith.constant 0.000000e+00 : f32
      %30 = vector.broadcast %cst_20 : f32 to vector<1x4xf32>
      %31 = arith.maximumf %29, %30 : vector<1x4xf32>
      %c0_21 = arith.constant 0 : index
      %c0_22 = arith.constant 0 : index
      %32 = vector.load %arg2[%c0_21, %c0_22] : memref<16x4xf32, #tpu.memory_space<vmem>>, vector<1x4xf32>
      tpu.vector_store %arg2[%c0_21, %c0_22], %25 {strides = array<i32>} : memref<16x4xf32, #tpu.memory_space<vmem>>, vector<1x4xf32>,
      %cst_23 = arith.constant 9.99999974E-6 : f32
      %33 = vector.broadcast %cst_23 : f32 to vector<1x4xf32>
      %34 = arith.addf %31, %33 : vector<1x4xf32>
      %35 = math.sqrt %34 : vector<1x4xf32>
      %cst_24 = arith.constant 1.000000e+00 : f32
      %36 = vector.broadcast %cst_24 : f32 to vector<1x4xf32>
      %37 = arith.divf %36, %35 : vector<1x4xf32>
      %c1 = arith.constant 1 : index
      %c0_25 = arith.constant 0 : index
      %38 = vector.load %arg2[%c1, %c0_25] : memref<16x4xf32, #tpu.memory_space<vmem>>, vector<1x4xf32>
      tpu.vector_store %arg2[%c1, %c0_25], %37 {strides = array<i32>} : memref<16x4xf32, #tpu.memory_space<vmem>>, vector<1x4xf32>,
    } else {
    }
    return
  }
  func.func @transform_0(%arg0: i32) -> (i32, i32) {
    %c0_i32 = arith.constant 0 : i32
    %c0_i32_0 = arith.constant 0 : i32
    return %arg0, %c0_i32 : i32, i32
  }
  func.func @transform_1(%arg0: i32) -> (i32, i32) {
    %c0_i32 = arith.constant 0 : i32
    %c0_i32_0 = arith.constant 0 : i32
    %c0_i32_1 = arith.constant 0 : i32
    return %c0_i32, %c0_i32_0 : i32, i32
  }
}

module attributes {stable_mosaic.version = 11 : i64} {
  func.func @_conv1_kernel(%arg0: i32, %arg1: memref<16x4xf32, #tpu.memory_space<vmem>>, %arg2: memref<1x4xf32, #tpu.memory_space<vmem>>, %arg3: memref<1x4xf32, #tpu.memory_space<vmem>>, %arg4: memref<128x128xf32, #tpu.memory_space<vmem>>, %arg5: memref<1x8xf32, #tpu.memory_space<vmem>>, %arg6: memref<1x16x16x4xf32, #tpu.memory_space<vmem>>, %arg7: memref<1x16x16x4xf32, #tpu.memory_space<vmem>>, %arg8: memref<1x16x16x8xf32, #tpu.memory_space<vmem>>, %arg9: memref<18x18x4xf32, #tpu.memory_space<vmem>>, %arg10: memref<16x16x128xf32, #tpu.memory_space<vmem>>) attributes {dimension_semantics = [#tpu.dimension_semantics<parallel>], iteration_bounds = array<i64: 2>, scalar_prefetch = 0 : i64, scratch_operands = 2 : i64, tpu.core_type = #tpu.core_type<tc>, window_params = [{pipeline_mode = #tpu.pipeline_mode<synchronous>, transform_indices = @transform_0, window_bounds = array<i64: 16, 4>}, {pipeline_mode = #tpu.pipeline_mode<synchronous>, transform_indices = @transform_1, window_bounds = array<i64: 1, 4>}, {pipeline_mode = #tpu.pipeline_mode<synchronous>, transform_indices = @transform_2, window_bounds = array<i64: 1, 4>}, {pipeline_mode = #tpu.pipeline_mode<synchronous>, transform_indices = @transform_3, window_bounds = array<i64: 128, 128>}, {pipeline_mode = #tpu.pipeline_mode<synchronous>, transform_indices = @transform_4, window_bounds = array<i64: 1, 8>}, {transform_indices = @transform_5, window_bounds = array<i64: 1, 16, 16, 4>}, {transform_indices = @transform_6, window_bounds = array<i64: 1, 16, 16, 4>}, {transform_indices = @transform_7, window_bounds = array<i64: 1, 16, 16, 8>}]} {
    %c0 = arith.constant 0 : index
    %c0_0 = arith.constant 0 : index
    %c0_1 = arith.constant 0 : index
    %c0_2 = arith.constant 0 : index
    %0 = vector.load %arg6[%c0, %c0_0, %c0_1, %c0_2] : memref<1x16x16x4xf32, #tpu.memory_space<vmem>>, vector<1x16x16x4xf32>
    %1 = vector.shape_cast %0 : vector<1x16x16x4xf32> to vector<16x16x4xf32>
    %c0_3 = arith.constant 0 : index
    %c0_4 = arith.constant 0 : index
    %2 = vector.load %arg1[%c0_3, %c0_4] : memref<16x4xf32, #tpu.memory_space<vmem>>, vector<1x4xf32>
    %c1 = arith.constant 1 : index
    %c0_5 = arith.constant 0 : index
    %3 = vector.load %arg1[%c1, %c0_5] : memref<16x4xf32, #tpu.memory_space<vmem>>, vector<1x4xf32>
    %c0_6 = arith.constant 0 : index
    %c0_7 = arith.constant 0 : index
    %4 = vector.load %arg2[%c0_6, %c0_7] : memref<1x4xf32, #tpu.memory_space<vmem>>, vector<1x4xf32>
    %5 = arith.mulf %3, %4 : vector<1x4xf32>
    %c0_8 = arith.constant 0 : index
    %c0_9 = arith.constant 0 : index
    %6 = vector.load %arg3[%c0_8, %c0_9] : memref<1x4xf32, #tpu.memory_space<vmem>>, vector<1x4xf32>
    %7 = arith.mulf %2, %5 : vector<1x4xf32>
    %8 = arith.subf %6, %7 : vector<1x4xf32>
    %9 = vector.shape_cast %5 : vector<1x4xf32> to vector<1x1x4xf32>
    %10 = vector.broadcast %9 : vector<1x1x4xf32> to vector<16x16x4xf32>
    %11 = arith.mulf %1, %10 : vector<16x16x4xf32>
    %12 = vector.shape_cast %8 : vector<1x4xf32> to vector<1x1x4xf32>
    %13 = vector.broadcast %12 : vector<1x1x4xf32> to vector<16x16x4xf32>
    %14 = arith.addf %11, %13 : vector<16x16x4xf32>
    %cst = arith.constant 3.000000e-01 : f32
    %15 = vector.broadcast %cst : f32 to vector<16x16x4xf32>
    %16 = arith.mulf %15, %14 : vector<16x16x4xf32>
    %17 = arith.maximumf %14, %16 : vector<16x16x4xf32>
    %cst_10 = arith.constant 0.000000e+00 : f32
    %18 = vector.broadcast %cst_10 : f32 to vector<18x18x4xf32>
    %c0_11 = arith.constant 0 : index
    %c0_12 = arith.constant 0 : index
    %c0_13 = arith.constant 0 : index
    %19 = vector.load %arg9[%c0_11, %c0_12, %c0_13] : memref<18x18x4xf32, #tpu.memory_space<vmem>>, vector<18x18x4xf32>
    tpu.vector_store %arg9[%c0_11, %c0_12, %c0_13], %18 {strides = array<i32>} : memref<18x18x4xf32, #tpu.memory_space<vmem>>, vector<18x18x4xf32>,
    %c1_14 = arith.constant 1 : index
    %c1_15 = arith.constant 1 : index
    %c0_16 = arith.constant 0 : index
    %20 = vector.load %arg9[%c1_14, %c1_15, %c0_16] : memref<18x18x4xf32, #tpu.memory_space<vmem>>, vector<16x16x4xf32>
    tpu.vector_store %arg9[%c1_14, %c1_15, %c0_16], %17 {strides = array<i32>} : memref<18x18x4xf32, #tpu.memory_space<vmem>>, vector<16x16x4xf32>,
    %cst_17 = arith.constant 0.000000e+00 : f32
    %21 = vector.broadcast %cst_17 : f32 to vector<16x16x128xf32>
    %c0_18 = arith.constant 0 : index
    %c0_19 = arith.constant 0 : index
    %c0_20 = arith.constant 0 : index
    %22 = vector.load %arg10[%c0_18, %c0_19, %c0_20] : memref<16x16x128xf32, #tpu.memory_space<vmem>>, vector<16x16x128xf32>
    tpu.vector_store %arg10[%c0_18, %c0_19, %c0_20], %21 {strides = array<i32>} : memref<16x16x128xf32, #tpu.memory_space<vmem>>, vector<16x16x128xf32>,
    %c0_21 = arith.constant 0 : index
    %c0_22 = arith.constant 0 : index
    %c0_23 = arith.constant 0 : index
    %23 = vector.load %arg9[%c0_21, %c0_22, %c0_23] : memref<18x18x4xf32, #tpu.memory_space<vmem>>, vector<16x16x4xf32>
    %c0_24 = arith.constant 0 : index
    %c0_25 = arith.constant 0 : index
    %c0_26 = arith.constant 0 : index
    %24 = vector.load %arg10[%c0_24, %c0_25, %c0_26] : memref<16x16x128xf32, #tpu.memory_space<vmem>>, vector<16x16x4xf32>
    tpu.vector_store %arg10[%c0_24, %c0_25, %c0_26], %23 {strides = array<i32>} : memref<16x16x128xf32, #tpu.memory_space<vmem>>, vector<16x16x4xf32>,
    %c0_27 = arith.constant 0 : index
    %c1_28 = arith.constant 1 : index
    %c0_29 = arith.constant 0 : index
    %25 = vector.load %arg9[%c0_27, %c1_28, %c0_29] : memref<18x18x4xf32, #tpu.memory_space<vmem>>, vector<16x16x4xf32>
    %c0_30 = arith.constant 0 : index
    %c0_31 = arith.constant 0 : index
    %c4 = arith.constant 4 : index
    %26 = vector.load %arg10[%c0_30, %c0_31, %c4] : memref<16x16x128xf32, #tpu.memory_space<vmem>>, vector<16x16x4xf32>
    tpu.vector_store %arg10[%c0_30, %c0_31, %c4], %25 {strides = array<i32>} : memref<16x16x128xf32, #tpu.memory_space<vmem>>, vector<16x16x4xf32>,
    %c0_32 = arith.constant 0 : index
    %c2 = arith.constant 2 : index
    %c0_33 = arith.constant 0 : index
    %27 = vector.load %arg9[%c0_32, %c2, %c0_33] : memref<18x18x4xf32, #tpu.memory_space<vmem>>, vector<16x16x4xf32>
    %c0_34 = arith.constant 0 : index
    %c0_35 = arith.constant 0 : index
    %c8 = arith.constant 8 : index
    %28 = vector.load %arg10[%c0_34, %c0_35, %c8] : memref<16x16x128xf32, #tpu.memory_space<vmem>>, vector<16x16x4xf32>
    tpu.vector_store %arg10[%c0_34, %c0_35, %c8], %27 {strides = array<i32>} : memref<16x16x128xf32, #tpu.memory_space<vmem>>, vector<16x16x4xf32>,
    %c1_36 = arith.constant 1 : index
    %c0_37 = arith.constant 0 : index
    %c0_38 = arith.constant 0 : index
    %29 = vector.load %arg9[%c1_36, %c0_37, %c0_38] : memref<18x18x4xf32, #tpu.memory_space<vmem>>, vector<16x16x4xf32>
    %c0_39 = arith.constant 0 : index
    %c0_40 = arith.constant 0 : index
    %c12 = arith.constant 12 : index
    %30 = vector.load %arg10[%c0_39, %c0_40, %c12] : memref<16x16x128xf32, #tpu.memory_space<vmem>>, vector<16x16x4xf32>
    tpu.vector_store %arg10[%c0_39, %c0_40, %c12], %29 {strides = array<i32>} : memref<16x16x128xf32, #tpu.memory_space<vmem>>, vector<16x16x4xf32>,
    %c1_41 = arith.constant 1 : index
    %c1_42 = arith.constant 1 : index
    %c0_43 = arith.constant 0 : index
    %31 = vector.load %arg9[%c1_41, %c1_42, %c0_43] : memref<18x18x4xf32, #tpu.memory_space<vmem>>, vector<16x16x4xf32>
    %c0_44 = arith.constant 0 : index
    %c0_45 = arith.constant 0 : index
    %c16 = arith.constant 16 : index
    %32 = vector.load %arg10[%c0_44, %c0_45, %c16] : memref<16x16x128xf32, #tpu.memory_space<vmem>>, vector<16x16x4xf32>
    tpu.vector_store %arg10[%c0_44, %c0_45, %c16], %31 {strides = array<i32>} : memref<16x16x128xf32, #tpu.memory_space<vmem>>, vector<16x16x4xf32>,
    %c1_46 = arith.constant 1 : index
    %c2_47 = arith.constant 2 : index
    %c0_48 = arith.constant 0 : index
    %33 = vector.load %arg9[%c1_46, %c2_47, %c0_48] : memref<18x18x4xf32, #tpu.memory_space<vmem>>, vector<16x16x4xf32>
    %c0_49 = arith.constant 0 : index
    %c0_50 = arith.constant 0 : index
    %c20 = arith.constant 20 : index
    %34 = vector.load %arg10[%c0_49, %c0_50, %c20] : memref<16x16x128xf32, #tpu.memory_space<vmem>>, vector<16x16x4xf32>
    tpu.vector_store %arg10[%c0_49, %c0_50, %c20], %33 {strides = array<i32>} : memref<16x16x128xf32, #tpu.memory_space<vmem>>, vector<16x16x4xf32>,
    %c2_51 = arith.constant 2 : index
    %c0_52 = arith.constant 0 : index
    %c0_53 = arith.constant 0 : index
    %35 = vector.load %arg9[%c2_51, %c0_52, %c0_53] : memref<18x18x4xf32, #tpu.memory_space<vmem>>, vector<16x16x4xf32>
    %c0_54 = arith.constant 0 : index
    %c0_55 = arith.constant 0 : index
    %c24 = arith.constant 24 : index
    %36 = vector.load %arg10[%c0_54, %c0_55, %c24] : memref<16x16x128xf32, #tpu.memory_space<vmem>>, vector<16x16x4xf32>
    tpu.vector_store %arg10[%c0_54, %c0_55, %c24], %35 {strides = array<i32>} : memref<16x16x128xf32, #tpu.memory_space<vmem>>, vector<16x16x4xf32>,
    %c2_56 = arith.constant 2 : index
    %c1_57 = arith.constant 1 : index
    %c0_58 = arith.constant 0 : index
    %37 = vector.load %arg9[%c2_56, %c1_57, %c0_58] : memref<18x18x4xf32, #tpu.memory_space<vmem>>, vector<16x16x4xf32>
    %c0_59 = arith.constant 0 : index
    %c0_60 = arith.constant 0 : index
    %c28 = arith.constant 28 : index
    %38 = vector.load %arg10[%c0_59, %c0_60, %c28] : memref<16x16x128xf32, #tpu.memory_space<vmem>>, vector<16x16x4xf32>
    tpu.vector_store %arg10[%c0_59, %c0_60, %c28], %37 {strides = array<i32>} : memref<16x16x128xf32, #tpu.memory_space<vmem>>, vector<16x16x4xf32>,
    %c2_61 = arith.constant 2 : index
    %c2_62 = arith.constant 2 : index
    %c0_63 = arith.constant 0 : index
    %39 = vector.load %arg9[%c2_61, %c2_62, %c0_63] : memref<18x18x4xf32, #tpu.memory_space<vmem>>, vector<16x16x4xf32>
    %c0_64 = arith.constant 0 : index
    %c0_65 = arith.constant 0 : index
    %c32 = arith.constant 32 : index
    %40 = vector.load %arg10[%c0_64, %c0_65, %c32] : memref<16x16x128xf32, #tpu.memory_space<vmem>>, vector<16x16x4xf32>
    tpu.vector_store %arg10[%c0_64, %c0_65, %c32], %39 {strides = array<i32>} : memref<16x16x128xf32, #tpu.memory_space<vmem>>, vector<16x16x4xf32>,
    %c0_66 = arith.constant 0 : index
    %c0_67 = arith.constant 0 : index
    %c0_68 = arith.constant 0 : index
    %c0_69 = arith.constant 0 : index
    %41 = vector.load %arg7[%c0_66, %c0_67, %c0_68, %c0_69] : memref<1x16x16x4xf32, #tpu.memory_space<vmem>>, vector<1x16x16x4xf32>
    %42 = vector.shape_cast %41 : vector<1x16x16x4xf32> to vector<16x16x4xf32>
    %c0_70 = arith.constant 0 : index
    %c0_71 = arith.constant 0 : index
    %c36 = arith.constant 36 : index
    %43 = vector.load %arg10[%c0_70, %c0_71, %c36] : memref<16x16x128xf32, #tpu.memory_space<vmem>>, vector<16x16x4xf32>
    tpu.vector_store %arg10[%c0_70, %c0_71, %c36], %42 {strides = array<i32>} : memref<16x16x128xf32, #tpu.memory_space<vmem>>, vector<16x16x4xf32>,
    %c0_72 = arith.constant 0 : index
    %c0_73 = arith.constant 0 : index
    %c0_74 = arith.constant 0 : index
    %44 = vector.load %arg10[%c0_72, %c0_73, %c0_74] : memref<16x16x128xf32, #tpu.memory_space<vmem>>, vector<16x16x128xf32>
    %45 = vector.shape_cast %44 : vector<16x16x128xf32> to vector<256x128xf32>
    %c0_75 = arith.constant 0 : index
    %c0_76 = arith.constant 0 : index
    %46 = vector.load %arg4[%c0_75, %c0_76] : memref<128x128xf32, #tpu.memory_space<vmem>>, vector<128x128xf32>
    %cst_77 = arith.constant dense<0.000000e+00> : vector<256x128xf32>
    %47 = tpu.matmul %45, %46, %cst_77 {dimension_numbers = #tpu.dot_dimension_numbers<[1], [0], [0], [1], [0, 0, 1, 1], [], []>} : vector<256x128xf32>, vector<128x128xf32>, vector<256x128xf32> -> vector<256x128xf32>
    %48 = vector.extract_strided_slice %47 {offsets = [0, 0], sizes = [256, 8], strides = [1, 1]} : vector<256x128xf32> to vector<256x8xf32>
    %c0_78 = arith.constant 0 : index
    %c0_79 = arith.constant 0 : index
    %49 = vector.load %arg5[%c0_78, %c0_79] : memref<1x8xf32, #tpu.memory_space<vmem>>, vector<1x8xf32>
    %50 = vector.broadcast %49 : vector<1x8xf32> to vector<256x8xf32>
    %51 = arith.addf %48, %50 : vector<256x8xf32>
    %52 = vector.shape_cast %51 : vector<256x8xf32> to vector<16x16x8xf32>
    %c0_80 = arith.constant 0 : index
    %c0_81 = arith.constant 0 : index
    %c0_82 = arith.constant 0 : index
    %c0_83 = arith.constant 0 : index
    %53 = vector.load %arg8[%c0_80, %c0_81, %c0_82, %c0_83] : memref<1x16x16x8xf32, #tpu.memory_space<vmem>>, vector<1x16x16x8xf32>
    %54 = vector.shape_cast %53 : vector<1x16x16x8xf32> to vector<16x16x8xf32>
    %55 = vector.shape_cast %52 : vector<16x16x8xf32> to vector<1x16x16x8xf32>
    tpu.vector_store %arg8[%c0_80, %c0_81, %c0_82, %c0_83], %55 {strides = array<i32>} : memref<1x16x16x8xf32, #tpu.memory_space<vmem>>, vector<1x16x16x8xf32>,
    return
  }
  func.func @transform_0(%arg0: i32) -> (i32, i32) {
    %c0_i32 = arith.constant 0 : i32
    %c0_i32_0 = arith.constant 0 : i32
    %c0_i32_1 = arith.constant 0 : i32
    return %c0_i32, %c0_i32_0 : i32, i32
  }
  func.func @transform_1(%arg0: i32) -> (i32, i32) {
    %c0_i32 = arith.constant 0 : i32
    %c0_i32_0 = arith.constant 0 : i32
    %c0_i32_1 = arith.constant 0 : i32
    return %c0_i32, %c0_i32_0 : i32, i32
  }
  func.func @transform_2(%arg0: i32) -> (i32, i32) {
    %c0_i32 = arith.constant 0 : i32
    %c0_i32_0 = arith.constant 0 : i32
    %c0_i32_1 = arith.constant 0 : i32
    return %c0_i32, %c0_i32_0 : i32, i32
  }
  func.func @transform_3(%arg0: i32) -> (i32, i32) {
    %c0_i32 = arith.constant 0 : i32
    %c0_i32_0 = arith.constant 0 : i32
    %c0_i32_1 = arith.constant 0 : i32
    return %c0_i32, %c0_i32_0 : i32, i32
  }
  func.func @transform_4(%arg0: i32) -> (i32, i32) {
    %c0_i32 = arith.constant 0 : i32
    %c0_i32_0 = arith.constant 0 : i32
    %c0_i32_1 = arith.constant 0 : i32
    return %c0_i32, %c0_i32_0 : i32, i32
  }
  func.func @transform_5(%arg0: i32) -> (i32, i32, i32, i32) {
    %c0_i32 = arith.constant 0 : i32
    %c0_i32_0 = arith.constant 0 : i32
    %c0_i32_1 = arith.constant 0 : i32
    %c0_i32_2 = arith.constant 0 : i32
    return %arg0, %c0_i32, %c0_i32_0, %c0_i32_1 : i32, i32, i32, i32
  }
  func.func @transform_6(%arg0: i32) -> (i32, i32, i32, i32) {
    %c0_i32 = arith.constant 0 : i32
    %c0_i32_0 = arith.constant 0 : i32
    %c0_i32_1 = arith.constant 0 : i32
    %c0_i32_2 = arith.constant 0 : i32
    return %arg0, %c0_i32, %c0_i32_0, %c0_i32_1 : i32, i32, i32, i32
  }
  func.func @transform_7(%arg0: i32) -> (i32, i32, i32, i32) {
    %c0_i32 = arith.constant 0 : i32
    %c0_i32_0 = arith.constant 0 : i32
    %c0_i32_1 = arith.constant 0 : i32
    %c0_i32_2 = arith.constant 0 : i32
    return %arg0, %c0_i32, %c0_i32_0, %c0_i32_1 : i32, i32, i32, i32
  }
}

module attributes {stable_mosaic.version = 11 : i64} {
  func.func @_conv0_kernel(%arg0: i32, %arg1: memref<16x4xf32, #tpu.memory_space<vmem>>, %arg2: memref<1x4xf32, #tpu.memory_space<vmem>>, %arg3: memref<1x4xf32, #tpu.memory_space<vmem>>, %arg4: memref<128x128xf32, #tpu.memory_space<vmem>>, %arg5: memref<1x4xf32, #tpu.memory_space<vmem>>, %arg6: memref<1x16x16x4xf32, #tpu.memory_space<vmem>>, %arg7: memref<1x16x16x4xf32, #tpu.memory_space<vmem>>, %arg8: memref<16x4xf32, #tpu.memory_space<vmem>>, %arg9: memref<18x18x4xf32, #tpu.memory_space<vmem>>, %arg10: memref<16x16x128xf32, #tpu.memory_space<vmem>>) attributes {dimension_semantics = [#tpu.dimension_semantics<arbitrary>], iteration_bounds = array<i64: 2>, scalar_prefetch = 0 : i64, scratch_operands = 2 : i64, tpu.core_type = #tpu.core_type<tc>, window_params = [{pipeline_mode = #tpu.pipeline_mode<synchronous>, transform_indices = @transform_0, window_bounds = array<i64: 16, 4>}, {pipeline_mode = #tpu.pipeline_mode<synchronous>, transform_indices = @transform_1, window_bounds = array<i64: 1, 4>}, {pipeline_mode = #tpu.pipeline_mode<synchronous>, transform_indices = @transform_2, window_bounds = array<i64: 1, 4>}, {pipeline_mode = #tpu.pipeline_mode<synchronous>, transform_indices = @transform_3, window_bounds = array<i64: 128, 128>}, {pipeline_mode = #tpu.pipeline_mode<synchronous>, transform_indices = @transform_4, window_bounds = array<i64: 1, 4>}, {transform_indices = @transform_5, window_bounds = array<i64: 1, 16, 16, 4>}, {transform_indices = @transform_6, window_bounds = array<i64: 1, 16, 16, 4>}, {pipeline_mode = #tpu.pipeline_mode<synchronous>, transform_indices = @transform_7, window_bounds = array<i64: 16, 4>}]} {
    %c0_i32 = arith.constant 0 : i32
    %0 = arith.cmpi eq, %arg0, %c0_i32 : i32
    %1 = arith.extui %0 : i1 to i32
    %c0_i32_0 = arith.constant 0 : i32
    %2 = arith.cmpi ne, %1, %c0_i32_0 : i32
    scf.if %2 {
      %cst_90 = arith.constant 0.000000e+00 : f32
      %70 = vector.broadcast %cst_90 : f32 to vector<16x4xf32>
      %c0_91 = arith.constant 0 : index
      %c0_92 = arith.constant 0 : index
      %71 = vector.load %arg8[%c0_91, %c0_92] : memref<16x4xf32, #tpu.memory_space<vmem>>, vector<16x4xf32>
      tpu.vector_store %arg8[%c0_91, %c0_92], %70 {strides = array<i32>} : memref<16x4xf32, #tpu.memory_space<vmem>>, vector<16x4xf32>,
    } else {
    }
    %c0 = arith.constant 0 : index
    %c0_1 = arith.constant 0 : index
    %c0_2 = arith.constant 0 : index
    %c0_3 = arith.constant 0 : index
    %3 = vector.load %arg6[%c0, %c0_1, %c0_2, %c0_3] : memref<1x16x16x4xf32, #tpu.memory_space<vmem>>, vector<1x16x16x4xf32>
    %4 = vector.shape_cast %3 : vector<1x16x16x4xf32> to vector<16x16x4xf32>
    %c0_4 = arith.constant 0 : index
    %c0_5 = arith.constant 0 : index
    %5 = vector.load %arg1[%c0_4, %c0_5] : memref<16x4xf32, #tpu.memory_space<vmem>>, vector<1x4xf32>
    %c1 = arith.constant 1 : index
    %c0_6 = arith.constant 0 : index
    %6 = vector.load %arg1[%c1, %c0_6] : memref<16x4xf32, #tpu.memory_space<vmem>>, vector<1x4xf32>
    %c0_7 = arith.constant 0 : index
    %c0_8 = arith.constant 0 : index
    %7 = vector.load %arg2[%c0_7, %c0_8] : memref<1x4xf32, #tpu.memory_space<vmem>>, vector<1x4xf32>
    %8 = arith.mulf %6, %7 : vector<1x4xf32>
    %c0_9 = arith.constant 0 : index
    %c0_10 = arith.constant 0 : index
    %9 = vector.load %arg3[%c0_9, %c0_10] : memref<1x4xf32, #tpu.memory_space<vmem>>, vector<1x4xf32>
    %10 = arith.mulf %5, %8 : vector<1x4xf32>
    %11 = arith.subf %9, %10 : vector<1x4xf32>
    %12 = vector.shape_cast %8 : vector<1x4xf32> to vector<1x1x4xf32>
    %13 = vector.broadcast %12 : vector<1x1x4xf32> to vector<16x16x4xf32>
    %14 = arith.mulf %4, %13 : vector<16x16x4xf32>
    %15 = vector.shape_cast %11 : vector<1x4xf32> to vector<1x1x4xf32>
    %16 = vector.broadcast %15 : vector<1x1x4xf32> to vector<16x16x4xf32>
    %17 = arith.addf %14, %16 : vector<16x16x4xf32>
    %cst = arith.constant 3.000000e-01 : f32
    %18 = vector.broadcast %cst : f32 to vector<16x16x4xf32>
    %19 = arith.mulf %18, %17 : vector<16x16x4xf32>
    %20 = arith.maximumf %17, %19 : vector<16x16x4xf32>
    %cst_11 = arith.constant 0.000000e+00 : f32
    %21 = vector.broadcast %cst_11 : f32 to vector<18x18x4xf32>
    %c0_12 = arith.constant 0 : index
    %c0_13 = arith.constant 0 : index
    %c0_14 = arith.constant 0 : index
    %22 = vector.load %arg9[%c0_12, %c0_13, %c0_14] : memref<18x18x4xf32, #tpu.memory_space<vmem>>, vector<18x18x4xf32>
    tpu.vector_store %arg9[%c0_12, %c0_13, %c0_14], %21 {strides = array<i32>} : memref<18x18x4xf32, #tpu.memory_space<vmem>>, vector<18x18x4xf32>,
    %c1_15 = arith.constant 1 : index
    %c1_16 = arith.constant 1 : index
    %c0_17 = arith.constant 0 : index
    %23 = vector.load %arg9[%c1_15, %c1_16, %c0_17] : memref<18x18x4xf32, #tpu.memory_space<vmem>>, vector<16x16x4xf32>
    tpu.vector_store %arg9[%c1_15, %c1_16, %c0_17], %20 {strides = array<i32>} : memref<18x18x4xf32, #tpu.memory_space<vmem>>, vector<16x16x4xf32>,
    %cst_18 = arith.constant 0.000000e+00 : f32
    %24 = vector.broadcast %cst_18 : f32 to vector<16x16x128xf32>
    %c0_19 = arith.constant 0 : index
    %c0_20 = arith.constant 0 : index
    %c0_21 = arith.constant 0 : index
    %25 = vector.load %arg10[%c0_19, %c0_20, %c0_21] : memref<16x16x128xf32, #tpu.memory_space<vmem>>, vector<16x16x128xf32>
    tpu.vector_store %arg10[%c0_19, %c0_20, %c0_21], %24 {strides = array<i32>} : memref<16x16x128xf32, #tpu.memory_space<vmem>>, vector<16x16x128xf32>,
    %c0_22 = arith.constant 0 : index
    %c0_23 = arith.constant 0 : index
    %c0_24 = arith.constant 0 : index
    %26 = vector.load %arg9[%c0_22, %c0_23, %c0_24] : memref<18x18x4xf32, #tpu.memory_space<vmem>>, vector<16x16x4xf32>
    %c0_25 = arith.constant 0 : index
    %c0_26 = arith.constant 0 : index
    %c0_27 = arith.constant 0 : index
    %27 = vector.load %arg10[%c0_25, %c0_26, %c0_27] : memref<16x16x128xf32, #tpu.memory_space<vmem>>, vector<16x16x4xf32>
    tpu.vector_store %arg10[%c0_25, %c0_26, %c0_27], %26 {strides = array<i32>} : memref<16x16x128xf32, #tpu.memory_space<vmem>>, vector<16x16x4xf32>,
    %c0_28 = arith.constant 0 : index
    %c1_29 = arith.constant 1 : index
    %c0_30 = arith.constant 0 : index
    %28 = vector.load %arg9[%c0_28, %c1_29, %c0_30] : memref<18x18x4xf32, #tpu.memory_space<vmem>>, vector<16x16x4xf32>
    %c0_31 = arith.constant 0 : index
    %c0_32 = arith.constant 0 : index
    %c4 = arith.constant 4 : index
    %29 = vector.load %arg10[%c0_31, %c0_32, %c4] : memref<16x16x128xf32, #tpu.memory_space<vmem>>, vector<16x16x4xf32>
    tpu.vector_store %arg10[%c0_31, %c0_32, %c4], %28 {strides = array<i32>} : memref<16x16x128xf32, #tpu.memory_space<vmem>>, vector<16x16x4xf32>,
    %c0_33 = arith.constant 0 : index
    %c2 = arith.constant 2 : index
    %c0_34 = arith.constant 0 : index
    %30 = vector.load %arg9[%c0_33, %c2, %c0_34] : memref<18x18x4xf32, #tpu.memory_space<vmem>>, vector<16x16x4xf32>
    %c0_35 = arith.constant 0 : index
    %c0_36 = arith.constant 0 : index
    %c8 = arith.constant 8 : index
    %31 = vector.load %arg10[%c0_35, %c0_36, %c8] : memref<16x16x128xf32, #tpu.memory_space<vmem>>, vector<16x16x4xf32>
    tpu.vector_store %arg10[%c0_35, %c0_36, %c8], %30 {strides = array<i32>} : memref<16x16x128xf32, #tpu.memory_space<vmem>>, vector<16x16x4xf32>,
    %c1_37 = arith.constant 1 : index
    %c0_38 = arith.constant 0 : index
    %c0_39 = arith.constant 0 : index
    %32 = vector.load %arg9[%c1_37, %c0_38, %c0_39] : memref<18x18x4xf32, #tpu.memory_space<vmem>>, vector<16x16x4xf32>
    %c0_40 = arith.constant 0 : index
    %c0_41 = arith.constant 0 : index
    %c12 = arith.constant 12 : index
    %33 = vector.load %arg10[%c0_40, %c0_41, %c12] : memref<16x16x128xf32, #tpu.memory_space<vmem>>, vector<16x16x4xf32>
    tpu.vector_store %arg10[%c0_40, %c0_41, %c12], %32 {strides = array<i32>} : memref<16x16x128xf32, #tpu.memory_space<vmem>>, vector<16x16x4xf32>,
    %c1_42 = arith.constant 1 : index
    %c1_43 = arith.constant 1 : index
    %c0_44 = arith.constant 0 : index
    %34 = vector.load %arg9[%c1_42, %c1_43, %c0_44] : memref<18x18x4xf32, #tpu.memory_space<vmem>>, vector<16x16x4xf32>
    %c0_45 = arith.constant 0 : index
    %c0_46 = arith.constant 0 : index
    %c16 = arith.constant 16 : index
    %35 = vector.load %arg10[%c0_45, %c0_46, %c16] : memref<16x16x128xf32, #tpu.memory_space<vmem>>, vector<16x16x4xf32>
    tpu.vector_store %arg10[%c0_45, %c0_46, %c16], %34 {strides = array<i32>} : memref<16x16x128xf32, #tpu.memory_space<vmem>>, vector<16x16x4xf32>,
    %c1_47 = arith.constant 1 : index
    %c2_48 = arith.constant 2 : index
    %c0_49 = arith.constant 0 : index
    %36 = vector.load %arg9[%c1_47, %c2_48, %c0_49] : memref<18x18x4xf32, #tpu.memory_space<vmem>>, vector<16x16x4xf32>
    %c0_50 = arith.constant 0 : index
    %c0_51 = arith.constant 0 : index
    %c20 = arith.constant 20 : index
    %37 = vector.load %arg10[%c0_50, %c0_51, %c20] : memref<16x16x128xf32, #tpu.memory_space<vmem>>, vector<16x16x4xf32>
    tpu.vector_store %arg10[%c0_50, %c0_51, %c20], %36 {strides = array<i32>} : memref<16x16x128xf32, #tpu.memory_space<vmem>>, vector<16x16x4xf32>,
    %c2_52 = arith.constant 2 : index
    %c0_53 = arith.constant 0 : index
    %c0_54 = arith.constant 0 : index
    %38 = vector.load %arg9[%c2_52, %c0_53, %c0_54] : memref<18x18x4xf32, #tpu.memory_space<vmem>>, vector<16x16x4xf32>
    %c0_55 = arith.constant 0 : index
    %c0_56 = arith.constant 0 : index
    %c24 = arith.constant 24 : index
    %39 = vector.load %arg10[%c0_55, %c0_56, %c24] : memref<16x16x128xf32, #tpu.memory_space<vmem>>, vector<16x16x4xf32>
    tpu.vector_store %arg10[%c0_55, %c0_56, %c24], %38 {strides = array<i32>} : memref<16x16x128xf32, #tpu.memory_space<vmem>>, vector<16x16x4xf32>,
    %c2_57 = arith.constant 2 : index
    %c1_58 = arith.constant 1 : index
    %c0_59 = arith.constant 0 : index
    %40 = vector.load %arg9[%c2_57, %c1_58, %c0_59] : memref<18x18x4xf32, #tpu.memory_space<vmem>>, vector<16x16x4xf32>
    %c0_60 = arith.constant 0 : index
    %c0_61 = arith.constant 0 : index
    %c28 = arith.constant 28 : index
    %41 = vector.load %arg10[%c0_60, %c0_61, %c28] : memref<16x16x128xf32, #tpu.memory_space<vmem>>, vector<16x16x4xf32>
    tpu.vector_store %arg10[%c0_60, %c0_61, %c28], %40 {strides = array<i32>} : memref<16x16x128xf32, #tpu.memory_space<vmem>>, vector<16x16x4xf32>,
    %c2_62 = arith.constant 2 : index
    %c2_63 = arith.constant 2 : index
    %c0_64 = arith.constant 0 : index
    %42 = vector.load %arg9[%c2_62, %c2_63, %c0_64] : memref<18x18x4xf32, #tpu.memory_space<vmem>>, vector<16x16x4xf32>
    %c0_65 = arith.constant 0 : index
    %c0_66 = arith.constant 0 : index
    %c32 = arith.constant 32 : index
    %43 = vector.load %arg10[%c0_65, %c0_66, %c32] : memref<16x16x128xf32, #tpu.memory_space<vmem>>, vector<16x16x4xf32>
    tpu.vector_store %arg10[%c0_65, %c0_66, %c32], %42 {strides = array<i32>} : memref<16x16x128xf32, #tpu.memory_space<vmem>>, vector<16x16x4xf32>,
    %c0_67 = arith.constant 0 : index
    %c0_68 = arith.constant 0 : index
    %c0_69 = arith.constant 0 : index
    %44 = vector.load %arg10[%c0_67, %c0_68, %c0_69] : memref<16x16x128xf32, #tpu.memory_space<vmem>>, vector<16x16x128xf32>
    %45 = vector.shape_cast %44 : vector<16x16x128xf32> to vector<256x128xf32>
    %c0_70 = arith.constant 0 : index
    %c0_71 = arith.constant 0 : index
    %46 = vector.load %arg4[%c0_70, %c0_71] : memref<128x128xf32, #tpu.memory_space<vmem>>, vector<128x128xf32>
    %cst_72 = arith.constant dense<0.000000e+00> : vector<256x128xf32>
    %47 = tpu.matmul %45, %46, %cst_72 {dimension_numbers = #tpu.dot_dimension_numbers<[1], [0], [0], [1], [0, 0, 1, 1], [], []>} : vector<256x128xf32>, vector<128x128xf32>, vector<256x128xf32> -> vector<256x128xf32>
    %48 = vector.extract_strided_slice %47 {offsets = [0, 0], sizes = [256, 4], strides = [1, 1]} : vector<256x128xf32> to vector<256x4xf32>
    %c0_73 = arith.constant 0 : index
    %c0_74 = arith.constant 0 : index
    %49 = vector.load %arg5[%c0_73, %c0_74] : memref<1x4xf32, #tpu.memory_space<vmem>>, vector<1x4xf32>
    %50 = vector.broadcast %49 : vector<1x4xf32> to vector<256x4xf32>
    %51 = arith.addf %48, %50 : vector<256x4xf32>
    %52 = vector.shape_cast %51 : vector<256x4xf32> to vector<16x16x4xf32>
    %c0_75 = arith.constant 0 : index
    %c0_76 = arith.constant 0 : index
    %c0_77 = arith.constant 0 : index
    %c0_78 = arith.constant 0 : index
    %53 = vector.load %arg7[%c0_75, %c0_76, %c0_77, %c0_78] : memref<1x16x16x4xf32, #tpu.memory_space<vmem>>, vector<1x16x16x4xf32>
    %54 = vector.shape_cast %53 : vector<1x16x16x4xf32> to vector<16x16x4xf32>
    %55 = vector.shape_cast %52 : vector<16x16x4xf32> to vector<1x16x16x4xf32>
    tpu.vector_store %arg7[%c0_75, %c0_76, %c0_77, %c0_78], %55 {strides = array<i32>} : memref<1x16x16x4xf32, #tpu.memory_space<vmem>>, vector<1x16x16x4xf32>,
    %c0_79 = arith.constant 0 : index
    %c0_80 = arith.constant 0 : index
    %56 = vector.load %arg8[%c0_79, %c0_80] : memref<16x4xf32, #tpu.memory_space<vmem>>, vector<8x4xf32>
    %57 = vector.shape_cast %51 : vector<256x4xf32> to vector<32x8x4xf32>
    %cst_81 = arith.constant dense<0.000000e+00> : vector<8x4xf32>
    %58 = vector.multi_reduction <add>, %57, %cst_81 [0] : vector<32x8x4xf32> to vector<8x4xf32>
    %59 = arith.addf %56, %58 : vector<8x4xf32>
    %c0_82 = arith.constant 0 : index
    %c0_83 = arith.constant 0 : index
    %60 = vector.load %arg8[%c0_82, %c0_83] : memref<16x4xf32, #tpu.memory_space<vmem>>, vector<8x4xf32>
    tpu.vector_store %arg8[%c0_82, %c0_83], %59 {strides = array<i32>} : memref<16x4xf32, #tpu.memory_space<vmem>>, vector<8x4xf32>,
    %c8_84 = arith.constant 8 : index
    %c0_85 = arith.constant 0 : index
    %61 = vector.load %arg8[%c8_84, %c0_85] : memref<16x4xf32, #tpu.memory_space<vmem>>, vector<8x4xf32>
    %62 = arith.mulf %51, %51 : vector<256x4xf32>
    %63 = vector.shape_cast %62 : vector<256x4xf32> to vector<32x8x4xf32>
    %cst_86 = arith.constant dense<0.000000e+00> : vector<8x4xf32>
    %64 = vector.multi_reduction <add>, %63, %cst_86 [0] : vector<32x8x4xf32> to vector<8x4xf32>
    %65 = arith.addf %61, %64 : vector<8x4xf32>
    %c8_87 = arith.constant 8 : index
    %c0_88 = arith.constant 0 : index
    %66 = vector.load %arg8[%c8_87, %c0_88] : memref<16x4xf32, #tpu.memory_space<vmem>>, vector<8x4xf32>
    tpu.vector_store %arg8[%c8_87, %c0_88], %65 {strides = array<i32>} : memref<16x4xf32, #tpu.memory_space<vmem>>, vector<8x4xf32>,
    %c1_i32 = arith.constant 1 : i32
    %67 = arith.cmpi eq, %arg0, %c1_i32 : i32
    %68 = arith.extui %67 : i1 to i32
    %c0_i32_89 = arith.constant 0 : i32
    %69 = arith.cmpi ne, %68, %c0_i32_89 : i32
    scf.if %69 {
      %c0_90 = arith.constant 0 : index
      %c0_91 = arith.constant 0 : index
      %70 = vector.load %arg8[%c0_90, %c0_91] : memref<16x4xf32, #tpu.memory_space<vmem>>, vector<8x4xf32>
      %cst_92 = arith.constant dense<0.000000e+00> : vector<4xf32>
      %71 = vector.multi_reduction <add>, %70, %cst_92 [0] : vector<8x4xf32> to vector<4xf32>
      %72 = vector.shape_cast %71 : vector<4xf32> to vector<1x4xf32>
      %c8_93 = arith.constant 8 : index
      %c0_94 = arith.constant 0 : index
      %73 = vector.load %arg8[%c8_93, %c0_94] : memref<16x4xf32, #tpu.memory_space<vmem>>, vector<8x4xf32>
      %cst_95 = arith.constant dense<0.000000e+00> : vector<4xf32>
      %74 = vector.multi_reduction <add>, %73, %cst_95 [0] : vector<8x4xf32> to vector<4xf32>
      %75 = vector.shape_cast %74 : vector<4xf32> to vector<1x4xf32>
      %cst_96 = arith.constant 0.001953125 : f32
      %76 = vector.broadcast %cst_96 : f32 to vector<1x4xf32>
      %77 = arith.mulf %72, %76 : vector<1x4xf32>
      %cst_97 = arith.constant 0.001953125 : f32
      %78 = vector.broadcast %cst_97 : f32 to vector<1x4xf32>
      %79 = arith.mulf %75, %78 : vector<1x4xf32>
      %80 = arith.mulf %77, %77 : vector<1x4xf32>
      %81 = arith.subf %79, %80 : vector<1x4xf32>
      %cst_98 = arith.constant 0.000000e+00 : f32
      %82 = vector.broadcast %cst_98 : f32 to vector<1x4xf32>
      %83 = arith.maximumf %81, %82 : vector<1x4xf32>
      %c0_99 = arith.constant 0 : index
      %c0_100 = arith.constant 0 : index
      %84 = vector.load %arg8[%c0_99, %c0_100] : memref<16x4xf32, #tpu.memory_space<vmem>>, vector<1x4xf32>
      tpu.vector_store %arg8[%c0_99, %c0_100], %77 {strides = array<i32>} : memref<16x4xf32, #tpu.memory_space<vmem>>, vector<1x4xf32>,
      %cst_101 = arith.constant 9.99999974E-6 : f32
      %85 = vector.broadcast %cst_101 : f32 to vector<1x4xf32>
      %86 = arith.addf %83, %85 : vector<1x4xf32>
      %87 = math.sqrt %86 : vector<1x4xf32>
      %cst_102 = arith.constant 1.000000e+00 : f32
      %88 = vector.broadcast %cst_102 : f32 to vector<1x4xf32>
      %89 = arith.divf %88, %87 : vector<1x4xf32>
      %c1_103 = arith.constant 1 : index
      %c0_104 = arith.constant 0 : index
      %90 = vector.load %arg8[%c1_103, %c0_104] : memref<16x4xf32, #tpu.memory_space<vmem>>, vector<1x4xf32>
      tpu.vector_store %arg8[%c1_103, %c0_104], %89 {strides = array<i32>} : memref<16x4xf32, #tpu.memory_space<vmem>>, vector<1x4xf32>,
    } else {
    }
    return
  }
  func.func @transform_0(%arg0: i32) -> (i32, i32) {
    %c0_i32 = arith.constant 0 : i32
    %c0_i32_0 = arith.constant 0 : i32
    %c0_i32_1 = arith.constant 0 : i32
    return %c0_i32, %c0_i32_0 : i32, i32
  }
  func.func @transform_1(%arg0: i32) -> (i32, i32) {
    %c0_i32 = arith.constant 0 : i32
    %c0_i32_0 = arith.constant 0 : i32
    %c0_i32_1 = arith.constant 0 : i32
    return %c0_i32, %c0_i32_0 : i32, i32
  }
  func.func @transform_2(%arg0: i32) -> (i32, i32) {
    %c0_i32 = arith.constant 0 : i32
    %c0_i32_0 = arith.constant 0 : i32
    %c0_i32_1 = arith.constant 0 : i32
    return %c0_i32, %c0_i32_0 : i32, i32
  }
  func.func @transform_3(%arg0: i32) -> (i32, i32) {
    %c0_i32 = arith.constant 0 : i32
    %c0_i32_0 = arith.constant 0 : i32
    %c0_i32_1 = arith.constant 0 : i32
    return %c0_i32, %c0_i32_0 : i32, i32
  }
  func.func @transform_4(%arg0: i32) -> (i32, i32) {
    %c0_i32 = arith.constant 0 : i32
    %c0_i32_0 = arith.constant 0 : i32
    %c0_i32_1 = arith.constant 0 : i32
    return %c0_i32, %c0_i32_0 : i32, i32
  }
  func.func @transform_5(%arg0: i32) -> (i32, i32, i32, i32) {
    %c0_i32 = arith.constant 0 : i32
    %c0_i32_0 = arith.constant 0 : i32
    %c0_i32_1 = arith.constant 0 : i32
    %c0_i32_2 = arith.constant 0 : i32
    return %arg0, %c0_i32, %c0_i32_0, %c0_i32_1 : i32, i32, i32, i32
  }
  func.func @transform_6(%arg0: i32) -> (i32, i32, i32, i32) {
    %c0_i32 = arith.constant 0 : i32
    %c0_i32_0 = arith.constant 0 : i32
    %c0_i32_1 = arith.constant 0 : i32
    %c0_i32_2 = arith.constant 0 : i32
    return %arg0, %c0_i32, %c0_i32_0, %c0_i32_1 : i32, i32, i32, i32
  }
  func.func @transform_7(%arg0: i32) -> (i32, i32) {
    %c0_i32 = arith.constant 0 : i32
    %c0_i32_0 = arith.constant 0 : i32
    %c0_i32_1 = arith.constant 0 : i32
    return %c0_i32, %c0_i32_0 : i32, i32
  }
}

</mosaic_0001>

<bundles_post_ra>
// kernel: resnet_block_forward.3
= control target key start
LH: loop header
LB: loop body
LE: loop exit
PB: predicated region body
PF: predicated region fallthrough
CT: control target
= control target key end

     0   :  { %vm12_vm0 = vcmask 31744   ;;  %v450_v0 = vmov 0.0   ;;  %vm428_vm1 = vcmask 24576   ;;  %s1114_s0 = inlined_call_operand.vmem [shape: f32[512,4], index: 0, kind: input, shape index: {}]   ;;  %s1115_s1 = inlined_call_operand.vmem [shape: f32[16,4], index: 1, kind: output, shape index: {}]  }
   0x1   :  { %13 = vst.msk [vmem:[%s1115_s1] sm:$0xff] %vm12_vm0, %v450_v0  ;;  %14 = vst.msk [vmem:[%s1115_s1 + $0x8] sm:$0xff] %vm12_vm0, %v450_v0  ;;  %v15_v1 = vld [vmem:[%s1114_s0] sm:$0xff]  ;;  %v16_v2 = vld [vmem:[%s1114_s0 + $0x8] sm:$0xff] }
   0x2   :  { %v17_v3 = vld [vmem:[%s1114_s0 + $0x10] sm:$0xff]  ;;  %v18_v4 = vld [vmem:[%s1114_s0 + $0x18] sm:$0xff]  ;;  %v81_v5 = vsel %vm12_vm0, %v15_v1, 0.0  ;;  %v82_v6 = vsel %vm12_vm0, %v16_v2, 0.0  ;;  %v19_v8 = vld [vmem:[%s1114_s0 + $0x20] sm:$0xff]  ;;  %v211_v56 = vmul.f32 %v15_v1, %v15_v1  ;;  %v212_v57 = vmul.f32 %v16_v2, %v16_v2 }
   0x3   :  { %v84_v7 = vsel %vm12_vm0, %v17_v3, 0.0  ;;  %v83_v9 = vadd.f32 %v82_v6, %v81_v5  ;;  %v86_v10 = vsel %vm12_vm0, %v18_v4, 0.0  ;;  %v491_v11 = vld [vmem:[%s1114_s0 + $0x28] sm:$0xff]  ;;  %v88_v13 = vsel %vm12_vm0, %v19_v8, 0.0  ;;  %v497_v14 = vld [vmem:[%s1114_s0 + $0x30] sm:$0xff]  ;;  %v504_v17 = vld [vmem:[%s1114_s0 + $0x38] sm:$0xff] }
   0x4   :  { %v90_v16 = vsel %vm12_vm0, %v491_v11, 0.0  ;;  %v92_v19 = vsel %vm12_vm0, %v497_v14, 0.0  ;;  %v511_v20 = vld [vmem:[%s1114_s0 + $0x40] sm:$0xff]  ;;  %v94_v22 = vsel %vm12_vm0, %v504_v17, 0.0  ;;  %v518_v23 = vld [vmem:[%s1114_s0 + $0x48] sm:$0xff]  ;;  %v525_v26 = vld [vmem:[%s1114_s0 + $0x50] sm:$0xff]  ;;  %v213_v60 = vmul.f32 %v17_v3, %v17_v3 }
   0x5   :  { %v85_v12 = vadd.f32 %v84_v7, %v83_v9  ;;  %v96_v25 = vsel %vm12_vm0, %v511_v20, 0.0  ;;  %v98_v28 = vsel %vm12_vm0, %v518_v23, 0.0  ;;  %v532_v29 = vld [vmem:[%s1114_s0 + $0x58] sm:$0xff]  ;;  %v100_v31 = vsel %vm12_vm0, %v525_v26, 0.0  ;;  %v539_v32 = vld [vmem:[%s1114_s0 + $0x60] sm:$0xff]  ;;  %v546_v35 = vld [vmem:[%s1114_s0 + $0x68] sm:$0xff] }
   0x6   :  { %v102_v34 = vsel %vm12_vm0, %v532_v29, 0.0  ;;  %v104_v37 = vsel %vm12_vm0, %v539_v32, 0.0  ;;  %v553_v38 = vld [vmem:[%s1114_s0 + $0x70] sm:$0xff]  ;;  %v106_v40 = vsel %vm12_vm0, %v546_v35, 0.0  ;;  %v560_v41 = vld [vmem:[%s1114_s0 + $0x78] sm:$0xff]  ;;  %v567_v44 = vld [vmem:[%s1114_s0 + $0x80] sm:$0xff]  ;;  %v214_v62 = vmul.f32 %v18_v4, %v18_v4 }
   0x7   :  { %v87_v15 = vadd.f32 %v86_v10, %v85_v12  ;;  %v108_v43 = vsel %vm12_vm0, %v553_v38, 0.0  ;;  %v110_v46 = vsel %vm12_vm0, %v560_v41, 0.0  ;;  %v574_v47 = vld [vmem:[%s1114_s0 + $0x88] sm:$0xff]  ;;  %v112_v49 = vsel %vm12_vm0, %v567_v44, 0.0  ;;  %v581_v50 = vld [vmem:[%s1114_s0 + $0x90] sm:$0xff]  ;;  %v588_v53 = vld [vmem:[%s1114_s0 + $0x98] sm:$0xff] }
   0x8   :  { %v114_v52 = vsel %vm12_vm0, %v574_v47, 0.0  ;;  %v116_v55 = vsel %vm12_vm0, %v581_v50, 0.0  ;;  %v595_v58 = vld [vmem:[%s1114_s0 + $0xa0] sm:$0xff]  ;;  %v118_v61 = vsel %vm12_vm0, %v588_v53, 0.0  ;;  %v602_v63 = vld [vmem:[%s1114_s0 + $0xa8] sm:$0xff]  ;;  %v215_v2 = vmul.f32 %v19_v8, %v19_v8  ;;  %v611_v3 = vld [vmem:[%s1114_s0 + $0xb0] sm:$0xff] }
   0x9   :  { %v89_v18 = vadd.f32 %v88_v13, %v87_v15  ;;  %v120_v1 = vsel %vm12_vm0, %v595_v58, 0.0  ;;  %v275_v5 = vsel %vm12_vm0, %v211_v56, 0.0  ;;  %v276_v6 = vsel %vm12_vm0, %v212_v57, 0.0  ;;  %v622_v13 = vld [vmem:[%s1114_s0 + $0xb8] sm:$0xff] }
   0xa   :  { %v277_v7 = vadd.f32 %v276_v6, %v275_v5  ;;  %v278_v9 = vsel %vm12_vm0, %v213_v60, 0.0  ;;  %v122_v10 = vsel %vm12_vm0, %v602_v63, 0.0  ;;  %v216_v12 = vmul.f32 %v491_v11, %v491_v11  ;;  %v632_v11 = vld [vmem:[%s1114_s0 + $0xc0] sm:$0xff] }
   0xb   :  { %v91_v21 = vadd.f32 %v90_v16, %v89_v18  ;;  %v280_v8 = vsel %vm12_vm0, %v214_v62, 0.0  ;;  %v124_v18 = vsel %vm12_vm0, %v611_v3, 0.0  ;;  %v222_v56 = vmul.f32 %v532_v29, %v532_v29  ;;  %v692_v29 = vld [vmem:[%s1114_s0 + $0xf0] sm:$0xff] }
   0xc   :  { %v279_v16 = vadd.f32 %v278_v9, %v277_v7  ;;  %v223_v62 = vmul.f32 %v539_v32, %v539_v32  ;;  %v224_v6 = vmul.f32 %v546_v35, %v546_v35  ;;  %v702_v32 = vld [vmem:[%s1114_s0 + $0xf8] sm:$0xff]  ;;  %v712_v35 = vld [vmem:[%s1114_s0 + $0x100] sm:$0xff] }
   0xd   :  { %v93_v24 = vadd.f32 %v92_v19, %v91_v21  ;;  %v217_v19 = vmul.f32 %v497_v14, %v497_v14  ;;  %v282_v21 = vsel %vm12_vm0, %v215_v2, 0.0  ;;  %v642_v14 = vld [vmem:[%s1114_s0 + $0xc8] sm:$0xff] }
   0xf   :  { %v95_v27 = vadd.f32 %v94_v22, %v93_v24  ;;  %v281_v24 = vadd.f32 %v280_v8, %v279_v16  ;;  %v298_v8 = vsel %vm12_vm0, %v223_v62, 0.0  ;;  %v232_v62 = vmul.f32 %v602_v63, %v602_v63  ;;  %v792_v63 = vld [vmem:[%s1114_s0 + $0x140] sm:$0xff] }
  0x11   :  { %v97_v30 = vadd.f32 %v96_v25, %v95_v27  ;;  %v126_v25 = vsel %vm12_vm0, %v622_v13, 0.0  ;;  %v218_v27 = vmul.f32 %v504_v17, %v504_v17  ;;  %v652_v17 = vld [vmem:[%s1114_s0 + $0xd0] sm:$0xff] }
  0x13   :  { %v99_v33 = vadd.f32 %v98_v28, %v97_v30  ;;  %v284_v28 = vsel %vm12_vm0, %v216_v12, 0.0  ;;  %v225_v12 = vmul.f32 %v553_v38, %v553_v38  ;;  %v722_v38 = vld [vmem:[%s1114_s0 + $0x108] sm:$0xff] }
  0x15   :  { %v101_v36 = vadd.f32 %v100_v31, %v99_v33  ;;  %v283_v31 = vadd.f32 %v282_v21, %v281_v24  ;;  %v128_v33 = vsel %vm12_vm0, %v632_v11, 0.0  ;;  %v300_v21 = vsel %vm12_vm0, %v224_v6, 0.0 }
  0x16   :  { %v233_v6 = vmul.f32 %v611_v3, %v611_v3  ;;  %v802_v3 = vld [vmem:[%s1114_s0 + $0x148] sm:$0xff] }
  0x17   :  { %v103_v39 = vadd.f32 %v102_v34, %v101_v36  ;;  %v219_v34 = vmul.f32 %v511_v20, %v511_v20  ;;  %v286_v36 = vsel %vm12_vm0, %v217_v19, 0.0  ;;  %v662_v20 = vld [vmem:[%s1114_s0 + $0xd8] sm:$0xff]  ;;  %v226_v19 = vmul.f32 %v560_v41, %v560_v41  ;;  %v732_v41 = vld [vmem:[%s1114_s0 + $0x110] sm:$0xff] }
  0x19   :  { %v105_v42 = vadd.f32 %v104_v37, %v103_v39  ;;  %v285_v39 = vadd.f32 %v284_v28, %v283_v31  ;;  %v302_v28 = vsel %vm12_vm0, %v225_v12, 0.0  ;;  %v234_v12 = vmul.f32 %v622_v13, %v622_v13  ;;  %v812_v13 = vld [vmem:[%s1114_s0 + $0x150] sm:$0xff] }
  0x1b   :  { %v107_v45 = vadd.f32 %v106_v40, %v105_v42  ;;  %v130_v40 = vsel %vm12_vm0, %v642_v14, 0.0  ;;  %v220_v42 = vmul.f32 %v518_v23, %v518_v23  ;;  %v672_v23 = vld [vmem:[%s1114_s0 + $0xe0] sm:$0xff] }
  0x1d   :  { %v109_v48 = vadd.f32 %v108_v43, %v107_v45  ;;  %v288_v43 = vsel %vm12_vm0, %v218_v27, 0.0  ;;  %v292_v57 = vsel %vm12_vm0, %v220_v42, 0.0  ;;  %v227_v27 = vmul.f32 %v567_v44, %v567_v44  ;;  %v742_v44 = vld [vmem:[%s1114_s0 + $0x118] sm:$0xff] }
  0x1e   :  { %v229_v42 = vmul.f32 %v581_v50, %v581_v50  ;;  %v762_v50 = vld [vmem:[%s1114_s0 + $0x128] sm:$0xff] }
  0x1f   :  { %v111_v51 = vadd.f32 %v110_v46, %v109_v48  ;;  %v287_v46 = vadd.f32 %v286_v36, %v285_v39  ;;  %v132_v48 = vsel %vm12_vm0, %v652_v17, 0.0  ;;  %v304_v36 = vsel %vm12_vm0, %v226_v19, 0.0 }
  0x20   :  { %v235_v19 = vmul.f32 %v632_v11, %v632_v11  ;;  %v822_v11 = vld [vmem:[%s1114_s0 + $0x158] sm:$0xff] }
  0x21   :  { %v113_v54 = vadd.f32 %v112_v49, %v111_v51  ;;  %v221_v49 = vmul.f32 %v525_v26, %v525_v26  ;;  %v290_v51 = vsel %vm12_vm0, %v219_v34, 0.0  ;;  %v682_v26 = vld [vmem:[%s1114_s0 + $0xe8] sm:$0xff]  ;;  %v228_v34 = vmul.f32 %v574_v47, %v574_v47  ;;  %v752_v47 = vld [vmem:[%s1114_s0 + $0x120] sm:$0xff] }
  0x22   :  { %v138_v5 = vsel %vm12_vm0, %v682_v26, 0.0 }
  0x23   :  { %v115_v59 = vadd.f32 %v114_v52, %v113_v54  ;;  %v289_v54 = vadd.f32 %v288_v43, %v287_v46  ;;  %v306_v43 = vsel %vm12_vm0, %v227_v27, 0.0  ;;  %v236_v27 = vmul.f32 %v642_v14, %v642_v14  ;;  %v832_v14 = vld [vmem:[%s1114_s0 + $0x160] sm:$0xff] }
  0x25   :  { %v117_v0 = vadd.f32 %v116_v55, %v115_v59  ;;  %v134_v55 = vsel %vm12_vm0, %v662_v20, 0.0  ;;  %v291_v60 = vadd.f32 %v290_v51, %v289_v54  ;;  %v308_v51 = vsel %vm12_vm0, %v228_v34, 0.0 }
  0x26   :  { %v237_v34 = vmul.f32 %v652_v17, %v652_v17  ;;  %v842_v17 = vld [vmem:[%s1114_s0 + $0x168] sm:$0xff] }
  0x27   :  { %v119_v4 = vadd.f32 %v118_v61, %v117_v0  ;;  %v136_v61 = vsel %vm12_vm0, %v672_v23, 0.0  ;;  %v294_v0 = vsel %vm12_vm0, %v221_v49, 0.0  ;;  %v293_v2 = vadd.f32 %v292_v57, %v291_v60 }
  0x28   :  { %v230_v49 = vmul.f32 %v588_v53, %v588_v53  ;;  %v310_v57 = vsel %vm12_vm0, %v229_v42, 0.0  ;;  %v772_v53 = vld [vmem:[%s1114_s0 + $0x130] sm:$0xff]  ;;  %v238_v42 = vmul.f32 %v662_v20, %v662_v20 }
  0x29   :  { %v121_v15 = vadd.f32 %v120_v1, %v119_v4  ;;  %v296_v4 = vsel %vm12_vm0, %v222_v56, 0.0  ;;  %v295_v9 = vadd.f32 %v294_v0, %v293_v2  ;;  %v231_v56 = vmul.f32 %v595_v58, %v595_v58  ;;  %v782_v58 = vld [vmem:[%s1114_s0 + $0x138] sm:$0xff]  ;;  %v852_v20 = vld [vmem:[%s1114_s0 + $0x170] sm:$0xff] }
  0x2a   :  { %v312_v0 = vsel %vm12_vm0, %v230_v49, 0.0  ;;  %v239_v49 = vmul.f32 %v672_v23, %v672_v23  ;;  %v862_v23 = vld [vmem:[%s1114_s0 + $0x178] sm:$0xff] }
  0x2b   :  { %v123_v22 = vadd.f32 %v122_v10, %v121_v15  ;;  %v140_v10 = vsel %vm12_vm0, %v692_v29, 0.0  ;;  %v297_v16 = vadd.f32 %v296_v4, %v295_v9  ;;  %v314_v4 = vsel %vm12_vm0, %v231_v56, 0.0 }
  0x2c   :  { %v240_v56 = vmul.f32 %v682_v26, %v682_v26  ;;  %v872_v26 = vld [vmem:[%s1114_s0 + $0x180] sm:$0xff] }
  0x2d   :  { %v125_v30 = vadd.f32 %v124_v18, %v123_v22  ;;  %v142_v18 = vsel %vm12_vm0, %v702_v32, 0.0  ;;  %v299_v24 = vadd.f32 %v298_v8, %v297_v16  ;;  %v316_v8 = vsel %vm12_vm0, %v232_v62, 0.0 }
  0x2e   :  { %v241_v62 = vmul.f32 %v692_v29, %v692_v29  ;;  %v882_v29 = vld [vmem:[%s1114_s0 + $0x188] sm:$0xff] }
  0x2f   :  { %v127_v37 = vadd.f32 %v126_v25, %v125_v30  ;;  %v144_v25 = vsel %vm12_vm0, %v712_v35, 0.0  ;;  %v301_v31 = vadd.f32 %v300_v21, %v299_v24  ;;  %v318_v21 = vsel %vm12_vm0, %v233_v6, 0.0 }
  0x30   :  { %v242_v6 = vmul.f32 %v702_v32, %v702_v32  ;;  %v892_v32 = vld [vmem:[%s1114_s0 + $0x190] sm:$0xff] }
  0x31   :  { %v129_v45 = vadd.f32 %v128_v33, %v127_v37  ;;  %v146_v33 = vsel %vm12_vm0, %v722_v38, 0.0  ;;  %v303_v39 = vadd.f32 %v302_v28, %v301_v31  ;;  %v320_v28 = vsel %vm12_vm0, %v234_v12, 0.0 }
  0x32   :  { %v243_v12 = vmul.f32 %v712_v35, %v712_v35  ;;  %v902_v35 = vld [vmem:[%s1114_s0 + $0x198] sm:$0xff] }
  0x33   :  { %v131_v52 = vadd.f32 %v130_v40, %v129_v45  ;;  %v148_v40 = vsel %vm12_vm0, %v732_v41, 0.0  ;;  %v305_v46 = vadd.f32 %v304_v36, %v303_v39  ;;  %v322_v36 = vsel %vm12_vm0, %v235_v19, 0.0 }
  0x34   :  { %v244_v19 = vmul.f32 %v722_v38, %v722_v38  ;;  %v912_v38 = vld [vmem:[%s1114_s0 + $0x1a0] sm:$0xff] }
  0x35   :  { %v133_v59 = vadd.f32 %v132_v48, %v131_v52  ;;  %v150_v48 = vsel %vm12_vm0, %v742_v44, 0.0  ;;  %v307_v54 = vadd.f32 %v306_v43, %v305_v46  ;;  %v324_v43 = vsel %vm12_vm0, %v236_v27, 0.0 }
  0x36   :  { %v245_v27 = vmul.f32 %v732_v41, %v732_v41  ;;  %v922_v41 = vld [vmem:[%s1114_s0 + $0x1a8] sm:$0xff] }
  0x37   :  { %v135_v1 = vadd.f32 %v134_v55, %v133_v59  ;;  %v152_v55 = vsel %vm12_vm0, %v752_v47, 0.0  ;;  %v309_v60 = vadd.f32 %v308_v51, %v307_v54  ;;  %v326_v51 = vsel %vm12_vm0, %v237_v34, 0.0 }
  0x38   :  { %v246_v34 = vmul.f32 %v742_v44, %v742_v44  ;;  %v932_v44 = vld [vmem:[%s1114_s0 + $0x1b0] sm:$0xff] }
  0x39   :  { %v137_v7 = vadd.f32 %v136_v61, %v135_v1  ;;  %v154_v61 = vsel %vm12_vm0, %v762_v50, 0.0  ;;  %v311_v2 = vadd.f32 %v310_v57, %v309_v60  ;;  %v328_v57 = vsel %vm12_vm0, %v238_v42, 0.0 }
  0x3a   :  { %v247_v42 = vmul.f32 %v752_v47, %v752_v47  ;;  %v942_v47 = vld [vmem:[%s1114_s0 + $0x1b8] sm:$0xff] }
  0x3b   :  { %v139_v15 = vadd.f32 %v138_v5, %v137_v7  ;;  %v156_v5 = vsel %vm12_vm0, %v772_v53, 0.0  ;;  %v313_v9 = vadd.f32 %v312_v0, %v311_v2  ;;  %v330_v0 = vsel %vm12_vm0, %v239_v49, 0.0 }
  0x3c   :  { %v248_v49 = vmul.f32 %v762_v50, %v762_v50  ;;  %v952_v50 = vld [vmem:[%s1114_s0 + $0x1c0] sm:$0xff] }
  0x3d   :  { %v141_v22 = vadd.f32 %v140_v10, %v139_v15  ;;  %v158_v10 = vsel %vm12_vm0, %v782_v58, 0.0  ;;  %v315_v16 = vadd.f32 %v314_v4, %v313_v9  ;;  %v332_v4 = vsel %vm12_vm0, %v240_v56, 0.0 }
  0x3e   :  { %v249_v56 = vmul.f32 %v772_v53, %v772_v53  ;;  %v962_v53 = vld [vmem:[%s1114_s0 + $0x1c8] sm:$0xff] }
  0x3f   :  { %v143_v30 = vadd.f32 %v142_v18, %v141_v22  ;;  %v160_v18 = vsel %vm12_vm0, %v792_v63, 0.0  ;;  %v317_v24 = vadd.f32 %v316_v8, %v315_v16  ;;  %v334_v8 = vsel %vm12_vm0, %v241_v62, 0.0 }
  0x40   :  { %v250_v62 = vmul.f32 %v782_v58, %v782_v58  ;;  %v972_v58 = vld [vmem:[%s1114_s0 + $0x1d0] sm:$0xff] }
  0x41   :  { %v145_v37 = vadd.f32 %v144_v25, %v143_v30  ;;  %v162_v25 = vsel %vm12_vm0, %v802_v3, 0.0  ;;  %v319_v31 = vadd.f32 %v318_v21, %v317_v24  ;;  %v336_v21 = vsel %vm12_vm0, %v242_v6, 0.0 }
  0x42   :  { %v251_v6 = vmul.f32 %v792_v63, %v792_v63  ;;  %v982_v63 = vld [vmem:[%s1114_s0 + $0x1d8] sm:$0xff] }
  0x43   :  { %v147_v45 = vadd.f32 %v146_v33, %v145_v37  ;;  %v164_v33 = vsel %vm12_vm0, %v812_v13, 0.0  ;;  %v321_v39 = vadd.f32 %v320_v28, %v319_v31  ;;  %v338_v28 = vsel %vm12_vm0, %v243_v12, 0.0 }
  0x44   :  { %v252_v12 = vmul.f32 %v802_v3, %v802_v3  ;;  %v992_v3 = vld [vmem:[%s1114_s0 + $0x1e0] sm:$0xff] }
  0x45   :  { %v149_v52 = vadd.f32 %v148_v40, %v147_v45  ;;  %v166_v40 = vsel %vm12_vm0, %v822_v11, 0.0  ;;  %v323_v46 = vadd.f32 %v322_v36, %v321_v39  ;;  %v340_v36 = vsel %vm12_vm0, %v244_v19, 0.0 }
  0x46   :  { %v253_v19 = vmul.f32 %v812_v13, %v812_v13  ;;  %v1002_v13 = vld [vmem:[%s1114_s0 + $0x1e8] sm:$0xff] }
  0x47   :  { %v151_v59 = vadd.f32 %v150_v48, %v149_v52  ;;  %v168_v48 = vsel %vm12_vm0, %v832_v14, 0.0  ;;  %v325_v54 = vadd.f32 %v324_v43, %v323_v46  ;;  %v342_v43 = vsel %vm12_vm0, %v245_v27, 0.0 }
  0x48   :  { %v254_v27 = vmul.f32 %v822_v11, %v822_v11  ;;  %v1012_v11 = vld [vmem:[%s1114_s0 + $0x1f0] sm:$0xff] }
  0x49   :  { %v153_v1 = vadd.f32 %v152_v55, %v151_v59  ;;  %v170_v55 = vsel %vm12_vm0, %v842_v17, 0.0  ;;  %v327_v60 = vadd.f32 %v326_v51, %v325_v54  ;;  %v344_v51 = vsel %vm12_vm0, %v246_v34, 0.0 }
  0x4a   :  { %v255_v34 = vmul.f32 %v832_v14, %v832_v14  ;;  %v1022_v14 = vld [vmem:[%s1114_s0 + $0x1f8] sm:$0xff] }
  0x4b   :  { %v155_v7 = vadd.f32 %v154_v61, %v153_v1  ;;  %v172_v61 = vsel %vm12_vm0, %v852_v20, 0.0  ;;  %v329_v2 = vadd.f32 %v328_v57, %v327_v60  ;;  %v346_v57 = vsel %vm12_vm0, %v247_v42, 0.0 }
  0x4c   :  { %v256_v42 = vmul.f32 %v842_v17, %v842_v17  ;;  %v206_v17 = vsel %vm12_vm0, %v1022_v14, 0.0 }
  0x4d   :  { %v157_v15 = vadd.f32 %v156_v5, %v155_v7  ;;  %v174_v5 = vsel %vm12_vm0, %v862_v23, 0.0  ;;  %v331_v9 = vadd.f32 %v330_v0, %v329_v2  ;;  %v348_v0 = vsel %vm12_vm0, %v248_v49, 0.0 }
  0x4e   :  { %v257_v49 = vmul.f32 %v852_v20, %v852_v20  ;;  %v259_v20 = vmul.f32 %v872_v26, %v872_v26 }
  0x4f   :  { %v159_v22 = vadd.f32 %v158_v10, %v157_v15  ;;  %v176_v10 = vsel %vm12_vm0, %v872_v26, 0.0  ;;  %v333_v16 = vadd.f32 %v332_v4, %v331_v9  ;;  %v350_v4 = vsel %vm12_vm0, %v249_v56, 0.0 }
  0x50   :  { %v364_v56 = vsel %vm12_vm0, %v256_v42, 0.0 }
  0x51   :  { %v161_v30 = vadd.f32 %v160_v18, %v159_v22  ;;  %v178_v18 = vsel %vm12_vm0, %v882_v29, 0.0  ;;  %v335_v24 = vadd.f32 %v334_v8, %v333_v16  ;;  %v352_v8 = vsel %vm12_vm0, %v250_v62, 0.0 }
  0x53   :  { %v163_v37 = vadd.f32 %v162_v25, %v161_v30  ;;  %v180_v25 = vsel %vm12_vm0, %v892_v32, 0.0  ;;  %v337_v31 = vadd.f32 %v336_v21, %v335_v24  ;;  %v354_v21 = vsel %vm12_vm0, %v251_v6, 0.0 }
  0x54   :  { %v261_v6 = vmul.f32 %v892_v32, %v892_v32 }
  0x55   :  { %v165_v45 = vadd.f32 %v164_v33, %v163_v37  ;;  %v182_v33 = vsel %vm12_vm0, %v902_v35, 0.0  ;;  %v339_v39 = vadd.f32 %v338_v28, %v337_v31  ;;  %v356_v28 = vsel %vm12_vm0, %v252_v12, 0.0 }
  0x56   :  { %v374_v12 = vsel %vm12_vm0, %v261_v6, 0.0 }
  0x57   :  { %v167_v52 = vadd.f32 %v166_v40, %v165_v45  ;;  %v184_v40 = vsel %vm12_vm0, %v912_v38, 0.0  ;;  %v341_v46 = vadd.f32 %v340_v36, %v339_v39  ;;  %v358_v36 = vsel %vm12_vm0, %v253_v19, 0.0 }
  0x59   :  { %v169_v59 = vadd.f32 %v168_v48, %v167_v52  ;;  %v186_v48 = vsel %vm12_vm0, %v922_v41, 0.0  ;;  %v343_v54 = vadd.f32 %v342_v43, %v341_v46  ;;  %v360_v43 = vsel %vm12_vm0, %v254_v27, 0.0 }
  0x5a   :  { %v267_v27 = vmul.f32 %v952_v50, %v952_v50 }
  0x5b   :  { %v171_v1 = vadd.f32 %v170_v55, %v169_v59  ;;  %v188_v55 = vsel %vm12_vm0, %v932_v44, 0.0  ;;  %v345_v60 = vadd.f32 %v344_v51, %v343_v54  ;;  %v362_v51 = vsel %vm12_vm0, %v255_v34, 0.0 }
  0x5d   :  { %v173_v7 = vadd.f32 %v172_v61, %v171_v1  ;;  %v190_v61 = vsel %vm12_vm0, %v942_v47, 0.0  ;;  %v347_v2 = vadd.f32 %v346_v57, %v345_v60  ;;  %v79_v60 = vld [vmem:[%s1115_s1] sm:$0xff] }
  0x5f   :  { %v175_v15 = vadd.f32 %v174_v5, %v173_v7  ;;  %v192_v5 = vsel %vm12_vm0, %v952_v50, 0.0  ;;  %v349_v9 = vadd.f32 %v348_v0, %v347_v2  ;;  %v270_v50 = vmul.f32 %v982_v63, %v982_v63 }
  0x61   :  { %v177_v22 = vadd.f32 %v176_v10, %v175_v15  ;;  %v194_v10 = vsel %vm12_vm0, %v962_v53, 0.0  ;;  %v351_v16 = vadd.f32 %v350_v4, %v349_v9  ;;  %v370_v4 = vsel %vm12_vm0, %v259_v20, 0.0  ;;  %v210_v20 = vld [vmem:[%s1115_s1 + $0x8] sm:$0xff] }
  0x63   :  { %v179_v30 = vadd.f32 %v178_v18, %v177_v22  ;;  %v196_v18 = vsel %vm12_vm0, %v972_v58, 0.0  ;;  %v353_v24 = vadd.f32 %v352_v8, %v351_v16  ;;  %v264_v8 = vmul.f32 %v922_v41, %v922_v41 }
  0x65   :  { %v181_v37 = vadd.f32 %v180_v25, %v179_v30  ;;  %v198_v25 = vsel %vm12_vm0, %v982_v63, 0.0  ;;  %v355_v31 = vadd.f32 %v354_v21, %v353_v24  ;;  %v380_v41 = vsel %vm12_vm0, %v264_v8, 0.0 }
  0x66   :  { %v273_v63 = vmul.f32 %v1012_v11, %v1012_v11 }
  0x67   :  { %v183_v45 = vadd.f32 %v182_v33, %v181_v37  ;;  %v200_v33 = vsel %vm12_vm0, %v992_v3, 0.0  ;;  %v357_v39 = vadd.f32 %v356_v28, %v355_v31  ;;  %v268_v31 = vmul.f32 %v962_v53, %v962_v53 }
  0x68   :  { %v271_v53 = vmul.f32 %v992_v3, %v992_v3 }
  0x69   :  { %v185_v52 = vadd.f32 %v184_v40, %v183_v45  ;;  %v202_v40 = vsel %vm12_vm0, %v1002_v13, 0.0  ;;  %v359_v46 = vadd.f32 %v358_v36, %v357_v39  ;;  %v388_v42 = vsel %vm12_vm0, %v268_v31, 0.0 }
  0x6b   :  { %v187_v59 = vadd.f32 %v186_v48, %v185_v52  ;;  %v204_v48 = vsel %vm12_vm0, %v1012_v11, 0.0  ;;  %v361_v54 = vadd.f32 %v360_v43, %v359_v46 }
  0x6d   :  { %v189_v1 = vadd.f32 %v188_v55, %v187_v59  ;;  %v258_v55 = vmul.f32 %v862_v23, %v862_v23  ;;  %v363_v59 = vadd.f32 %v362_v51, %v361_v54  ;;  %v392_v51 = vsel %vm12_vm0, %v270_v50, 0.0 }
  0x6f   :  { %v191_v7 = vadd.f32 %v190_v61, %v189_v1  ;;  %v366_v61 = vsel %vm12_vm0, %v257_v49, 0.0  ;;  %v365_v0 = vadd.f32 %v364_v56, %v363_v59  ;;  %v260_v1 = vmul.f32 %v882_v29, %v882_v29 }
  0x70   :  { %v368_v23 = vsel %vm12_vm0, %v258_v55, 0.0  ;;  %v274_v55 = vmul.f32 %v1022_v14, %v1022_v14 }
  0x71   :  { %v193_v15 = vadd.f32 %v192_v5, %v191_v7  ;;  %v367_v5 = vadd.f32 %v366_v61, %v365_v0  ;;  %v262_v7 = vmul.f32 %v902_v35, %v902_v35  ;;  %v372_v29 = vsel %vm12_vm0, %v260_v1, 0.0 }
  0x73   :  { %v195_v22 = vadd.f32 %v194_v10, %v193_v15  ;;  %v369_v26 = vadd.f32 %v368_v23, %v367_v5  ;;  %v263_v10 = vmul.f32 %v912_v38, %v912_v38  ;;  %v376_v15 = vsel %vm12_vm0, %v262_v7, 0.0 }
  0x75   :  { %v197_v30 = vadd.f32 %v196_v18, %v195_v22  ;;  %v371_v9 = vadd.f32 %v370_v4, %v369_v26  ;;  %v265_v18 = vmul.f32 %v932_v44, %v932_v44  ;;  %v378_v35 = vsel %vm12_vm0, %v263_v10, 0.0 }
  0x76   :  { %v266_v22 = vmul.f32 %v942_v47, %v942_v47  ;;  %v269_v47 = vmul.f32 %v972_v58, %v972_v58  ;;  %v272_v58 = vmul.f32 %v1002_v13, %v1002_v13 }
  0x77   :  { %v199_v37 = vadd.f32 %v198_v25, %v197_v30  ;;  %v373_v32 = vadd.f32 %v372_v29, %v371_v9  ;;  %v382_v44 = vsel %vm12_vm0, %v265_v18, 0.0 }
  0x78   :  { %v390_v46 = vsel %vm12_vm0, %v269_v47, 0.0  ;;  %v396_v13 = vsel %vm12_vm0, %v272_v58, 0.0 }
  0x79   :  { %v201_v45 = vadd.f32 %v200_v33, %v199_v37  ;;  %v375_v16 = vadd.f32 %v374_v12, %v373_v32  ;;  %v384_v33 = vsel %vm12_vm0, %v266_v22, 0.0  ;;  %v386_v37 = vsel %vm12_vm0, %v267_v27, 0.0 }
  0x7b   :  { %v203_v52 = vadd.f32 %v202_v40, %v201_v45  ;;  %v377_v21 = vadd.f32 %v376_v15, %v375_v16 }
  0x7d   :  { %v205_v57 = vadd.f32 %v204_v48, %v203_v52  ;;  %v379_v25 = vadd.f32 %v378_v35, %v377_v21 }
  0x7f   :  { %v207_v62 = vadd.f32 %v206_v17, %v205_v57  ;;  %v381_v30 = vadd.f32 %v380_v41, %v379_v25  ;;  %v394_v17 = vsel %vm12_vm0, %v271_v53, 0.0  ;;  %v398_v57 = vsel %vm12_vm0, %v273_v63, 0.0 }
  0x81   :  { %v208_v2 = vadd.f32 %v207_v62, %v79_v60  ;;  %v383_v36 = vadd.f32 %v382_v44, %v381_v30  ;;  %v400_v60 = vsel %vm12_vm0, %v274_v55, 0.0 }
  0x83   :  { %209 = vst.msk [vmem:[%s1115_s1] sm:$0xff] %vm12_vm0, %v208_v2  ;;  %v385_v40 = vadd.f32 %v384_v33, %v383_v36 }
  0x85   :  { %v387_v45 = vadd.f32 %v386_v37, %v385_v40 }
  0x87   :  { %v389_v49 = vadd.f32 %v388_v42, %v387_v45 }
  0x89   :  { %v391_v54 = vadd.f32 %v390_v46, %v389_v49 }
  0x8a   :  { %v407_v19 = vld [vmem:[%s1115_s1] sm:$0xff] }
  0x8b   :  { %v408_v38 = vsel %vm12_vm0, %v407_v19, 0.0  ;;  %v393_v3 = vadd.f32 %v392_v51, %v391_v54 }
  0x8c   :  { %v409_v24 = vrot.slane %v408_v38, 4 }
  0x8d   :  { %v395_v56 = vadd.f32 %v394_v17, %v393_v3 }
  0x8e   :  { %v410_v28 = vadd.f32 %v409_v24, %v408_v38 }
  0x8f   :  { %v397_v59 = vadd.f32 %v396_v13, %v395_v56 }
  0x90   :  { %v411_v34 = vrot.slane %v410_v28, 2 }
  0x91   :  { %v399_v11 = vadd.f32 %v398_v57, %v397_v59 }
  0x92   :  { %v412_v39 = vadd.f32 %v411_v34, %v410_v28 }
  0x93   :  { %v401_v61 = vadd.f32 %v400_v60, %v399_v11 }
  0x94   :  { %v413_v43 = vrot.slane %v412_v39, 1 }
  0x95   :  { %v402_v62 = vadd.f32 %v401_v61, %v210_v20 }
  0x96   :  { %v414_v48 = vadd.f32 %v413_v43, %v412_v39 }
  0x97   :  { %403 = vst.msk [vmem:[%s1115_s1 + $0x8] sm:$0xff] %vm12_vm0, %v402_v62 }
  0x98   :  { %v423_v52 = vmul.f32 0.001953125, %v414_v48 }
  0x9a   :  { %429 = vst.msk [vmem:[%s1115_s1] sm:$0x1] %vm428_vm1, %v423_v52  ;;  %v425_v26 = vmul.f32 %v423_v52, %v423_v52 }
  0x9e   :  { %v415_v14 = vld [vmem:[%s1115_s1 + $0x8] sm:$0xff] }
  0x9f   :  { %v416_v0 = vsel %vm12_vm0, %v415_v14, 0.0 }
  0xa0   :  { %v417_v1 = vrot.slane %v416_v0, 4 }
  0xa2   :  { %v418_v23 = vadd.f32 %v417_v1, %v416_v0 }
  0xa4   :  { %v419_v2 = vrot.slane %v418_v23, 2 }
  0xa6   :  { %v420_v5 = vadd.f32 %v419_v2, %v418_v23 }
  0xa8   :  { %v421_v6 = vrot.slane %v420_v5, 1 }
  0xaa   :  { %v422_v4 = vadd.f32 %v421_v6, %v420_v5 }
  0xac   :  { %v424_v7 = vmul.f32 0.001953125, %v422_v4 }
  0xae   :  { %v426_v29 = vsub.f32 %v424_v7, %v425_v26 }
  0xb0   :  { %v427_v9 = vmax.f32 %v426_v29, 0.0 }
  0xb2   :  { %v430_v10 = vadd.f32 1e-05, %v427_v9 }
  0xb4   :  { %446 = vrsqrt.f32 %v430_v10  ;;  %vm433_vm2 = vcmp.eq.f32.partialorder %v430_v10, inf  ;;  %v436_v8 = vand.u32 2147483648, %v430_v10  ;;  %vm435_vm3 = vcmp.eq.f32.partialorder %v430_v10, 0.0 }
  0xbe   :  { %v447_v12 = vpop.eup %446 }
  0xbf   :  { %v432_v32 = vmul.f32 %v447_v12, %v430_v10 }
  0xc1   :  { %v434_v15 = vsel %vm433_vm2, %v430_v10, %v432_v32 }
  0xc2   :  { %v437_v16 = vsel %vm435_vm3, %v436_v8, %v434_v15 }
  0xc3   :  { %448 = vrcp.f32 %v437_v16 }
  0xcd   :  { %v449_v18 = vpop.eup %448 }
  0xce   :  { %440 = vst.msk [vmem:[%s1115_s1 + $0x1] sm:$0x1] %vm428_vm1, %v449_v18 }

// kernel: resnet_block_forward.5
= control target key start
LH: loop header
LB: loop body
LE: loop exit
PB: predicated region body
PF: predicated region fallthrough
CT: control target
= control target key end

     0   :  { %s3080_s24 = smov 0   ;;  %s4481_s0 = inlined_call_operand.vmem [shape: f32[16,4], index: 0, kind: input, shape index: {}]   ;;  %s4482_s1 = inlined_call_operand.vmem [shape: f32[1,4], index: 1, kind: input, shape index: {}]   ;;  %s4483_s2 = inlined_call_operand.vmem [shape: f32[1,4], index: 2, kind: input, shape index: {}]   ;;  %s4484_s3 = inlined_call_operand.vmem [shape: f32[128,128], index: 3, kind: input, shape index: {}]   ;;  %s4485_s4 = inlined_call_operand.vmem [shape: f32[1,8], index: 4, kind: input, shape index: {}]   ;;  %s4486_s5 = inlined_call_operand.vmem [shape: f32[2,16,16,4], index: 5, kind: input, shape index: {}]   ;;  %s4487_s6 = inlined_call_operand.vmem [shape: f32[2,16,16,4], index: 6, kind: input, shape index: {}]   ;;  %s4488_s7 = inlined_call_operand.vmem [shape: f32[2,16,16,8], index: 7, kind: output, shape index: {}]  }
   0x1 LB: > { %s2811_s25 = sadd.s32 4294967295, %s3028_s24   ;;  %p2815_p0 = scmp.ge.s32.totalorder %s3028_s24, 1  ;;  %s3028_s24 = sphi %s3080_s24, %s17_s24  }
   0x2   : > { %p247_p1 = scmp.lt.s32.totalorder %s3028_s24, 3 }
   0x4   : > { %p248_p2 = pnand %p2815_p0, %p247_p1 }
   0x6   : > { %251 = sbr.rel (%p248_p2) target bundleno = 976 (0x3d0), region = 48 }
   0xd   : > { %vm476_vm0 = vcmask 31744   ;;  %p3090_p3 = scmp.lt.s32.totalorder %s2811_s25, 1  ;;  %v338_v0 = vlaneseq  ;;  %v3030_v1 = vmov 0.0   ;;  %v331_v2 = vld [vmem:[%s4481_s0] sm:$0x1]  ;;  %vm479_vm1 = vcmask 25600  }
   0xe   : > { %477 = vst.msk [vmem:[#allocation2] sm:$0xff] %vm476_vm0, %v3030_v1  ;;  %478 = vst.msk [vmem:[#allocation2 + $0x8] sm:$0xff] %vm476_vm0, %v3030_v1  ;;  %v332_v3 = vld [vmem:[%s4481_s0 + $0x1] sm:$0x1]  ;;  %v333_v4 = vld [vmem:[%s4482_s1] sm:$0x1] }
   0xf   : > { %481 = vst.msk [vmem:[#allocation2 + $0x18] sm:$0xff] %vm476_vm0, %v3030_v1  ;;  %482 = vst.msk [vmem:[#allocation2 + $0x20] sm:$0xff] %vm476_vm0, %v3030_v1  ;;  %s4531_s25 = smov (!%p3090_p3, %s2811_s25), 1  ;;  %v334_v5 = vmul.f32 %v333_v4, %v332_v3  ;;  %v339_v6 = vshrl.u32 %v338_v0, 7  ;;  %v335_v7 = vld [vmem:[%s4483_s2] sm:$0x1] }
  0x10   : > { %484 = vst.msk [vmem:[#allocation2 + $0x30] sm:$0xff] %vm476_vm0, %v3030_v1  ;;  %485 = vst.msk [vmem:[#allocation2 + $0x38] sm:$0xff] %vm476_vm0, %v3030_v1  ;;  %s3251_s12 = sshll.u32 %s4531_s25, 8  ;;  %s3031_s16 = smov 4   ;;  %vm821_vm2 = vcmask 64544   ;;  %vm1014_vm3 = vcmask 97344  }
  0x11   : > { %487 = vst.msk [vmem:[#allocation2 + $0x48] sm:$0xff] %vm476_vm0, %v3030_v1  ;;  %488 = vst.msk [vmem:[#allocation2 + $0x50] sm:$0xff] %vm476_vm0, %v3030_v1  ;;  %v336_v8 = vmul.f32 %v334_v5, %v331_v2  ;;  %v340_v9 = vsub.s32 0, %v339_v6  ;;  %s3257_s15 = scalar_lea.vmem %s4486_s5, %s3251_s12  ;;  %s3032_s17 = smov 8   ;;  %vm1207_vm4 = vcmask 130144   ;;  %vm1400_vm5 = vcmask 162944  }
  0x12   : > { %490 = vst.msk [vmem:[#allocation2 + $0x60] sm:$0xff] %vm476_vm0, %v3030_v1  ;;  %491 = vst.msk [vmem:[#allocation2 + $0x68] sm:$0xff] %vm476_vm0, %v3030_v1  ;;  %v299_v10 = vld [vmem:[%s3257_s15] sm:$0xff]  ;;  %v300_v13 = vld [vmem:[%s3257_s15 + $0x8] sm:$0xff]  ;;  %s3033_s18 = smov 12   ;;  %s3034_s19 = smov 16  }
  0x13   : > { %493 = vst.msk [vmem:[#allocation2 + $0x78] sm:$0xff] %vm476_vm0, %v3030_v1  ;;  %494 = vst.msk [vmem:[#allocation2 + $0x80] sm:$0xff] %vm476_vm0, %v3030_v1  ;;  %v337_v11 = vsub.f32 %v335_v7, %v336_v8  ;;  %v3260_v12 = vrot.slane %v334_v5, %v340_v9  ;;  %v301_v14 = vld [vmem:[%s3257_s15 + $0x10] sm:$0xff]  ;;  %v302_v15 = vld [vmem:[%s3257_s15 + $0x18] sm:$0xff]  ;;  %s3035_s20 = smov 20   ;;  %s3036_s21 = smov 24  }
  0x14   : > { %496 = vst.msk [vmem:[#allocation2 + $0x90] sm:$0xff] %vm476_vm0, %v3030_v1  ;;  %497 = vst.msk [vmem:[#allocation2 + $0x98] sm:$0xff] %vm476_vm0, %v3030_v1  ;;  %v303_v16 = vld [vmem:[%s3257_s15 + $0x20] sm:$0xff]  ;;  %v304_v17 = vld [vmem:[%s3257_s15 + $0x28] sm:$0xff]  ;;  %s3037_s8 = smov 28   ;;  %s3946_s23 = scalar_lea.vmem %s4487_s6, %s3251_s12  ;;  %vm1593_vm6 = vcmask 195744  }
  0x15   : > { %499 = vst.msk [vmem:[#allocation2 + $0xa8] sm:$0xff] %vm476_vm0, %v3030_v1  ;;  %500 = vst.msk [vmem:[#allocation2 + $0xb0] sm:$0xff] %vm476_vm0, %v3030_v1  ;;  %v661_v18 = vld [vmem:[#allocation2 + $0x1] sm:$0xff]  ;;  %v342_v19 = vmul.f32 %v3260_v12, %v299_v10  ;;  %v3268_v20 = vrot.slane %v337_v11, %v340_v9  ;;  %v343_v21 = vmul.f32 %v3260_v12, %v300_v13  ;;  %v305_v23 = vld [vmem:[%s3257_s15 + $0x30] sm:$0xff]  ;;  %s3039_s11 = smov 36   ;;  %vm1787_vm7 = vcmask 228544  }
  0x16   : > { %502 = vst.msk [vmem:[#allocation2 + $0xc0] sm:$0xff] %vm476_vm0, %v3030_v1  ;;  %503 = vst.msk [vmem:[#allocation2 + $0xc8] sm:$0xff] %vm476_vm0, %v3030_v1  ;;  %v344_v22 = vmul.f32 %v3260_v12, %v301_v14  ;;  %v306_v24 = vld [vmem:[%s3257_s15 + $0x38] sm:$0xff]  ;;  %725 = vrot.lane.b32.xlu0 %v661_v18, %s3031_s16  ;;  %v345_v25 = vmul.f32 %v3260_v12, %v302_v15  ;;  %v346_v26 = vmul.f32 %v3260_v12, %v303_v16  ;;  %v307_v34 = vld [vmem:[%s3257_s15 + $0x40] sm:$0xff]  ;;  %vm1980_vm8 = vcmask 261344  }
  0x17   : > { %505 = vst.msk [vmem:[#allocation2 + $0xd8] sm:$0xff] %vm476_vm0, %v3030_v1  ;;  %506 = vst.msk [vmem:[#allocation2 + $0xe0] sm:$0xff] %vm476_vm0, %v3030_v1  ;;  %v347_v27 = vmul.f32 %v3260_v12, %v304_v17  ;;  %v348_v28 = vmul.f32 %v3260_v12, %v305_v23  ;;  %v380_v29 = vadd.f32 %v3268_v20, %v342_v19  ;;  %v308_v39 = vld [vmem:[%s3257_s15 + $0x48] sm:$0xff]  ;;  %v309_v40 = vld [vmem:[%s3257_s15 + $0x50] sm:$0xff]  ;;  %vm2173_vm9 = vcmask 294144  }
  0x18   : > { %508 = vst.msk [vmem:[#allocation2 + $0xf0] sm:$0xff] %vm476_vm0, %v3030_v1  ;;  %509 = vst.msk [vmem:[#allocation2 + $0xf8] sm:$0xff] %vm476_vm0, %v3030_v1  ;;  %v381_v31 = vadd.f32 %v3268_v20, %v343_v21  ;;  %v382_v32 = vadd.f32 %v3268_v20, %v344_v22  ;;  %v349_v33 = vmul.f32 %v3260_v12, %v306_v24  ;;  %v310_v53 = vld [vmem:[%s3257_s15 + $0x58] sm:$0xff]  ;;  %v311_v54 = vld [vmem:[%s3257_s15 + $0x60] sm:$0xff]  ;;  %vm2366_vm10 = vcmask 326944  }
  0x19   : > { %511 = vst.msk [vmem:[#allocation2 + $0x108] sm:$0xff] %vm476_vm0, %v3030_v1  ;;  %512 = vst.msk [vmem:[#allocation2 + $0x110] sm:$0xff] %vm476_vm0, %v3030_v1  ;;  %v383_v35 = vadd.f32 %v3268_v20, %v345_v25  ;;  %v384_v36 = vadd.f32 %v3268_v20, %v346_v26  ;;  %v385_v37 = vadd.f32 %v3268_v20, %v347_v27  ;;  %v412_v41 = vmul.f32 0.3, %v380_v29  ;;  %v312_v55 = vld [vmem:[%s3257_s15 + $0x68] sm:$0xff]  ;;  %v313_v60 = vld [vmem:[%s3257_s15 + $0x70] sm:$0xff] }
  0x1a   : > { %514 = vst.msk [vmem:[#allocation2 + $0x120] sm:$0xff] %vm476_vm0, %v3030_v1  ;;  %515 = vst.msk [vmem:[#allocation2 + $0x128] sm:$0xff] %vm476_vm0, %v3030_v1  ;;  %v386_v38 = vadd.f32 %v3268_v20, %v348_v28  ;;  %v413_v42 = vmul.f32 0.3, %v381_v31  ;;  %v414_v43 = vmul.f32 0.3, %v382_v32  ;;  %v387_v44 = vadd.f32 %v3268_v20, %v349_v33 }
  0x1b   : > { %517 = vst.msk [vmem:[#allocation2 + $0x138] sm:$0xff] %vm476_vm0, %v3030_v1  ;;  %518 = vst.msk [vmem:[#allocation2 + $0x140] sm:$0xff] %vm476_vm0, %v3030_v1  ;;  %v415_v45 = vmul.f32 0.3, %v383_v35  ;;  %v416_v46 = vmul.f32 0.3, %v384_v36  ;;  %v350_v48 = vmul.f32 %v3260_v12, %v307_v34  ;;  %v444_v49 = vmax.f32 %v380_v29, %v412_v41 }
  0x1c   : > { %520 = vst.msk [vmem:[#allocation2 + $0x150] sm:$0xff] %vm476_vm0, %v3030_v1  ;;  %521 = vst.msk [vmem:[#allocation2 + $0x158] sm:$0xff] %vm476_vm0, %v3030_v1  ;;  %v417_v47 = vmul.f32 0.3, %v385_v37  ;;  %v445_v50 = vmax.f32 %v381_v31, %v413_v42  ;;  %v446_v51 = vmax.f32 %v382_v32, %v414_v43  ;;  %v418_v52 = vmul.f32 0.3, %v386_v38 }
  0x1d   : > { %523 = vst.msk [vmem:[#allocation2 + $0x168] sm:$0xff] %vm476_vm0, %v3030_v1  ;;  %524 = vst.msk [vmem:[#allocation2 + $0x170] sm:$0xff] %vm476_vm0, %v3030_v1  ;;  %v447_v56 = vmax.f32 %v383_v35, %v415_v45  ;;  %v448_v57 = vmax.f32 %v384_v36, %v416_v46  ;;  %v419_v59 = vmul.f32 0.3, %v387_v44  ;;  %v388_v62 = vadd.f32 %v3268_v20, %v350_v48  ;;  %v315_v15 = vld [vmem:[%s3257_s15 + $0x80] sm:$0xff]  ;;  %v598_v17 = vld [vmem:[#allocation2 + $0x8] sm:$0xff] }
  0x1e   : > { %526 = vst.msk [vmem:[#allocation2 + $0x180] sm:$0xff] %vm476_vm0, %v3030_v1  ;;  %527 = vst.msk [vmem:[#allocation2 + $0x188] sm:$0xff] %vm476_vm0, %v3030_v1  ;;  %v449_v58 = vmax.f32 %v385_v37, %v417_v47  ;;  %v450_v61 = vmax.f32 %v386_v38, %v418_v52  ;;  %v351_v63 = vmul.f32 %v3260_v12, %v308_v39  ;;  %v597_v16 = vld [vmem:[#allocation2] sm:$0xff]  ;;  %v316_v23 = vld [vmem:[%s3257_s15 + $0x88] sm:$0xff]  ;;  %vm2711_vm11 = vcmask 64512  }
  0x1f   : > { %529 = vst.msk [vmem:[#allocation2 + $0x198] sm:$0xff] %vm476_vm0, %v3030_v1  ;;  %530 = vst.msk [vmem:[#allocation2 + $0x1a0] sm:$0xff] %vm476_vm0, %v3030_v1  ;;  %v352_v0 = vmul.f32 %v3260_v12, %v309_v40  ;;  %v451_v2 = vmax.f32 %v387_v44, %v419_v59  ;;  %v353_v3 = vmul.f32 %v3260_v12, %v310_v53  ;;  %v420_v6 = vmul.f32 0.3, %v388_v62  ;;  %v317_v24 = vld [vmem:[%s3257_s15 + $0x90] sm:$0xff]  ;;  %v318_v33 = vld [vmem:[%s3257_s15 + $0x98] sm:$0xff] }
  0x20   : > { %565 = vst [vmem:[#allocation3] sm:$0xff] %v3030_v1  ;;  %566 = vst [vmem:[#allocation3 + $0x8] sm:$0xff] %v3030_v1  ;;  %v354_v4 = vmul.f32 %v3260_v12, %v311_v54  ;;  %v355_v5 = vmul.f32 %v3260_v12, %v312_v55  ;;  %v389_v7 = vadd.f32 %v3268_v20, %v351_v63  ;;  %v319_v34 = vld [vmem:[%s3257_s15 + $0xa0] sm:$0xff]  ;;  %v320_v35 = vld [vmem:[%s3257_s15 + $0xa8] sm:$0xff] }
  0x21   : > { %567 = vst [vmem:[#allocation3 + $0x10] sm:$0xff] %v3030_v1  ;;  %568 = vst [vmem:[#allocation3 + $0x18] sm:$0xff] %v3030_v1  ;;  %v390_v8 = vadd.f32 %v3268_v20, %v352_v0  ;;  %v356_v9 = vmul.f32 %v3260_v12, %v313_v60  ;;  %v391_v10 = vadd.f32 %v3268_v20, %v353_v3  ;;  %v321_v42 = vld [vmem:[%s3257_s15 + $0xb0] sm:$0xff]  ;;  %v322_v46 = vld [vmem:[%s3257_s15 + $0xb8] sm:$0xff] }
  0x22   : > { %569 = vst [vmem:[#allocation3 + $0x20] sm:$0xff] %v3030_v1  ;;  %570 = vst [vmem:[#allocation3 + $0x28] sm:$0xff] %v3030_v1  ;;  %v392_v11 = vadd.f32 %v3268_v20, %v354_v4  ;;  %v393_v13 = vadd.f32 %v3268_v20, %v355_v5  ;;  %v452_v18 = vmax.f32 %v388_v62, %v420_v6  ;;  %v421_v19 = vmul.f32 0.3, %v389_v7  ;;  %v324_v3 = vld [vmem:[%s3257_s15 + $0xc8] sm:$0xff]  ;;  %v325_v4 = vld [vmem:[%s3257_s15 + $0xd0] sm:$0xff] }
  0x23   : > { %571 = vst [vmem:[#allocation3 + $0x30] sm:$0xff] %v3030_v1  ;;  %572 = vst [vmem:[#allocation3 + $0x38] sm:$0xff] %v3030_v1  ;;  %v422_v21 = vmul.f32 0.3, %v390_v8  ;;  %v394_v22 = vadd.f32 %v3268_v20, %v356_v9  ;;  %v423_v25 = vmul.f32 0.3, %v391_v10  ;;  %v358_v32 = vmul.f32 %v3260_v12, %v315_v15 }
  0x24   : > { %573 = vst [vmem:[#allocation3 + $0x40] sm:$0xff] %v3030_v1  ;;  %574 = vst [vmem:[#allocation3 + $0x48] sm:$0xff] %v3030_v1  ;;  %v424_v26 = vmul.f32 0.3, %v392_v11  ;;  %v425_v27 = vmul.f32 0.3, %v393_v13  ;;  %v453_v29 = vmax.f32 %v389_v7, %v421_v19  ;;  %v359_v45 = vmul.f32 %v3260_v12, %v316_v23 }
  0x25   : > { %575 = vst [vmem:[#allocation3 + $0x50] sm:$0xff] %v3030_v1  ;;  %576 = vst [vmem:[#allocation3 + $0x58] sm:$0xff] %v3030_v1  ;;  %v426_v31 = vmul.f32 0.3, %v394_v22  ;;  %v455_v38 = vmax.f32 %v391_v10, %v423_v25  ;;  %v396_v44 = vadd.f32 %v3268_v20, %v358_v32  ;;  %v362_v52 = vmul.f32 %v3260_v12, %v319_v34  ;;  %v326_v23 = vld [vmem:[%s3257_s15 + $0xd8] sm:$0xff]  ;;  %v328_v25 = vld [vmem:[%s3257_s15 + $0xe8] sm:$0xff] }
  0x26   : > { %577 = vst [vmem:[#allocation3 + $0x60] sm:$0xff] %v3030_v1  ;;  %578 = vst [vmem:[#allocation3 + $0x68] sm:$0xff] %v3030_v1  ;;  %v456_v39 = vmax.f32 %v392_v11, %v424_v26  ;;  %v457_v40 = vmax.f32 %v393_v13, %v425_v27  ;;  %v397_v54 = vadd.f32 %v3268_v20, %v359_v45 }
  0x27   : > { %579 = vst [vmem:[#allocation3 + $0x70] sm:$0xff] %v3030_v1  ;;  %580 = vst [vmem:[#allocation3 + $0x78] sm:$0xff] %v3030_v1  ;;  %v458_v43 = vmax.f32 %v394_v22, %v426_v31  ;;  %v428_v53 = vmul.f32 0.3, %v396_v44  ;;  %v363_v55 = vmul.f32 %v3260_v12, %v320_v35  ;;  %v400_v60 = vadd.f32 %v3268_v20, %v362_v52 }
  0x28   : > { %581 = vst [vmem:[#allocation3 + $0x80] sm:$0xff] %v3030_v1  ;;  %582 = vst [vmem:[#allocation3 + $0x88] sm:$0xff] %v3030_v1  ;;  %v429_v0 = vmul.f32 0.3, %v397_v54  ;;  %v368_v34 = vmul.f32 %v3260_v12, %v325_v4  ;;  %v369_v35 = vmul.f32 %v3260_v12, %v326_v23 }
  0x29   : > { %583 = vst [vmem:[#allocation3 + $0x90] sm:$0xff] %v3030_v1  ;;  %584 = vst [vmem:[#allocation3 + $0x98] sm:$0xff] %v3030_v1  ;;  %v460_v63 = vmax.f32 %v396_v44, %v428_v53  ;;  %v432_v15 = vmul.f32 0.3, %v400_v60 }
  0x2a   : > { %585 = vst [vmem:[#allocation3 + $0xa0] sm:$0xff] %v3030_v1  ;;  %586 = vst [vmem:[#allocation3 + $0xa8] sm:$0xff] %v3030_v1 }
  0x2b   : > { %587 = vst [vmem:[#allocation3 + $0xb0] sm:$0xff] %v3030_v1  ;;  %588 = vst [vmem:[#allocation3 + $0xb8] sm:$0xff] %v3030_v1  ;;  %v464_v26 = vmax.f32 %v400_v60, %v432_v15 }
  0x2c   : > { %589 = vst [vmem:[#allocation3 + $0xc0] sm:$0xff] %v3030_v1  ;;  %590 = vst [vmem:[#allocation3 + $0xc8] sm:$0xff] %v3030_v1 }
  0x2d   : > { %591 = vst [vmem:[#allocation3 + $0xd0] sm:$0xff] %v3030_v1  ;;  %592 = vst [vmem:[#allocation3 + $0xd8] sm:$0xff] %v3030_v1 }
  0x2e   : > { %593 = vst [vmem:[#allocation3 + $0xe0] sm:$0xff] %v3030_v1  ;;  %594 = vst [vmem:[#allocation3 + $0xe8] sm:$0xff] %v3030_v1 }
  0x2f   : > { %595 = vst [vmem:[#allocation3 + $0xf0] sm:$0xff] %v3030_v1  ;;  %596 = vst [vmem:[#allocation3 + $0xf8] sm:$0xff] %v3030_v1 }
  0x30   : > { %480 = vst.msk [vmem:[#allocation2 + $0x10] sm:$0x3] %vm479_vm1, %v3030_v1  ;;  %483 = vst.msk [vmem:[#allocation2 + $0x28] sm:$0x3] %vm479_vm1, %v3030_v1 }
  0x31   : > { %486 = vst.msk [vmem:[#allocation2 + $0x40] sm:$0x3] %vm479_vm1, %v3030_v1  ;;  %489 = vst.msk [vmem:[#allocation2 + $0x58] sm:$0x3] %vm479_vm1, %v3030_v1 }
  0x32   : > { %492 = vst.msk [vmem:[#allocation2 + $0x70] sm:$0x3] %vm479_vm1, %v3030_v1  ;;  %495 = vst.msk [vmem:[#allocation2 + $0x88] sm:$0x3] %vm479_vm1, %v3030_v1 }
  0x33   : > { %498 = vst.msk [vmem:[#allocation2 + $0xa0] sm:$0x3] %vm479_vm1, %v3030_v1  ;;  %501 = vst.msk [vmem:[#allocation2 + $0xb8] sm:$0x3] %vm479_vm1, %v3030_v1 }
  0x34   : > { %504 = vst.msk [vmem:[#allocation2 + $0xd0] sm:$0x3] %vm479_vm1, %v3030_v1  ;;  %507 = vst.msk [vmem:[#allocation2 + $0xe8] sm:$0x3] %vm479_vm1, %v3030_v1 }
  0x35   : > { %510 = vst.msk [vmem:[#allocation2 + $0x100] sm:$0x3] %vm479_vm1, %v3030_v1  ;;  %513 = vst.msk [vmem:[#allocation2 + $0x118] sm:$0x3] %vm479_vm1, %v3030_v1 }
  0x36   : > { %516 = vst.msk [vmem:[#allocation2 + $0x130] sm:$0x3] %vm479_vm1, %v3030_v1  ;;  %519 = vst.msk [vmem:[#allocation2 + $0x148] sm:$0x3] %vm479_vm1, %v3030_v1 }
  0x37   : > { %522 = vst.msk [vmem:[#allocation2 + $0x160] sm:$0x3] %vm479_vm1, %v3030_v1  ;;  %525 = vst.msk [vmem:[#allocation2 + $0x178] sm:$0x3] %vm479_vm1, %v3030_v1  ;;  %v662_v30 = vld [vmem:[#allocation2 + $0x9] sm:$0xff] }
  0x38   : > { %528 = vst.msk [vmem:[#allocation2 + $0x190] sm:$0x3] %vm479_vm1, %v3030_v1  ;;  %531 = vst.msk [vmem:[#allocation2 + $0x1a8] sm:$0x3] %vm479_vm1, %v3030_v1  ;;  %727 = vrot.lane.b32.xlu0 %v662_v30, %s3031_s16  ;;  %v314_v1 = vld [vmem:[%s3257_s15 + $0x78] sm:$0xff]  ;;  %v454_v30 = vmax.f32 %v390_v8, %v422_v21 }
  0x39   : > { %533 = vst.msk [vmem:[#allocation2 + $0x19] sm:$0xff] %vm476_vm0, %v444_v49  ;;  %534 = vst.msk [vmem:[#allocation2 + $0x21] sm:$0xff] %vm476_vm0, %v445_v50  ;;  %v357_v14 = vmul.f32 %v3260_v12, %v314_v1  ;;  %v360_v50 = vmul.f32 %v3260_v12, %v317_v24  ;;  %v401_v1 = vadd.f32 %v3268_v20, %v363_v55  ;;  %v327_v24 = vld [vmem:[%s3257_s15 + $0xe0] sm:$0xff] }
  0x3a   : > { %535 = vst.msk [vmem:[#allocation2 + $0x31] sm:$0xff] %vm476_vm0, %v446_v51  ;;  %536 = vst.msk [vmem:[#allocation2 + $0x39] sm:$0xff] %vm476_vm0, %v447_v56  ;;  %v361_v51 = vmul.f32 %v3260_v12, %v318_v33  ;;  %v364_v56 = vmul.f32 %v3260_v12, %v321_v42  ;;  %v367_v33 = vmul.f32 %v3260_v12, %v324_v3 }
  0x3b   : > { %537 = vst.msk [vmem:[#allocation2 + $0x49] sm:$0xff] %vm476_vm0, %v448_v57  ;;  %538 = vst.msk [vmem:[#allocation2 + $0x51] sm:$0xff] %vm476_vm0, %v449_v58  ;;  %v395_v28 = vadd.f32 %v3268_v20, %v357_v14  ;;  %v323_v57 = vld [vmem:[%s3257_s15 + $0xc0] sm:$0xff]  ;;  %v398_v58 = vadd.f32 %v3268_v20, %v360_v50  ;;  %v461_v14 = vmax.f32 %v397_v54, %v429_v0 }
  0x3c   : > { %539 = vst.msk [vmem:[#allocation2 + $0x61] sm:$0xff] %vm476_vm0, %v450_v61  ;;  %540 = vst.msk [vmem:[#allocation2 + $0x69] sm:$0xff] %vm476_vm0, %v451_v2  ;;  %v399_v59 = vadd.f32 %v3268_v20, %v361_v51  ;;  %v365_v61 = vmul.f32 %v3260_v12, %v322_v46  ;;  %v402_v2 = vadd.f32 %v3268_v20, %v364_v56 }
  0x3d   : > { %629 = vst.msk [vmem:[#allocation3] sm:$0xff] %vm476_vm0, %v597_v16  ;;  %630 = vst.msk [vmem:[#allocation3 + $0x8] sm:$0xff] %vm476_vm0, %v598_v17  ;;  %v427_v41 = vmul.f32 0.3, %v395_v28  ;;  %v430_v8 = vmul.f32 0.3, %v398_v58  ;;  %v366_v11 = vmul.f32 %v3260_v12, %v323_v57  ;;  %v407_v42 = vadd.f32 %v3268_v20, %v369_v35 }
  0x3e   : > { %541 = vst.msk [vmem:[#allocation2 + $0x79] sm:$0xff] %vm476_vm0, %v452_v18  ;;  %542 = vst.msk [vmem:[#allocation2 + $0x81] sm:$0xff] %vm476_vm0, %v453_v29  ;;  %v431_v9 = vmul.f32 0.3, %v399_v59  ;;  %v403_v10 = vadd.f32 %v3268_v20, %v365_v61  ;;  %v433_v16 = vmul.f32 0.3, %v401_v1 }
  0x3f   : > { %543 = vst.msk [vmem:[#allocation2 + $0x91] sm:$0xff] %vm476_vm0, %v454_v30  ;;  %544 = vst.msk [vmem:[#allocation2 + $0x99] sm:$0xff] %vm476_vm0, %v455_v38  ;;  %v459_v49 = vmax.f32 %v395_v28, %v427_v41  ;;  %v434_v17 = vmul.f32 0.3, %v402_v2  ;;  %v462_v18 = vmax.f32 %v398_v58, %v430_v8  ;;  %v404_v22 = vadd.f32 %v3268_v20, %v366_v11 }
  0x40   : > { %v663_v36 = vld [vmem:[#allocation2 + $0x19] sm:$0xff]  ;;  %v664_v47 = vld [vmem:[#allocation2 + $0x21] sm:$0xff]  ;;  %545 = vst.msk [vmem:[#allocation2 + $0xa9] sm:$0xff] %vm476_vm0, %v456_v39  ;;  %546 = vst.msk [vmem:[#allocation2 + $0xb1] sm:$0xff] %vm476_vm0, %v457_v40  ;;  %v463_v19 = vmax.f32 %v399_v59, %v431_v9  ;;  %v435_v21 = vmul.f32 0.3, %v403_v10  ;;  %v465_v27 = vmax.f32 %v401_v1, %v433_v16  ;;  %v405_v40 = vadd.f32 %v3268_v20, %v367_v33 }
  0x41   : > { %v665_v37 = vld [vmem:[#allocation2 + $0x31] sm:$0xff]  ;;  %729 = vrot.lane.b32.xlu1 %v663_v36, %s3031_s16  ;;  %547 = vst.msk [vmem:[#allocation2 + $0xc1] sm:$0xff] %vm476_vm0, %v458_v43  ;;  %548 = vst.msk [vmem:[#allocation2 + $0xc9] sm:$0xff] %vm476_vm0, %v459_v49  ;;  %v3358_v62 = vld [vmem:[#allocation2 + $0x39] sm:$0xff]  ;;  %v466_v28 = vmax.f32 %v402_v2, %v434_v17  ;;  %v436_v32 = vmul.f32 0.3, %v404_v22  ;;  %v370_v36 = vmul.f32 %v3260_v12, %v327_v24 }
  0x42   : > { %733 = vrot.lane.b32.xlu0 %v665_v37, %s3031_s16  ;;  %v3339_v48 = vld [vmem:[#allocation2 + $0x49] sm:$0xff]  ;;  %v3366_v5 = vld [vmem:[#allocation2 + $0x18] sm:$0xff]  ;;  %v3368_v6 = vld [vmem:[#allocation2 + $0x20] sm:$0xff]  ;;  %549 = vst.msk [vmem:[#allocation2 + $0xd9] sm:$0xff] %vm476_vm0, %v460_v63  ;;  %v467_v31 = vmax.f32 %v403_v10, %v435_v21  ;;  %v371_v37 = vmul.f32 %v3260_v12, %v328_v25  ;;  %v406_v41 = vadd.f32 %v3268_v20, %v368_v34  ;;  %v437_v50 = vmul.f32 0.3, %v405_v40 }
  0x43   : > { %v3370_v7 = vld [vmem:[#allocation2 + $0x61] sm:$0xff]  ;;  %631 = vst.msk [vmem:[#allocation3 + $0x10] sm:$0xff] %vm476_vm0, %v3366_v5  ;;  %632 = vst.msk [vmem:[#allocation3 + $0x18] sm:$0xff] %vm476_vm0, %v3368_v6  ;;  %v3378_v13 = vld [vmem:[#allocation2 + $0x30] sm:$0xff]  ;;  %v468_v39 = vmax.f32 %v404_v22, %v436_v32  ;;  %v408_v43 = vadd.f32 %v3268_v20, %v370_v36  ;;  %v439_v53 = vmul.f32 0.3, %v407_v42 }
  0x44   : > { %633 = vst.msk [vmem:[#allocation3 + $0x20] sm:$0xff] %vm476_vm0, %v3378_v13  ;;  %550 = vst.msk [vmem:[#allocation2 + $0xe1] sm:$0xff] %vm476_vm0, %v461_v14  ;;  %v3392_v29 = vld [vmem:[#allocation2 + $0x51] sm:$0xff]  ;;  %v3406_v38 = vld [vmem:[#allocation2 + $0x69] sm:$0xff]  ;;  %v409_v44 = vadd.f32 %v3268_v20, %v371_v37  ;;  %v438_v51 = vmul.f32 0.3, %v406_v41  ;;  %v469_v56 = vmax.f32 %v405_v40, %v437_v50 }
  0x45   : > { %731 = vrot.lane.b32.xlu1 %v664_v47, %s3031_s16  ;;  %v3394_v30 = vld [vmem:[#allocation2 + $0x79] sm:$0xff]  ;;  %551 = vst.msk [vmem:[#allocation2 + $0xf1] sm:$0xff] %vm476_vm0, %v462_v18  ;;  %552 = vst.msk [vmem:[#allocation2 + $0xf9] sm:$0xff] %vm476_vm0, %v463_v19  ;;  %v3420_v46 = vld [vmem:[#allocation2 + $0x48] sm:$0xff]  ;;  %v440_v54 = vmul.f32 0.3, %v408_v43  ;;  %v471_v58 = vmax.f32 %v407_v42, %v439_v53 }
  0x46   : > { %737 = vrot.lane.b32.xlu0 %v3339_v48, %s3031_s16  ;;  %553 = vst.msk [vmem:[#allocation2 + $0x109] sm:$0xff] %vm476_vm0, %v464_v26  ;;  %554 = vst.msk [vmem:[#allocation2 + $0x111] sm:$0xff] %vm476_vm0, %v465_v27  ;;  %v3418_v45 = vld [vmem:[#allocation2 + $0x38] sm:$0xff]  ;;  %v3422_v47 = vld [vmem:[#allocation2 + $0x50] sm:$0xff]  ;;  %v441_v55 = vmul.f32 0.3, %v409_v44  ;;  %v470_v57 = vmax.f32 %v406_v41, %v438_v51 }
  0x47   : > { %555 = vst.msk [vmem:[#allocation2 + $0x121] sm:$0xff] %vm476_vm0, %v466_v28  ;;  %556 = vst.msk [vmem:[#allocation2 + $0x129] sm:$0xff] %vm476_vm0, %v467_v31  ;;  %v3424_v49 = vld [vmem:[#allocation2 + $0x91] sm:$0xff]  ;;  %v3433_v52 = vld [vmem:[#allocation2 + $0x60] sm:$0xff]  ;;  %v472_v59 = vmax.f32 %v408_v43, %v440_v54 }
  0x48   : > { %557 = vst.msk [vmem:[#allocation2 + $0x139] sm:$0xff] %vm476_vm0, %v468_v39  ;;  %634 = vst.msk [vmem:[#allocation3 + $0x28] sm:$0xff] %vm476_vm0, %v3418_v45  ;;  %v473_v60 = vmax.f32 %v409_v44, %v441_v55  ;;  %v3441_v61 = vld [vmem:[#allocation2 + $0x81] sm:$0xff]  ;;  %v3443_v63 = vld [vmem:[#allocation2 + $0xa9] sm:$0xff] }
  0x49   : > { %735 = vrot.lane.b32.xlu1 %v3358_v62, %s3031_s16  ;;  %635 = vst.msk [vmem:[#allocation3 + $0x30] sm:$0xff] %vm476_vm0, %v3420_v46  ;;  %636 = vst.msk [vmem:[#allocation3 + $0x38] sm:$0xff] %vm476_vm0, %v3422_v47  ;;  %v3450_v0 = vld [vmem:[#allocation2 + $0x99] sm:$0xff]  ;;  %v3456_v1 = vld [vmem:[#allocation2 + $0xc1] sm:$0xff] }
  0x4a   : > { %741 = vrot.lane.b32.xlu0 %v3370_v7, %s3031_s16  ;;  %637 = vst.msk [vmem:[#allocation3 + $0x40] sm:$0xff] %vm476_vm0, %v3433_v52  ;;  %558 = vst.msk [vmem:[#allocation2 + $0x141] sm:$0xff] %vm476_vm0, %v469_v56  ;;  %v3458_v2 = vld [vmem:[#allocation2 + $0x68] sm:$0xff]  ;;  %v3460_v3 = vld [vmem:[#allocation2 + $0x78] sm:$0xff] }
  0x4b   : > { %559 = vst.msk [vmem:[#allocation2 + $0x151] sm:$0xff] %vm476_vm0, %v470_v57  ;;  %560 = vst.msk [vmem:[#allocation2 + $0x159] sm:$0xff] %vm476_vm0, %v471_v58  ;;  %v3466_v4 = vld [vmem:[#allocation2 + $0x80] sm:$0xff]  ;;  %v3468_v8 = vld [vmem:[#allocation2 + $0x90] sm:$0xff] }
  0x4c   : > { %561 = vst.msk [vmem:[#allocation2 + $0x169] sm:$0xff] %vm476_vm0, %v472_v59  ;;  %562 = vst.msk [vmem:[#allocation2 + $0x171] sm:$0xff] %vm476_vm0, %v473_v60  ;;  %v3470_v9 = vld [vmem:[#allocation2 + $0x98] sm:$0xff]  ;;  %v3478_v10 = vld [vmem:[#allocation2 + $0xa8] sm:$0xff] }
  0x4d   : > { %739 = vrot.lane.b32.xlu1 %v3392_v29, %s3031_s16  ;;  %638 = vst.msk [vmem:[#allocation3 + $0x48] sm:$0xff] %vm476_vm0, %v3458_v2  ;;  %639 = vst.msk [vmem:[#allocation3 + $0x50] sm:$0xff] %vm476_vm0, %v3460_v3  ;;  %v3480_v11 = vld [vmem:[#allocation2 + $0xb0] sm:$0xff]  ;;  %v3482_v14 = vld [vmem:[#allocation2 + $0xc0] sm:$0xff] }
  0x4e   : > { %745 = vrot.lane.b32.xlu0 %v3394_v30, %s3031_s16  ;;  %640 = vst.msk [vmem:[#allocation3 + $0x58] sm:$0xff] %vm476_vm0, %v3466_v4  ;;  %641 = vst.msk [vmem:[#allocation3 + $0x60] sm:$0xff] %vm476_vm0, %v3468_v8  ;;  %v3490_v15 = vld [vmem:[#allocation2 + $0xc8] sm:$0xff]  ;;  %v3492_v16 = vld [vmem:[#allocation2 + $0xd8] sm:$0xff] }
  0x4f   : > { %642 = vst.msk [vmem:[#allocation3 + $0x68] sm:$0xff] %vm476_vm0, %v3470_v9  ;;  %643 = vst.msk [vmem:[#allocation3 + $0x70] sm:$0xff] %vm476_vm0, %v3478_v10  ;;  %v3494_v17 = vld [vmem:[#allocation2 + $0xe0] sm:$0xff]  ;;  %v3506_v18 = vld [vmem:[#allocation2 + $0xb1] sm:$0xff] }
  0x50   : > { %644 = vst.msk [vmem:[#allocation3 + $0x78] sm:$0xff] %vm476_vm0, %v3480_v11  ;;  %645 = vst.msk [vmem:[#allocation3 + $0x80] sm:$0xff] %vm476_vm0, %v3482_v14  ;;  %v3508_v19 = vld [vmem:[#allocation2 + $0xd9] sm:$0xff]  ;;  %v3510_v21 = vld [vmem:[#allocation2 + $0xf0] sm:$0xff] }
  0x51   : > { %743 = vrot.lane.b32.xlu1 %v3406_v38, %s3031_s16  ;;  %646 = vst.msk [vmem:[#allocation3 + $0x88] sm:$0xff] %vm476_vm0, %v3490_v15  ;;  %647 = vst.msk [vmem:[#allocation3 + $0x90] sm:$0xff] %vm476_vm0, %v3492_v16  ;;  %v3518_v22 = vld [vmem:[#allocation2 + $0xf8] sm:$0xff]  ;;  %v3520_v23 = vld [vmem:[#allocation2 + $0x108] sm:$0xff] }
  0x52   : > { %749 = vrot.lane.b32.xlu0 %v3424_v49, %s3031_s16  ;;  %648 = vst.msk [vmem:[#allocation3 + $0x98] sm:$0xff] %vm476_vm0, %v3494_v17  ;;  %649 = vst.msk [vmem:[#allocation3 + $0xa0] sm:$0xff] %vm476_vm0, %v3510_v21  ;;  %v3522_v24 = vld [vmem:[#allocation2 + $0x110] sm:$0xff]  ;;  %v3538_v27 = vld [vmem:[#allocation2 + $0x120] sm:$0xff] }
  0x53   : > { %v3524_v25 = vld [vmem:[#allocation2 + $0xc9] sm:$0xff]  ;;  %v3526_v26 = vld [vmem:[#allocation2 + $0xf1] sm:$0xff]  ;;  %650 = vst.msk [vmem:[#allocation3 + $0xa8] sm:$0xff] %vm476_vm0, %v3518_v22  ;;  %651 = vst.msk [vmem:[#allocation3 + $0xb0] sm:$0xff] %vm476_vm0, %v3520_v23 }
  0x54   : > { %652 = vst.msk [vmem:[#allocation3 + $0xb8] sm:$0xff] %vm476_vm0, %v3522_v24  ;;  %v3540_v28 = vld [vmem:[#allocation2 + $0x128] sm:$0xff]  ;;  %653 = vst.msk [vmem:[#allocation3 + $0xc0] sm:$0xff] %vm476_vm0, %v3538_v27  ;;  %v3554_v33 = vld [vmem:[#allocation2 + $0x138] sm:$0xff] }
  0x55   : > { %747 = vrot.lane.b32.xlu1 %v3441_v61, %s3031_s16  ;;  %v3542_v31 = vld [vmem:[#allocation2 + $0xe1] sm:$0xff]  ;;  %v3544_v32 = vld [vmem:[#allocation2 + $0x109] sm:$0xff]  ;;  %654 = vst.msk [vmem:[#allocation3 + $0xc8] sm:$0xff] %vm476_vm0, %v3540_v28  ;;  %v3558_v35 = vld [vmem:[#allocation2 + $0xf9] sm:$0xff] }
  0x56   : > { %753 = vrot.lane.b32.xlu0 %v3443_v63, %s3031_s16  ;;  %v3556_v34 = vld [vmem:[#allocation2 + $0x140] sm:$0xff]  ;;  %655 = vst.msk [vmem:[#allocation3 + $0xd0] sm:$0xff] %vm476_vm0, %v3554_v33  ;;  %v3570_v37 = vld [vmem:[#allocation2 + $0x150] sm:$0xff]  ;;  %v3572_v39 = vld [vmem:[#allocation2 + $0x158] sm:$0xff] }
  0x57   : > { %v3560_v36 = vld [vmem:[#allocation2 + $0x121] sm:$0xff]  ;;  %656 = vst.msk [vmem:[#allocation3 + $0xd8] sm:$0xff] %vm476_vm0, %v3556_v34  ;;  %v3574_v40 = vld [vmem:[#allocation2 + $0x111] sm:$0xff]  ;;  %v3576_v41 = vld [vmem:[#allocation2 + $0x139] sm:$0xff] }
  0x58   : > { %657 = vst.msk [vmem:[#allocation3 + $0xe0] sm:$0xff] %vm476_vm0, %v3570_v37  ;;  %658 = vst.msk [vmem:[#allocation3 + $0xe8] sm:$0xff] %vm476_vm0, %v3572_v39  ;;  %v329_v42 = vld [vmem:[%s3257_s15 + $0xf0] sm:$0xff]  ;;  %v330_v44 = vld [vmem:[%s3257_s15 + $0xf8] sm:$0xff] }
  0x59   : > { %751 = vrot.lane.b32.xlu1 %v3450_v0, %s3031_s16  ;;  %v372_v43 = vmul.f32 %v3260_v12, %v329_v42  ;;  %v3589_v50 = vld [vmem:[#allocation2 + $0x168] sm:$0xff]  ;;  %v3591_v51 = vld [vmem:[#allocation2 + $0x170] sm:$0xff]  ;;  %v373_v53 = vmul.f32 %v3260_v12, %v330_v44 }
  0x5a   : > { %757 = vrot.lane.b32.xlu0 %v3456_v1, %s3031_s16  ;;  %v3594_v54 = vld [vmem:[#allocation2 + $0x129] sm:$0xff]  ;;  %v3596_v55 = vld [vmem:[#allocation2 + $0x151] sm:$0xff]  ;;  %659 = vst.msk [vmem:[#allocation3 + $0xf0] sm:$0xff] %vm476_vm0, %v3589_v50  ;;  %660 = vst.msk [vmem:[#allocation3 + $0xf8] sm:$0xff] %vm476_vm0, %v3591_v51 }
  0x5b   : > { %v410_v56 = vadd.f32 %v3268_v20, %v372_v43  ;;  %v411_v57 = vadd.f32 %v3268_v20, %v373_v53  ;;  %v3608_v59 = vld [vmem:[#allocation2 + $0x141] sm:$0xff]  ;;  %v3610_v60 = vld [vmem:[#allocation2 + $0x169] sm:$0xff]  ;;  %v3618_v20 = vld [vmem:[#allocation2 + $0x159] sm:$0xff] }
  0x5c   : > { %4506 = vst [vmem:[#allocation4_spill] sm:$0xff] %v3610_v60  ;;  %4507 = vst [vmem:[#allocation5_spill] sm:$0xff] %v3618_v20  ;;  %v854_v43 = vld [vmem:[#allocation2 + $0x2] sm:$0xff]  ;;  %v3623_v53 = vld [vmem:[#allocation2 + $0x171] sm:$0xff] }
  0x5d   : > { %755 = vrot.lane.b32.xlu1 %v3506_v18, %s3031_s16  ;;  %v442_v58 = vmul.f32 0.3, %v410_v56  ;;  %v443_v12 = vmul.f32 0.3, %v411_v57  ;;  %4508 = vst [vmem:[#allocation6_spill] sm:$0xff] %v3623_v53 }
  0x5e   : > { %761 = vrot.lane.b32.xlu0 %v3508_v19, %s3031_s16 }
  0x5f   : > { %v474_v42 = vmax.f32 %v410_v56, %v442_v58  ;;  %v475_v44 = vmax.f32 %v411_v57, %v443_v12  ;;  %v3625_v56 = vld [vmem:[#allocation2 + $0x1a] sm:$0xff]  ;;  %v855_v57 = vld [vmem:[#allocation2 + $0xa] sm:$0xff]  ;;  %v3631_v58 = vld [vmem:[#allocation2 + $0x32] sm:$0xff] }
  0x60   : > { %4509 = vst [vmem:[#allocation7_spill] sm:$0xff] %v3625_v56  ;;  %4510 = vst [vmem:[#allocation8_spill] sm:$0xff] %v3631_v58  ;;  %v3636_v12 = vld [vmem:[#allocation2 + $0x22] sm:$0xff] }
  0x61   : > { %759 = vrot.lane.b32.xlu1 %v3524_v25, %s3031_s16  ;;  %563 = vst.msk [vmem:[#allocation2 + $0x181] sm:$0xff] %vm476_vm0, %v474_v42  ;;  %564 = vst.msk [vmem:[#allocation2 + $0x189] sm:$0xff] %vm476_vm0, %v475_v44  ;;  %v860_v42 = vld [vmem:[#allocation2 + $0x4a] sm:$0xff]  ;;  %v3641_v44 = vld [vmem:[#allocation2 + $0x3a] sm:$0xff] }
  0x62   : > { %765 = vrot.lane.b32.xlu0 %v3526_v26, %s3031_s16  ;;  %4511 = vst [vmem:[#allocation9_spill] sm:$0xff] %v3636_v12  ;;  %4512 = vst [vmem:[#allocation10_spill] sm:$0xff] %v3641_v44 }
  0x65   : > { %763 = vrot.lane.b32.xlu1 %v3542_v31, %s3031_s16 }
  0x66   : > { %769 = vrot.lane.b32.xlu0 %v3544_v32, %s3031_s16 }
  0x69   : > { %767 = vrot.lane.b32.xlu1 %v3558_v35, %s3031_s16 }
  0x6a   : > { %773 = vrot.lane.b32.xlu0 %v3560_v36, %s3031_s16 }
  0x6d   : > { %771 = vrot.lane.b32.xlu1 %v3574_v40, %s3031_s16 }
  0x6e   : > { %777 = vrot.lane.b32.xlu0 %v3576_v41, %s3031_s16 }
  0x71   : > { %775 = vrot.lane.b32.xlu1 %v3594_v54, %s3031_s16 }
  0x72   : > { %781 = vrot.lane.b32.xlu0 %v3596_v55, %s3031_s16 }
  0x75   : > { %779 = vrot.lane.b32.xlu1 %v3608_v59, %s3031_s16 }
  0x76   : > { %785 = vrot.lane.b32.xlu0 %v3610_v60, %s3031_s16 }
  0x79   : > { %783 = vrot.lane.b32.xlu1 %v3618_v20, %s3031_s16  ;;  %v884_v20 = vld [vmem:[#allocation2 + $0x16a] sm:$0xff] }
  0x7a   : > { %918 = vrot.lane.b32.xlu0 %v854_v43, %s3032_s17  ;;  %v862_v43 = vld [vmem:[#allocation2 + $0x62] sm:$0xff] }
  0x7d   : > { %787 = vrot.lane.b32.xlu1 %v3623_v53, %s3031_s16  ;;  %v866_v53 = vld [vmem:[#allocation2 + $0x92] sm:$0xff] }
  0x7e   : > { %922 = vrot.lane.b32.xlu0 %v3625_v56, %s3032_s17  ;;  %v864_v56 = vld [vmem:[#allocation2 + $0x7a] sm:$0xff] }
  0x81   : > { %920 = vrot.lane.b32.xlu1 %v855_v57, %s3032_s17  ;;  %v861_v57 = vld [vmem:[#allocation2 + $0x52] sm:$0xff] }
  0x82   : > { %926 = vrot.lane.b32.xlu0 %v3631_v58, %s3032_s17  ;;  %v863_v58 = vld [vmem:[#allocation2 + $0x6a] sm:$0xff] }
  0x85   : > { %924 = vrot.lane.b32.xlu1 %v3636_v12, %s3032_s17  ;;  %v868_v12 = vld [vmem:[#allocation2 + $0xaa] sm:$0xff] }
  0x86   : > { %930 = vrot.lane.b32.xlu0 %v860_v42, %s3032_s17  ;;  %v865_v42 = vld [vmem:[#allocation2 + $0x82] sm:$0xff] }
  0x89   : > { %928 = vrot.lane.b32.xlu1 %v3641_v44, %s3032_s17  ;;  %v867_v44 = vld [vmem:[#allocation2 + $0x9a] sm:$0xff] }
  0x8a   : > { %934 = vrot.lane.b32.xlu0 %v862_v43, %s3032_s17  ;;  %v870_v43 = vld [vmem:[#allocation2 + $0xc2] sm:$0xff] }
  0x8d   : > { %932 = vrot.lane.b32.xlu1 %v861_v57, %s3032_s17  ;;  %v869_v57 = vld [vmem:[#allocation2 + $0xb2] sm:$0xff] }
  0x8e   : > { %938 = vrot.lane.b32.xlu0 %v864_v56, %s3032_s17  ;;  %v3654_v56 = vld [vmem:[#allocation2 + $0xda] sm:$0xff] }
  0x8f   : > { %4513 = vst [vmem:[#allocation11_spill] sm:$0xff] %v3654_v56 }
  0x91   : > { %936 = vrot.lane.b32.xlu1 %v863_v58, %s3032_s17  ;;  %v3659_v58 = vld [vmem:[#allocation2 + $0xf2] sm:$0xff] }
  0x92   : > { %942 = vrot.lane.b32.xlu0 %v866_v53, %s3032_s17  ;;  %v871_v53 = vld [vmem:[#allocation2 + $0xca] sm:$0xff]  ;;  %4514 = vst [vmem:[#allocation12_spill] sm:$0xff] %v3659_v58 }
  0x95   : > { %940 = vrot.lane.b32.xlu1 %v865_v42, %s3032_s17  ;;  %v726_v42 = vpop.permute.xlu0 %725 }
  0x96   : > { %946 = vrot.lane.b32.xlu0 %v868_v12, %s3032_s17  ;;  %v3664_v12 = vld [vmem:[#allocation2 + $0xe2] sm:$0xff]  ;;  %822 = vst.msk [vmem:[#allocation3] sm:$0xff] %vm821_vm2, %v726_v42 }
  0x97   : > { %4515 = vst [vmem:[#allocation13_spill] sm:$0xff] %v3664_v12  ;;  %v881_v42 = vld [vmem:[#allocation2 + $0x142] sm:$0xff] }
  0x99   : > { %944 = vrot.lane.b32.xlu1 %v867_v44, %s3032_s17  ;;  %v3666_v44 = vld [vmem:[#allocation2 + $0x10a] sm:$0xff] }
  0x9a   : > { %950 = vrot.lane.b32.xlu0 %v870_v43, %s3032_s17  ;;  %4516 = vst [vmem:[#allocation14_spill] sm:$0xff] %v3666_v44  ;;  %v3673_v43 = vld [vmem:[#allocation2 + $0xfa] sm:$0xff] }
  0x9b   : > { %4517 = vst [vmem:[#allocation15_spill] sm:$0xff] %v3673_v43 }
  0x9d   : > { %948 = vrot.lane.b32.xlu1 %v869_v57, %s3032_s17  ;;  %v878_v57 = vld [vmem:[#allocation2 + $0x122] sm:$0xff] }
  0x9e   : > { %954 = vrot.lane.b32.xlu0 %v3654_v56, %s3032_s17  ;;  %v880_v56 = vld [vmem:[#allocation2 + $0x13a] sm:$0xff] }
  0xa1   : > { %952 = vrot.lane.b32.xlu1 %v871_v53, %s3032_s17 }
  0xa2   : > { %958 = vrot.lane.b32.xlu0 %v3659_v58, %s3032_s17  ;;  %v877_v58 = vld [vmem:[#allocation2 + $0x112] sm:$0xff] }
  0xa5   : > { %956 = vrot.lane.b32.xlu1 %v3664_v12, %s3032_s17  ;;  %v882_v12 = vld [vmem:[#allocation2 + $0x152] sm:$0xff] }
  0xa6   : > { %962 = vrot.lane.b32.xlu0 %v3666_v44, %s3032_s17  ;;  %v879_v44 = vld [vmem:[#allocation2 + $0x12a] sm:$0xff] }
  0xa9   : > { %960 = vrot.lane.b32.xlu1 %v3673_v43, %s3032_s17 }
  0xaa   : > { %v728_v53 = vpop.permute.xlu0 %727  ;;  %966 = vrot.lane.b32.xlu0 %v878_v57, %s3032_s17 }
  0xab   : > { %823 = vst.msk [vmem:[#allocation3 + $0x8] sm:$0xff] %vm821_vm2, %v728_v53 }
  0xad   : > { %964 = vrot.lane.b32.xlu1 %v877_v58, %s3032_s17  ;;  %v883_v58 = vld [vmem:[#allocation2 + $0x15a] sm:$0xff] }
  0xae   : > { %970 = vrot.lane.b32.xlu0 %v880_v56, %s3032_s17 }
  0xb1   : > { %968 = vrot.lane.b32.xlu1 %v879_v44, %s3032_s17 }
  0xb2   : > { %974 = vrot.lane.b32.xlu0 %v882_v12, %s3032_s17 }
  0xb3   : > { %v730_v60 = vpop.permute.xlu1 %729 }
  0xb4   : > { %v734_v43 = vpop.permute.xlu0 %733  ;;  %824 = vst.msk [vmem:[#allocation3 + $0x10] sm:$0xff] %vm821_vm2, %v730_v60  ;;  %v885_v60 = vld [vmem:[#allocation2 + $0x172] sm:$0xff] }
  0xb5   : > { %826 = vst.msk [vmem:[#allocation3 + $0x20] sm:$0xff] %vm821_vm2, %v734_v43  ;;  %972 = vrot.lane.b32.xlu1 %v881_v42, %s3032_s17 }
  0xb6   : > { %978 = vrot.lane.b32.xlu0 %v884_v20, %s3032_s17 }
  0xb7   : > { %v732_v56 = vpop.permute.xlu1 %731 }
  0xb8   : > { %v738_v57 = vpop.permute.xlu0 %737  ;;  %825 = vst.msk [vmem:[#allocation3 + $0x18] sm:$0xff] %vm821_vm2, %v732_v56 }
  0xb9   : > { %828 = vst.msk [vmem:[#allocation3 + $0x30] sm:$0xff] %vm821_vm2, %v738_v57  ;;  %976 = vrot.lane.b32.xlu1 %v883_v58, %s3032_s17 }
  0xba   : > { %1111 = vrot.lane.b32.xlu0 %v3366_v5, %s3033_s18 }
  0xbb   : > { %v736_v12 = vpop.permute.xlu1 %735 }
  0xbc   : > { %v742_v44 = vpop.permute.xlu0 %741  ;;  %827 = vst.msk [vmem:[#allocation3 + $0x28] sm:$0xff] %vm821_vm2, %v736_v12 }
  0xbd   : > { %830 = vst.msk [vmem:[#allocation3 + $0x40] sm:$0xff] %vm821_vm2, %v742_v44  ;;  %980 = vrot.lane.b32.xlu1 %v885_v60, %s3032_s17 }
  0xbe   : > { %1115 = vrot.lane.b32.xlu0 %v3378_v13, %s3033_s18 }
  0xbf   : > { %v740_v20 = vpop.permute.xlu1 %739 }
  0xc0   : > { %v746_v43 = vpop.permute.xlu0 %745  ;;  %829 = vst.msk [vmem:[#allocation3 + $0x38] sm:$0xff] %vm821_vm2, %v740_v20 }
  0xc1   : > { %832 = vst.msk [vmem:[#allocation3 + $0x50] sm:$0xff] %vm821_vm2, %v746_v43  ;;  %1113 = vrot.lane.b32.xlu1 %v3368_v6, %s3033_s18 }
  0xc2   : > { %1119 = vrot.lane.b32.xlu0 %v3420_v46, %s3033_s18 }
  0xc3   : > { %v744_v5 = vpop.permute.xlu1 %743 }
  0xc4   : > { %v750_v53 = vpop.permute.xlu0 %749  ;;  %831 = vst.msk [vmem:[#allocation3 + $0x48] sm:$0xff] %vm821_vm2, %v744_v5 }
  0xc5   : > { %834 = vst.msk [vmem:[#allocation3 + $0x60] sm:$0xff] %vm821_vm2, %v750_v53  ;;  %1117 = vrot.lane.b32.xlu1 %v3418_v45, %s3033_s18 }
  0xc6   : > { %1123 = vrot.lane.b32.xlu0 %v3433_v52, %s3033_s18 }
  0xc7   : > { %v748_v42 = vpop.permute.xlu1 %747 }
  0xc8   : > { %v754_v58 = vpop.permute.xlu0 %753  ;;  %833 = vst.msk [vmem:[#allocation3 + $0x58] sm:$0xff] %vm821_vm2, %v748_v42  ;;  %v1077_v42 = vld [vmem:[#allocation2 + $0x180] sm:$0xff] }
  0xc9   : > { %836 = vst.msk [vmem:[#allocation3 + $0x70] sm:$0xff] %vm821_vm2, %v754_v58  ;;  %1121 = vrot.lane.b32.xlu1 %v3422_v47, %s3033_s18 }
  0xca   : > { %1127 = vrot.lane.b32.xlu0 %v3460_v3, %s3033_s18 }
  0xcb   : > { %v752_v6 = vpop.permute.xlu1 %751 }
  0xcc   : > { %v758_v56 = vpop.permute.xlu0 %757  ;;  %835 = vst.msk [vmem:[#allocation3 + $0x68] sm:$0xff] %vm821_vm2, %v752_v6 }
  0xcd   : > { %838 = vst.msk [vmem:[#allocation3 + $0x80] sm:$0xff] %vm821_vm2, %v758_v56  ;;  %1125 = vrot.lane.b32.xlu1 %v3458_v2, %s3033_s18 }
  0xce   : > { %1131 = vrot.lane.b32.xlu0 %v3468_v8, %s3033_s18 }
  0xcf   : > { %v756_v57 = vpop.permute.xlu1 %755 }
  0xd0   : > { %v762_v60 = vpop.permute.xlu0 %761  ;;  %837 = vst.msk [vmem:[#allocation3 + $0x78] sm:$0xff] %vm821_vm2, %v756_v57 }
  0xd1   : > { %840 = vst.msk [vmem:[#allocation3 + $0x90] sm:$0xff] %vm821_vm2, %v762_v60  ;;  %1129 = vrot.lane.b32.xlu1 %v3466_v4, %s3033_s18  ;;  %v3785_v60 = vld [vmem:[#allocation2 + $0x31] sm:$0xff] }
  0xd2   : > { %1135 = vrot.lane.b32.xlu0 %v3478_v10, %s3033_s18 }
  0xd3   : > { %v760_v3 = vpop.permute.xlu1 %759 }
  0xd4   : > { %v766_v12 = vpop.permute.xlu0 %765  ;;  %839 = vst.msk [vmem:[#allocation3 + $0x88] sm:$0xff] %vm821_vm2, %v760_v3 }
  0xd5   : > { %842 = vst.msk [vmem:[#allocation3 + $0xa0] sm:$0xff] %vm821_vm2, %v766_v12  ;;  %1133 = vrot.lane.b32.xlu1 %v3470_v9, %s3033_s18  ;;  %v1241_v12 = vld [vmem:[#allocation2 + $0x21] sm:$0xff] }
  0xd6   : > { %1139 = vrot.lane.b32.xlu0 %v3482_v14, %s3033_s18 }
  0xd7   : > { %v764_v8 = vpop.permute.xlu1 %763 }
  0xd8   : > { %v770_v44 = vpop.permute.xlu0 %769  ;;  %841 = vst.msk [vmem:[#allocation3 + $0x98] sm:$0xff] %vm821_vm2, %v764_v8 }
  0xd9   : > { %844 = vst.msk [vmem:[#allocation3 + $0xb0] sm:$0xff] %vm821_vm2, %v770_v44  ;;  %1137 = vrot.lane.b32.xlu1 %v3480_v11, %s3033_s18 }
  0xda   : > { %1143 = vrot.lane.b32.xlu0 %v3492_v16, %s3033_s18 }
  0xdb   : > { %v768_v4 = vpop.permute.xlu1 %767 }
  0xdc   : > { %v774_v10 = vpop.permute.xlu0 %773  ;;  %843 = vst.msk [vmem:[#allocation3 + $0xa8] sm:$0xff] %vm821_vm2, %v768_v4 }
  0xdd   : > { %846 = vst.msk [vmem:[#allocation3 + $0xc0] sm:$0xff] %vm821_vm2, %v774_v10  ;;  %1141 = vrot.lane.b32.xlu1 %v3490_v15, %s3033_s18 }
  0xde   : > { %1147 = vrot.lane.b32.xlu0 %v3510_v21, %s3033_s18 }
  0xdf   : > { %v772_v9 = vpop.permute.xlu1 %771 }
  0xe0   : > { %v778_v14 = vpop.permute.xlu0 %777  ;;  %845 = vst.msk [vmem:[#allocation3 + $0xb8] sm:$0xff] %vm821_vm2, %v772_v9 }
  0xe1   : > { %848 = vst.msk [vmem:[#allocation3 + $0xd0] sm:$0xff] %vm821_vm2, %v778_v14  ;;  %1145 = vrot.lane.b32.xlu1 %v3494_v17, %s3033_s18 }
  0xe2   : > { %1151 = vrot.lane.b32.xlu0 %v3520_v23, %s3033_s18 }
  0xe3   : > { %v776_v11 = vpop.permute.xlu1 %775 }
  0xe4   : > { %v782_v16 = vpop.permute.xlu0 %781  ;;  %847 = vst.msk [vmem:[#allocation3 + $0xc8] sm:$0xff] %vm821_vm2, %v776_v11 }
  0xe5   : > { %850 = vst.msk [vmem:[#allocation3 + $0xe0] sm:$0xff] %vm821_vm2, %v782_v16  ;;  %1149 = vrot.lane.b32.xlu1 %v3518_v22, %s3033_s18 }
  0xe6   : > { %1155 = vrot.lane.b32.xlu0 %v3538_v27, %s3033_s18 }
  0xe7   : > { %v780_v15 = vpop.permute.xlu1 %779 }
  0xe8   : > { %v786_v20 = vpop.permute.xlu0 %785  ;;  %849 = vst.msk [vmem:[#allocation3 + $0xd8] sm:$0xff] %vm821_vm2, %v780_v15 }
  0xe9   : > { %852 = vst.msk [vmem:[#allocation3 + $0xf0] sm:$0xff] %vm821_vm2, %v786_v20  ;;  %1153 = vrot.lane.b32.xlu1 %v3522_v24, %s3033_s18  ;;  %v4521_v20 = vld [vmem:[#allocation7_spill] sm:$0xff] }
  0xea   : > { %1159 = vrot.lane.b32.xlu0 %v3554_v33, %s3033_s18 }
  0xeb   : > { %v784_v17 = vpop.permute.xlu1 %783 }
  0xec   : > { %v919_v43 = vpop.permute.xlu0 %918  ;;  %851 = vst.msk [vmem:[#allocation3 + $0xe8] sm:$0xff] %vm821_vm2, %v784_v17  ;;  %v1271_v17 = vld [vmem:[#allocation2 + $0x189] sm:$0xff] }
  0xed   : > { %1015 = vst.msk [vmem:[#allocation3] sm:$0xff] %vm1014_vm3, %v919_v43  ;;  %1157 = vrot.lane.b32.xlu1 %v3540_v28, %s3033_s18 }
  0xee   : > { %1163 = vrot.lane.b32.xlu0 %v3570_v37, %s3033_s18  ;;  %v1240_v37 = vld [vmem:[#allocation2 + $0x19] sm:$0xff] }
  0xef   : > { %v788_v5 = vpop.permute.xlu1 %787 }
  0xf0   : > { %v923_v53 = vpop.permute.xlu0 %922  ;;  %853 = vst.msk [vmem:[#allocation3 + $0xf8] sm:$0xff] %vm821_vm2, %v788_v5 }
  0xf1   : > { %1017 = vst.msk [vmem:[#allocation3 + $0x10] sm:$0xff] %vm1014_vm3, %v923_v53  ;;  %1161 = vrot.lane.b32.xlu1 %v3556_v34, %s3033_s18  ;;  %v4522_v53 = vld [vmem:[#allocation8_spill] sm:$0xff] }
  0xf2   : > { %1167 = vrot.lane.b32.xlu0 %v3589_v50, %s3033_s18  ;;  %v1078_v50 = vld [vmem:[#allocation2 + $0x188] sm:$0xff] }
  0xf3   : > { %v921_v58 = vpop.permute.xlu1 %920 }
  0xf4   : > { %v927_v6 = vpop.permute.xlu0 %926  ;;  %1016 = vst.msk [vmem:[#allocation3 + $0x8] sm:$0xff] %vm1014_vm3, %v921_v58 }
  0xf5   : > { %1019 = vst.msk [vmem:[#allocation3 + $0x20] sm:$0xff] %vm1014_vm3, %v927_v6  ;;  %1165 = vrot.lane.b32.xlu1 %v3572_v39, %s3033_s18  ;;  %v4523_v6 = vld [vmem:[#allocation9_spill] sm:$0xff] }
  0xf6   : > { %1171 = vrot.lane.b32.xlu0 %v1077_v42, %s3033_s18 }
  0xf7   : > { %v925_v56 = vpop.permute.xlu1 %924 }
  0xf8   : > { %v931_v57 = vpop.permute.xlu0 %930  ;;  %1018 = vst.msk [vmem:[#allocation3 + $0x18] sm:$0xff] %vm1014_vm3, %v925_v56 }
  0xf9   : > { %1021 = vst.msk [vmem:[#allocation3 + $0x30] sm:$0xff] %vm1014_vm3, %v931_v57  ;;  %1169 = vrot.lane.b32.xlu1 %v3591_v51, %s3033_s18 }
  0xfa   : > { %1304 = vrot.lane.b32.xlu0 %v1240_v37, %s3034_s19  ;;  %v4524_v37 = vld [vmem:[#allocation13_spill] sm:$0xff] }
  0xfb   : > { %v929_v3 = vpop.permute.xlu1 %928 }
  0xfc   : > { %v935_v39 = vpop.permute.xlu0 %934  ;;  %1020 = vst.msk [vmem:[#allocation3 + $0x28] sm:$0xff] %vm1014_vm3, %v929_v3 }
  0xfd   : > { %1023 = vst.msk [vmem:[#allocation3 + $0x40] sm:$0xff] %vm1014_vm3, %v935_v39  ;;  %1173 = vrot.lane.b32.xlu1 %v1078_v50, %s3033_s18  ;;  %v4525_v50 = vld [vmem:[#allocation11_spill] sm:$0xff]  ;;  %s3038_s18 = smov 32  }
  0xfe   : > { %1308 = vrot.lane.b32.xlu0 %v3785_v60, %s3034_s19 }
  0xff   : > { %v933_v8 = vpop.permute.xlu1 %932 }
 0x100   : > { %v939_v51 = vpop.permute.xlu0 %938  ;;  %1022 = vst.msk [vmem:[#allocation3 + $0x38] sm:$0xff] %vm1014_vm3, %v933_v8  ;;  %v2432_v8 = vld [vmem:[%s4484_s3 + $0x8] sm:$0xff] }
 0x101   : > { %1025 = vst.msk [vmem:[#allocation3 + $0x50] sm:$0xff] %vm1014_vm3, %v939_v51  ;;  %1306 = vrot.lane.b32.xlu1 %v1241_v12, %s3034_s19  ;;  %v2431_v12 = vld [vmem:[%s4484_s3] sm:$0xff]  ;;  %v1836_v51 = vld [vmem:[#allocation2 + $0xf1] sm:$0xff] }
 0x102   : > { %1312 = vrot.lane.b32.xlu0 %v3339_v48, %s3034_s19 }
 0x103   : > { %v937_v44 = vpop.permute.xlu1 %936 }
 0x104   : > { %v943_v4 = vpop.permute.xlu0 %942  ;;  %1024 = vst.msk [vmem:[#allocation3 + $0x48] sm:$0xff] %vm1014_vm3, %v937_v44 }
 0x105   : > { %1027 = vst.msk [vmem:[#allocation3 + $0x60] sm:$0xff] %vm1014_vm3, %v943_v4  ;;  %1310 = vrot.lane.b32.xlu1 %v3358_v62, %s3034_s19 }
 0x106   : > { %1316 = vrot.lane.b32.xlu0 %v3370_v7, %s3034_s19 }
 0x107   : > { %v941_v10 = vpop.permute.xlu1 %940 }
 0x108   : > { %v947_v9 = vpop.permute.xlu0 %946  ;;  %1026 = vst.msk [vmem:[#allocation3 + $0x58] sm:$0xff] %vm1014_vm3, %v941_v10  ;;  %v2433_v10 = vld [vmem:[%s4484_s3 + $0x10] sm:$0xff] }
 0x109   : > { %1029 = vst.msk [vmem:[#allocation3 + $0x70] sm:$0xff] %vm1014_vm3, %v947_v9  ;;  %1314 = vrot.lane.b32.xlu1 %v3392_v29, %s3034_s19  ;;  %v1837_v9 = vld [vmem:[#allocation2 + $0xf9] sm:$0xff] }
 0x10a   : > { %1320 = vrot.lane.b32.xlu0 %v3394_v30, %s3034_s19 }
 0x10b   : > { %v945_v48 = vpop.permute.xlu1 %944 }
 0x10c   : > { %v951_v14 = vpop.permute.xlu0 %950  ;;  %1028 = vst.msk [vmem:[#allocation3 + $0x68] sm:$0xff] %vm1014_vm3, %v945_v48 }
 0x10d   : > { %1031 = vst.msk [vmem:[#allocation3 + $0x80] sm:$0xff] %vm1014_vm3, %v951_v14  ;;  %1318 = vrot.lane.b32.xlu1 %v3406_v38, %s3034_s19 }
 0x10e   : > { %1324 = vrot.lane.b32.xlu0 %v3424_v49, %s3034_s19 }
 0x10f   : > { %v949_v62 = vpop.permute.xlu1 %948 }
 0x110   : > { %v955_v7 = vpop.permute.xlu0 %954  ;;  %1030 = vst.msk [vmem:[#allocation3 + $0x78] sm:$0xff] %vm1014_vm3, %v949_v62  ;;  %v2435_v62 = vld [vmem:[%s4484_s3 + $0x20] sm:$0xff] }
 0x111   : > { %1033 = vst.msk [vmem:[#allocation3 + $0x90] sm:$0xff] %vm1014_vm3, %v955_v7  ;;  %1322 = vrot.lane.b32.xlu1 %v3441_v61, %s3034_s19 }
 0x112   : > { %1328 = vrot.lane.b32.xlu0 %v3443_v63, %s3034_s19 }
 0x113   : > { %v953_v29 = vpop.permute.xlu1 %952 }
 0x114   : > { %v959_v30 = vpop.permute.xlu0 %958  ;;  %1032 = vst.msk [vmem:[#allocation3 + $0x88] sm:$0xff] %vm1014_vm3, %v953_v29  ;;  %v1821_v29 = vld [vmem:[#allocation2 + $0x39] sm:$0xff] }
 0x115   : > { %1035 = vst.msk [vmem:[#allocation3 + $0xa0] sm:$0xff] %vm1014_vm3, %v959_v30  ;;  %1326 = vrot.lane.b32.xlu1 %v3450_v0, %s3034_s19 }
 0x116   : > { %1332 = vrot.lane.b32.xlu0 %v3456_v1, %s3034_s19 }
 0x117   : > { %v957_v38 = vpop.permute.xlu1 %956 }
 0x118   : > { %v963_v49 = vpop.permute.xlu0 %962  ;;  %1034 = vst.msk [vmem:[#allocation3 + $0x98] sm:$0xff] %vm1014_vm3, %v957_v38 }
 0x119   : > { %1037 = vst.msk [vmem:[#allocation3 + $0xb0] sm:$0xff] %vm1014_vm3, %v963_v49  ;;  %1330 = vrot.lane.b32.xlu1 %v3506_v18, %s3034_s19  ;;  %v2437_v49 = vld [vmem:[%s4484_s3 + $0x30] sm:$0xff] }
 0x11a   : > { %1336 = vrot.lane.b32.xlu0 %v3508_v19, %s3034_s19 }
 0x11b   : > { %v961_v61 = vpop.permute.xlu1 %960 }
 0x11c   : > { %v967_v63 = vpop.permute.xlu0 %966  ;;  %1036 = vst.msk [vmem:[#allocation3 + $0xa8] sm:$0xff] %vm1014_vm3, %v961_v61  ;;  %v4526_v61 = vld [vmem:[#allocation12_spill] sm:$0xff] }
 0x11d   : > { %1039 = vst.msk [vmem:[#allocation3 + $0xc0] sm:$0xff] %vm1014_vm3, %v967_v63  ;;  %1334 = vrot.lane.b32.xlu1 %v3524_v25, %s3034_s19 }
 0x11e   : > { %1340 = vrot.lane.b32.xlu0 %v3526_v26, %s3034_s19 }
 0x11f   : > { %v965_v0 = vpop.permute.xlu1 %964 }
 0x120   : > { %v971_v1 = vpop.permute.xlu0 %970  ;;  %1038 = vst.msk [vmem:[#allocation3 + $0xb8] sm:$0xff] %vm1014_vm3, %v965_v0 }
 0x121   : > { %1041 = vst.msk [vmem:[#allocation3 + $0xd0] sm:$0xff] %vm1014_vm3, %v971_v1  ;;  %1338 = vrot.lane.b32.xlu1 %v3542_v31, %s3034_s19 }
 0x122   : > { %1344 = vrot.lane.b32.xlu0 %v3544_v32, %s3034_s19 }
 0x123   : > { %v969_v18 = vpop.permute.xlu1 %968 }
 0x124   : > { %v975_v19 = vpop.permute.xlu0 %974  ;;  %1040 = vst.msk [vmem:[#allocation3 + $0xc8] sm:$0xff] %vm1014_vm3, %v969_v18  ;;  %v2439_v18 = vld [vmem:[%s4484_s3 + $0x40] sm:$0xff] }
 0x125   : > { %1043 = vst.msk [vmem:[#allocation3 + $0xe0] sm:$0xff] %vm1014_vm3, %v975_v19  ;;  %1342 = vrot.lane.b32.xlu1 %v3558_v35, %s3034_s19  ;;  %v2440_v19 = vld [vmem:[%s4484_s3 + $0x48] sm:$0xff] }
 0x126   : > { %1348 = vrot.lane.b32.xlu0 %v3560_v36, %s3034_s19 }
 0x127   : > { %v973_v25 = vpop.permute.xlu1 %972 }
 0x128   : > { %v979_v26 = vpop.permute.xlu0 %978  ;;  %1042 = vst.msk [vmem:[#allocation3 + $0xd8] sm:$0xff] %vm1014_vm3, %v973_v25  ;;  %v4527_v25 = vld [vmem:[#allocation10_spill] sm:$0xff] }
 0x129   : > { %1045 = vst.msk [vmem:[#allocation3 + $0xf0] sm:$0xff] %vm1014_vm3, %v979_v26  ;;  %1346 = vrot.lane.b32.xlu1 %v3574_v40, %s3034_s19  ;;  %v4518_v40 = vld [vmem:[#allocation4_spill] sm:$0xff]  ;;  %v2972_v26 = vpack.c.bf16 %v2440_v19, %v2439_v18 }
 0x12a   : > { %1352 = vrot.lane.b32.xlu0 %v3576_v41, %s3034_s19  ;;  %v1270_v41 = vld [vmem:[#allocation2 + $0x181] sm:$0xff] }
 0x12b   : > { %v977_v31 = vpop.permute.xlu1 %976 }
 0x12c   : > { %v1112_v32 = vpop.permute.xlu0 %1111  ;;  %1044 = vst.msk [vmem:[#allocation3 + $0xe8] sm:$0xff] %vm1014_vm3, %v977_v31  ;;  %v2206_v31 = vld [vmem:[%s3946_s23] sm:$0xff] }
 0x12d   : > { %1208 = vst.msk [vmem:[#allocation3] sm:$0xff] %vm1207_vm4, %v1112_v32  ;;  %1350 = vrot.lane.b32.xlu1 %v3594_v54, %s3034_s19  ;;  %v4519_v54 = vld [vmem:[#allocation5_spill] sm:$0xff] }
 0x12e   : > { %1356 = vrot.lane.b32.xlu0 %v3596_v55, %s3034_s19 }
 0x12f   : > { %v981_v35 = vpop.permute.xlu1 %980 }
 0x130   : > { %v1116_v36 = vpop.permute.xlu0 %1115  ;;  %1046 = vst.msk [vmem:[#allocation3 + $0xf8] sm:$0xff] %vm1014_vm3, %v981_v35 }
 0x131   : > { %1210 = vst.msk [vmem:[#allocation3 + $0x10] sm:$0xff] %vm1207_vm4, %v1116_v36  ;;  %1354 = vrot.lane.b32.xlu1 %v3608_v59, %s3034_s19  ;;  %v4520_v59 = vld [vmem:[#allocation6_spill] sm:$0xff]  ;;  %v2441_v36 = vld [vmem:[%s4484_s3 + $0x50] sm:$0xff] }
 0x132   : > { %1360 = vrot.lane.b32.xlu0 %v4518_v40, %s3034_s19  ;;  %v2442_v40 = vld [vmem:[%s4484_s3 + $0x58] sm:$0xff] }
 0x133   : > { %v1114_v11 = vpop.permute.xlu1 %1113 }
 0x134   : > { %v1120_v16 = vpop.permute.xlu0 %1119  ;;  %1209 = vst.msk [vmem:[#allocation3 + $0x8] sm:$0xff] %vm1207_vm4, %v1114_v11 }
 0x135   : > { %1212 = vst.msk [vmem:[#allocation3 + $0x20] sm:$0xff] %vm1207_vm4, %v1120_v16  ;;  %1358 = vrot.lane.b32.xlu1 %v4519_v54, %s3034_s19  ;;  %v2443_v54 = vld [vmem:[%s4484_s3 + $0x60] sm:$0xff] }
 0x136   : > { %1364 = vrot.lane.b32.xlu0 %v1270_v41, %s3034_s19  ;;  %v2976_v41 = vpack.c.bf16 %v2442_v40, %v2441_v36 }
 0x137   : > { %v1118_v55 = vpop.permute.xlu1 %1117 }
 0x138   : > { %v1124_v15 = vpop.permute.xlu0 %1123  ;;  %1211 = vst.msk [vmem:[#allocation3 + $0x18] sm:$0xff] %vm1207_vm4, %v1118_v55  ;;  %v2444_v55 = vld [vmem:[%s4484_s3 + $0x68] sm:$0xff] }
 0x139   : > { %1214 = vst.msk [vmem:[#allocation3 + $0x30] sm:$0xff] %vm1207_vm4, %v1124_v15  ;;  %1362 = vrot.lane.b32.xlu1 %v4520_v59, %s3034_s19  ;;  %v4528_v15 = vld [vmem:[#allocation15_spill] sm:$0xff]  ;;  %v2980_v59 = vpack.c.bf16 %v2444_v55, %v2443_v54 }
 0x13a   : > { %1497 = vrot.lane.b32.xlu0 %v4521_v20, %s3035_s20  ;;  %v2222_v20 = vld [vmem:[%s3946_s23 + $0x80] sm:$0xff]  ;;  %v2018_v55 = vld [vmem:[#allocation2 + $0x6a] sm:$0xff] }
 0x13b   : > { %v1122_v43 = vpop.permute.xlu1 %1121 }
 0x13c   : > { %v1128_v5 = vpop.permute.xlu0 %1127  ;;  %1213 = vst.msk [vmem:[#allocation3 + $0x28] sm:$0xff] %vm1207_vm4, %v1122_v43 }
 0x13d   : > { %1216 = vst.msk [vmem:[#allocation3 + $0x40] sm:$0xff] %vm1207_vm4, %v1128_v5  ;;  %1366 = vrot.lane.b32.xlu1 %v1271_v17, %s3034_s19  ;;  %v2445_v5 = vld [vmem:[%s4484_s3 + $0x70] sm:$0xff] }
 0x13e   : > { %1501 = vrot.lane.b32.xlu0 %v4522_v53, %s3035_s20 }
 0x13f   : > { %v1126_v42 = vpop.permute.xlu1 %1125 }
 0x140   : > { %v1132_v58 = vpop.permute.xlu0 %1131  ;;  %1215 = vst.msk [vmem:[#allocation3 + $0x38] sm:$0xff] %vm1207_vm4, %v1126_v42 }
 0x141   : > { %1218 = vst.msk [vmem:[#allocation3 + $0x50] sm:$0xff] %vm1207_vm4, %v1132_v58  ;;  %1499 = vrot.lane.b32.xlu1 %v4523_v6, %s3035_s20  ;;  %v2207_v58 = vld [vmem:[%s3946_s23 + $0x8] sm:$0xff] }
 0x142   : > { %1531 = vrot.lane.b32.xlu0 %v4524_v37, %s3035_s20 }
 0x143   : > { %v1130_v56 = vpop.permute.xlu1 %1129 }
 0x144   : > { %v1136_v57 = vpop.permute.xlu0 %1135  ;;  %1217 = vst.msk [vmem:[#allocation3 + $0x48] sm:$0xff] %vm1207_vm4, %v1130_v56 }
 0x145   : > { %1220 = vst.msk [vmem:[#allocation3 + $0x60] sm:$0xff] %vm1207_vm4, %v1136_v57  ;;  %1529 = vrot.lane.b32.xlu1 %v4525_v50, %s3035_s20  ;;  %v2223_v57 = vld [vmem:[%s3946_s23 + $0x88] sm:$0xff] }
 0x146   : > { %1723 = vrot.lane.b32.xlu0 %v3510_v21, %s3036_s21  ;;  %v2956_v21 = vpack.c.bf16 %v2432_v8, %v2431_v12  ;;  %v1822_v50 = vld [vmem:[#allocation2 + $0x49] sm:$0xff]  ;;  %v1823_v12 = vld [vmem:[#allocation2 + $0x51] sm:$0xff] }
 0x147   : > { %v1134_v3 = vpop.permute.xlu1 %1133 }
 0x148   : > { %v1140_v39 = vpop.permute.xlu0 %1139  ;;  %1219 = vst.msk [vmem:[#allocation3 + $0x58] sm:$0xff] %vm1207_vm4, %v1134_v3  ;;  %2957 = vmatprep.subr.bf16.mxu0 %v2956_v21  ;;  %2988 = vmatprep.subr.bf16.mxu1 %v2956_v21 }
 0x149   : > { %1222 = vst.msk [vmem:[#allocation3 + $0x70] sm:$0xff] %vm1207_vm4, %v1140_v39  ;;  %1691 = vrot.lane.b32.xlu1 %v3378_v13, %s3036_s21  ;;  %2959 = vmatpush3.bf16.msra.mxu0 %v2956_v21  ;;  %v2434_v13 = vld [vmem:[%s4484_s3 + $0x18] sm:$0xff] }
 0x14a   : > { %1725 = vrot.lane.b32.xlu0 %v3518_v22, %s3036_s21  ;;  %2996 = vmatpush3.bf16.msra.mxu1 %v2956_v21  ;;  %v2960_v22 = vpack.c.bf16 %v2434_v13, %v2433_v10 }
 0x14b   : > { %v1138_v44 = vpop.permute.xlu1 %1137 }
 0x14c   : > { %v1144_v4 = vpop.permute.xlu0 %1143  ;;  %1221 = vst.msk [vmem:[#allocation3 + $0x68] sm:$0xff] %vm1207_vm4, %v1138_v44  ;;  %2961 = vmatprep.subr.bf16.mxu0 %v2960_v22  ;;  %2989 = vmatprep.subr.bf16.mxu1 %v2960_v22 }
 0x14d   : > { %1224 = vst.msk [vmem:[#allocation3 + $0x80] sm:$0xff] %vm1207_vm4, %v1144_v4  ;;  %1693 = vrot.lane.b32.xlu1 %v3418_v45, %s3036_s21  ;;  %2963 = vmatpush3.bf16.msra.mxu0 %v2960_v22  ;;  %v2436_v45 = vld [vmem:[%s4484_s3 + $0x28] sm:$0xff]  ;;  %v1839_v4 = vld [vmem:[#allocation2 + $0x111] sm:$0xff] }
 0x14e   : > { %1916 = vrot.lane.b32.xlu0 %v1836_v51, %s3037_s8  ;;  %2997 = vmatpush3.bf16.msra.mxu1 %v2960_v22  ;;  %v2964_v7 = vpack.c.bf16 %v2436_v45, %v2435_v62  ;;  %v2208_v62 = vld [vmem:[%s3946_s23 + $0x10] sm:$0xff] }
 0x14f   : > { %v1142_v48 = vpop.permute.xlu1 %1141 }
 0x150   : > { %v1148_v14 = vpop.permute.xlu0 %1147  ;;  %1223 = vst.msk [vmem:[#allocation3 + $0x78] sm:$0xff] %vm1207_vm4, %v1142_v48  ;;  %2965 = vmatprep.subr.bf16.mxu0 %v2964_v7  ;;  %2990 = vmatprep.subr.bf16.mxu1 %v2964_v7  ;;  %v4529_v48 = vld [vmem:[#allocation14_spill] sm:$0xff] }
 0x151   : > { %1226 = vst.msk [vmem:[#allocation3 + $0x90] sm:$0xff] %vm1207_vm4, %v1148_v14  ;;  %1884 = vrot.lane.b32.xlu1 %v3785_v60, %s3037_s8  ;;  %2967 = vmatpush3.bf16.msra.mxu0 %v2964_v7  ;;  %v2438_v60 = vld [vmem:[%s4484_s3 + $0x38] sm:$0xff]  ;;  %v1453_v14 = vld [vmem:[#allocation2 + $0x10a] sm:$0xff] }
 0x152   : > { %1918 = vrot.lane.b32.xlu0 %v1837_v9, %s3037_s8  ;;  %2998 = vmatpush3.bf16.msra.mxu1 %v2964_v7  ;;  %v2968_v63 = vpack.c.bf16 %v2438_v60, %v2437_v49  ;;  %v2224_v49 = vld [vmem:[%s3946_s23 + $0x90] sm:$0xff] }
 0x153   : > { %v1146_v30 = vpop.permute.xlu1 %1145 }
 0x154   : > { %v1152_v38 = vpop.permute.xlu0 %1151  ;;  %1225 = vst.msk [vmem:[#allocation3 + $0x88] sm:$0xff] %vm1207_vm4, %v1146_v30  ;;  %2969 = vmatprep.subr.bf16.mxu0 %v2968_v63  ;;  %2991 = vmatprep.subr.bf16.mxu1 %v2968_v63 }
 0x155   : > { %1228 = vst.msk [vmem:[#allocation3 + $0xa0] sm:$0xff] %vm1207_vm4, %v1152_v38  ;;  %1886 = vrot.lane.b32.xlu1 %v1821_v29, %s3037_s8  ;;  %2971 = vmatpush3.bf16.msra.mxu0 %v2968_v63  ;;  %v2032_v29 = vld [vmem:[#allocation2 + $0x112] sm:$0xff] }
 0x156   : > { %2109 = vrot.lane.b32.xlu0 %v4526_v61, %s3038_s18  ;;  %2999 = vmatpush3.bf16.msra.mxu1 %v2968_v63  ;;  %v2209_v63 = vld [vmem:[%s3946_s23 + $0x18] sm:$0xff] }
 0x157   : > { %v1150_v0 = vpop.permute.xlu1 %1149  ;;  %2973 = vmatprep.subr.bf16.mxu0 %v2972_v26  ;;  %2992 = vmatprep.subr.bf16.mxu1 %v2972_v26 }
 0x158   : > { %v1156_v1 = vpop.permute.xlu0 %1155  ;;  %1227 = vst.msk [vmem:[#allocation3 + $0x98] sm:$0xff] %vm1207_vm4, %v1150_v0 }
 0x159   : > { %1230 = vst.msk [vmem:[#allocation3 + $0xb0] sm:$0xff] %vm1207_vm4, %v1156_v1  ;;  %2077 = vrot.lane.b32.xlu1 %v4522_v53, %s3038_s18  ;;  %2975 = vmatpush3.bf16.msra.mxu0 %v2972_v26  ;;  %v2446_v53 = vld [vmem:[%s4484_s3 + $0x78] sm:$0xff] }
 0x15a   : > { %2079 = vrot.lane.b32.xlu0 %v4527_v25, %s3038_s18  ;;  %3000 = vmatpush3.bf16.msra.mxu1 %v2972_v26  ;;  %v2984_v42 = vpack.c.bf16 %v2446_v53, %v2445_v5  ;;  %v2034_v5 = vld [vmem:[#allocation2 + $0x12a] sm:$0xff] }
 0x15b   : > { %v1154_v32 = vpop.permute.xlu1 %1153  ;;  %2977 = vmatprep.subr.bf16.mxu0 %v2976_v41  ;;  %2993 = vmatprep.subr.bf16.mxu1 %v2976_v41 }
 0x15c   : > { %v1160_v35 = vpop.permute.xlu0 %1159  ;;  %1229 = vst.msk [vmem:[#allocation3 + $0xa8] sm:$0xff] %vm1207_vm4, %v1154_v32  ;;  %v1825_v32 = vld [vmem:[#allocation2 + $0x69] sm:$0xff] }
 0x15d   : > { %1232 = vst.msk [vmem:[#allocation3 + $0xc0] sm:$0xff] %vm1207_vm4, %v1160_v35  ;;  %1533 = vrot.lane.b32.xlu1 %v4526_v61, %s3035_s20  ;;  %2979 = vmatpush3.bf16.msra.mxu0 %v2976_v41 }
 0x15e   : > { %2270 = vrot.lane.b32.xlu0 %v2206_v31, %s3039_s11  ;;  %3001 = vmatpush3.bf16.msra.mxu1 %v2976_v41 }
 0x15f   : > { %v1158_v11 = vpop.permute.xlu1 %1157  ;;  %2981 = vmatprep.subr.bf16.mxu0 %v2980_v59  ;;  %2994 = vmatprep.subr.bf16.mxu1 %v2980_v59 }
 0x160   : > { %v1164_v16 = vpop.permute.xlu0 %1163  ;;  %1231 = vst.msk [vmem:[#allocation3 + $0xb8] sm:$0xff] %vm1207_vm4, %v1158_v11  ;;  %v1841_v11 = vld [vmem:[#allocation2 + $0x129] sm:$0xff] }
 0x161   : > { %1234 = vst.msk [vmem:[#allocation3 + $0xd0] sm:$0xff] %vm1207_vm4, %v1164_v16  ;;  %2111 = vrot.lane.b32.xlu1 %v4528_v15, %s3038_s18  ;;  %2983 = vmatpush3.bf16.msra.mxu0 %v2980_v59 }
 0x162   : > { %1503 = vrot.lane.b32.xlu0 %v4527_v25, %s3035_s20  ;;  %3002 = vmatpush3.bf16.msra.mxu1 %v2980_v59  ;;  %v1824_v25 = vld [vmem:[#allocation2 + $0x61] sm:$0xff] }
 0x163   : > { %v1162_v17 = vpop.permute.xlu1 %1161  ;;  %2985 = vmatprep.subr.bf16.mxu0 %v2984_v42  ;;  %2995 = vmatprep.subr.bf16.mxu1 %v2984_v42 }
 0x164   : > { %v1168_v43 = vpop.permute.xlu0 %1167  ;;  %1233 = vst.msk [vmem:[#allocation3 + $0xc8] sm:$0xff] %vm1207_vm4, %v1162_v17 }
 0x165   : > { %1236 = vst.msk [vmem:[#allocation3 + $0xe0] sm:$0xff] %vm1207_vm4, %v1168_v43  ;;  %2302 = vrot.lane.b32.xlu1 %v2222_v20, %s3039_s11  ;;  %2987 = vmatpush3.bf16.msra.mxu0 %v2984_v42  ;;  %v2210_v20 = vld [vmem:[%s3946_s23 + $0x20] sm:$0xff] }
 0x166   : > { %1695 = vrot.lane.b32.xlu0 %v3420_v46, %s3036_s21  ;;  %3003 = vmatpush3.bf16.msra.mxu1 %v2984_v42 }
 0x167   : > { %v1166_v6 = vpop.permute.xlu1 %1165 }
 0x168   : > { %v1172_v37 = vpop.permute.xlu0 %1171  ;;  %1235 = vst.msk [vmem:[#allocation3 + $0xd8] sm:$0xff] %vm1207_vm4, %v1166_v6  ;;  %v1633_v6 = vld [vmem:[#allocation2 + $0x78] sm:$0xff] }
 0x169   : > { %1238 = vst.msk [vmem:[#allocation3 + $0xf0] sm:$0xff] %vm1207_vm4, %v1172_v37  ;;  %1535 = vrot.lane.b32.xlu1 %v4528_v15, %s3035_s20 }
 0x16a   : > { %2272 = vrot.lane.b32.xlu0 %v2207_v58, %s3039_s11  ;;  %v2226_v58 = vld [vmem:[%s3946_s23 + $0xa0] sm:$0xff] }
 0x16b   : > { %v1170_v46 = vpop.permute.xlu1 %1169 }
 0x16c   : > { %v1305_v56 = vpop.permute.xlu0 %1304  ;;  %1237 = vst.msk [vmem:[#allocation3 + $0xe8] sm:$0xff] %vm1207_vm4, %v1170_v46 }
 0x16d   : > { %1401 = vst.msk [vmem:[#allocation3] sm:$0xff] %vm1400_vm5, %v1305_v56  ;;  %1727 = vrot.lane.b32.xlu1 %v3520_v23, %s3036_s21  ;;  %v2015_v23 = vld [vmem:[#allocation2 + $0x4a] sm:$0xff] }
 0x16e   : > { %1697 = vrot.lane.b32.xlu0 %v3422_v47, %s3036_s21  ;;  %v1838_v47 = vld [vmem:[#allocation2 + $0x109] sm:$0xff] }
 0x16f   : > { %v1174_v3 = vpop.permute.xlu1 %1173  ;;  %v2211_v56 = vld [vmem:[%s3946_s23 + $0x28] sm:$0xff] }
 0x170   : > { %v1309_v39 = vpop.permute.xlu0 %1308  ;;  %1239 = vst.msk [vmem:[#allocation3 + $0xf8] sm:$0xff] %vm1207_vm4, %v1174_v3  ;;  %v1634_v3 = vld [vmem:[#allocation2 + $0x80] sm:$0xff] }
 0x171   : > { %1403 = vst.msk [vmem:[#allocation3 + $0x10] sm:$0xff] %vm1400_vm5, %v1309_v39  ;;  %2304 = vrot.lane.b32.xlu1 %v2223_v57, %s3039_s11 }
 0x172   : > { %1888 = vrot.lane.b32.xlu0 %v1822_v50, %s3037_s8 }
 0x173   : > { %v1307_v8 = vpop.permute.xlu1 %1306 }
 0x174   : > { %v1313_v21 = vpop.permute.xlu0 %1312  ;;  %1402 = vst.msk [vmem:[#allocation3 + $0x8] sm:$0xff] %vm1400_vm5, %v1307_v8  ;;  %v2227_v8 = vld [vmem:[%s3946_s23 + $0xa8] sm:$0xff] }
 0x175   : > { %1405 = vst.msk [vmem:[#allocation3 + $0x20] sm:$0xff] %vm1400_vm5, %v1313_v21  ;;  %1729 = vrot.lane.b32.xlu1 %v3522_v24, %s3036_s21  ;;  %v2016_v24 = vld [vmem:[#allocation2 + $0x52] sm:$0xff] }
 0x176   : > { %1890 = vrot.lane.b32.xlu0 %v1823_v12, %s3037_s8  ;;  %v1826_v21 = vld [vmem:[#allocation2 + $0x79] sm:$0xff] }
 0x177   : > { %v1311_v51 = vpop.permute.xlu1 %1310 }
 0x178   : > { %v1317_v44 = vpop.permute.xlu0 %1316  ;;  %1404 = vst.msk [vmem:[#allocation3 + $0x18] sm:$0xff] %vm1400_vm5, %v1311_v51  ;;  %v1827_v51 = vld [vmem:[#allocation2 + $0x81] sm:$0xff] }
 0x179   : > { %1407 = vst.msk [vmem:[#allocation3 + $0x30] sm:$0xff] %vm1400_vm5, %v1317_v44  ;;  %1920 = vrot.lane.b32.xlu1 %v1838_v47, %s3037_s8 }
 0x17a   : > { %2081 = vrot.lane.b32.xlu0 %v2015_v23, %s3038_s18 }
 0x17b   : > { %v1315_v10 = vpop.permute.xlu1 %1314 }
 0x17c   : > { %v1321_v13 = vpop.permute.xlu0 %1320  ;;  %1406 = vst.msk [vmem:[#allocation3 + $0x28] sm:$0xff] %vm1400_vm5, %v1315_v10  ;;  %v2019_v10 = vld [vmem:[#allocation2 + $0x7a] sm:$0xff] }
 0x17d   : > { %1409 = vst.msk [vmem:[#allocation3 + $0x40] sm:$0xff] %vm1400_vm5, %v1321_v13  ;;  %1922 = vrot.lane.b32.xlu1 %v1839_v4, %s3037_s8 }
 0x17e   : > { %1505 = vrot.lane.b32.xlu0 %v2015_v23, %s3035_s20 }
 0x17f   : > { %v1319_v22 = vpop.permute.xlu1 %1318 }
 0x180   : > { %v1325_v9 = vpop.permute.xlu0 %1324  ;;  %1408 = vst.msk [vmem:[#allocation3 + $0x38] sm:$0xff] %vm1400_vm5, %v1319_v22  ;;  %v1843_v22 = vld [vmem:[#allocation2 + $0x141] sm:$0xff] }
 0x181   : > { %1411 = vst.msk [vmem:[#allocation3 + $0x50] sm:$0xff] %vm1400_vm5, %v1325_v9  ;;  %2113 = vrot.lane.b32.xlu1 %v4529_v48, %s3038_s18 }
 0x182   : > { %2083 = vrot.lane.b32.xlu0 %v2016_v24, %s3038_s18 }
 0x183   : > { %v1323_v45 = vpop.permute.xlu1 %1322 }
 0x184   : > { %v1329_v7 = vpop.permute.xlu0 %1328  ;;  %1410 = vst.msk [vmem:[#allocation3 + $0x48] sm:$0xff] %vm1400_vm5, %v1323_v45 }
 0x185   : > { %1413 = vst.msk [vmem:[#allocation3 + $0x60] sm:$0xff] %vm1400_vm5, %v1329_v7  ;;  %1537 = vrot.lane.b32.xlu1 %v1453_v14, %s3035_s20  ;;  %v2020_v14 = vld [vmem:[#allocation2 + $0x82] sm:$0xff]  ;;  %v2212_v7 = vld [vmem:[%s3946_s23 + $0x30] sm:$0xff] }
 0x186   : > { %2274 = vrot.lane.b32.xlu0 %v2208_v62, %s3039_s11 }
 0x187   : > { %v1327_v30 = vpop.permute.xlu1 %1326 }
 0x188   : > { %v1333_v38 = vpop.permute.xlu0 %1332  ;;  %1412 = vst.msk [vmem:[#allocation3 + $0x58] sm:$0xff] %vm1400_vm5, %v1327_v30 }
 0x189   : > { %1415 = vst.msk [vmem:[#allocation3 + $0x70] sm:$0xff] %vm1400_vm5, %v1333_v38  ;;  %2115 = vrot.lane.b32.xlu1 %v2032_v29, %s3038_s18  ;;  %v2036_v38 = vld [vmem:[#allocation2 + $0x142] sm:$0xff] }
 0x18a   : > { %1507 = vrot.lane.b32.xlu0 %v2016_v24, %s3035_s20 }
 0x18b   : > { %v1331_v60 = vpop.permute.xlu1 %1330 }
 0x18c   : > { %v1337_v61 = vpop.permute.xlu0 %1336  ;;  %1414 = vst.msk [vmem:[#allocation3 + $0x68] sm:$0xff] %vm1400_vm5, %v1331_v60 }
 0x18d   : > { %1417 = vst.msk [vmem:[#allocation3 + $0x80] sm:$0xff] %vm1400_vm5, %v1337_v61  ;;  %2306 = vrot.lane.b32.xlu1 %v2224_v49, %s3039_s11 }
 0x18e   : > { %1699 = vrot.lane.b32.xlu0 %v3433_v52, %s3036_s21  ;;  %v2225_v52 = vld [vmem:[%s3946_s23 + $0x98] sm:$0xff] }
 0x18f   : > { %v1335_v0 = vpop.permute.xlu1 %1334 }
 0x190   : > { %v1341_v1 = vpop.permute.xlu0 %1340  ;;  %1416 = vst.msk [vmem:[#allocation3 + $0x78] sm:$0xff] %vm1400_vm5, %v1335_v0  ;;  %v1635_v0 = vld [vmem:[#allocation2 + $0x90] sm:$0xff] }
 0x191   : > { %1419 = vst.msk [vmem:[#allocation3 + $0x90] sm:$0xff] %vm1400_vm5, %v1341_v1  ;;  %1539 = vrot.lane.b32.xlu1 %v2032_v29, %s3035_s20 }
 0x192   : > { %2276 = vrot.lane.b32.xlu0 %v2209_v63, %s3039_s11  ;;  %v2228_v63 = vld [vmem:[%s3946_s23 + $0xb0] sm:$0xff] }
 0x193   : > { %v1339_v18 = vpop.permute.xlu1 %1338 }
 0x194   : > { %v1345_v19 = vpop.permute.xlu0 %1344  ;;  %1418 = vst.msk [vmem:[#allocation3 + $0x88] sm:$0xff] %vm1400_vm5, %v1339_v18 }
 0x195   : > { %1421 = vst.msk [vmem:[#allocation3 + $0xa0] sm:$0xff] %vm1400_vm5, %v1345_v19  ;;  %1731 = vrot.lane.b32.xlu1 %v3538_v27, %s3036_s21  ;;  %v2017_v27 = vld [vmem:[#allocation2 + $0x62] sm:$0xff]  ;;  %v2213_v19 = vld [vmem:[%s3946_s23 + $0x38] sm:$0xff] }
 0x196   : > { %1701 = vrot.lane.b32.xlu0 %v3458_v2, %s3036_s21  ;;  %v1840_v2 = vld [vmem:[#allocation2 + $0x121] sm:$0xff] }
 0x197   : > { %v1343_v26 = vpop.permute.xlu1 %1342 }
 0x198   : > { %v1349_v31 = vpop.permute.xlu0 %1348  ;;  %1420 = vst.msk [vmem:[#allocation3 + $0x98] sm:$0xff] %vm1400_vm5, %v1343_v26 }
 0x199   : > { %1423 = vst.msk [vmem:[#allocation3 + $0xb0] sm:$0xff] %vm1400_vm5, %v1349_v31  ;;  %2308 = vrot.lane.b32.xlu1 %v2225_v52, %s3039_s11  ;;  %v1651_v31 = vld [vmem:[#allocation2 + $0x150] sm:$0xff] }
 0x19a   : > { %1892 = vrot.lane.b32.xlu0 %v1824_v25, %s3037_s8 }
 0x19b   : > { %v1347_v35 = vpop.permute.xlu1 %1346 }
 0x19c   : > { %v1353_v36 = vpop.permute.xlu0 %1352  ;;  %1422 = vst.msk [vmem:[#allocation3 + $0xa8] sm:$0xff] %vm1400_vm5, %v1347_v35 }
 0x19d   : > { %1425 = vst.msk [vmem:[#allocation3 + $0xc0] sm:$0xff] %vm1400_vm5, %v1353_v36  ;;  %1733 = vrot.lane.b32.xlu1 %v3540_v28, %s3036_s21  ;;  %v2033_v28 = vld [vmem:[#allocation2 + $0x122] sm:$0xff] }
 0x19e   : > { %1894 = vrot.lane.b32.xlu0 %v1825_v32, %s3037_s8  ;;  %v1636_v32 = vld [vmem:[#allocation2 + $0x98] sm:$0xff] }
 0x19f   : > { %v1351_v40 = vpop.permute.xlu1 %1350 }
 0x1a0   : > { %v1357_v41 = vpop.permute.xlu0 %1356  ;;  %1424 = vst.msk [vmem:[#allocation3 + $0xb8] sm:$0xff] %vm1400_vm5, %v1351_v40  ;;  %v1828_v40 = vld [vmem:[#allocation2 + $0x91] sm:$0xff] }
 0x1a1   : > { %1427 = vst.msk [vmem:[#allocation3 + $0xd0] sm:$0xff] %vm1400_vm5, %v1357_v41  ;;  %1924 = vrot.lane.b32.xlu1 %v1840_v2, %s3037_s8 }
 0x1a2   : > { %2085 = vrot.lane.b32.xlu0 %v2017_v27, %s3038_s18 }
 0x1a3   : > { %v1355_v16 = vpop.permute.xlu1 %1354 }
 0x1a4   : > { %v1361_v54 = vpop.permute.xlu0 %1360  ;;  %1426 = vst.msk [vmem:[#allocation3 + $0xc8] sm:$0xff] %vm1400_vm5, %v1355_v16  ;;  %v1652_v16 = vld [vmem:[#allocation2 + $0x158] sm:$0xff] }
 0x1a5   : > { %1429 = vst.msk [vmem:[#allocation3 + $0xe0] sm:$0xff] %vm1400_vm5, %v1361_v54  ;;  %1926 = vrot.lane.b32.xlu1 %v1841_v11, %s3037_s8  ;;  %v1829_v54 = vld [vmem:[#allocation2 + $0x99] sm:$0xff] }
 0x1a6   : > { %1509 = vrot.lane.b32.xlu0 %v2017_v27, %s3035_s20  ;;  %v2229_v27 = vld [vmem:[%s3946_s23 + $0xb8] sm:$0xff] }
 0x1a7   : > { %v1359_v15 = vpop.permute.xlu1 %1358 }
 0x1a8   : > { %v1365_v59 = vpop.permute.xlu0 %1364  ;;  %1428 = vst.msk [vmem:[#allocation3 + $0xd8] sm:$0xff] %vm1400_vm5, %v1359_v15 }
 0x1a9   : > { %1431 = vst.msk [vmem:[#allocation3 + $0xf0] sm:$0xff] %vm1400_vm5, %v1365_v59  ;;  %2117 = vrot.lane.b32.xlu1 %v2033_v28, %s3038_s18  ;;  %v1844_v59 = vld [vmem:[#allocation2 + $0x151] sm:$0xff] }
 0x1aa   : > { %2087 = vrot.lane.b32.xlu0 %v2018_v55, %s3038_s18 }
 0x1ab   : > { %v1363_v17 = vpop.permute.xlu1 %1362 }
 0x1ac   : > { %v1498_v43 = vpop.permute.xlu0 %1497  ;;  %1430 = vst.msk [vmem:[#allocation3 + $0xe8] sm:$0xff] %vm1400_vm5, %v1363_v17 }
 0x1ad   : > { %1594 = vst.msk [vmem:[#allocation3] sm:$0xff] %vm1593_vm6, %v1498_v43  ;;  %1541 = vrot.lane.b32.xlu1 %v2033_v28, %s3035_s20 }
 0x1ae   : > { %2278 = vrot.lane.b32.xlu0 %v2210_v20, %s3039_s11  ;;  %v2021_v20 = vld [vmem:[#allocation2 + $0x92] sm:$0xff] }
 0x1af   : > { %v1367_v53 = vpop.permute.xlu1 %1366 }
 0x1b0   : > { %v1502_v42 = vpop.permute.xlu0 %1501  ;;  %1432 = vst.msk [vmem:[#allocation3 + $0xf8] sm:$0xff] %vm1400_vm5, %v1367_v53 }
 0x1b1   : > { %1596 = vst.msk [vmem:[#allocation3 + $0x10] sm:$0xff] %vm1593_vm6, %v1502_v42  ;;  %2119 = vrot.lane.b32.xlu1 %v2034_v5, %s3038_s18 }
 0x1b2   : > { %1511 = vrot.lane.b32.xlu0 %v2018_v55, %s3035_s20 }
 0x1b3   : > { %v1500_v37 = vpop.permute.xlu1 %1499 }
 0x1b4   : > { %v1532_v46 = vpop.permute.xlu0 %1531  ;;  %1595 = vst.msk [vmem:[#allocation3 + $0x8] sm:$0xff] %vm1593_vm6, %v1500_v37 }
 0x1b5   : > { %1611 = vst.msk [vmem:[#allocation3 + $0x88] sm:$0xff] %vm1593_vm6, %v1532_v46  ;;  %2310 = vrot.lane.b32.xlu1 %v2226_v58, %s3039_s11  ;;  %v2037_v58 = vld [vmem:[#allocation2 + $0x152] sm:$0xff] }
 0x1b6   : > { %1703 = vrot.lane.b32.xlu0 %v1633_v6, %s3036_s21  ;;  %v2022_v6 = vld [vmem:[#allocation2 + $0x9a] sm:$0xff] }
 0x1b7   : > { %v1530_v57 = vpop.permute.xlu1 %1529 }
 0x1b8   : > { %v1724_v50 = vpop.permute.xlu0 %1723  ;;  %1610 = vst.msk [vmem:[#allocation3 + $0x80] sm:$0xff] %vm1593_vm6, %v1530_v57 }
 0x1b9   : > { %1543 = vrot.lane.b32.xlu1 %v2034_v5, %s3035_s20  ;;  %1804 = vst.msk [vmem:[#allocation3 + $0x80] sm:$0xff] %vm1787_vm7, %v1724_v50  ;;  %v1845_v5 = vld [vmem:[#allocation2 + $0x159] sm:$0xff] }
 0x1ba   : > { %2280 = vrot.lane.b32.xlu0 %v2211_v56, %s3039_s11  ;;  %v2214_v56 = vld [vmem:[%s3946_s23 + $0x40] sm:$0xff] }
 0x1bb   : > { %v1692_v39 = vpop.permute.xlu1 %1691 }
 0x1bc   : > { %v1726_v12 = vpop.permute.xlu0 %1725  ;;  %1788 = vst.msk [vmem:[#allocation3] sm:$0xff] %vm1787_vm7, %v1692_v39 }
 0x1bd   : > { %1805 = vst.msk [vmem:[#allocation3 + $0x88] sm:$0xff] %vm1787_vm7, %v1726_v12  ;;  %1735 = vrot.lane.b32.xlu1 %v3554_v33, %s3036_s21  ;;  %v1842_v33 = vld [vmem:[#allocation2 + $0x139] sm:$0xff] }
 0x1be   : > { %1705 = vrot.lane.b32.xlu0 %v1634_v3, %s3036_s21  ;;  %v2038_v3 = vld [vmem:[#allocation2 + $0x15a] sm:$0xff] }
 0x1bf   : > { %v1694_v47 = vpop.permute.xlu1 %1693 }
 0x1c0   : > { %v1917_v23 = vpop.permute.xlu0 %1916  ;;  %1789 = vst.msk [vmem:[#allocation3 + $0x8] sm:$0xff] %vm1787_vm7, %v1694_v47  ;;  %v1637_v47 = vld [vmem:[#allocation2 + $0xa8] sm:$0xff] }
 0x1c1   : > { %1997 = vst.msk [vmem:[#allocation3 + $0x80] sm:$0xff] %vm1980_vm8, %v1917_v23  ;;  %2312 = vrot.lane.b32.xlu1 %v2227_v8, %s3039_s11 }
 0x1c2   : > { %1896 = vrot.lane.b32.xlu0 %v1826_v21, %s3037_s8  ;;  %v2230_v21 = vld [vmem:[%s3946_s23 + $0xc0] sm:$0xff] }
 0x1c3   : > { %v1885_v44 = vpop.permute.xlu1 %1884 }
 0x1c4   : > { %v1919_v4 = vpop.permute.xlu0 %1918  ;;  %1981 = vst.msk [vmem:[#allocation3] sm:$0xff] %vm1980_vm8, %v1885_v44  ;;  %v2215_v44 = vld [vmem:[%s3946_s23 + $0x48] sm:$0xff] }
 0x1c5   : > { %1998 = vst.msk [vmem:[#allocation3 + $0x88] sm:$0xff] %vm1980_vm8, %v1919_v4  ;;  %1737 = vrot.lane.b32.xlu1 %v3556_v34, %s3036_s21  ;;  %v2035_v34 = vld [vmem:[#allocation2 + $0x13a] sm:$0xff] }
 0x1c6   : > { %1898 = vrot.lane.b32.xlu0 %v1827_v51, %s3037_s8 }
 0x1c7   : > { %v1887_v13 = vpop.permute.xlu1 %1886 }
 0x1c8   : > { %v2110_v24 = vpop.permute.xlu0 %2109  ;;  %1982 = vst.msk [vmem:[#allocation3 + $0x8] sm:$0xff] %vm1980_vm8, %v1887_v13  ;;  %v1653_v13 = vld [vmem:[#allocation2 + $0x168] sm:$0xff] }
 0x1c9   : > { %2190 = vst.msk [vmem:[#allocation3 + $0x80] sm:$0xff] %vm2173_vm9, %v2110_v24  ;;  %1928 = vrot.lane.b32.xlu1 %v1842_v33, %s3037_s8  ;;  %v1638_v24 = vld [vmem:[#allocation2 + $0xb0] sm:$0xff] }
 0x1ca   : > { %2089 = vrot.lane.b32.xlu0 %v2019_v10, %s3038_s18 }
 0x1cb   : > { %v2078_v9 = vpop.permute.xlu1 %2077 }
 0x1cc   : > { %v2080_v48 = vpop.permute.xlu0 %2079  ;;  %2174 = vst.msk [vmem:[#allocation3] sm:$0xff] %vm2173_vm9, %v2078_v9 }
 0x1cd   : > { %2175 = vst.msk [vmem:[#allocation3 + $0x8] sm:$0xff] %vm2173_vm9, %v2080_v48  ;;  %1930 = vrot.lane.b32.xlu1 %v1843_v22, %s3037_s8 }
 0x1ce   : > { %1513 = vrot.lane.b32.xlu0 %v2019_v10, %s3035_s20 }
 0x1cf   : > { %v1534_v62 = vpop.permute.xlu1 %1533 }
 0x1d0   : > { %v2271_v45 = vpop.permute.xlu0 %2270  ;;  %1612 = vst.msk [vmem:[#allocation3 + $0x90] sm:$0xff] %vm1593_vm6, %v1534_v62 }
 0x1d1   : > { %2367 = vst.msk [vmem:[#allocation3] sm:$0xff] %vm2366_vm10, %v2271_v45  ;;  %2121 = vrot.lane.b32.xlu1 %v2035_v34, %s3038_s18 }
 0x1d2   : > { %2091 = vrot.lane.b32.xlu0 %v2020_v14, %s3038_s18 }
 0x1d3   : > { %v2112_v29 = vpop.permute.xlu1 %2111 }
 0x1d4   : > { %v1504_v30 = vpop.permute.xlu0 %1503  ;;  %2191 = vst.msk [vmem:[#allocation3 + $0x88] sm:$0xff] %vm2173_vm9, %v2112_v29  ;;  %v1831_v29 = vld [vmem:[#allocation2 + $0xb1] sm:$0xff] }
 0x1d5   : > { %1597 = vst.msk [vmem:[#allocation3 + $0x18] sm:$0xff] %vm1593_vm6, %v1504_v30  ;;  %1545 = vrot.lane.b32.xlu1 %v2035_v34, %s3035_s20  ;;  %v2231_v34 = vld [vmem:[%s3946_s23 + $0xc8] sm:$0xff] }
 0x1d6   : > { %2282 = vrot.lane.b32.xlu0 %v2212_v7, %s3039_s11  ;;  %v1654_v7 = vld [vmem:[#allocation2 + $0x170] sm:$0xff] }
 0x1d7   : > { %v2303_v49 = vpop.permute.xlu1 %2302 }
 0x1d8   : > { %v1696_v60 = vpop.permute.xlu0 %1695  ;;  %v2399_v61 = vld [vmem:[#allocation3] sm:$0xff]  ;;  %2383 = vst.msk [vmem:[#allocation3 + $0x80] sm:$0xff] %vm2366_vm10, %v2303_v49 }
 0x1d9   : > { %1790 = vst.msk [vmem:[#allocation3 + $0x10] sm:$0xff] %vm1787_vm7, %v1696_v60  ;;  %2908 = vmatprep.mubr.f32.mxu0 %v2399_v61  ;;  %2123 = vrot.lane.b32.xlu1 %v2036_v38, %s3038_s18  ;;  %v1846_v60 = vld [vmem:[#allocation2 + $0x169] sm:$0xff] }
 0x1da   : > { %1515 = vrot.lane.b32.xlu0 %v2020_v14, %s3035_s20  ;;  %v1830_v14 = vld [vmem:[#allocation2 + $0xa9] sm:$0xff] }
 0x1db   : > { %v1536_v1 = vpop.permute.xlu1 %1535  ;;  %v2023_v61 = vld [vmem:[#allocation2 + $0xaa] sm:$0xff] }
 0x1dc   : > { %v2273_v18 = vpop.permute.xlu0 %2272  ;;  %1613 = vst.msk [vmem:[#allocation3 + $0x98] sm:$0xff] %vm1593_vm6, %v1536_v1  ;;  %v1847_v1 = vld [vmem:[#allocation2 + $0x171] sm:$0xff] }
 0x1dd   : > { %2368 = vst.msk [vmem:[#allocation3 + $0x8] sm:$0xff] %vm2366_vm10, %v2273_v18  ;;  %2314 = vrot.lane.b32.xlu1 %v2228_v63, %s3039_s11 }
 0x1de   : > { %1707 = vrot.lane.b32.xlu0 %v1635_v0, %s3036_s21 }
 0x1df   : > { %v1728_v52 = vpop.permute.xlu1 %1727  ;;  %v2415_v25 = vld [vmem:[#allocation3 + $0x80] sm:$0xff] }
 0x1e0   : > { %v1698_v26 = vpop.permute.xlu0 %1697  ;;  %1806 = vst.msk [vmem:[#allocation3 + $0x90] sm:$0xff] %vm1787_vm7, %v1728_v52  ;;  %2932 = vmatprep.mubr.f32.mxu1 %v2415_v25  ;;  %v2039_v52 = vld [vmem:[#allocation2 + $0x16a] sm:$0xff]  ;;  %v2024_v25 = vld [vmem:[#allocation2 + $0xb2] sm:$0xff] }
 0x1e1   : > { %1791 = vst.msk [vmem:[#allocation3 + $0x18] sm:$0xff] %vm1787_vm7, %v1698_v26  ;;  %1547 = vrot.lane.b32.xlu1 %v2036_v38, %s3035_s20 }
 0x1e2   : > { %2284 = vrot.lane.b32.xlu0 %v2213_v19, %s3039_s11 }
 0x1e3   : > { %v2305_v35 = vpop.permute.xlu1 %2304 }
 0x1e4   : > { %v1889_v36 = vpop.permute.xlu0 %1888  ;;  %v2400_v2 = vld [vmem:[#allocation3 + $0x8] sm:$0xff]  ;;  %2384 = vst.msk [vmem:[#allocation3 + $0x88] sm:$0xff] %vm2366_vm10, %v2305_v35 }
 0x1e5   : > { %1983 = vst.msk [vmem:[#allocation3 + $0x10] sm:$0xff] %vm1980_vm8, %v1889_v36  ;;  %2909 = vmatmul.mubr.f32.vlgmr.msra.gmra.mrb[0].mxu0 %v2400_v2  ;;  %1739 = vrot.lane.b32.xlu1 %v1651_v31, %s3036_s21  ;;  %v2040_v2 = vld [vmem:[#allocation2 + $0x172] sm:$0xff] }
 0x1e6   : > { %1709 = vrot.lane.b32.xlu0 %v1636_v32, %s3036_s21  ;;  %v2216_v32 = vld [vmem:[%s3946_s23 + $0x50] sm:$0xff] }
 0x1e7   : > { %v1730_v41 = vpop.permute.xlu1 %1729 }
 0x1e8   : > { %v1891_v11 = vpop.permute.xlu0 %1890  ;;  %1807 = vst.msk [vmem:[#allocation3 + $0x98] sm:$0xff] %vm1787_vm7, %v1730_v41 }
 0x1e9   : > { %1984 = vst.msk [vmem:[#allocation3 + $0x18] sm:$0xff] %vm1980_vm8, %v1891_v11  ;;  %2316 = vrot.lane.b32.xlu1 %v2229_v27, %s3039_s11  ;;  %v2232_v11 = vld [vmem:[%s3946_s23 + $0xd0] sm:$0xff] }
 0x1ea   : > { %1900 = vrot.lane.b32.xlu0 %v1828_v40, %s3037_s8 }
 0x1eb   : > { %v1921_v28 = vpop.permute.xlu1 %1920  ;;  %v2416_v55 = vld [vmem:[#allocation3 + $0x88] sm:$0xff] }
 0x1ec   : > { %v2082_v15 = vpop.permute.xlu0 %2081  ;;  %1999 = vst.msk [vmem:[#allocation3 + $0x90] sm:$0xff] %vm1980_vm8, %v1921_v28  ;;  %2933 = vmatmul.mubr.f32.vlgmr.msra.gmra.mrb[0].mxu1 %v2416_v55  ;;  %v2217_v55 = vld [vmem:[%s3946_s23 + $0x58] sm:$0xff] }
 0x1ed   : > { %2176 = vst.msk [vmem:[#allocation3 + $0x10] sm:$0xff] %vm2173_vm9, %v2082_v15  ;;  %1741 = vrot.lane.b32.xlu1 %v1652_v16, %s3036_s21  ;;  %v1639_v16 = vld [vmem:[#allocation2 + $0xc0] sm:$0xff] }
 0x1ee   : > { %1902 = vrot.lane.b32.xlu0 %v1829_v54, %s3037_s8 }
 0x1ef   : > { %v1923_v17 = vpop.permute.xlu1 %1922 }
 0x1f0   : > { %v1506_v43 = vpop.permute.xlu0 %1505  ;;  %2000 = vst.msk [vmem:[#allocation3 + $0x98] sm:$0xff] %vm1980_vm8, %v1923_v17  ;;  %v1655_v17 = vld [vmem:[#allocation2 + $0x180] sm:$0xff] }
 0x1f1   : > { %1598 = vst.msk [vmem:[#allocation3 + $0x20] sm:$0xff] %vm1593_vm6, %v1506_v43  ;;  %1932 = vrot.lane.b32.xlu1 %v1844_v59, %s3037_s8  ;;  %v1640_v43 = vld [vmem:[#allocation2 + $0xc8] sm:$0xff] }
 0x1f2   : > { %2093 = vrot.lane.b32.xlu0 %v2021_v20, %s3038_s18 }
 0x1f3   : > { %v2114_v53 = vpop.permute.xlu1 %2113 }
 0x1f4   : > { %v2084_v42 = vpop.permute.xlu0 %2083  ;;  %2192 = vst.msk [vmem:[#allocation3 + $0x90] sm:$0xff] %vm2173_vm9, %v2114_v53 }
 0x1f5   : > { %2177 = vst.msk [vmem:[#allocation3 + $0x18] sm:$0xff] %vm2173_vm9, %v2084_v42  ;;  %1934 = vrot.lane.b32.xlu1 %v1845_v5, %s3037_s8 }
 0x1f6   : > { %1517 = vrot.lane.b32.xlu0 %v2021_v20, %s3035_s20 }
 0x1f7   : > { %v1538_v37 = vpop.permute.xlu1 %1537 }
 0x1f8   : > { %v2275_v46 = vpop.permute.xlu0 %2274  ;;  %1614 = vst.msk [vmem:[#allocation3 + $0xa0] sm:$0xff] %vm1593_vm6, %v1538_v37 }
 0x1f9   : > { %2369 = vst.msk [vmem:[#allocation3 + $0x10] sm:$0xff] %vm2366_vm10, %v2275_v46  ;;  %2125 = vrot.lane.b32.xlu1 %v2037_v58, %s3038_s18 }
 0x1fa   : > { %2095 = vrot.lane.b32.xlu0 %v2022_v6, %s3038_s18 }
 0x1fb   : > { %v2116_v57 = vpop.permute.xlu1 %2115 }
 0x1fc   : > { %v1508_v50 = vpop.permute.xlu0 %1507  ;;  %2193 = vst.msk [vmem:[#allocation3 + $0x98] sm:$0xff] %vm2173_vm9, %v2116_v57  ;;  %v1833_v57 = vld [vmem:[#allocation2 + $0xc9] sm:$0xff] }
 0x1fd   : > { %1599 = vst.msk [vmem:[#allocation3 + $0x28] sm:$0xff] %vm1593_vm6, %v1508_v50  ;;  %1549 = vrot.lane.b32.xlu1 %v2037_v58, %s3035_s20  ;;  %v2233_v58 = vld [vmem:[%s3946_s23 + $0xd8] sm:$0xff] }
 0x1fe   : > { %2286 = vrot.lane.b32.xlu0 %v2214_v56, %s3039_s11  ;;  %v1656_v56 = vld [vmem:[#allocation2 + $0x188] sm:$0xff] }
 0x1ff   : > { %v2307_v39 = vpop.permute.xlu1 %2306 }
 0x200   : > { %v1700_v12 = vpop.permute.xlu0 %1699  ;;  %v2401_v8 = vld [vmem:[#allocation3 + $0x10] sm:$0xff]  ;;  %2385 = vst.msk [vmem:[#allocation3 + $0x90] sm:$0xff] %vm2366_vm10, %v2307_v39 }
 0x201   : > { %1792 = vst.msk [vmem:[#allocation3 + $0x20] sm:$0xff] %vm1787_vm7, %v1700_v12  ;;  %2911 = vmatprep.mubr.f32.mxu0 %v2401_v8  ;;  %2127 = vrot.lane.b32.xlu1 %v2038_v3, %s3038_s18  ;;  %v1848_v12 = vld [vmem:[#allocation2 + $0x181] sm:$0xff] }
 0x202   : > { %1519 = vrot.lane.b32.xlu0 %v2022_v6, %s3035_s20  ;;  %v1832_v6 = vld [vmem:[#allocation2 + $0xc1] sm:$0xff] }
 0x203   : > { %v1540_v23 = vpop.permute.xlu1 %1539  ;;  %v2025_v8 = vld [vmem:[#allocation2 + $0xc2] sm:$0xff] }
 0x204   : > { %v2277_v51 = vpop.permute.xlu0 %2276  ;;  %1615 = vst.msk [vmem:[#allocation3 + $0xa8] sm:$0xff] %vm1593_vm6, %v1540_v23  ;;  %v1849_v23 = vld [vmem:[#allocation2 + $0x189] sm:$0xff] }
 0x205   : > { %2370 = vst.msk [vmem:[#allocation3 + $0x18] sm:$0xff] %vm2366_vm10, %v2277_v51  ;;  %2318 = vrot.lane.b32.xlu1 %v2230_v21, %s3039_s11 }
 0x206   : > { %1711 = vrot.lane.b32.xlu0 %v1637_v47, %s3036_s21 }
 0x207   : > { %v1732_v4 = vpop.permute.xlu1 %1731  ;;  %v2417_v33 = vld [vmem:[#allocation3 + $0x90] sm:$0xff] }
 0x208   : > { %v1702_v10 = vpop.permute.xlu0 %1701  ;;  %1808 = vst.msk [vmem:[#allocation3 + $0xa0] sm:$0xff] %vm1787_vm7, %v1732_v4  ;;  %2935 = vmatprep.mubr.f32.mxu1 %v2417_v33  ;;  %v2041_v4 = vld [vmem:[#allocation2 + $0x182] sm:$0xff]  ;;  %v2026_v33 = vld [vmem:[#allocation2 + $0xca] sm:$0xff] }
 0x209   : > { %1793 = vst.msk [vmem:[#allocation3 + $0x28] sm:$0xff] %vm1787_vm7, %v1702_v10  ;;  %1551 = vrot.lane.b32.xlu1 %v2038_v3, %s3035_s20 }
 0x20a   : > { %2288 = vrot.lane.b32.xlu0 %v2215_v44, %s3039_s11 }
 0x20b   : > { %v2309_v22 = vpop.permute.xlu1 %2308 }
 0x20c   : > { %v1893_v9 = vpop.permute.xlu0 %1892  ;;  %v2402_v48 = vld [vmem:[#allocation3 + $0x18] sm:$0xff]  ;;  %2386 = vst.msk [vmem:[#allocation3 + $0x98] sm:$0xff] %vm2366_vm10, %v2309_v22 }
 0x20d   : > { %1985 = vst.msk [vmem:[#allocation3 + $0x20] sm:$0xff] %vm1980_vm8, %v1893_v9  ;;  %2912 = vmatmul.mubr.f32.gmra.mrb[2].mxu0 %v2402_v48  ;;  %1743 = vrot.lane.b32.xlu1 %v1653_v13, %s3036_s21  ;;  %v2042_v48 = vld [vmem:[#allocation2 + $0x18a] sm:$0xff] }
 0x20e   : > { %1713 = vrot.lane.b32.xlu0 %v1638_v24, %s3036_s21  ;;  %v2218_v24 = vld [vmem:[%s3946_s23 + $0x60] sm:$0xff] }
 0x20f   : > { %v1734_v62 = vpop.permute.xlu1 %1733 }
 0x210   : > { %v1895_v45 = vpop.permute.xlu0 %1894  ;;  %1809 = vst.msk [vmem:[#allocation3 + $0xa8] sm:$0xff] %vm1787_vm7, %v1734_v62 }
 0x211   : > { %1986 = vst.msk [vmem:[#allocation3 + $0x28] sm:$0xff] %vm1980_vm8, %v1895_v45  ;;  %2320 = vrot.lane.b32.xlu1 %v2231_v34, %s3039_s11  ;;  %v2234_v45 = vld [vmem:[%s3946_s23 + $0xe0] sm:$0xff] }
 0x212   : > { %1904 = vrot.lane.b32.xlu0 %v1830_v14, %s3037_s8 }
 0x213   : > { %v1925_v30 = vpop.permute.xlu1 %1924  ;;  %v2418_v38 = vld [vmem:[#allocation3 + $0x98] sm:$0xff] }
 0x214   : > { %v2086_v49 = vpop.permute.xlu0 %2085  ;;  %2001 = vst.msk [vmem:[#allocation3 + $0xa0] sm:$0xff] %vm1980_vm8, %v1925_v30  ;;  %2936 = vmatmul.mubr.f32.gmra.mrb[2].mxu1 %v2418_v38  ;;  %v2219_v38 = vld [vmem:[%s3946_s23 + $0x68] sm:$0xff] }
 0x215   : > { %2178 = vst.msk [vmem:[#allocation3 + $0x20] sm:$0xff] %vm2173_vm9, %v2086_v49  ;;  %1745 = vrot.lane.b32.xlu1 %v1654_v7, %s3036_s21  ;;  %v1641_v7 = vld [vmem:[#allocation2 + $0xd8] sm:$0xff] }
 0x216   : > { %1906 = vrot.lane.b32.xlu0 %v1831_v29, %s3037_s8 }
 0x217   : > { %v1927_v63 = vpop.permute.xlu1 %1926 }
 0x218   : > { %v1510_v0 = vpop.permute.xlu0 %1509  ;;  %2002 = vst.msk [vmem:[#allocation3 + $0xa8] sm:$0xff] %vm1980_vm8, %v1927_v63  ;;  %v1657_v63 = vld [vmem:[#allocation2 + $0x198] sm:$0xff] }
 0x219   : > { %1600 = vst.msk [vmem:[#allocation3 + $0x30] sm:$0xff] %vm1593_vm6, %v1510_v0  ;;  %1936 = vrot.lane.b32.xlu1 %v1846_v60, %s3037_s8  ;;  %v1642_v0 = vld [vmem:[#allocation2 + $0xe0] sm:$0xff] }
 0x21a   : > { %2097 = vrot.lane.b32.xlu0 %v2023_v61, %s3038_s18 }
 0x21b   : > { %v2118_v18 = vpop.permute.xlu1 %2117 }
 0x21c   : > { %v2088_v19 = vpop.permute.xlu0 %2087  ;;  %2194 = vst.msk [vmem:[#allocation3 + $0xa0] sm:$0xff] %vm2173_vm9, %v2118_v18 }
 0x21d   : > { %2179 = vst.msk [vmem:[#allocation3 + $0x28] sm:$0xff] %vm2173_vm9, %v2088_v19  ;;  %1938 = vrot.lane.b32.xlu1 %v1847_v1, %s3037_s8 }
 0x21e   : > { %1521 = vrot.lane.b32.xlu0 %v2023_v61, %s3035_s20 }
 0x21f   : > { %v1542_v26 = vpop.permute.xlu1 %1541 }
 0x220   : > { %v2279_v31 = vpop.permute.xlu0 %2278  ;;  %1616 = vst.msk [vmem:[#allocation3 + $0xb0] sm:$0xff] %vm1593_vm6, %v1542_v26 }
 0x221   : > { %2371 = vst.msk [vmem:[#allocation3 + $0x20] sm:$0xff] %vm2366_vm10, %v2279_v31  ;;  %2129 = vrot.lane.b32.xlu1 %v2039_v52, %s3038_s18 }
 0x222   : > { %2099 = vrot.lane.b32.xlu0 %v2024_v25, %s3038_s18 }
 0x223   : > { %v2120_v35 = vpop.permute.xlu1 %2119 }
 0x224   : > { %v1512_v36 = vpop.permute.xlu0 %1511  ;;  %2195 = vst.msk [vmem:[#allocation3 + $0xa8] sm:$0xff] %vm2173_vm9, %v2120_v35  ;;  %v1835_v35 = vld [vmem:[#allocation2 + $0xe1] sm:$0xff] }
 0x225   : > { %1601 = vst.msk [vmem:[#allocation3 + $0x38] sm:$0xff] %vm1593_vm6, %v1512_v36  ;;  %1553 = vrot.lane.b32.xlu1 %v2039_v52, %s3035_s20  ;;  %v2235_v52 = vld [vmem:[%s3946_s23 + $0xe8] sm:$0xff] }
 0x226   : > { %2290 = vrot.lane.b32.xlu0 %v2216_v32, %s3039_s11  ;;  %v1658_v32 = vld [vmem:[#allocation2 + $0x1a0] sm:$0xff] }
 0x227   : > { %v2311_v27 = vpop.permute.xlu1 %2310 }
 0x228   : > { %v1704_v40 = vpop.permute.xlu0 %1703  ;;  %v2403_v41 = vld [vmem:[#allocation3 + $0x20] sm:$0xff]  ;;  %2387 = vst.msk [vmem:[#allocation3 + $0xa0] sm:$0xff] %vm2366_vm10, %v2311_v27 }
 0x229   : > { %1794 = vst.msk [vmem:[#allocation3 + $0x30] sm:$0xff] %vm1787_vm7, %v1704_v40  ;;  %2914 = vmatprep.mubr.f32.mxu0 %v2403_v41  ;;  %2131 = vrot.lane.b32.xlu1 %v2040_v2, %s3038_s18  ;;  %v1850_v40 = vld [vmem:[#allocation2 + $0x199] sm:$0xff] }
 0x22a   : > { %1523 = vrot.lane.b32.xlu0 %v2024_v25, %s3035_s20  ;;  %v1834_v25 = vld [vmem:[#allocation2 + $0xd9] sm:$0xff] }
 0x22b   : > { %v1544_v54 = vpop.permute.xlu1 %1543  ;;  %v2027_v41 = vld [vmem:[#allocation2 + $0xda] sm:$0xff] }
 0x22c   : > { %v2281_v28 = vpop.permute.xlu0 %2280  ;;  %1617 = vst.msk [vmem:[#allocation3 + $0xb8] sm:$0xff] %vm1593_vm6, %v1544_v54  ;;  %v1851_v54 = vld [vmem:[#allocation2 + $0x1a1] sm:$0xff] }
 0x22d   : > { %2372 = vst.msk [vmem:[#allocation3 + $0x28] sm:$0xff] %vm2366_vm10, %v2281_v28  ;;  %2322 = vrot.lane.b32.xlu1 %v2232_v11, %s3039_s11  ;;  %v2028_v28 = vld [vmem:[#allocation2 + $0xe2] sm:$0xff] }
 0x22e   : > { %1715 = vrot.lane.b32.xlu0 %v1639_v16, %s3036_s21 }
 0x22f   : > { %v1736_v15 = vpop.permute.xlu1 %1735  ;;  %v2419_v59 = vld [vmem:[#allocation3 + $0xa0] sm:$0xff] }
 0x230   : > { %v1706_v20 = vpop.permute.xlu0 %1705  ;;  %1810 = vst.msk [vmem:[#allocation3 + $0xb0] sm:$0xff] %vm1787_vm7, %v1736_v15  ;;  %2938 = vmatprep.mubr.f32.mxu1 %v2419_v59  ;;  %v2043_v59 = vld [vmem:[#allocation2 + $0x19a] sm:$0xff] }
 0x231   : > { %1795 = vst.msk [vmem:[#allocation3 + $0x38] sm:$0xff] %vm1787_vm7, %v1706_v20  ;;  %1555 = vrot.lane.b32.xlu1 %v2040_v2, %s3035_s20  ;;  %v2220_v20 = vld [vmem:[%s3946_s23 + $0x70] sm:$0xff] }
 0x232   : > { %2292 = vrot.lane.b32.xlu0 %v2217_v55, %s3039_s11 }
 0x233   : > { %v2313_v5 = vpop.permute.xlu1 %2312 }
 0x234   : > { %v1897_v53 = vpop.permute.xlu0 %1896  ;;  %v2404_v42 = vld [vmem:[#allocation3 + $0x28] sm:$0xff]  ;;  %2388 = vst.msk [vmem:[#allocation3 + $0xa8] sm:$0xff] %vm2366_vm10, %v2313_v5  ;;  %v2044_v5 = vld [vmem:[#allocation2 + $0x1a2] sm:$0xff] }
 0x235   : > { %1987 = vst.msk [vmem:[#allocation3 + $0x30] sm:$0xff] %vm1980_vm8, %v1897_v53  ;;  %2915 = vmatmul.mubr.f32.gmra.mrb[4].mxu0 %v2404_v42  ;;  %1747 = vrot.lane.b32.xlu1 %v1655_v17, %s3036_s21  ;;  %v2221_v53 = vld [vmem:[%s3946_s23 + $0x78] sm:$0xff] }
 0x236   : > { %1717 = vrot.lane.b32.xlu0 %v1640_v43, %s3036_s21 }
 0x237   : > { %v1738_v37 = vpop.permute.xlu1 %1737 }
 0x238   : > { %v1899_v46 = vpop.permute.xlu0 %1898  ;;  %1811 = vst.msk [vmem:[#allocation3 + $0xb8] sm:$0xff] %vm1787_vm7, %v1738_v37 }
 0x239   : > { %1988 = vst.msk [vmem:[#allocation3 + $0x38] sm:$0xff] %vm1980_vm8, %v1899_v46  ;;  %2324 = vrot.lane.b32.xlu1 %v2233_v58, %s3039_s11 }
 0x23a   : > { %1908 = vrot.lane.b32.xlu0 %v1832_v6, %s3037_s8  ;;  %v2236_v6 = vld [vmem:[%s3946_s23 + $0xf0] sm:$0xff] }
 0x23b   : > { %v1929_v50 = vpop.permute.xlu1 %1928  ;;  %v2420_v3 = vld [vmem:[#allocation3 + $0xa8] sm:$0xff] }
 0x23c   : > { %v2090_v39 = vpop.permute.xlu0 %2089  ;;  %2003 = vst.msk [vmem:[#allocation3 + $0xb0] sm:$0xff] %vm1980_vm8, %v1929_v50  ;;  %2939 = vmatmul.mubr.f32.gmra.mrb[4].mxu1 %v2420_v3 }
 0x23d   : > { %2180 = vst.msk [vmem:[#allocation3 + $0x30] sm:$0xff] %vm2173_vm9, %v2090_v39  ;;  %1749 = vrot.lane.b32.xlu1 %v1656_v56, %s3036_s21 }
 0x23e   : > { %1910 = vrot.lane.b32.xlu0 %v1833_v57, %s3037_s8  ;;  %v2237_v57 = vld [vmem:[%s3946_s23 + $0xf8] sm:$0xff]  ;;  %s4354_s23 = scalar_lea.vmem %s4488_s7, %s3251_s12 }
 0x23f   : > { %v1931_v21 = vpop.permute.xlu1 %1930 }
 0x240   : > { %v1514_v47 = vpop.permute.xlu0 %1513  ;;  %2004 = vst.msk [vmem:[#allocation3 + $0xb8] sm:$0xff] %vm1980_vm8, %v1931_v21 }
 0x241   : > { %1602 = vst.msk [vmem:[#allocation3 + $0x40] sm:$0xff] %vm1593_vm6, %v1514_v47  ;;  %1940 = vrot.lane.b32.xlu1 %v1848_v12, %s3037_s8 }
 0x242   : > { %2101 = vrot.lane.b32.xlu0 %v2025_v8, %s3038_s18 }
 0x243   : > { %v2122_v51 = vpop.permute.xlu1 %2121 }
 0x244   : > { %v2092_v44 = vpop.permute.xlu0 %2091  ;;  %2196 = vst.msk [vmem:[#allocation3 + $0xb0] sm:$0xff] %vm2173_vm9, %v2122_v51 }
 0x245   : > { %2181 = vst.msk [vmem:[#allocation3 + $0x38] sm:$0xff] %vm2173_vm9, %v2092_v44  ;;  %1942 = vrot.lane.b32.xlu1 %v1849_v23, %s3037_s8 }
 0x246   : > { %1525 = vrot.lane.b32.xlu0 %v2025_v8, %s3035_s20 }
 0x247   : > { %v1546_v10 = vpop.permute.xlu1 %1545 }
 0x248   : > { %v2283_v13 = vpop.permute.xlu0 %2282  ;;  %1618 = vst.msk [vmem:[#allocation3 + $0xc0] sm:$0xff] %vm1593_vm6, %v1546_v10 }
 0x249   : > { %2373 = vst.msk [vmem:[#allocation3 + $0x30] sm:$0xff] %vm2366_vm10, %v2283_v13  ;;  %2133 = vrot.lane.b32.xlu1 %v2041_v4, %s3038_s18 }
 0x24a   : > { %2103 = vrot.lane.b32.xlu0 %v2026_v33, %s3038_s18 }
 0x24b   : > { %v2124_v22 = vpop.permute.xlu1 %2123 }
 0x24c   : > { %v1516_v9 = vpop.permute.xlu0 %1515  ;;  %2197 = vst.msk [vmem:[#allocation3 + $0xb8] sm:$0xff] %vm2173_vm9, %v2124_v22 }
 0x24d   : > { %1603 = vst.msk [vmem:[#allocation3 + $0x48] sm:$0xff] %vm1593_vm6, %v1516_v9  ;;  %1557 = vrot.lane.b32.xlu1 %v2041_v4, %s3035_s20 }
 0x24e   : > { %2294 = vrot.lane.b32.xlu0 %v2218_v24, %s3039_s11 }
 0x24f   : > { %v2315_v34 = vpop.permute.xlu1 %2314 }
 0x250   : > { %v1708_v14 = vpop.permute.xlu0 %1707  ;;  %v2405_v62 = vld [vmem:[#allocation3 + $0x30] sm:$0xff]  ;;  %2389 = vst.msk [vmem:[#allocation3 + $0xb0] sm:$0xff] %vm2366_vm10, %v2315_v34 }
 0x251   : > { %1796 = vst.msk [vmem:[#allocation3 + $0x40] sm:$0xff] %vm1787_vm7, %v1708_v14  ;;  %2917 = vmatprep.mubr.f32.mxu0 %v2405_v62  ;;  %2135 = vrot.lane.b32.xlu1 %v2042_v48, %s3038_s18 }
 0x252   : > { %1527 = vrot.lane.b32.xlu0 %v2026_v33, %s3035_s20 }
 0x253   : > { %v1548_v29 = vpop.permute.xlu1 %1547 }
 0x254   : > { %v2285_v30 = vpop.permute.xlu0 %2284  ;;  %1619 = vst.msk [vmem:[#allocation3 + $0xc8] sm:$0xff] %vm1593_vm6, %v1548_v29 }
 0x255   : > { %2374 = vst.msk [vmem:[#allocation3 + $0x38] sm:$0xff] %vm2366_vm10, %v2285_v30  ;;  %2326 = vrot.lane.b32.xlu1 %v2234_v45, %s3039_s11 }
 0x256   : > { %1719 = vrot.lane.b32.xlu0 %v1641_v7, %s3036_s21 }
 0x257   : > { %v1740_v49 = vpop.permute.xlu1 %1739  ;;  %v2421_v60 = vld [vmem:[#allocation3 + $0xb0] sm:$0xff] }
 0x258   : > { %v1710_v61 = vpop.permute.xlu0 %1709  ;;  %1812 = vst.msk [vmem:[#allocation3 + $0xc0] sm:$0xff] %vm1787_vm7, %v1740_v49  ;;  %2941 = vmatprep.mubr.f32.mxu1 %v2421_v60 }
 0x259   : > { %1797 = vst.msk [vmem:[#allocation3 + $0x48] sm:$0xff] %vm1787_vm7, %v1710_v61  ;;  %1559 = vrot.lane.b32.xlu1 %v2042_v48, %s3035_s20 }
 0x25a   : > { %2296 = vrot.lane.b32.xlu0 %v2219_v38, %s3039_s11 }
 0x25b   : > { %v2317_v1 = vpop.permute.xlu1 %2316 }
 0x25c   : > { %v1901_v18 = vpop.permute.xlu0 %1900  ;;  %v2406_v19 = vld [vmem:[#allocation3 + $0x38] sm:$0xff]  ;;  %2390 = vst.msk [vmem:[#allocation3 + $0xb8] sm:$0xff] %vm2366_vm10, %v2317_v1 }
 0x25d   : > { %1989 = vst.msk [vmem:[#allocation3 + $0x40] sm:$0xff] %vm1980_vm8, %v1901_v18  ;;  %2918 = vmatmul.mubr.f32.gmra.mrb[6].mxu0 %v2406_v19  ;;  %1751 = vrot.lane.b32.xlu1 %v1657_v63, %s3036_s21 }
 0x25e   : > { %1721 = vrot.lane.b32.xlu0 %v1642_v0, %s3036_s21 }
 0x25f   : > { %v1742_v26 = vpop.permute.xlu1 %1741 }
 0x260   : > { %v1903_v31 = vpop.permute.xlu0 %1902  ;;  %1813 = vst.msk [vmem:[#allocation3 + $0xc8] sm:$0xff] %vm1787_vm7, %v1742_v26 }
 0x261   : > { %1990 = vst.msk [vmem:[#allocation3 + $0x48] sm:$0xff] %vm1980_vm8, %v1903_v31  ;;  %2328 = vrot.lane.b32.xlu1 %v2235_v52, %s3039_s11  ;;  %v4346_v31 = vld [vmem:[%s4485_s4] ss:$0 sm:$0xff] }
 0x262   : > { %1912 = vrot.lane.b32.xlu0 %v1834_v25, %s3037_s8 }
 0x263   : > { %v1933_v36 = vpop.permute.xlu1 %1932  ;;  %v2422_v2 = vld [vmem:[#allocation3 + $0xb8] sm:$0xff] }
 0x264   : > { %v2094_v27 = vpop.permute.xlu0 %2093  ;;  %2005 = vst.msk [vmem:[#allocation3 + $0xc0] sm:$0xff] %vm1980_vm8, %v1933_v36  ;;  %2942 = vmatmul.mubr.f32.gmra.mrb[6].mxu1 %v2422_v2 }
 0x265   : > { %2182 = vst.msk [vmem:[#allocation3 + $0x40] sm:$0xff] %vm2173_vm9, %v2094_v27  ;;  %1753 = vrot.lane.b32.xlu1 %v1658_v32, %s3036_s21 }
 0x266   : > { %1914 = vrot.lane.b32.xlu0 %v1835_v35, %s3037_s8 }
 0x267   : > { %v1935_v11 = vpop.permute.xlu1 %1934 }
 0x268   : > { %v1518_v16 = vpop.permute.xlu0 %1517  ;;  %2006 = vst.msk [vmem:[#allocation3 + $0xc8] sm:$0xff] %vm1980_vm8, %v1935_v11 }
 0x269   : > { %1604 = vst.msk [vmem:[#allocation3 + $0x50] sm:$0xff] %vm1593_vm6, %v1518_v16  ;;  %1944 = vrot.lane.b32.xlu1 %v1850_v40, %s3037_s8 }
 0x26a   : > { %2105 = vrot.lane.b32.xlu0 %v2027_v41, %s3038_s18 }
 0x26b   : > { %v2126_v55 = vpop.permute.xlu1 %2125 }
 0x26c   : > { %v2096_v15 = vpop.permute.xlu0 %2095  ;;  %2198 = vst.msk [vmem:[#allocation3 + $0xc0] sm:$0xff] %vm2173_vm9, %v2126_v55 }
 0x26d   : > { %2183 = vst.msk [vmem:[#allocation3 + $0x48] sm:$0xff] %vm2173_vm9, %v2096_v15  ;;  %1946 = vrot.lane.b32.xlu1 %v1851_v54, %s3037_s8 }
 0x26e   : > { %2107 = vrot.lane.b32.xlu0 %v2028_v28, %s3038_s18 }
 0x26f   : > { %v1550_v17 = vpop.permute.xlu1 %1549 }
 0x270   : > { %v2287_v43 = vpop.permute.xlu0 %2286  ;;  %1620 = vst.msk [vmem:[#allocation3 + $0xd0] sm:$0xff] %vm1593_vm6, %v1550_v17 }
 0x271   : > { %2375 = vst.msk [vmem:[#allocation3 + $0x40] sm:$0xff] %vm2366_vm10, %v2287_v43  ;;  %2137 = vrot.lane.b32.xlu1 %v2043_v59, %s3038_s18 }
 0x272   : > { %2298 = vrot.lane.b32.xlu0 %v2220_v20, %s3039_s11 }
 0x273   : > { %v2128_v42 = vpop.permute.xlu1 %2127 }
 0x274   : > { %v1520_v58 = vpop.permute.xlu0 %1519  ;;  %2199 = vst.msk [vmem:[#allocation3 + $0xc8] sm:$0xff] %vm2173_vm9, %v2128_v42 }
 0x275   : > { %1605 = vst.msk [vmem:[#allocation3 + $0x58] sm:$0xff] %vm1593_vm6, %v1520_v58  ;;  %2139 = vrot.lane.b32.xlu1 %v2044_v5, %s3038_s18 }
 0x276   : > { %2300 = vrot.lane.b32.xlu0 %v2221_v53, %s3039_s11 }
 0x277   : > { %v2319_v37 = vpop.permute.xlu1 %2318 }
 0x278   : > { %v1712_v46 = vpop.permute.xlu0 %1711  ;;  %v2407_v56 = vld [vmem:[#allocation3 + $0x40] sm:$0xff]  ;;  %2391 = vst.msk [vmem:[#allocation3 + $0xc0] sm:$0xff] %vm2366_vm10, %v2319_v37 }
 0x279   : > { %1798 = vst.msk [vmem:[#allocation3 + $0x50] sm:$0xff] %vm1787_vm7, %v1712_v46  ;;  %2920 = vmatprep.mubr.f32.mxu0 %v2407_v56  ;;  %2330 = vrot.lane.b32.xlu1 %v2236_v6, %s3039_s11 }
 0x27b   : > { %v1552_v50 = vpop.permute.xlu1 %1551 }
 0x27c   : > { %v2289_v3 = vpop.permute.xlu0 %2288  ;;  %1621 = vst.msk [vmem:[#allocation3 + $0xd8] sm:$0xff] %vm1593_vm6, %v1552_v50 }
 0x27d   : > { %2376 = vst.msk [vmem:[#allocation3 + $0x48] sm:$0xff] %vm2366_vm10, %v2289_v3  ;;  %2332 = vrot.lane.b32.xlu1 %v2237_v57, %s3039_s11 }
 0x27f   : > { %v1744_v39 = vpop.permute.xlu1 %1743  ;;  %v2423_v12 = vld [vmem:[#allocation3 + $0xc0] sm:$0xff] }
 0x280   : > { %v1714_v8 = vpop.permute.xlu0 %1713  ;;  %1814 = vst.msk [vmem:[#allocation3 + $0xd0] sm:$0xff] %vm1787_vm7, %v1744_v39  ;;  %2944 = vmatprep.mubr.f32.mxu1 %v2423_v12 }
 0x281   : > { %1799 = vst.msk [vmem:[#allocation3 + $0x58] sm:$0xff] %vm1787_vm7, %v1714_v8 }
 0x283   : > { %v2321_v21 = vpop.permute.xlu1 %2320 }
 0x284   : > { %v1905_v47 = vpop.permute.xlu0 %1904  ;;  %v2408_v23 = vld [vmem:[#allocation3 + $0x48] sm:$0xff]  ;;  %2392 = vst.msk [vmem:[#allocation3 + $0xc8] sm:$0xff] %vm2366_vm10, %v2321_v21 }
 0x285   : > { %1991 = vst.msk [vmem:[#allocation3 + $0x50] sm:$0xff] %vm1980_vm8, %v1905_v47  ;;  %2921 = vmatmul.mubr.f32.gmra.mrb[8].mxu0 %v2408_v23 }
 0x287   : > { %v1746_v51 = vpop.permute.xlu1 %1745 }
 0x288   : > { %v1907_v44 = vpop.permute.xlu0 %1906  ;;  %1815 = vst.msk [vmem:[#allocation3 + $0xd8] sm:$0xff] %vm1787_vm7, %v1746_v51 }
 0x289   : > { %1992 = vst.msk [vmem:[#allocation3 + $0x58] sm:$0xff] %vm1980_vm8, %v1907_v44 }
 0x28b   : > { %v1937_v4 = vpop.permute.xlu1 %1936  ;;  %v2424_v33 = vld [vmem:[#allocation3 + $0xc8] sm:$0xff] }
 0x28c   : > { %v2098_v10 = vpop.permute.xlu0 %2097  ;;  %2007 = vst.msk [vmem:[#allocation3 + $0xd0] sm:$0xff] %vm1980_vm8, %v1937_v4  ;;  %2945 = vmatmul.mubr.f32.gmra.mrb[8].mxu1 %v2424_v33 }
 0x28d   : > { %2184 = vst.msk [vmem:[#allocation3 + $0x50] sm:$0xff] %vm2173_vm9, %v2098_v10 }
 0x28f   : > { %v1939_v13 = vpop.permute.xlu1 %1938 }
 0x290   : > { %v1522_v24 = vpop.permute.xlu0 %1521  ;;  %2008 = vst.msk [vmem:[#allocation3 + $0xd8] sm:$0xff] %vm1980_vm8, %v1939_v13 }
 0x291   : > { %1606 = vst.msk [vmem:[#allocation3 + $0x60] sm:$0xff] %vm1593_vm6, %v1522_v24 }
 0x293   : > { %v2130_v22 = vpop.permute.xlu1 %2129 }
 0x294   : > { %v2100_v9 = vpop.permute.xlu0 %2099  ;;  %2200 = vst.msk [vmem:[#allocation3 + $0xd0] sm:$0xff] %vm2173_vm9, %v2130_v22 }
 0x295   : > { %2185 = vst.msk [vmem:[#allocation3 + $0x58] sm:$0xff] %vm2173_vm9, %v2100_v9 }
 0x297   : > { %v1554_v48 = vpop.permute.xlu1 %1553 }
 0x298   : > { %v2291_v34 = vpop.permute.xlu0 %2290  ;;  %1622 = vst.msk [vmem:[#allocation3 + $0xe0] sm:$0xff] %vm1593_vm6, %v1554_v48 }
 0x299   : > { %2377 = vst.msk [vmem:[#allocation3 + $0x50] sm:$0xff] %vm2366_vm10, %v2291_v34 }
 0x29b   : > { %v2132_v14 = vpop.permute.xlu1 %2131 }
 0x29c   : > { %v1524_v62 = vpop.permute.xlu0 %1523  ;;  %2201 = vst.msk [vmem:[#allocation3 + $0xd8] sm:$0xff] %vm2173_vm9, %v2132_v14 }
 0x29d   : > { %1607 = vst.msk [vmem:[#allocation3 + $0x68] sm:$0xff] %vm1593_vm6, %v1524_v62 }
 0x29f   : > { %v2323_v45 = vpop.permute.xlu1 %2322 }
 0x2a0   : > { %v1716_v7 = vpop.permute.xlu0 %1715  ;;  %v2409_v29 = vld [vmem:[#allocation3 + $0x50] sm:$0xff]  ;;  %2393 = vst.msk [vmem:[#allocation3 + $0xd0] sm:$0xff] %vm2366_vm10, %v2323_v45 }
 0x2a1   : > { %1800 = vst.msk [vmem:[#allocation3 + $0x60] sm:$0xff] %vm1787_vm7, %v1716_v7  ;;  %2923 = vmatprep.mubr.f32.mxu0 %v2409_v29 }
 0x2a3   : > { %v1556_v30 = vpop.permute.xlu1 %1555 }
 0x2a4   : > { %v2293_v38 = vpop.permute.xlu0 %2292  ;;  %1623 = vst.msk [vmem:[#allocation3 + $0xe8] sm:$0xff] %vm1593_vm6, %v1556_v30 }
 0x2a5   : > { %2378 = vst.msk [vmem:[#allocation3 + $0x58] sm:$0xff] %vm2366_vm10, %v2293_v38 }
 0x2a7   : > { %v1748_v49 = vpop.permute.xlu1 %1747  ;;  %v2425_v60 = vld [vmem:[#allocation3 + $0xd0] sm:$0xff] }
 0x2a8   : > { %v1718_v61 = vpop.permute.xlu0 %1717  ;;  %1816 = vst.msk [vmem:[#allocation3 + $0xe0] sm:$0xff] %vm1787_vm7, %v1748_v49  ;;  %2947 = vmatprep.mubr.f32.mxu1 %v2425_v60 }
 0x2a9   : > { %1801 = vst.msk [vmem:[#allocation3 + $0x68] sm:$0xff] %vm1787_vm7, %v1718_v61 }
 0x2ab   : > { %v2325_v63 = vpop.permute.xlu1 %2324 }
 0x2ac   : > { %v1909_v0 = vpop.permute.xlu0 %1908  ;;  %v2410_v1 = vld [vmem:[#allocation3 + $0x58] sm:$0xff]  ;;  %2394 = vst.msk [vmem:[#allocation3 + $0xd8] sm:$0xff] %vm2366_vm10, %v2325_v63 }
 0x2ad   : > { %1993 = vst.msk [vmem:[#allocation3 + $0x60] sm:$0xff] %vm1980_vm8, %v1909_v0  ;;  %2924 = vmatmul.mubr.f32.gmra.mrb[10].mxu0 %v2410_v1 }
 0x2af   : > { %v1750_v18 = vpop.permute.xlu1 %1749 }
 0x2b0   : > { %v1911_v19 = vpop.permute.xlu0 %1910  ;;  %1817 = vst.msk [vmem:[#allocation3 + $0xe8] sm:$0xff] %vm1787_vm7, %v1750_v18 }
 0x2b1   : > { %1994 = vst.msk [vmem:[#allocation3 + $0x68] sm:$0xff] %vm1980_vm8, %v1911_v19 }
 0x2b3   : > { %v1941_v52 = vpop.permute.xlu1 %1940  ;;  %v2426_v25 = vld [vmem:[#allocation3 + $0xd8] sm:$0xff] }
 0x2b4   : > { %v2102_v26 = vpop.permute.xlu0 %2101  ;;  %2009 = vst.msk [vmem:[#allocation3 + $0xe0] sm:$0xff] %vm1980_vm8, %v1941_v52  ;;  %2948 = vmatmul.mubr.f32.gmra.mrb[10].mxu1 %v2426_v25 }
 0x2b5   : > { %2186 = vst.msk [vmem:[#allocation3 + $0x60] sm:$0xff] %vm2173_vm9, %v2102_v26 }
 0x2b7   : > { %v1943_v32 = vpop.permute.xlu1 %1942 }
 0x2b8   : > { %v1526_v35 = vpop.permute.xlu0 %1525  ;;  %2010 = vst.msk [vmem:[#allocation3 + $0xe8] sm:$0xff] %vm1980_vm8, %v1943_v32  ;;  %v2910_v36 = vpop.f32.mrb[0].mxu0 }
 0x2b9   : > { %1608 = vst.msk [vmem:[#allocation3 + $0x70] sm:$0xff] %vm1593_vm6, %v1526_v35  ;;  %v2680_v2 = vadd.f32 %v2910_v36, %v4346_v31  ;;  %v2513_v27 = vpop.f32.mrb[1].mxu0 }
 0x2ba   : > { %v2679_v40 = vadd.f32 %v4346_v31, %v2513_v27 }
 0x2bb   : > { %v2134_v41 = vpop.permute.xlu1 %2133  ;;  %2713 = vst.msk [vmem:[%s4354_s23 + $0x8] sm:$0xff] %vm2711_vm11, %v2680_v2 }
 0x2bc   : > { %v2104_v11 = vpop.permute.xlu0 %2103  ;;  %2202 = vst.msk [vmem:[#allocation3 + $0xe0] sm:$0xff] %vm2173_vm9, %v2134_v41 }
 0x2bd   : > { %2712 = vst.msk [vmem:[%s4354_s23] sm:$0xff] %vm2711_vm11, %v2679_v40 }
 0x2be   : > { %2187 = vst.msk [vmem:[#allocation3 + $0x68] sm:$0xff] %vm2173_vm9, %v2104_v11 }
 0x2bf   : > { %v2934_v16 = vpop.f32.mrb[0].mxu1  ;;  %v1558_v54 = vpop.permute.xlu1 %1557 }
 0x2c0   : > { %v2696_v28 = vadd.f32 %v2934_v16, %v4346_v31  ;;  %1624 = vst.msk [vmem:[#allocation3 + $0xf0] sm:$0xff] %vm1593_vm6, %v1558_v54  ;;  %v2593_v55 = vpop.f32.mrb[1].mxu1  ;;  %v2295_v15 = vpop.permute.xlu0 %2294 }
 0x2c1   : > { %v2695_v59 = vadd.f32 %v4346_v31, %v2593_v55  ;;  %2379 = vst.msk [vmem:[#allocation3 + $0x60] sm:$0xff] %vm2366_vm10, %v2295_v15 }
 0x2c2   : > { %2729 = vst.msk [vmem:[%s4354_s23 + $0x88] sm:$0xff] %vm2711_vm11, %v2696_v28 }
 0x2c3   : > { %2728 = vst.msk [vmem:[%s4354_s23 + $0x80] sm:$0xff] %vm2711_vm11, %v2695_v59  ;;  %v2136_v20 = vpop.permute.xlu1 %2135 }
 0x2c4   : > { %2203 = vst.msk [vmem:[#allocation3 + $0xe8] sm:$0xff] %vm2173_vm9, %v2136_v20  ;;  %v1528_v17 = vpop.permute.xlu0 %1527 }
 0x2c5   : > { %1609 = vst.msk [vmem:[#allocation3 + $0x78] sm:$0xff] %vm1593_vm6, %v1528_v17 }
 0x2c7   : > { %v2327_v43 = vpop.permute.xlu1 %2326 }
 0x2c8   : > { %2395 = vst.msk [vmem:[#allocation3 + $0xe0] sm:$0xff] %vm2366_vm10, %v2327_v43  ;;  %v1720_v5 = vpop.permute.xlu0 %1719  ;;  %v2411_v53 = vld [vmem:[#allocation3 + $0x60] sm:$0xff] }
 0x2c9   : > { %1802 = vst.msk [vmem:[#allocation3 + $0x70] sm:$0xff] %vm1787_vm7, %v1720_v5  ;;  %2926 = vmatprep.mubr.f32.mxu0 %v2411_v53 }
 0x2cb   : > { %v1560_v42 = vpop.permute.xlu1 %1559 }
 0x2cc   : > { %1625 = vst.msk [vmem:[#allocation3 + $0xf8] sm:$0xff] %vm1593_vm6, %v1560_v42  ;;  %v2297_v58 = vpop.permute.xlu0 %2296 }
 0x2cd   : > { %2380 = vst.msk [vmem:[#allocation3 + $0x68] sm:$0xff] %vm2366_vm10, %v2297_v58 }
 0x2cf   : > { %v1752_v6 = vpop.permute.xlu1 %1751  ;;  %v2427_v37 = vld [vmem:[#allocation3 + $0xe0] sm:$0xff] }
 0x2d0   : > { %1818 = vst.msk [vmem:[#allocation3 + $0xf0] sm:$0xff] %vm1787_vm7, %v1752_v6  ;;  %2950 = vmatprep.mubr.f32.mxu1 %v2427_v37  ;;  %v1722_v46 = vpop.permute.xlu0 %1721 }
 0x2d1   : > { %1803 = vst.msk [vmem:[#allocation3 + $0x78] sm:$0xff] %vm1787_vm7, %v1722_v46 }
 0x2d3   : > { %v2329_v56 = vpop.permute.xlu1 %2328 }
 0x2d4   : > { %2396 = vst.msk [vmem:[#allocation3 + $0xe8] sm:$0xff] %vm2366_vm10, %v2329_v56  ;;  %v1913_v57 = vpop.permute.xlu0 %1912  ;;  %v2412_v50 = vld [vmem:[#allocation3 + $0x68] sm:$0xff] }
 0x2d5   : > { %1995 = vst.msk [vmem:[#allocation3 + $0x70] sm:$0xff] %vm1980_vm8, %v1913_v57  ;;  %2927 = vmatmul.mubr.f32.gmra.mrb[12].mxu0 %v2412_v50 }
 0x2d7   : > { %v1754_v3 = vpop.permute.xlu1 %1753 }
 0x2d8   : > { %1819 = vst.msk [vmem:[#allocation3 + $0xf8] sm:$0xff] %vm1787_vm7, %v1754_v3  ;;  %v1915_v39 = vpop.permute.xlu0 %1914 }
 0x2d9   : > { %1996 = vst.msk [vmem:[#allocation3 + $0x78] sm:$0xff] %vm1980_vm8, %v1915_v39 }
 0x2db   : > { %v1945_v12 = vpop.permute.xlu1 %1944  ;;  %v2428_v8 = vld [vmem:[#allocation3 + $0xe8] sm:$0xff] }
 0x2dc   : > { %2011 = vst.msk [vmem:[#allocation3 + $0xf0] sm:$0xff] %vm1980_vm8, %v1945_v12  ;;  %2951 = vmatmul.mubr.f32.gmra.mrb[12].mxu1 %v2428_v8  ;;  %v2106_v21 = vpop.permute.xlu0 %2105 }
 0x2dd   : > { %2188 = vst.msk [vmem:[#allocation3 + $0x70] sm:$0xff] %vm2173_vm9, %v2106_v21 }
 0x2df   : > { %v1947_v47 = vpop.permute.xlu1 %1946 }
 0x2e0   : > { %v2913_v23 = vpop.f32.mrb[2].mxu0  ;;  %2012 = vst.msk [vmem:[#allocation3 + $0xf8] sm:$0xff] %vm1980_vm8, %v1947_v47  ;;  %v2108_v51 = vpop.permute.xlu0 %2107 }
 0x2e1   : > { %v2682_v44 = vadd.f32 %v2913_v23, %v4346_v31  ;;  %v2523_v4 = vpop.f32.mrb[3].mxu0  ;;  %2189 = vst.msk [vmem:[#allocation3 + $0x78] sm:$0xff] %vm2173_vm9, %v2108_v51 }
 0x2e2   : > { %v2681_v33 = vadd.f32 %v4346_v31, %v2523_v4 }
 0x2e3   : > { %2715 = vst.msk [vmem:[%s4354_s23 + $0x18] sm:$0xff] %vm2711_vm11, %v2682_v44  ;;  %v2138_v10 = vpop.permute.xlu1 %2137 }
 0x2e4   : > { %2714 = vst.msk [vmem:[%s4354_s23 + $0x10] sm:$0xff] %vm2711_vm11, %v2681_v33  ;;  %v2299_v13 = vpop.permute.xlu0 %2298 }
 0x2e5   : > { %2204 = vst.msk [vmem:[#allocation3 + $0xf0] sm:$0xff] %vm2173_vm9, %v2138_v10 }
 0x2e6   : > { %2381 = vst.msk [vmem:[#allocation3 + $0x70] sm:$0xff] %vm2366_vm10, %v2299_v13 }
 0x2e7   : > { %v2937_v24 = vpop.f32.mrb[2].mxu1  ;;  %v2140_v22 = vpop.permute.xlu1 %2139 }
 0x2e8   : > { %v2698_v9 = vadd.f32 %v2937_v24, %v4346_v31  ;;  %2205 = vst.msk [vmem:[#allocation3 + $0xf8] sm:$0xff] %vm2173_vm9, %v2140_v22  ;;  %v2603_v48 = vpop.f32.mrb[3].mxu1  ;;  %v2301_v34 = vpop.permute.xlu0 %2300 }
 0x2e9   : > { %v2697_v14 = vadd.f32 %v4346_v31, %v2603_v48  ;;  %2382 = vst.msk [vmem:[#allocation3 + $0x78] sm:$0xff] %vm2366_vm10, %v2301_v34 }
 0x2ea   : > { %2731 = vst.msk [vmem:[%s4354_s23 + $0x98] sm:$0xff] %vm2711_vm11, %v2698_v9 }
 0x2eb   : > { %2730 = vst.msk [vmem:[%s4354_s23 + $0x90] sm:$0xff] %vm2711_vm11, %v2697_v14  ;;  %v2331_v62 = vpop.permute.xlu1 %2330 }
 0x2ec   : > { %2397 = vst.msk [vmem:[#allocation3 + $0xf0] sm:$0xff] %vm2366_vm10, %v2331_v62 }
 0x2ed   : > { %v2413_v45 = vld [vmem:[#allocation3 + $0x70] sm:$0xff] }
 0x2ee   : > { %2929 = vmatprep.mubr.f32.mxu0 %v2413_v45 }
 0x2ef   : > { %v2333_v7 = vpop.permute.xlu1 %2332 }
 0x2f0   : > { %2398 = vst.msk [vmem:[#allocation3 + $0xf8] sm:$0xff] %vm2366_vm10, %v2333_v7  ;;  %v2414_v29 = vld [vmem:[#allocation3 + $0x78] sm:$0xff] }
 0x2f1   : > { %2930 = vmatmul.mubr.f32.gmra.mrb[14].mxu0 %v2414_v29 }
 0x2f3   : > { %v2429_v30 = vld [vmem:[#allocation3 + $0xf0] sm:$0xff] }
 0x2f4   : > { %2953 = vmatprep.mubr.f32.mxu1 %v2429_v30 }
 0x2f7   : > { %v2430_v38 = vld [vmem:[#allocation3 + $0xf8] sm:$0xff] }
 0x2f8   : > { %2954 = vmatmul.mubr.f32.gmra.mrb[14].mxu1 %v2430_v38 }
 0x308   : > { %v2916_v49 = vpop.f32.mrb[4].mxu0 }
 0x309   : > { %v2684_v60 = vadd.f32 %v2916_v49, %v4346_v31  ;;  %v2533_v61 = vpop.f32.mrb[5].mxu0 }
 0x30a   : > { %v2683_v63 = vadd.f32 %v4346_v31, %v2533_v61 }
 0x30b   : > { %2717 = vst.msk [vmem:[%s4354_s23 + $0x28] sm:$0xff] %vm2711_vm11, %v2684_v60 }
 0x30c   : > { %2716 = vst.msk [vmem:[%s4354_s23 + $0x20] sm:$0xff] %vm2711_vm11, %v2683_v63 }
 0x30f   : > { %v2940_v0 = vpop.f32.mrb[4].mxu1 }
 0x310   : > { %v2700_v1 = vadd.f32 %v2940_v0, %v4346_v31  ;;  %v2613_v18 = vpop.f32.mrb[5].mxu1 }
 0x311   : > { %v2699_v19 = vadd.f32 %v4346_v31, %v2613_v18 }
 0x312   : > { %2733 = vst.msk [vmem:[%s4354_s23 + $0xa8] sm:$0xff] %vm2711_vm11, %v2700_v1 }
 0x313   : > { %2732 = vst.msk [vmem:[%s4354_s23 + $0xa0] sm:$0xff] %vm2711_vm11, %v2699_v19 }
 0x330   : > { %v2919_v52 = vpop.f32.mrb[6].mxu0 }
 0x331   : > { %v2686_v25 = vadd.f32 %v2919_v52, %v4346_v31  ;;  %v2543_v26 = vpop.f32.mrb[7].mxu0 }
 0x332   : > { %v2685_v32 = vadd.f32 %v4346_v31, %v2543_v26 }
 0x333   : > { %2719 = vst.msk [vmem:[%s4354_s23 + $0x38] sm:$0xff] %vm2711_vm11, %v2686_v25 }
 0x334   : > { %2718 = vst.msk [vmem:[%s4354_s23 + $0x30] sm:$0xff] %vm2711_vm11, %v2685_v32 }
 0x337   : > { %v2943_v35 = vpop.f32.mrb[6].mxu1 }
 0x338   : > { %v2702_v36 = vadd.f32 %v2943_v35, %v4346_v31  ;;  %v2623_v2 = vpop.f32.mrb[7].mxu1 }
 0x339   : > { %v2701_v27 = vadd.f32 %v4346_v31, %v2623_v2 }
 0x33a   : > { %2735 = vst.msk [vmem:[%s4354_s23 + $0xb8] sm:$0xff] %vm2711_vm11, %v2702_v36 }
 0x33b   : > { %2734 = vst.msk [vmem:[%s4354_s23 + $0xb0] sm:$0xff] %vm2711_vm11, %v2701_v27 }
 0x358   : > { %v2922_v40 = vpop.f32.mrb[8].mxu0 }
 0x359   : > { %v2688_v41 = vadd.f32 %v2922_v40, %v4346_v31  ;;  %v2553_v11 = vpop.f32.mrb[9].mxu0 }
 0x35a   : > { %v2687_v16 = vadd.f32 %v4346_v31, %v2553_v11 }
 0x35b   : > { %2721 = vst.msk [vmem:[%s4354_s23 + $0x48] sm:$0xff] %vm2711_vm11, %v2688_v41 }
 0x35c   : > { %2720 = vst.msk [vmem:[%s4354_s23 + $0x40] sm:$0xff] %vm2711_vm11, %v2687_v16 }
 0x35f   : > { %v2946_v54 = vpop.f32.mrb[8].mxu1 }
 0x360   : > { %v2704_v28 = vadd.f32 %v2946_v54, %v4346_v31  ;;  %v2633_v55 = vpop.f32.mrb[9].mxu1 }
 0x361   : > { %v2703_v15 = vadd.f32 %v4346_v31, %v2633_v55 }
 0x362   : > { %2737 = vst.msk [vmem:[%s4354_s23 + $0xc8] sm:$0xff] %vm2711_vm11, %v2704_v28 }
 0x363   : > { %2736 = vst.msk [vmem:[%s4354_s23 + $0xc0] sm:$0xff] %vm2711_vm11, %v2703_v15 }
 0x380   : > { %v2925_v59 = vpop.f32.mrb[10].mxu0 }
 0x381   : > { %v2690_v20 = vadd.f32 %v2925_v59, %v4346_v31  ;;  %v2563_v17 = vpop.f32.mrb[11].mxu0 }
 0x382   : > { %v2689_v43 = vadd.f32 %v4346_v31, %v2563_v17 }
 0x383   : > { %2723 = vst.msk [vmem:[%s4354_s23 + $0x58] sm:$0xff] %vm2711_vm11, %v2690_v20 }
 0x384   : > { %2722 = vst.msk [vmem:[%s4354_s23 + $0x50] sm:$0xff] %vm2711_vm11, %v2689_v43 }
 0x387   : > { %v2949_v5 = vpop.f32.mrb[10].mxu1 }
 0x388   : > { %v2706_v53 = vadd.f32 %v2949_v5, %v4346_v31  ;;  %v2643_v42 = vpop.f32.mrb[11].mxu1 }
 0x389   : > { %v2705_v58 = vadd.f32 %v4346_v31, %v2643_v42 }
 0x38a   : > { %2739 = vst.msk [vmem:[%s4354_s23 + $0xd8] sm:$0xff] %vm2711_vm11, %v2706_v53 }
 0x38b   : > { %2738 = vst.msk [vmem:[%s4354_s23 + $0xd0] sm:$0xff] %vm2711_vm11, %v2705_v58 }
 0x3a8   : > { %v2928_v6 = vpop.f32.mrb[12].mxu0 }
 0x3a9   : > { %v2692_v37 = vadd.f32 %v2928_v6, %v4346_v31  ;;  %v2573_v46 = vpop.f32.mrb[13].mxu0 }
 0x3aa   : > { %v2691_v56 = vadd.f32 %v4346_v31, %v2573_v46 }
 0x3ab   : > { %2725 = vst.msk [vmem:[%s4354_s23 + $0x68] sm:$0xff] %vm2711_vm11, %v2692_v37 }
 0x3ac   : > { %2724 = vst.msk [vmem:[%s4354_s23 + $0x60] sm:$0xff] %vm2711_vm11, %v2691_v56 }
 0x3af   : > { %v2952_v57 = vpop.f32.mrb[12].mxu1 }
 0x3b0   : > { %v2708_v50 = vadd.f32 %v2952_v57, %v4346_v31  ;;  %v2653_v3 = vpop.f32.mrb[13].mxu1 }
 0x3b1   : > { %v2707_v39 = vadd.f32 %v4346_v31, %v2653_v3 }
 0x3b2   : > { %2741 = vst.msk [vmem:[%s4354_s23 + $0xe8] sm:$0xff] %vm2711_vm11, %v2708_v50 }
 0x3b3   : > { %2740 = vst.msk [vmem:[%s4354_s23 + $0xe0] sm:$0xff] %vm2711_vm11, %v2707_v39 }
 0x3c4   : > { %v2931_v12 = vpop.f32.mrb[14].mxu0 }
 0x3c5   : > { %v2694_v8 = vadd.f32 %v2931_v12, %v4346_v31  ;;  %v2583_v21 = vpop.f32.mrb[15].mxu0 }
 0x3c6   : > { %v2693_v47 = vadd.f32 %v4346_v31, %v2583_v21 }
 0x3c7   : > { %2727 = vst.msk [vmem:[%s4354_s23 + $0x78] sm:$0xff] %vm2711_vm11, %v2694_v8 }
 0x3c8   : > { %2726 = vst.msk [vmem:[%s4354_s23 + $0x70] sm:$0xff] %vm2711_vm11, %v2693_v47 }
 0x3cb   : > { %v2955_v23 = vpop.f32.mrb[14].mxu1 }
 0x3cc   : > { %v2710_v51 = vadd.f32 %v2955_v23, %v4346_v31  ;;  %v2663_v44 = vpop.f32.mrb[15].mxu1 }
 0x3cd   : > { %v2709_v4 = vadd.f32 %v4346_v31, %v2663_v44 }
 0x3ce   : > { %2743 = vst.msk [vmem:[%s4354_s23 + $0xf8] sm:$0xff] %vm2711_vm11, %v2710_v51 }
 0x3cf   : > { %2742 = vst.msk [vmem:[%s4354_s23 + $0xf0] sm:$0xff] %vm2711_vm11, %v2709_v4 }
 0x3d0 PF: > { %s17_s24 = sadd.s32 1, %s3028_s24  }
 0x3d1   : > { %p14_p4 = scmp.ge.s32.totalorder %s17_s24, 4  }
 0x3d3   :  { %16 = sbr.rel (!%p14_p4) target bundleno = 1 (0x1), region = 83 }

// kernel: resnet_block_forward.4
= control target key start
LH: loop header
LB: loop body
LE: loop exit
PB: predicated region body
PF: predicated region fallthrough
CT: control target
= control target key end

     0   :  { %s3070_s24 = smov 0   ;;  %s4400_s0 = inlined_call_operand.vmem [shape: f32[16,4], index: 0, kind: input, shape index: {}]   ;;  %s4401_s1 = inlined_call_operand.vmem [shape: f32[1,4], index: 1, kind: input, shape index: {}]   ;;  %s4402_s2 = inlined_call_operand.vmem [shape: f32[1,4], index: 2, kind: input, shape index: {}]   ;;  %s4403_s3 = inlined_call_operand.vmem [shape: f32[128,128], index: 3, kind: input, shape index: {}]   ;;  %s4404_s4 = inlined_call_operand.vmem [shape: f32[1,4], index: 4, kind: input, shape index: {}]   ;;  %s4405_s5 = inlined_call_operand.vmem [shape: f32[2,16,16,4], index: 5, kind: input, shape index: {}]   ;;  %s4406_s6 = inlined_call_operand.vmem [shape: f32[2,16,16,4], index: 6, kind: output, shape index: {0}]   ;;  %s4407_s7 = inlined_call_operand.vmem [shape: f32[16,4], index: 7, kind: output, shape index: {1}]  }
   0x1 LB: > { %s3076_s25 = sadd.s32 4294967295, %s3018_s24   ;;  %p2802_p0 = scmp.ge.s32.totalorder %s3018_s24, 1  ;;  %s3018_s24 = sphi %s3070_s24, %s18_s24  }
   0x2   : > { %p235_p1 = scmp.lt.s32.totalorder %s3018_s24, 3 }
   0x4   : > { %p236_p2 = pnand %p2802_p0, %p235_p1 }
   0x5   : > { %p267_p3 = scmp.lt.s32.totalorder (!%p236_p2), %s3076_s25, 1  ;;  %p2807_p4 = scmp.ne.s32.totalorder (!%p236_p2), %s3076_s25, 0 }
   0x6   : > { %239 = sbr.rel (%p236_p2) target bundleno = 984 (0x3d8), region = 44 }
   0xd   : > { %s268_s26 = scalar_select %p267_p3, %s3076_s25, 1 }
   0xe   : > { %280 = sbr.rel (%p2807_p4) target bundleno = 21 (0x15), region = 48  ;;  %vm281_vm0 = vcmask (!%p2807_p4), 31744   ;;  %v3020_v0 = vmov (!%p2807_p4), 0.0  }
   0xf   : > { %s2812_s27 = sshll.u32 %s268_s26, 8  ;;  %282 = vst.msk [vmem:[%s4407_s7] sm:$0xff] (!%p2807_p4), %vm281_vm0, %v3020_v0  ;;  %283 = vst.msk [vmem:[%s4407_s7 + $0x8] sm:$0xff] (!%p2807_p4), %vm281_vm0, %v3020_v0 }
  0x10   : > { %s3085_s30 = scalar_lea.vmem %s4405_s5, %s2812_s27  ;;  %s3090_s10 = scalar_lea.vmem %s4406_s6, %s2812_s27 }
  0x15 PF: > { %vm461_vm1 = vcmask 31744   ;;  %vm464_vm2 = vcmask 25600   ;;  %v323_v1 = vlaneseq  ;;  %v3021_v2 = vmov 0.0   ;;  %v316_v3 = vld [vmem:[%s4400_s0] sm:$0x1]  ;;  %v286_v12 = vld [vmem:[%s3085_s30 + $0x10] sm:$0xff] }
  0x16   : > { %462 = vst.msk [vmem:[#allocation2] sm:$0xff] %vm461_vm1, %v3021_v2  ;;  %463 = vst.msk [vmem:[#allocation2 + $0x8] sm:$0xff] %vm461_vm1, %v3021_v2  ;;  %v317_v4 = vld [vmem:[%s4400_s0 + $0x1] sm:$0x1]  ;;  %v318_v5 = vld [vmem:[%s4401_s1] sm:$0x1] }
  0x17   : > { %466 = vst.msk [vmem:[#allocation2 + $0x18] sm:$0xff] %vm461_vm1, %v3021_v2  ;;  %467 = vst.msk [vmem:[#allocation2 + $0x20] sm:$0xff] %vm461_vm1, %v3021_v2  ;;  %v319_v6 = vmul.f32 %v318_v5, %v317_v4  ;;  %v324_v7 = vshrl.u32 %v323_v1, 7  ;;  %v320_v8 = vld [vmem:[%s4402_s2] sm:$0x1]  ;;  %v285_v13 = vld [vmem:[%s3085_s30 + $0x8] sm:$0xff] }
  0x18   : > { %469 = vst.msk [vmem:[#allocation2 + $0x30] sm:$0xff] %vm461_vm1, %v3021_v2  ;;  %470 = vst.msk [vmem:[#allocation2 + $0x38] sm:$0xff] %vm461_vm1, %v3021_v2  ;;  %v284_v9 = vld [vmem:[%s3085_s30] sm:$0xff]  ;;  %v287_v17 = vld [vmem:[%s3085_s30 + $0x18] sm:$0xff]  ;;  %s3022_s23 = smov 4   ;;  %s3023_s26 = smov 8  }
  0x19   : > { %472 = vst.msk [vmem:[#allocation2 + $0x48] sm:$0xff] %vm461_vm1, %v3021_v2  ;;  %473 = vst.msk [vmem:[#allocation2 + $0x50] sm:$0xff] %vm461_vm1, %v3021_v2  ;;  %v321_v10 = vmul.f32 %v319_v6, %v316_v3  ;;  %v325_v11 = vsub.s32 0, %v324_v7  ;;  %v288_v14 = vld [vmem:[%s3085_s30 + $0x20] sm:$0xff]  ;;  %v290_v18 = vld [vmem:[%s3085_s30 + $0x30] sm:$0xff]  ;;  %vm806_vm3 = vcmask 64544  }
  0x1a   : > { %475 = vst.msk [vmem:[#allocation2 + $0x60] sm:$0xff] %vm461_vm1, %v3021_v2  ;;  %476 = vst.msk [vmem:[#allocation2 + $0x68] sm:$0xff] %vm461_vm1, %v3021_v2  ;;  %v289_v19 = vld [vmem:[%s3085_s30 + $0x28] sm:$0xff]  ;;  %v292_v20 = vld [vmem:[%s3085_s30 + $0x40] sm:$0xff]  ;;  %s3024_s27 = smov 12   ;;  %s3025_s19 = smov 16  }
  0x1b   : > { %478 = vst.msk [vmem:[#allocation2 + $0x78] sm:$0xff] %vm461_vm1, %v3021_v2  ;;  %479 = vst.msk [vmem:[#allocation2 + $0x80] sm:$0xff] %vm461_vm1, %v3021_v2  ;;  %v322_v15 = vsub.f32 %v320_v8, %v321_v10  ;;  %v3256_v16 = vrot.slane %v319_v6, %v325_v11  ;;  %v291_v35 = vld [vmem:[%s3085_s30 + $0x38] sm:$0xff]  ;;  %v294_v40 = vld [vmem:[%s3085_s30 + $0x50] sm:$0xff]  ;;  %s3027_s11 = smov 24   ;;  %s3028_s21 = smov 28  }
  0x1c   : > { %481 = vst.msk [vmem:[#allocation2 + $0x90] sm:$0xff] %vm461_vm1, %v3021_v2  ;;  %482 = vst.msk [vmem:[#allocation2 + $0x98] sm:$0xff] %vm461_vm1, %v3021_v2  ;;  %v293_v41 = vld [vmem:[%s3085_s30 + $0x48] sm:$0xff]  ;;  %v296_v54 = vld [vmem:[%s3085_s30 + $0x60] sm:$0xff]  ;;  %s3029_s22 = smov 32   ;;  %vm999_vm4 = vcmask 97344  }
  0x1d   : > { %484 = vst.msk [vmem:[#allocation2 + $0xa8] sm:$0xff] %vm461_vm1, %v3021_v2  ;;  %485 = vst.msk [vmem:[#allocation2 + $0xb0] sm:$0xff] %vm461_vm1, %v3021_v2  ;;  %v646_v21 = vld [vmem:[#allocation2 + $0x1] sm:$0xff]  ;;  %v327_v22 = vmul.f32 %v3256_v16, %v284_v9  ;;  %v3263_v23 = vrot.slane %v322_v15, %v325_v11  ;;  %v329_v24 = vmul.f32 %v3256_v16, %v286_v12  ;;  %v295_v55 = vld [vmem:[%s3085_s30 + $0x58] sm:$0xff]  ;;  %vm1192_vm5 = vcmask 130144   ;;  %p2809_p5 = scmp.ne.s32.totalorder %s3076_s25, 1 }
  0x1e   : > { %487 = vst.msk [vmem:[#allocation2 + $0xc0] sm:$0xff] %vm461_vm1, %v3021_v2  ;;  %488 = vst.msk [vmem:[#allocation2 + $0xc8] sm:$0xff] %vm461_vm1, %v3021_v2  ;;  %v328_v25 = vmul.f32 %v3256_v16, %v285_v13  ;;  %710 = vrot.lane.b32.xlu0 %v646_v21, %s3022_s23  ;;  %v331_v26 = vmul.f32 %v3256_v16, %v288_v14  ;;  %v330_v27 = vmul.f32 %v3256_v16, %v287_v17  ;;  %v298_v56 = vld [vmem:[%s3085_s30 + $0x70] sm:$0xff]  ;;  %v297_v61 = vld [vmem:[%s3085_s30 + $0x68] sm:$0xff]  ;;  %vm1385_vm6 = vcmask 162944  }
  0x1f   : > { %490 = vst.msk [vmem:[#allocation2 + $0xd8] sm:$0xff] %vm461_vm1, %v3021_v2  ;;  %491 = vst.msk [vmem:[#allocation2 + $0xe0] sm:$0xff] %vm461_vm1, %v3021_v2  ;;  %v333_v28 = vmul.f32 %v3256_v16, %v290_v18  ;;  %v332_v29 = vmul.f32 %v3256_v16, %v289_v19  ;;  %v365_v31 = vadd.f32 %v3263_v23, %v327_v22  ;;  %v582_v62 = vld [vmem:[#allocation2] sm:$0xff]  ;;  %v583_v63 = vld [vmem:[#allocation2 + $0x8] sm:$0xff]  ;;  %vm1578_vm7 = vcmask 195744  }
  0x20   : > { %493 = vst.msk [vmem:[#allocation2 + $0xf0] sm:$0xff] %vm461_vm1, %v3021_v2  ;;  %494 = vst.msk [vmem:[#allocation2 + $0xf8] sm:$0xff] %vm461_vm1, %v3021_v2  ;;  %v367_v32 = vadd.f32 %v3263_v23, %v329_v24  ;;  %v366_v33 = vadd.f32 %v3263_v23, %v328_v25  ;;  %v335_v34 = vmul.f32 %v3256_v16, %v292_v20  ;;  %v300_v4 = vld [vmem:[%s3085_s30 + $0x80] sm:$0xff]  ;;  %v299_v18 = vld [vmem:[%s3085_s30 + $0x78] sm:$0xff]  ;;  %vm1772_vm8 = vcmask 228544  }
  0x21   : > { %496 = vst.msk [vmem:[#allocation2 + $0x108] sm:$0xff] %vm461_vm1, %v3021_v2  ;;  %497 = vst.msk [vmem:[#allocation2 + $0x110] sm:$0xff] %vm461_vm1, %v3021_v2  ;;  %v369_v36 = vadd.f32 %v3263_v23, %v331_v26  ;;  %v368_v37 = vadd.f32 %v3263_v23, %v330_v27  ;;  %v371_v38 = vadd.f32 %v3263_v23, %v333_v28  ;;  %v397_v42 = vmul.f32 0.3, %v365_v31  ;;  %v302_v24 = vld [vmem:[%s3085_s30 + $0x90] sm:$0xff]  ;;  %v301_v25 = vld [vmem:[%s3085_s30 + $0x88] sm:$0xff] }
  0x22   : > { %499 = vst.msk [vmem:[#allocation2 + $0x120] sm:$0xff] %vm461_vm1, %v3021_v2  ;;  %500 = vst.msk [vmem:[#allocation2 + $0x128] sm:$0xff] %vm461_vm1, %v3021_v2  ;;  %v370_v39 = vadd.f32 %v3263_v23, %v332_v29  ;;  %v399_v43 = vmul.f32 0.3, %v367_v32  ;;  %v398_v44 = vmul.f32 0.3, %v366_v33  ;;  %v373_v45 = vadd.f32 %v3263_v23, %v335_v34 }
  0x23   : > { %502 = vst.msk [vmem:[#allocation2 + $0x138] sm:$0xff] %vm461_vm1, %v3021_v2  ;;  %503 = vst.msk [vmem:[#allocation2 + $0x140] sm:$0xff] %vm461_vm1, %v3021_v2  ;;  %v401_v46 = vmul.f32 0.3, %v369_v36  ;;  %v400_v47 = vmul.f32 0.3, %v368_v37  ;;  %v334_v49 = vmul.f32 %v3256_v16, %v291_v35  ;;  %v429_v50 = vmax.f32 %v365_v31, %v397_v42 }
  0x24   : > { %505 = vst.msk [vmem:[#allocation2 + $0x150] sm:$0xff] %vm461_vm1, %v3021_v2  ;;  %506 = vst.msk [vmem:[#allocation2 + $0x158] sm:$0xff] %vm461_vm1, %v3021_v2  ;;  %v403_v48 = vmul.f32 0.3, %v371_v38  ;;  %v431_v51 = vmax.f32 %v367_v32, %v399_v43  ;;  %v430_v52 = vmax.f32 %v366_v33, %v398_v44  ;;  %v402_v53 = vmul.f32 0.3, %v370_v39 }
  0x25   : > { %508 = vst.msk [vmem:[#allocation2 + $0x168] sm:$0xff] %vm461_vm1, %v3021_v2  ;;  %509 = vst.msk [vmem:[#allocation2 + $0x170] sm:$0xff] %vm461_vm1, %v3021_v2  ;;  %v433_v57 = vmax.f32 %v369_v36, %v401_v46  ;;  %v432_v58 = vmax.f32 %v368_v37, %v400_v47  ;;  %v405_v60 = vmul.f32 0.3, %v373_v45  ;;  %v372_v1 = vadd.f32 %v3263_v23, %v334_v49  ;;  %v304_v34 = vld [vmem:[%s3085_s30 + $0xa0] sm:$0xff]  ;;  %v303_v35 = vld [vmem:[%s3085_s30 + $0x98] sm:$0xff] }
  0x26   : > { %511 = vst.msk [vmem:[#allocation2 + $0x180] sm:$0xff] %vm461_vm1, %v3021_v2  ;;  %512 = vst.msk [vmem:[#allocation2 + $0x188] sm:$0xff] %vm461_vm1, %v3021_v2  ;;  %v435_v59 = vmax.f32 %v371_v38, %v403_v48  ;;  %v434_v0 = vmax.f32 %v370_v39, %v402_v53  ;;  %v336_v3 = vmul.f32 %v3256_v16, %v293_v41  ;;  %v306_v36 = vld [vmem:[%s3085_s30 + $0xb0] sm:$0xff]  ;;  %v305_v43 = vld [vmem:[%s3085_s30 + $0xa8] sm:$0xff]  ;;  %vm1965_vm9 = vcmask 261344  }
  0x27   : > { %514 = vst.msk [vmem:[#allocation2 + $0x198] sm:$0xff] %vm461_vm1, %v3021_v2  ;;  %515 = vst.msk [vmem:[#allocation2 + $0x1a0] sm:$0xff] %vm461_vm1, %v3021_v2  ;;  %v437_v5 = vmax.f32 %v373_v45, %v405_v60  ;;  %v339_v6 = vmul.f32 %v3256_v16, %v296_v54  ;;  %v338_v7 = vmul.f32 %v3256_v16, %v295_v55  ;;  %v404_v9 = vmul.f32 0.3, %v372_v1  ;;  %v308_v47 = vld [vmem:[%s3085_s30 + $0xc0] sm:$0xff] }
  0x28   : > { %550 = vst [vmem:[#allocation3] sm:$0xff] %v3021_v2  ;;  %551 = vst [vmem:[#allocation3 + $0x8] sm:$0xff] %v3021_v2  ;;  %v341_v8 = vmul.f32 %v3256_v16, %v298_v56  ;;  %v374_v11 = vadd.f32 %v3263_v23, %v336_v3  ;;  %v340_v12 = vmul.f32 %v3256_v16, %v297_v61  ;;  %vm2158_vm10 = vcmask 294144  }
  0x29   : > { %552 = vst [vmem:[#allocation3 + $0x10] sm:$0xff] %v3021_v2  ;;  %553 = vst [vmem:[#allocation3 + $0x18] sm:$0xff] %v3021_v2  ;;  %v377_v13 = vadd.f32 %v3263_v23, %v339_v6  ;;  %v376_v14 = vadd.f32 %v3263_v23, %v338_v7  ;;  %v343_v17 = vmul.f32 %v3256_v16, %v300_v4  ;;  %v310_v4 = vld [vmem:[%s3085_s30 + $0xd0] sm:$0xff]  ;;  %vm2724_vm11 = vcmask (!%p2809_p5), 24576  }
  0x2a   : > { %554 = vst [vmem:[#allocation3 + $0x20] sm:$0xff] %v3021_v2  ;;  %555 = vst [vmem:[#allocation3 + $0x28] sm:$0xff] %v3021_v2  ;;  %v379_v15 = vadd.f32 %v3263_v23, %v341_v8  ;;  %v436_v19 = vmax.f32 %v372_v1, %v404_v9  ;;  %v406_v21 = vmul.f32 0.3, %v374_v11  ;;  %v378_v22 = vadd.f32 %v3263_v23, %v340_v12 }
  0x2b   : > { %556 = vst [vmem:[#allocation3 + $0x30] sm:$0xff] %v3021_v2  ;;  %557 = vst [vmem:[#allocation3 + $0x38] sm:$0xff] %v3021_v2  ;;  %v409_v26 = vmul.f32 0.3, %v377_v13  ;;  %v408_v27 = vmul.f32 0.3, %v376_v14  ;;  %v381_v29 = vadd.f32 %v3263_v23, %v343_v17  ;;  %v342_v33 = vmul.f32 %v3256_v16, %v299_v18 }
  0x2c   : > { %558 = vst [vmem:[#allocation3 + $0x40] sm:$0xff] %v3021_v2  ;;  %559 = vst [vmem:[#allocation3 + $0x48] sm:$0xff] %v3021_v2  ;;  %v411_v28 = vmul.f32 0.3, %v379_v15  ;;  %v438_v31 = vmax.f32 %v374_v11, %v406_v21  ;;  %v410_v32 = vmul.f32 0.3, %v378_v22  ;;  %v345_v46 = vmul.f32 %v3256_v16, %v302_v24 }
  0x2d   : > { %560 = vst [vmem:[#allocation3 + $0x50] sm:$0xff] %v3021_v2  ;;  %561 = vst [vmem:[#allocation3 + $0x58] sm:$0xff] %v3021_v2  ;;  %v441_v39 = vmax.f32 %v377_v13, %v409_v26  ;;  %v413_v42 = vmul.f32 0.3, %v381_v29  ;;  %v380_v45 = vadd.f32 %v3263_v23, %v342_v33  ;;  %v346_v53 = vmul.f32 %v3256_v16, %v303_v35  ;;  %v311_v26 = vld [vmem:[%s3085_s30 + $0xd8] sm:$0xff] }
  0x2e   : > { %562 = vst [vmem:[#allocation3 + $0x60] sm:$0xff] %v3021_v2  ;;  %563 = vst [vmem:[#allocation3 + $0x68] sm:$0xff] %v3021_v2  ;;  %v443_v41 = vmax.f32 %v379_v15, %v411_v28  ;;  %v442_v44 = vmax.f32 %v378_v22, %v410_v32  ;;  %v383_v55 = vadd.f32 %v3263_v23, %v345_v46 }
  0x2f   : > { %564 = vst [vmem:[#allocation3 + $0x70] sm:$0xff] %v3021_v2  ;;  %565 = vst [vmem:[#allocation3 + $0x78] sm:$0xff] %v3021_v2  ;;  %v412_v54 = vmul.f32 0.3, %v380_v45  ;;  %v349_v56 = vmul.f32 %v3256_v16, %v306_v36  ;;  %v384_v61 = vadd.f32 %v3263_v23, %v346_v53  ;;  %v353_v35 = vmul.f32 %v3256_v16, %v310_v4 }
  0x30   : > { %566 = vst [vmem:[#allocation3 + $0x80] sm:$0xff] %v3021_v2  ;;  %567 = vst [vmem:[#allocation3 + $0x88] sm:$0xff] %v3021_v2  ;;  %v415_v1 = vmul.f32 0.3, %v383_v55 }
  0x31   : > { %568 = vst [vmem:[#allocation3 + $0x90] sm:$0xff] %v3021_v2  ;;  %569 = vst [vmem:[#allocation3 + $0x98] sm:$0xff] %v3021_v2  ;;  %v416_v17 = vmul.f32 0.3, %v384_v61 }
  0x32   : > { %570 = vst [vmem:[#allocation3 + $0xa0] sm:$0xff] %v3021_v2  ;;  %571 = vst [vmem:[#allocation3 + $0xa8] sm:$0xff] %v3021_v2  ;;  %v447_v15 = vmax.f32 %v383_v55, %v415_v1 }
  0x33   : > { %572 = vst [vmem:[#allocation3 + $0xb0] sm:$0xff] %v3021_v2  ;;  %573 = vst [vmem:[#allocation3 + $0xb8] sm:$0xff] %v3021_v2  ;;  %v448_v28 = vmax.f32 %v384_v61, %v416_v17 }
  0x34   : > { %574 = vst [vmem:[#allocation3 + $0xc0] sm:$0xff] %v3021_v2  ;;  %575 = vst [vmem:[#allocation3 + $0xc8] sm:$0xff] %v3021_v2 }
  0x35   : > { %576 = vst [vmem:[#allocation3 + $0xd0] sm:$0xff] %v3021_v2  ;;  %577 = vst [vmem:[#allocation3 + $0xd8] sm:$0xff] %v3021_v2 }
  0x36   : > { %578 = vst [vmem:[#allocation3 + $0xe0] sm:$0xff] %v3021_v2  ;;  %579 = vst [vmem:[#allocation3 + $0xe8] sm:$0xff] %v3021_v2 }
  0x37   : > { %580 = vst [vmem:[#allocation3 + $0xf0] sm:$0xff] %v3021_v2  ;;  %581 = vst [vmem:[#allocation3 + $0xf8] sm:$0xff] %v3021_v2 }
  0x38   : > { %465 = vst.msk [vmem:[#allocation2 + $0x10] sm:$0x3] %vm464_vm2, %v3021_v2  ;;  %468 = vst.msk [vmem:[#allocation2 + $0x28] sm:$0x3] %vm464_vm2, %v3021_v2 }
  0x39   : > { %471 = vst.msk [vmem:[#allocation2 + $0x40] sm:$0x3] %vm464_vm2, %v3021_v2  ;;  %474 = vst.msk [vmem:[#allocation2 + $0x58] sm:$0x3] %vm464_vm2, %v3021_v2 }
  0x3a   : > { %477 = vst.msk [vmem:[#allocation2 + $0x70] sm:$0x3] %vm464_vm2, %v3021_v2  ;;  %480 = vst.msk [vmem:[#allocation2 + $0x88] sm:$0x3] %vm464_vm2, %v3021_v2 }
  0x3b   : > { %483 = vst.msk [vmem:[#allocation2 + $0xa0] sm:$0x3] %vm464_vm2, %v3021_v2  ;;  %486 = vst.msk [vmem:[#allocation2 + $0xb8] sm:$0x3] %vm464_vm2, %v3021_v2 }
  0x3c   : > { %489 = vst.msk [vmem:[#allocation2 + $0xd0] sm:$0x3] %vm464_vm2, %v3021_v2  ;;  %492 = vst.msk [vmem:[#allocation2 + $0xe8] sm:$0x3] %vm464_vm2, %v3021_v2 }
  0x3d   : > { %495 = vst.msk [vmem:[#allocation2 + $0x100] sm:$0x3] %vm464_vm2, %v3021_v2  ;;  %498 = vst.msk [vmem:[#allocation2 + $0x118] sm:$0x3] %vm464_vm2, %v3021_v2 }
  0x3e   : > { %501 = vst.msk [vmem:[#allocation2 + $0x130] sm:$0x3] %vm464_vm2, %v3021_v2  ;;  %504 = vst.msk [vmem:[#allocation2 + $0x148] sm:$0x3] %vm464_vm2, %v3021_v2 }
  0x3f   : > { %507 = vst.msk [vmem:[#allocation2 + $0x160] sm:$0x3] %vm464_vm2, %v3021_v2  ;;  %510 = vst.msk [vmem:[#allocation2 + $0x178] sm:$0x3] %vm464_vm2, %v3021_v2  ;;  %v647_v30 = vld [vmem:[#allocation2 + $0x9] sm:$0xff] }
  0x40   : > { %513 = vst.msk [vmem:[#allocation2 + $0x190] sm:$0x3] %vm464_vm2, %v3021_v2  ;;  %516 = vst.msk [vmem:[#allocation2 + $0x1a8] sm:$0x3] %vm464_vm2, %v3021_v2  ;;  %712 = vrot.lane.b32.xlu0 %v647_v30, %s3022_s23  ;;  %v337_v2 = vmul.f32 %v3256_v16, %v294_v40  ;;  %v440_v40 = vmax.f32 %v376_v14, %v408_v27  ;;  %v313_v27 = vld [vmem:[%s3085_s30 + $0xe8] sm:$0xff] }
  0x41   : > { %518 = vst.msk [vmem:[#allocation2 + $0x19] sm:$0xff] %vm461_vm1, %v429_v50  ;;  %520 = vst.msk [vmem:[#allocation2 + $0x31] sm:$0xff] %vm461_vm1, %v431_v51  ;;  %v445_v50 = vmax.f32 %v381_v29, %v413_v42  ;;  %v344_v51 = vmul.f32 %v3256_v16, %v301_v25  ;;  %v312_v25 = vld [vmem:[%s3085_s30 + $0xe0] sm:$0xff] }
  0x42   : > { %519 = vst.msk [vmem:[#allocation2 + $0x21] sm:$0xff] %vm461_vm1, %v430_v52  ;;  %614 = vst.msk [vmem:[#allocation3] sm:$0xff] %vm461_vm1, %v582_v62  ;;  %v375_v10 = vadd.f32 %v3263_v23, %v337_v2  ;;  %v347_v52 = vmul.f32 %v3256_v16, %v304_v34  ;;  %v351_v62 = vmul.f32 %v3256_v16, %v308_v47 }
  0x43   : > { %615 = vst.msk [vmem:[#allocation3 + $0x8] sm:$0xff] %vm461_vm1, %v583_v63  ;;  %522 = vst.msk [vmem:[#allocation2 + $0x49] sm:$0xff] %vm461_vm1, %v433_v57  ;;  %v348_v57 = vmul.f32 %v3256_v16, %v305_v43  ;;  %v387_v2 = vadd.f32 %v3263_v23, %v349_v56  ;;  %v391_v43 = vadd.f32 %v3263_v23, %v353_v35 }
  0x44   : > { %521 = vst.msk [vmem:[#allocation2 + $0x39] sm:$0xff] %vm461_vm1, %v432_v58  ;;  %524 = vst.msk [vmem:[#allocation2 + $0x61] sm:$0xff] %vm461_vm1, %v435_v59  ;;  %v407_v20 = vmul.f32 0.3, %v375_v10  ;;  %v307_v58 = vld [vmem:[%s3085_s30 + $0xb8] sm:$0xff]  ;;  %v382_v59 = vadd.f32 %v3263_v23, %v344_v51  ;;  %v385_v60 = vadd.f32 %v3263_v23, %v347_v52  ;;  %v389_v13 = vadd.f32 %v3263_v23, %v351_v62 }
  0x45   : > { %523 = vst.msk [vmem:[#allocation2 + $0x51] sm:$0xff] %vm461_vm1, %v434_v0  ;;  %526 = vst.msk [vmem:[#allocation2 + $0x79] sm:$0xff] %vm461_vm1, %v437_v5  ;;  %v444_v0 = vmax.f32 %v380_v45, %v412_v54  ;;  %v386_v3 = vadd.f32 %v3263_v23, %v348_v57  ;;  %v309_v5 = vld [vmem:[%s3085_s30 + $0xc8] sm:$0xff]  ;;  %v350_v14 = vmul.f32 %v3256_v16, %v307_v58  ;;  %v419_v18 = vmul.f32 0.3, %v387_v2 }
  0x46   : > { %525 = vst.msk [vmem:[#allocation2 + $0x69] sm:$0xff] %vm461_vm1, %v436_v19  ;;  %v439_v30 = vmax.f32 %v375_v10, %v407_v20  ;;  %527 = vst.msk [vmem:[#allocation2 + $0x81] sm:$0xff] %vm461_vm1, %v438_v31  ;;  %v414_v11 = vmul.f32 0.3, %v382_v59  ;;  %v417_v12 = vmul.f32 0.3, %v385_v60  ;;  %v352_v36 = vmul.f32 %v3256_v16, %v309_v5 }
  0x47   : > { %530 = vst.msk [vmem:[#allocation2 + $0xa9] sm:$0xff] %vm461_vm1, %v441_v39  ;;  %529 = vst.msk [vmem:[#allocation2 + $0x99] sm:$0xff] %vm461_vm1, %v440_v40  ;;  %v418_v19 = vmul.f32 0.3, %v386_v3  ;;  %v421_v22 = vmul.f32 0.3, %v389_v13  ;;  %v388_v24 = vadd.f32 %v3263_v23, %v350_v14  ;;  %v451_v29 = vmax.f32 %v387_v2, %v419_v18 }
  0x48   : > { %v3324_v37 = vld [vmem:[#allocation2 + $0x19] sm:$0xff]  ;;  %v3326_v38 = vld [vmem:[#allocation2 + $0x31] sm:$0xff]  ;;  %528 = vst.msk [vmem:[#allocation2 + $0x91] sm:$0xff] %vm461_vm1, %v439_v30  ;;  %532 = vst.msk [vmem:[#allocation2 + $0xc1] sm:$0xff] %vm461_vm1, %v443_v41  ;;  %v446_v20 = vmax.f32 %v382_v59, %v414_v11  ;;  %v449_v21 = vmax.f32 %v385_v60, %v417_v12  ;;  %v355_v39 = vmul.f32 %v3256_v16, %v312_v25  ;;  %v423_v56 = vmul.f32 0.3, %v391_v43 }
  0x49   : > { %714 = vrot.lane.b32.xlu1 %v3324_v37, %s3022_s23  ;;  %718 = vrot.lane.b32.xlu0 %v3326_v38, %s3022_s23  ;;  %v3338_v48 = vld [vmem:[#allocation2 + $0x21] sm:$0xff]  ;;  %531 = vst.msk [vmem:[#allocation2 + $0xb1] sm:$0xff] %vm461_vm1, %v442_v44  ;;  %534 = vst.msk [vmem:[#allocation2 + $0xd9] sm:$0xff] %vm461_vm1, %v445_v50  ;;  %v3358_v63 = vld [vmem:[#allocation2 + $0x18] sm:$0xff]  ;;  %v450_v30 = vmax.f32 %v386_v3, %v418_v19  ;;  %v453_v33 = vmax.f32 %v389_v13, %v421_v22  ;;  %v420_v34 = vmul.f32 0.3, %v388_v24 }
  0x4a   : > { %v3340_v49 = vld [vmem:[#allocation2 + $0x49] sm:$0xff]  ;;  %616 = vst.msk [vmem:[#allocation3 + $0x10] sm:$0xff] %vm461_vm1, %v3358_v63  ;;  %v3372_v7 = vld [vmem:[#allocation2 + $0x20] sm:$0xff]  ;;  %533 = vst.msk [vmem:[#allocation2 + $0xc9] sm:$0xff] %vm461_vm1, %v444_v0  ;;  %v354_v40 = vmul.f32 %v3256_v16, %v311_v26  ;;  %v356_v41 = vmul.f32 %v3256_v16, %v313_v27  ;;  %v390_v44 = vadd.f32 %v3263_v23, %v352_v36 }
  0x4b   : > { %v3370_v6 = vld [vmem:[#allocation2 + $0x30] sm:$0xff]  ;;  %v3374_v8 = vld [vmem:[#allocation2 + $0x48] sm:$0xff]  ;;  %v3376_v9 = vld [vmem:[#allocation2 + $0x39] sm:$0xff]  ;;  %617 = vst.msk [vmem:[#allocation3 + $0x18] sm:$0xff] %vm461_vm1, %v3372_v7  ;;  %v452_v42 = vmax.f32 %v388_v24, %v420_v34  ;;  %v393_v46 = vadd.f32 %v3263_v23, %v355_v39  ;;  %v455_v61 = vmax.f32 %v391_v43, %v423_v56 }
  0x4c   : > { %v3378_v10 = vld [vmem:[#allocation2 + $0x61] sm:$0xff]  ;;  %618 = vst.msk [vmem:[#allocation3 + $0x20] sm:$0xff] %vm461_vm1, %v3370_v6  ;;  %620 = vst.msk [vmem:[#allocation3 + $0x30] sm:$0xff] %vm461_vm1, %v3374_v8  ;;  %v3398_v31 = vld [vmem:[#allocation2 + $0x51] sm:$0xff]  ;;  %v392_v47 = vadd.f32 %v3263_v23, %v354_v40  ;;  %v394_v50 = vadd.f32 %v3263_v23, %v356_v41  ;;  %v422_v57 = vmul.f32 0.3, %v390_v44 }
  0x4d   : > { %716 = vrot.lane.b32.xlu1 %v3338_v48, %s3022_s23  ;;  %722 = vrot.lane.b32.xlu0 %v3340_v49, %s3022_s23  ;;  %536 = vst.msk [vmem:[#allocation2 + $0xf1] sm:$0xff] %vm461_vm1, %v447_v15  ;;  %v656_v32 = vld [vmem:[#allocation2 + $0x79] sm:$0xff]  ;;  %535 = vst.msk [vmem:[#allocation2 + $0xe1] sm:$0xff] %vm461_vm1, %v446_v20  ;;  %v3425_v52 = vld [vmem:[#allocation2 + $0x50] sm:$0xff]  ;;  %v425_v58 = vmul.f32 0.3, %v393_v46 }
  0x4e   : > { %538 = vst.msk [vmem:[#allocation2 + $0x109] sm:$0xff] %vm461_vm1, %v449_v21  ;;  %537 = vst.msk [vmem:[#allocation2 + $0xf9] sm:$0xff] %vm461_vm1, %v448_v28  ;;  %v3413_v45 = vld [vmem:[#allocation2 + $0x38] sm:$0xff]  ;;  %v3423_v51 = vld [vmem:[#allocation2 + $0x60] sm:$0xff]  ;;  %v424_v59 = vmul.f32 0.3, %v392_v47  ;;  %v454_v62 = vmax.f32 %v390_v44, %v422_v57 }
  0x4f   : > { %540 = vst.msk [vmem:[#allocation2 + $0x121] sm:$0xff] %vm461_vm1, %v451_v29  ;;  %539 = vst.msk [vmem:[#allocation2 + $0x111] sm:$0xff] %vm461_vm1, %v450_v30  ;;  %v3427_v53 = vld [vmem:[#allocation2 + $0x78] sm:$0xff]  ;;  %v3429_v54 = vld [vmem:[#allocation2 + $0x69] sm:$0xff]  ;;  %v426_v60 = vmul.f32 0.3, %v394_v50  ;;  %v457_v1 = vmax.f32 %v393_v46, %v425_v58 }
  0x50   : > { %542 = vst.msk [vmem:[#allocation2 + $0x139] sm:$0xff] %vm461_vm1, %v453_v33  ;;  %619 = vst.msk [vmem:[#allocation3 + $0x28] sm:$0xff] %vm461_vm1, %v3413_v45  ;;  %v658_v55 = vld [vmem:[#allocation2 + $0x91] sm:$0xff]  ;;  %v3438_v0 = vld [vmem:[#allocation2 + $0x68] sm:$0xff]  ;;  %v456_v2 = vmax.f32 %v392_v47, %v424_v59 }
  0x51   : > { %720 = vrot.lane.b32.xlu1 %v3376_v9, %s3022_s23  ;;  %726 = vrot.lane.b32.xlu0 %v3378_v10, %s3022_s23  ;;  %541 = vst.msk [vmem:[#allocation2 + $0x129] sm:$0xff] %vm461_vm1, %v452_v42  ;;  %622 = vst.msk [vmem:[#allocation3 + $0x40] sm:$0xff] %vm461_vm1, %v3423_v51  ;;  %v458_v3 = vmax.f32 %v394_v50, %v426_v60  ;;  %v657_v4 = vld [vmem:[#allocation2 + $0x81] sm:$0xff]  ;;  %v660_v5 = vld [vmem:[#allocation2 + $0xa9] sm:$0xff] }
  0x52   : > { %621 = vst.msk [vmem:[#allocation3 + $0x38] sm:$0xff] %vm461_vm1, %v3425_v52  ;;  %624 = vst.msk [vmem:[#allocation3 + $0x50] sm:$0xff] %vm461_vm1, %v3427_v53  ;;  %v659_v11 = vld [vmem:[#allocation2 + $0x99] sm:$0xff]  ;;  %v662_v12 = vld [vmem:[#allocation2 + $0xc1] sm:$0xff] }
  0x53   : > { %623 = vst.msk [vmem:[#allocation3 + $0x48] sm:$0xff] %vm461_vm1, %v3438_v0  ;;  %544 = vst.msk [vmem:[#allocation2 + $0x151] sm:$0xff] %vm461_vm1, %v455_v61  ;;  %v3452_v13 = vld [vmem:[#allocation2 + $0x90] sm:$0xff]  ;;  %v3454_v14 = vld [vmem:[#allocation2 + $0x80] sm:$0xff] }
  0x54   : > { %543 = vst.msk [vmem:[#allocation2 + $0x141] sm:$0xff] %vm461_vm1, %v454_v62  ;;  %546 = vst.msk [vmem:[#allocation2 + $0x169] sm:$0xff] %vm461_vm1, %v457_v1  ;;  %v3456_v15 = vld [vmem:[#allocation2 + $0xa8] sm:$0xff]  ;;  %v3464_v17 = vld [vmem:[#allocation2 + $0x98] sm:$0xff] }
  0x55   : > { %724 = vrot.lane.b32.xlu1 %v3398_v31, %s3022_s23  ;;  %730 = vrot.lane.b32.xlu0 %v656_v32, %s3022_s23  ;;  %545 = vst.msk [vmem:[#allocation2 + $0x159] sm:$0xff] %vm461_vm1, %v456_v2  ;;  %547 = vst.msk [vmem:[#allocation2 + $0x171] sm:$0xff] %vm461_vm1, %v458_v3  ;;  %v3466_v18 = vld [vmem:[#allocation2 + $0xc0] sm:$0xff]  ;;  %v3468_v19 = vld [vmem:[#allocation2 + $0xb0] sm:$0xff] }
  0x56   : > { %626 = vst.msk [vmem:[#allocation3 + $0x60] sm:$0xff] %vm461_vm1, %v3452_v13  ;;  %625 = vst.msk [vmem:[#allocation3 + $0x58] sm:$0xff] %vm461_vm1, %v3454_v14  ;;  %v3476_v20 = vld [vmem:[#allocation2 + $0xd8] sm:$0xff]  ;;  %v3478_v21 = vld [vmem:[#allocation2 + $0xc8] sm:$0xff] }
  0x57   : > { %628 = vst.msk [vmem:[#allocation3 + $0x70] sm:$0xff] %vm461_vm1, %v3456_v15  ;;  %627 = vst.msk [vmem:[#allocation3 + $0x68] sm:$0xff] %vm461_vm1, %v3464_v17  ;;  %v3480_v22 = vld [vmem:[#allocation2 + $0xf0] sm:$0xff]  ;;  %v664_v25 = vld [vmem:[#allocation2 + $0xd9] sm:$0xff] }
  0x58   : > { %630 = vst.msk [vmem:[#allocation3 + $0x80] sm:$0xff] %vm461_vm1, %v3466_v18  ;;  %629 = vst.msk [vmem:[#allocation3 + $0x78] sm:$0xff] %vm461_vm1, %v3468_v19  ;;  %v661_v24 = vld [vmem:[#allocation2 + $0xb1] sm:$0xff]  ;;  %v3490_v26 = vld [vmem:[#allocation2 + $0xe0] sm:$0xff] }
  0x59   : > { %728 = vrot.lane.b32.xlu1 %v3429_v54, %s3022_s23  ;;  %734 = vrot.lane.b32.xlu0 %v658_v55, %s3022_s23  ;;  %632 = vst.msk [vmem:[#allocation3 + $0x90] sm:$0xff] %vm461_vm1, %v3476_v20  ;;  %631 = vst.msk [vmem:[#allocation3 + $0x88] sm:$0xff] %vm461_vm1, %v3478_v21  ;;  %v3496_v27 = vld [vmem:[#allocation2 + $0x108] sm:$0xff]  ;;  %v3498_v28 = vld [vmem:[#allocation2 + $0xf8] sm:$0xff] }
  0x5a   : > { %634 = vst.msk [vmem:[#allocation3 + $0xa0] sm:$0xff] %vm461_vm1, %v3480_v22  ;;  %633 = vst.msk [vmem:[#allocation3 + $0x98] sm:$0xff] %vm461_vm1, %v3490_v26  ;;  %v606_v29 = vld [vmem:[#allocation2 + $0x120] sm:$0xff]  ;;  %v663_v30 = vld [vmem:[#allocation2 + $0xc9] sm:$0xff] }
  0x5b   : > { %v666_v32 = vld [vmem:[#allocation2 + $0xf1] sm:$0xff]  ;;  %636 = vst.msk [vmem:[#allocation3 + $0xb0] sm:$0xff] %vm461_vm1, %v3496_v27  ;;  %635 = vst.msk [vmem:[#allocation3 + $0xa8] sm:$0xff] %vm461_vm1, %v3498_v28  ;;  %v3512_v35 = vld [vmem:[#allocation2 + $0x128] sm:$0xff] }
  0x5c   : > { %638 = vst.msk [vmem:[#allocation3 + $0xc0] sm:$0xff] %vm461_vm1, %v606_v29  ;;  %v3505_v33 = vld [vmem:[#allocation2 + $0x110] sm:$0xff]  ;;  %v608_v34 = vld [vmem:[#allocation2 + $0x138] sm:$0xff]  ;;  %v665_v36 = vld [vmem:[#allocation2 + $0xe1] sm:$0xff] }
  0x5d   : > { %732 = vrot.lane.b32.xlu1 %v657_v4, %s3022_s23  ;;  %738 = vrot.lane.b32.xlu0 %v660_v5, %s3022_s23  ;;  %637 = vst.msk [vmem:[#allocation3 + $0xb8] sm:$0xff] %vm461_vm1, %v3505_v33  ;;  %640 = vst.msk [vmem:[#allocation3 + $0xd0] sm:$0xff] %vm461_vm1, %v608_v34  ;;  %v668_v39 = vld [vmem:[#allocation2 + $0x109] sm:$0xff]  ;;  %v609_v41 = vld [vmem:[#allocation2 + $0x140] sm:$0xff] }
  0x5e   : > { %639 = vst.msk [vmem:[#allocation3 + $0xc8] sm:$0xff] %vm461_vm1, %v3512_v35  ;;  %v610_v40 = vld [vmem:[#allocation2 + $0x150] sm:$0xff]  ;;  %v667_v42 = vld [vmem:[#allocation2 + $0xf9] sm:$0xff]  ;;  %v670_v43 = vld [vmem:[#allocation2 + $0x121] sm:$0xff] }
  0x5f   : > { %642 = vst.msk [vmem:[#allocation3 + $0xe0] sm:$0xff] %vm461_vm1, %v610_v40  ;;  %641 = vst.msk [vmem:[#allocation3 + $0xd8] sm:$0xff] %vm461_vm1, %v609_v41  ;;  %v612_v44 = vld [vmem:[#allocation2 + $0x168] sm:$0xff]  ;;  %v611_v46 = vld [vmem:[#allocation2 + $0x158] sm:$0xff] }
  0x60   : > { %644 = vst.msk [vmem:[#allocation3 + $0xf0] sm:$0xff] %vm461_vm1, %v612_v44  ;;  %v669_v47 = vld [vmem:[#allocation2 + $0x111] sm:$0xff]  ;;  %v672_v50 = vld [vmem:[#allocation2 + $0x139] sm:$0xff]  ;;  %643 = vst.msk [vmem:[#allocation3 + $0xe8] sm:$0xff] %vm461_vm1, %v611_v46 }
  0x61   : > { %736 = vrot.lane.b32.xlu1 %v659_v11, %s3022_s23  ;;  %742 = vrot.lane.b32.xlu0 %v662_v12, %s3022_s23  ;;  %v613_v55 = vld [vmem:[#allocation2 + $0x170] sm:$0xff]  ;;  %v673_v58 = vld [vmem:[#allocation2 + $0x141] sm:$0xff]  ;;  %v675_v60 = vld [vmem:[#allocation2 + $0x159] sm:$0xff] }
  0x62   : > { %v671_v56 = vld [vmem:[#allocation2 + $0x129] sm:$0xff]  ;;  %v674_v57 = vld [vmem:[#allocation2 + $0x151] sm:$0xff]  ;;  %645 = vst.msk [vmem:[#allocation3 + $0xf8] sm:$0xff] %vm461_vm1, %v613_v55  ;;  %v3533_v1 = vld [vmem:[#allocation2 + $0x1a] sm:$0xff] }
  0x63   : > { %v676_v59 = vld [vmem:[#allocation2 + $0x169] sm:$0xff]  ;;  %v677_v62 = vld [vmem:[#allocation2 + $0x171] sm:$0xff]  ;;  %v3551_v11 = vld [vmem:[#allocation2 + $0x3a] sm:$0xff] }
  0x64   : > { %v839_v61 = vld [vmem:[#allocation2 + $0x2] sm:$0xff]  ;;  %v840_v2 = vld [vmem:[#allocation2 + $0xa] sm:$0xff]  ;;  %v3538_v3 = vld [vmem:[#allocation2 + $0x32] sm:$0xff] }
  0x65   : > { %740 = vrot.lane.b32.xlu1 %v661_v24, %s3022_s23  ;;  %746 = vrot.lane.b32.xlu0 %v664_v25, %s3022_s23  ;;  %v3543_v4 = vld [vmem:[#allocation2 + $0x22] sm:$0xff]  ;;  %v3545_v5 = vld [vmem:[#allocation2 + $0x4a] sm:$0xff]  ;;  %v3559_v24 = vld [vmem:[#allocation2 + $0x52] sm:$0xff] }
  0x66   : > { %v3553_v12 = vld [vmem:[#allocation2 + $0x62] sm:$0xff]  ;;  %v3561_v25 = vld [vmem:[#allocation2 + $0x7a] sm:$0xff]  ;;  %v3567_v29 = vld [vmem:[#allocation2 + $0x6a] sm:$0xff] }
  0x67   : > { %v3577_v34 = vld [vmem:[#allocation2 + $0xaa] sm:$0xff]  ;;  %v3591_v40 = vld [vmem:[#allocation2 + $0xb2] sm:$0xff]  ;;  %v857_v41 = vld [vmem:[#allocation2 + $0xda] sm:$0xff] }
  0x68   : > { %v858_v44 = vld [vmem:[#allocation2 + $0xe2] sm:$0xff]  ;;  %v861_v46 = vld [vmem:[#allocation2 + $0x10a] sm:$0xff] }
  0x69   : > { %744 = vrot.lane.b32.xlu1 %v663_v30, %s3022_s23  ;;  %750 = vrot.lane.b32.xlu0 %v666_v32, %s3022_s23  ;;  %v3569_v30 = vld [vmem:[#allocation2 + $0x92] sm:$0xff]  ;;  %v3575_v32 = vld [vmem:[#allocation2 + $0x82] sm:$0xff] }
  0x6a   : > { %v863_v55 = vld [vmem:[#allocation2 + $0x122] sm:$0xff] }
  0x6d   : > { %748 = vrot.lane.b32.xlu1 %v665_v36, %s3022_s23  ;;  %754 = vrot.lane.b32.xlu0 %v668_v39, %s3022_s23  ;;  %v3583_v36 = vld [vmem:[#allocation2 + $0x9a] sm:$0xff]  ;;  %v3585_v39 = vld [vmem:[#allocation2 + $0xc2] sm:$0xff] }
  0x71   : > { %752 = vrot.lane.b32.xlu1 %v667_v42, %s3022_s23  ;;  %758 = vrot.lane.b32.xlu0 %v670_v43, %s3022_s23  ;;  %v3596_v42 = vld [vmem:[#allocation2 + $0xca] sm:$0xff]  ;;  %v859_v43 = vld [vmem:[#allocation2 + $0xf2] sm:$0xff] }
  0x75   : > { %756 = vrot.lane.b32.xlu1 %v669_v47, %s3022_s23  ;;  %762 = vrot.lane.b32.xlu0 %v672_v50, %s3022_s23  ;;  %v860_v50 = vld [vmem:[#allocation2 + $0xfa] sm:$0xff] }
  0x79   : > { %760 = vrot.lane.b32.xlu1 %v671_v56, %s3022_s23  ;;  %766 = vrot.lane.b32.xlu0 %v674_v57, %s3022_s23  ;;  %v862_v57 = vld [vmem:[#allocation2 + $0x112] sm:$0xff] }
  0x7d   : > { %764 = vrot.lane.b32.xlu1 %v673_v58, %s3022_s23  ;;  %770 = vrot.lane.b32.xlu0 %v676_v59, %s3022_s23  ;;  %v865_v58 = vld [vmem:[#allocation2 + $0x13a] sm:$0xff]  ;;  %v864_v59 = vld [vmem:[#allocation2 + $0x12a] sm:$0xff] }
  0x81   : > { %768 = vrot.lane.b32.xlu1 %v675_v60, %s3022_s23  ;;  %903 = vrot.lane.b32.xlu0 %v839_v61, %s3023_s26  ;;  %v867_v60 = vld [vmem:[#allocation2 + $0x152] sm:$0xff]  ;;  %v866_v61 = vld [vmem:[#allocation2 + $0x142] sm:$0xff] }
  0x85   : > { %772 = vrot.lane.b32.xlu1 %v677_v62, %s3022_s23  ;;  %907 = vrot.lane.b32.xlu0 %v3533_v1, %s3023_s26  ;;  %v869_v62 = vld [vmem:[#allocation2 + $0x16a] sm:$0xff] }
  0x89   : > { %905 = vrot.lane.b32.xlu1 %v840_v2, %s3023_s26  ;;  %911 = vrot.lane.b32.xlu0 %v3538_v3, %s3023_s26 }
  0x8d   : > { %909 = vrot.lane.b32.xlu1 %v3543_v4, %s3023_s26  ;;  %915 = vrot.lane.b32.xlu0 %v3545_v5, %s3023_s26 }
  0x90   : > { %v711_v47 = vpop.permute.xlu0 %710 }
  0x91   : > { %913 = vrot.lane.b32.xlu1 %v3551_v11, %s3023_s26  ;;  %919 = vrot.lane.b32.xlu0 %v3553_v12, %s3023_s26  ;;  %807 = vst.msk [vmem:[#allocation3] sm:$0xff] %vm806_vm3, %v711_v47  ;;  %v870_v47 = vld [vmem:[#allocation2 + $0x172] sm:$0xff] }
  0x95   : > { %917 = vrot.lane.b32.xlu1 %v3559_v24, %s3023_s26  ;;  %923 = vrot.lane.b32.xlu0 %v3561_v25, %s3023_s26 }
  0x99   : > { %921 = vrot.lane.b32.xlu1 %v3567_v29, %s3023_s26  ;;  %927 = vrot.lane.b32.xlu0 %v3569_v30, %s3023_s26 }
  0x9d   : > { %925 = vrot.lane.b32.xlu1 %v3575_v32, %s3023_s26  ;;  %931 = vrot.lane.b32.xlu0 %v3577_v34, %s3023_s26 }
  0xa1   : > { %929 = vrot.lane.b32.xlu1 %v3583_v36, %s3023_s26  ;;  %935 = vrot.lane.b32.xlu0 %v3585_v39, %s3023_s26 }
  0xa5   : > { %933 = vrot.lane.b32.xlu1 %v3591_v40, %s3023_s26  ;;  %939 = vrot.lane.b32.xlu0 %v857_v41, %s3023_s26 }
  0xa9   : > { %937 = vrot.lane.b32.xlu1 %v3596_v42, %s3023_s26  ;;  %943 = vrot.lane.b32.xlu0 %v859_v43, %s3023_s26  ;;  %v868_v43 = vld [vmem:[#allocation2 + $0x15a] sm:$0xff] }
  0xad   : > { %941 = vrot.lane.b32.xlu1 %v858_v44, %s3023_s26  ;;  %947 = vrot.lane.b32.xlu0 %v861_v46, %s3023_s26 }
  0xb1   : > { %945 = vrot.lane.b32.xlu1 %v860_v50, %s3023_s26  ;;  %951 = vrot.lane.b32.xlu0 %v863_v55, %s3023_s26 }
  0xb2   : > { %v713_v56 = vpop.permute.xlu0 %712 }
  0xb3   : > { %808 = vst.msk [vmem:[#allocation3 + $0x8] sm:$0xff] %vm806_vm3, %v713_v56 }
  0xb5   : > { %949 = vrot.lane.b32.xlu1 %v862_v57, %s3023_s26  ;;  %955 = vrot.lane.b32.xlu0 %v865_v58, %s3023_s26 }
  0xb9   : > { %953 = vrot.lane.b32.xlu1 %v864_v59, %s3023_s26  ;;  %959 = vrot.lane.b32.xlu0 %v867_v60, %s3023_s26 }
  0xbb   : > { %v715_v2 = vpop.permute.xlu1 %714  ;;  %v719_v41 = vpop.permute.xlu0 %718 }
  0xbc   : > { %809 = vst.msk [vmem:[#allocation3 + $0x10] sm:$0xff] %vm806_vm3, %v715_v2  ;;  %811 = vst.msk [vmem:[#allocation3 + $0x20] sm:$0xff] %vm806_vm3, %v719_v41  ;;  %v2224_v2 = vld [vmem:[%s4403_s3 + $0x8] sm:$0xff] }
  0xbd   : > { %957 = vrot.lane.b32.xlu1 %v866_v61, %s3023_s26  ;;  %963 = vrot.lane.b32.xlu0 %v869_v62, %s3023_s26  ;;  %v2223_v62 = vld [vmem:[%s4403_s3] sm:$0xff] }
  0xbe   : > { %v2942_v41 = vpack.c.bf16 %v2224_v2, %v2223_v62 }
  0xbf   : > { %v717_v44 = vpop.permute.xlu1 %716  ;;  %v723_v46 = vpop.permute.xlu0 %722 }
  0xc0   : > { %810 = vst.msk [vmem:[#allocation3 + $0x18] sm:$0xff] %vm806_vm3, %v717_v44  ;;  %813 = vst.msk [vmem:[#allocation3 + $0x30] sm:$0xff] %vm806_vm3, %v723_v46  ;;  %2943 = vmatprep.subr.bf16.mxu0 %v2942_v41  ;;  %2974 = vmatprep.subr.bf16.mxu1 %v2942_v41  ;;  %v2225_v46 = vld [vmem:[%s4403_s3 + $0x10] sm:$0xff] }
  0xc1   : > { %961 = vrot.lane.b32.xlu1 %v868_v43, %s3023_s26  ;;  %1096 = vrot.lane.b32.xlu0 %v3358_v63, %s3024_s27 }
  0xc2   : > { %2945 = vmatpush3.bf16.msra.mxu0 %v2942_v41  ;;  %2982 = vmatpush3.bf16.msra.mxu1 %v2942_v41 }
  0xc3   : > { %v721_v50 = vpop.permute.xlu1 %720  ;;  %v727_v55 = vpop.permute.xlu0 %726 }
  0xc4   : > { %812 = vst.msk [vmem:[#allocation3 + $0x28] sm:$0xff] %vm806_vm3, %v721_v50  ;;  %815 = vst.msk [vmem:[#allocation3 + $0x40] sm:$0xff] %vm806_vm3, %v727_v55 }
  0xc5   : > { %965 = vrot.lane.b32.xlu1 %v870_v47, %s3023_s26  ;;  %1100 = vrot.lane.b32.xlu0 %v3370_v6, %s3024_s27  ;;  %v2226_v47 = vld [vmem:[%s4403_s3 + $0x18] sm:$0xff]  ;;  %s3026_s26 = smov 20  }
  0xc6   : > { %v2946_v50 = vpack.c.bf16 %v2226_v47, %v2225_v46 }
  0xc7   : > { %v725_v56 = vpop.permute.xlu1 %724  ;;  %v731_v57 = vpop.permute.xlu0 %730 }
  0xc8   : > { %814 = vst.msk [vmem:[#allocation3 + $0x38] sm:$0xff] %vm806_vm3, %v725_v56  ;;  %817 = vst.msk [vmem:[#allocation3 + $0x50] sm:$0xff] %vm806_vm3, %v731_v57  ;;  %2947 = vmatprep.subr.bf16.mxu0 %v2946_v50  ;;  %2975 = vmatprep.subr.bf16.mxu1 %v2946_v50  ;;  %v2227_v57 = vld [vmem:[%s4403_s3 + $0x20] sm:$0xff] }
  0xc9   : > { %1098 = vrot.lane.b32.xlu1 %v3372_v7, %s3024_s27  ;;  %1104 = vrot.lane.b32.xlu0 %v3374_v8, %s3024_s27 }
  0xca   : > { %2949 = vmatpush3.bf16.msra.mxu0 %v2946_v50  ;;  %2983 = vmatpush3.bf16.msra.mxu1 %v2946_v50 }
  0xcb   : > { %v729_v63 = vpop.permute.xlu1 %728  ;;  %v735_v58 = vpop.permute.xlu0 %734 }
  0xcc   : > { %816 = vst.msk [vmem:[#allocation3 + $0x48] sm:$0xff] %vm806_vm3, %v729_v63  ;;  %819 = vst.msk [vmem:[#allocation3 + $0x60] sm:$0xff] %vm806_vm3, %v735_v58  ;;  %v2228_v63 = vld [vmem:[%s4403_s3 + $0x28] sm:$0xff] }
  0xcd   : > { %1102 = vrot.lane.b32.xlu1 %v3413_v45, %s3024_s27  ;;  %1108 = vrot.lane.b32.xlu0 %v3423_v51, %s3024_s27  ;;  %v2950_v58 = vpack.c.bf16 %v2228_v63, %v2227_v57 }
  0xcf   : > { %v733_v59 = vpop.permute.xlu1 %732  ;;  %v739_v60 = vpop.permute.xlu0 %738  ;;  %2951 = vmatprep.subr.bf16.mxu0 %v2950_v58  ;;  %2976 = vmatprep.subr.bf16.mxu1 %v2950_v58 }
  0xd0   : > { %818 = vst.msk [vmem:[#allocation3 + $0x58] sm:$0xff] %vm806_vm3, %v733_v59  ;;  %821 = vst.msk [vmem:[#allocation3 + $0x70] sm:$0xff] %vm806_vm3, %v739_v60  ;;  %2953 = vmatpush3.bf16.msra.mxu0 %v2950_v58  ;;  %2984 = vmatpush3.bf16.msra.mxu1 %v2950_v58 }
  0xd1   : > { %1106 = vrot.lane.b32.xlu1 %v3425_v52, %s3024_s27  ;;  %1112 = vrot.lane.b32.xlu0 %v3427_v53, %s3024_s27 }
  0xd3   : > { %v737_v7 = vpop.permute.xlu1 %736  ;;  %v743_v61 = vpop.permute.xlu0 %742 }
  0xd4   : > { %820 = vst.msk [vmem:[#allocation3 + $0x68] sm:$0xff] %vm806_vm3, %v737_v7  ;;  %823 = vst.msk [vmem:[#allocation3 + $0x80] sm:$0xff] %vm806_vm3, %v743_v61  ;;  %v2229_v7 = vld [vmem:[%s4403_s3 + $0x30] sm:$0xff]  ;;  %v2230_v61 = vld [vmem:[%s4403_s3 + $0x38] sm:$0xff] }
  0xd5   : > { %1110 = vrot.lane.b32.xlu1 %v3438_v0, %s3024_s27  ;;  %1116 = vrot.lane.b32.xlu0 %v3452_v13, %s3024_s27  ;;  %v2954_v62 = vpack.c.bf16 %v2230_v61, %v2229_v7 }
  0xd7   : > { %v741_v43 = vpop.permute.xlu1 %740  ;;  %v747_v44 = vpop.permute.xlu0 %746  ;;  %2955 = vmatprep.subr.bf16.mxu0 %v2954_v62  ;;  %2977 = vmatprep.subr.bf16.mxu1 %v2954_v62 }
  0xd8   : > { %822 = vst.msk [vmem:[#allocation3 + $0x78] sm:$0xff] %vm806_vm3, %v741_v43  ;;  %825 = vst.msk [vmem:[#allocation3 + $0x90] sm:$0xff] %vm806_vm3, %v747_v44  ;;  %v2232_v43 = vld [vmem:[%s4403_s3 + $0x48] sm:$0xff]  ;;  %2957 = vmatpush3.bf16.msra.mxu0 %v2954_v62  ;;  %2985 = vmatpush3.bf16.msra.mxu1 %v2954_v62 }
  0xd9   : > { %1114 = vrot.lane.b32.xlu1 %v3454_v14, %s3024_s27  ;;  %1120 = vrot.lane.b32.xlu0 %v3456_v15, %s3024_s27 }
  0xdb   : > { %v745_v55 = vpop.permute.xlu1 %744  ;;  %v751_v56 = vpop.permute.xlu0 %750 }
  0xdc   : > { %824 = vst.msk [vmem:[#allocation3 + $0x88] sm:$0xff] %vm806_vm3, %v745_v55  ;;  %827 = vst.msk [vmem:[#allocation3 + $0xa0] sm:$0xff] %vm806_vm3, %v751_v56 }
  0xdd   : > { %1118 = vrot.lane.b32.xlu1 %v3464_v17, %s3024_s27  ;;  %1124 = vrot.lane.b32.xlu0 %v3466_v18, %s3024_s27 }
  0xdf   : > { %v749_v59 = vpop.permute.xlu1 %748  ;;  %v755_v60 = vpop.permute.xlu0 %754 }
  0xe0   : > { %826 = vst.msk [vmem:[#allocation3 + $0x98] sm:$0xff] %vm806_vm3, %v749_v59  ;;  %829 = vst.msk [vmem:[#allocation3 + $0xb0] sm:$0xff] %vm806_vm3, %v755_v60  ;;  %v2238_v59 = vld [vmem:[%s4403_s3 + $0x78] sm:$0xff] }
  0xe1   : > { %1122 = vrot.lane.b32.xlu1 %v3468_v19, %s3024_s27  ;;  %1291 = vrot.lane.b32.xlu0 %v3338_v48, %s3025_s19  ;;  %v2231_v48 = vld [vmem:[%s4403_s3 + $0x40] sm:$0xff] }
  0xe2   : > { %v2958_v44 = vpack.c.bf16 %v2232_v43, %v2231_v48 }
  0xe3   : > { %v753_v2 = vpop.permute.xlu1 %752  ;;  %v759_v41 = vpop.permute.xlu0 %758 }
  0xe4   : > { %828 = vst.msk [vmem:[#allocation3 + $0xa8] sm:$0xff] %vm806_vm3, %v753_v2  ;;  %831 = vst.msk [vmem:[#allocation3 + $0xc0] sm:$0xff] %vm806_vm3, %v759_v41  ;;  %2959 = vmatprep.subr.bf16.mxu0 %v2958_v44  ;;  %2978 = vmatprep.subr.bf16.mxu1 %v2958_v44 }
  0xe5   : > { %1289 = vrot.lane.b32.xlu1 %v3324_v37, %s3025_s19  ;;  %1484 = vrot.lane.b32.xlu0 %v3543_v4, %s3026_s26  ;;  %v2233_v37 = vld [vmem:[%s4403_s3 + $0x50] sm:$0xff]  ;;  %v2234_v4 = vld [vmem:[%s4403_s3 + $0x58] sm:$0xff] }
  0xe6   : > { %2961 = vmatpush3.bf16.msra.mxu0 %v2958_v44  ;;  %v2962_v50 = vpack.c.bf16 %v2234_v4, %v2233_v37  ;;  %2986 = vmatpush3.bf16.msra.mxu1 %v2958_v44 }
  0xe7   : > { %v757_v46 = vpop.permute.xlu1 %756  ;;  %v763_v47 = vpop.permute.xlu0 %762 }
  0xe8   : > { %830 = vst.msk [vmem:[#allocation3 + $0xb8] sm:$0xff] %vm806_vm3, %v757_v46  ;;  %833 = vst.msk [vmem:[#allocation3 + $0xd0] sm:$0xff] %vm806_vm3, %v763_v47  ;;  %2963 = vmatprep.subr.bf16.mxu0 %v2962_v50  ;;  %2979 = vmatprep.subr.bf16.mxu1 %v2962_v50 }
  0xe9   : > { %1482 = vrot.lane.b32.xlu1 %v3533_v1, %s3026_s26  ;;  %1678 = vrot.lane.b32.xlu0 %v3413_v45, %s3027_s11  ;;  %v2235_v45 = vld [vmem:[%s4403_s3 + $0x60] sm:$0xff]  ;;  %v2236_v1 = vld [vmem:[%s4403_s3 + $0x68] sm:$0xff] }
  0xea   : > { %2965 = vmatpush3.bf16.msra.mxu0 %v2962_v50  ;;  %v2966_v57 = vpack.c.bf16 %v2236_v1, %v2235_v45  ;;  %2987 = vmatpush3.bf16.msra.mxu1 %v2962_v50 }
  0xeb   : > { %v761_v55 = vpop.permute.xlu1 %760  ;;  %v767_v56 = vpop.permute.xlu0 %766 }
  0xec   : > { %832 = vst.msk [vmem:[#allocation3 + $0xc8] sm:$0xff] %vm806_vm3, %v761_v55  ;;  %835 = vst.msk [vmem:[#allocation3 + $0xe0] sm:$0xff] %vm806_vm3, %v767_v56  ;;  %2967 = vmatprep.subr.bf16.mxu0 %v2966_v57  ;;  %2980 = vmatprep.subr.bf16.mxu1 %v2966_v57 }
  0xed   : > { %1676 = vrot.lane.b32.xlu1 %v3370_v6, %s3027_s11  ;;  %1293 = vrot.lane.b32.xlu0 %v3326_v38, %s3025_s19  ;;  %v2237_v6 = vld [vmem:[%s4403_s3 + $0x70] sm:$0xff] }
  0xee   : > { %2969 = vmatpush3.bf16.msra.mxu0 %v2966_v57  ;;  %v2970_v60 = vpack.c.bf16 %v2238_v59, %v2237_v6  ;;  %2988 = vmatpush3.bf16.msra.mxu1 %v2966_v57 }
  0xef   : > { %v765_v63 = vpop.permute.xlu1 %764  ;;  %v771_v58 = vpop.permute.xlu0 %770 }
  0xf0   : > { %834 = vst.msk [vmem:[#allocation3 + $0xd8] sm:$0xff] %vm806_vm3, %v765_v63  ;;  %837 = vst.msk [vmem:[#allocation3 + $0xf0] sm:$0xff] %vm806_vm3, %v771_v58  ;;  %2971 = vmatprep.subr.bf16.mxu0 %v2970_v60  ;;  %2981 = vmatprep.subr.bf16.mxu1 %v2970_v60 }
  0xf1   : > { %1869 = vrot.lane.b32.xlu1 %v3326_v38, %s3028_s21  ;;  %2062 = vrot.lane.b32.xlu0 %v3538_v3, %s3029_s22 }
  0xf2   : > { %2973 = vmatpush3.bf16.msra.mxu0 %v2970_v60  ;;  %2989 = vmatpush3.bf16.msra.mxu1 %v2970_v60 }
  0xf3   : > { %v769_v7 = vpop.permute.xlu1 %768  ;;  %v904_v61 = vpop.permute.xlu0 %903 }
  0xf4   : > { %836 = vst.msk [vmem:[#allocation3 + $0xe8] sm:$0xff] %vm806_vm3, %v769_v7 }
  0xf5   : > { %1000 = vst.msk [vmem:[#allocation3] sm:$0xff] %vm999_vm4, %v904_v61  ;;  %1871 = vrot.lane.b32.xlu1 %v3376_v9, %s3028_s21  ;;  %1486 = vrot.lane.b32.xlu0 %v3538_v3, %s3026_s26 }
  0xf7   : > { %v773_v38 = vpop.permute.xlu1 %772  ;;  %v908_v62 = vpop.permute.xlu0 %907 }
  0xf8   : > { %838 = vst.msk [vmem:[#allocation3 + $0xf8] sm:$0xff] %vm806_vm3, %v773_v38 }
  0xf9   : > { %1002 = vst.msk [vmem:[#allocation3 + $0x10] sm:$0xff] %vm999_vm4, %v908_v62  ;;  %1295 = vrot.lane.b32.xlu1 %v3376_v9, %s3025_s19  ;;  %1488 = vrot.lane.b32.xlu0 %v3551_v11, %s3026_s26 }
  0xfb   : > { %v906_v2 = vpop.permute.xlu1 %905  ;;  %v912_v41 = vpop.permute.xlu0 %911 }
  0xfc   : > { %1001 = vst.msk [vmem:[#allocation3 + $0x8] sm:$0xff] %vm999_vm4, %v906_v2  ;;  %1004 = vst.msk [vmem:[#allocation3 + $0x20] sm:$0xff] %vm999_vm4, %v912_v41 }
  0xfd   : > { %2064 = vrot.lane.b32.xlu1 %v3551_v11, %s3029_s22  ;;  %1682 = vrot.lane.b32.xlu0 %v3425_v52, %s3027_s11 }
  0xff   : > { %v910_v3 = vpop.permute.xlu1 %909  ;;  %v916_v48 = vpop.permute.xlu0 %915 }
 0x100   : > { %1003 = vst.msk [vmem:[#allocation3 + $0x18] sm:$0xff] %vm999_vm4, %v910_v3  ;;  %1006 = vst.msk [vmem:[#allocation3 + $0x30] sm:$0xff] %vm999_vm4, %v916_v48 }
 0x101   : > { %1680 = vrot.lane.b32.xlu1 %v3374_v8, %s3027_s11  ;;  %1297 = vrot.lane.b32.xlu0 %v3340_v49, %s3025_s19 }
 0x103   : > { %v914_v9 = vpop.permute.xlu1 %913  ;;  %v920_v43 = vpop.permute.xlu0 %919 }
 0x104   : > { %1005 = vst.msk [vmem:[#allocation3 + $0x28] sm:$0xff] %vm999_vm4, %v914_v9  ;;  %1008 = vst.msk [vmem:[#allocation3 + $0x40] sm:$0xff] %vm999_vm4, %v920_v43 }
 0x105   : > { %1873 = vrot.lane.b32.xlu1 %v3340_v49, %s3028_s21  ;;  %2066 = vrot.lane.b32.xlu0 %v3545_v5, %s3029_s22 }
 0x107   : > { %v918_v52 = vpop.permute.xlu1 %917  ;;  %v924_v11 = vpop.permute.xlu0 %923 }
 0x108   : > { %1007 = vst.msk [vmem:[#allocation3 + $0x38] sm:$0xff] %vm999_vm4, %v918_v52  ;;  %1010 = vst.msk [vmem:[#allocation3 + $0x50] sm:$0xff] %vm999_vm4, %v924_v11 }
 0x109   : > { %1875 = vrot.lane.b32.xlu1 %v3398_v31, %s3028_s21  ;;  %1490 = vrot.lane.b32.xlu0 %v3545_v5, %s3026_s26 }
 0x10b   : > { %v922_v8 = vpop.permute.xlu1 %921  ;;  %v928_v44 = vpop.permute.xlu0 %927 }
 0x10c   : > { %1009 = vst.msk [vmem:[#allocation3 + $0x48] sm:$0xff] %vm999_vm4, %v922_v8  ;;  %1012 = vst.msk [vmem:[#allocation3 + $0x60] sm:$0xff] %vm999_vm4, %v928_v44 }
 0x10d   : > { %1299 = vrot.lane.b32.xlu1 %v3398_v31, %s3025_s19  ;;  %1492 = vrot.lane.b32.xlu0 %v3559_v24, %s3026_s26  ;;  %v1809_v31 = vld [vmem:[#allocation2 + $0x61] sm:$0xff] }
 0x10f   : > { %v926_v49 = vpop.permute.xlu1 %925  ;;  %v932_v46 = vpop.permute.xlu0 %931 }
 0x110   : > { %1011 = vst.msk [vmem:[#allocation3 + $0x58] sm:$0xff] %vm999_vm4, %v926_v49  ;;  %1014 = vst.msk [vmem:[#allocation3 + $0x70] sm:$0xff] %vm999_vm4, %v932_v46  ;;  %v1817_v46 = vld [vmem:[#allocation2 + $0xc1] sm:$0xff] }
 0x111   : > { %2068 = vrot.lane.b32.xlu1 %v3559_v24, %s3029_s22  ;;  %1686 = vrot.lane.b32.xlu0 %v3438_v0, %s3027_s11 }
 0x113   : > { %v930_v5 = vpop.permute.xlu1 %929  ;;  %v936_v47 = vpop.permute.xlu0 %935 }
 0x114   : > { %1013 = vst.msk [vmem:[#allocation3 + $0x68] sm:$0xff] %vm999_vm4, %v930_v5  ;;  %1016 = vst.msk [vmem:[#allocation3 + $0x80] sm:$0xff] %vm999_vm4, %v936_v47  ;;  %v1818_v5 = vld [vmem:[#allocation2 + $0xc9] sm:$0xff] }
 0x115   : > { %1684 = vrot.lane.b32.xlu1 %v3423_v51, %s3027_s11  ;;  %1301 = vrot.lane.b32.xlu0 %v3378_v10, %s3025_s19 }
 0x117   : > { %v934_v37 = vpop.permute.xlu1 %933  ;;  %v940_v4 = vpop.permute.xlu0 %939 }
 0x118   : > { %1015 = vst.msk [vmem:[#allocation3 + $0x78] sm:$0xff] %vm999_vm4, %v934_v37  ;;  %1018 = vst.msk [vmem:[#allocation3 + $0x90] sm:$0xff] %vm999_vm4, %v940_v4 }
 0x119   : > { %1877 = vrot.lane.b32.xlu1 %v1809_v31, %s3028_s21  ;;  %2070 = vrot.lane.b32.xlu0 %v3553_v12, %s3029_s22 }
 0x11b   : > { %v938_v0 = vpop.permute.xlu1 %937  ;;  %v944_v24 = vpop.permute.xlu0 %943 }
 0x11c   : > { %1017 = vst.msk [vmem:[#allocation3 + $0x88] sm:$0xff] %vm999_vm4, %v938_v0  ;;  %1020 = vst.msk [vmem:[#allocation3 + $0xa0] sm:$0xff] %vm999_vm4, %v944_v24  ;;  %v1432_v0 = vld [vmem:[#allocation2 + $0xc2] sm:$0xff] }
 0x11d   : > { %1879 = vrot.lane.b32.xlu1 %v3429_v54, %s3028_s21  ;;  %1494 = vrot.lane.b32.xlu0 %v3553_v12, %s3026_s26  ;;  %v1233_v12 = vld [vmem:[#allocation2 + $0x79] sm:$0xff] }
 0x11f   : > { %v942_v10 = vpop.permute.xlu1 %941  ;;  %v948_v51 = vpop.permute.xlu0 %947 }
 0x120   : > { %1019 = vst.msk [vmem:[#allocation3 + $0x98] sm:$0xff] %vm999_vm4, %v942_v10  ;;  %1022 = vst.msk [vmem:[#allocation3 + $0xb0] sm:$0xff] %vm999_vm4, %v948_v51  ;;  %v1433_v51 = vld [vmem:[#allocation2 + $0xca] sm:$0xff] }
 0x121   : > { %1303 = vrot.lane.b32.xlu1 %v3429_v54, %s3025_s19  ;;  %1496 = vrot.lane.b32.xlu0 %v3567_v29, %s3026_s26 }
 0x123   : > { %v946_v50 = vpop.permute.xlu1 %945  ;;  %v952_v55 = vpop.permute.xlu0 %951 }
 0x124   : > { %1021 = vst.msk [vmem:[#allocation3 + $0xa8] sm:$0xff] %vm999_vm4, %v946_v50  ;;  %1024 = vst.msk [vmem:[#allocation3 + $0xc0] sm:$0xff] %vm999_vm4, %v952_v55 }
 0x125   : > { %2072 = vrot.lane.b32.xlu1 %v3567_v29, %s3029_s22  ;;  %1690 = vrot.lane.b32.xlu0 %v3454_v14, %s3027_s11  ;;  %v1812_v14 = vld [vmem:[#allocation2 + $0x81] sm:$0xff] }
 0x127   : > { %v950_v56 = vpop.permute.xlu1 %949  ;;  %v956_v45 = vpop.permute.xlu0 %955 }
 0x128   : > { %1023 = vst.msk [vmem:[#allocation3 + $0xb8] sm:$0xff] %vm999_vm4, %v950_v56  ;;  %1026 = vst.msk [vmem:[#allocation3 + $0xd0] sm:$0xff] %vm999_vm4, %v956_v45  ;;  %v1819_v56 = vld [vmem:[#allocation2 + $0xd9] sm:$0xff]  ;;  %v1820_v45 = vld [vmem:[#allocation2 + $0xe1] sm:$0xff] }
 0x129   : > { %1688 = vrot.lane.b32.xlu1 %v3427_v53, %s3027_s11  ;;  %1305 = vrot.lane.b32.xlu0 %v1233_v12, %s3025_s19 }
 0x12b   : > { %v954_v54 = vpop.permute.xlu1 %953  ;;  %v960_v1 = vpop.permute.xlu0 %959 }
 0x12c   : > { %1025 = vst.msk [vmem:[#allocation3 + $0xc8] sm:$0xff] %vm999_vm4, %v954_v54  ;;  %1028 = vst.msk [vmem:[#allocation3 + $0xe0] sm:$0xff] %vm999_vm4, %v960_v1 }
 0x12d   : > { %1881 = vrot.lane.b32.xlu1 %v1233_v12, %s3028_s21  ;;  %2074 = vrot.lane.b32.xlu0 %v3561_v25, %s3029_s22 }
 0x12f   : > { %v958_v29 = vpop.permute.xlu1 %957  ;;  %v964_v57 = vpop.permute.xlu0 %963 }
 0x130   : > { %1027 = vst.msk [vmem:[#allocation3 + $0xd8] sm:$0xff] %vm999_vm4, %v958_v29  ;;  %1030 = vst.msk [vmem:[#allocation3 + $0xf0] sm:$0xff] %vm999_vm4, %v964_v57 }
 0x131   : > { %1883 = vrot.lane.b32.xlu1 %v1812_v14, %s3028_s21  ;;  %1498 = vrot.lane.b32.xlu0 %v3561_v25, %s3026_s26  ;;  %v1235_v25 = vld [vmem:[#allocation2 + $0x91] sm:$0xff] }
 0x133   : > { %v962_v53 = vpop.permute.xlu1 %961  ;;  %v1097_v63 = vpop.permute.xlu0 %1096 }
 0x134   : > { %1029 = vst.msk [vmem:[#allocation3 + $0xe8] sm:$0xff] %vm999_vm4, %v962_v53 }
 0x135   : > { %1193 = vst.msk [vmem:[#allocation3] sm:$0xff] %vm1192_vm5, %v1097_v63  ;;  %1307 = vrot.lane.b32.xlu1 %v1812_v14, %s3025_s19  ;;  %1500 = vrot.lane.b32.xlu0 %v3575_v32, %s3026_s26 }
 0x137   : > { %v966_v58 = vpop.permute.xlu1 %965  ;;  %v1101_v6 = vpop.permute.xlu0 %1100 }
 0x138   : > { %1031 = vst.msk [vmem:[#allocation3 + $0xf8] sm:$0xff] %vm999_vm4, %v966_v58 }
 0x139   : > { %1195 = vst.msk [vmem:[#allocation3 + $0x10] sm:$0xff] %vm1192_vm5, %v1101_v6  ;;  %2076 = vrot.lane.b32.xlu1 %v3575_v32, %s3029_s22  ;;  %1694 = vrot.lane.b32.xlu0 %v3464_v17, %s3027_s11  ;;  %v1814_v17 = vld [vmem:[#allocation2 + $0x99] sm:$0xff] }
 0x13b   : > { %v1099_v59 = vpop.permute.xlu1 %1098  ;;  %v1105_v60 = vpop.permute.xlu0 %1104 }
 0x13c   : > { %1194 = vst.msk [vmem:[#allocation3 + $0x8] sm:$0xff] %vm1192_vm5, %v1099_v59  ;;  %1197 = vst.msk [vmem:[#allocation3 + $0x20] sm:$0xff] %vm1192_vm5, %v1105_v60  ;;  %v314_v59 = vld [vmem:[%s3085_s30 + $0xf0] sm:$0xff] }
 0x13d   : > { %1692 = vrot.lane.b32.xlu1 %v3452_v13, %s3027_s11  ;;  %1309 = vrot.lane.b32.xlu0 %v1235_v25, %s3025_s19  ;;  %v357_v60 = vmul.f32 %v3256_v16, %v314_v59 }
 0x13f   : > { %v1103_v7 = vpop.permute.xlu1 %1102  ;;  %v1109_v61 = vpop.permute.xlu0 %1108 }
 0x140   : > { %1196 = vst.msk [vmem:[#allocation3 + $0x18] sm:$0xff] %vm1192_vm5, %v1103_v7  ;;  %1199 = vst.msk [vmem:[#allocation3 + $0x30] sm:$0xff] %vm1192_vm5, %v1109_v61 }
 0x141   : > { %1885 = vrot.lane.b32.xlu1 %v1235_v25, %s3028_s21  ;;  %2078 = vrot.lane.b32.xlu0 %v3569_v30, %s3029_s22 }
 0x143   : > { %v1107_v32 = vpop.permute.xlu1 %1106  ;;  %v1113_v38 = vpop.permute.xlu0 %1112 }
 0x144   : > { %1198 = vst.msk [vmem:[#allocation3 + $0x28] sm:$0xff] %vm1192_vm5, %v1107_v32  ;;  %1201 = vst.msk [vmem:[#allocation3 + $0x40] sm:$0xff] %vm1192_vm5, %v1113_v38  ;;  %v315_v32 = vld [vmem:[%s3085_s30 + $0xf8] sm:$0xff] }
 0x145   : > { %1887 = vrot.lane.b32.xlu1 %v1814_v17, %s3028_s21  ;;  %1502 = vrot.lane.b32.xlu0 %v3569_v30, %s3026_s26  ;;  %v1237_v30 = vld [vmem:[#allocation2 + $0xa9] sm:$0xff] }
 0x147   : > { %v1111_v13 = vpop.permute.xlu1 %1110  ;;  %v1117_v62 = vpop.permute.xlu0 %1116 }
 0x148   : > { %1200 = vst.msk [vmem:[#allocation3 + $0x38] sm:$0xff] %vm1192_vm5, %v1111_v13  ;;  %1203 = vst.msk [vmem:[#allocation3 + $0x50] sm:$0xff] %vm1192_vm5, %v1117_v62  ;;  %v358_v13 = vmul.f32 %v3256_v16, %v315_v32 }
 0x149   : > { %1311 = vrot.lane.b32.xlu1 %v1814_v17, %s3025_s19  ;;  %1504 = vrot.lane.b32.xlu0 %v3583_v36, %s3026_s26  ;;  %v395_v17 = vadd.f32 %v3263_v23, %v357_v60  ;;  %v1634_v60 = vld [vmem:[#allocation2 + $0x138] sm:$0xff] }
 0x14b   : > { %v1115_v2 = vpop.permute.xlu1 %1114  ;;  %v1121_v41 = vpop.permute.xlu0 %1120  ;;  %v427_v38 = vmul.f32 0.3, %v395_v17 }
 0x14c   : > { %1202 = vst.msk [vmem:[#allocation3 + $0x48] sm:$0xff] %vm1192_vm5, %v1115_v2  ;;  %1205 = vst.msk [vmem:[#allocation3 + $0x60] sm:$0xff] %vm1192_vm5, %v1121_v41 }
 0x14d   : > { %2080 = vrot.lane.b32.xlu1 %v3583_v36, %s3029_s22  ;;  %1698 = vrot.lane.b32.xlu0 %v3468_v19, %s3027_s11  ;;  %v1816_v19 = vld [vmem:[#allocation2 + $0xb1] sm:$0xff] }
 0x14f   : > { %v1119_v3 = vpop.permute.xlu1 %1118  ;;  %v1125_v48 = vpop.permute.xlu0 %1124 }
 0x150   : > { %1204 = vst.msk [vmem:[#allocation3 + $0x58] sm:$0xff] %vm1192_vm5, %v1119_v3  ;;  %1207 = vst.msk [vmem:[#allocation3 + $0x70] sm:$0xff] %vm1192_vm5, %v1125_v48  ;;  %v396_v3 = vadd.f32 %v3263_v23, %v358_v13  ;;  %v1821_v48 = vld [vmem:[#allocation2 + $0xf1] sm:$0xff] }
 0x151   : > { %1696 = vrot.lane.b32.xlu1 %v3456_v15, %s3027_s11  ;;  %1313 = vrot.lane.b32.xlu0 %v1237_v30, %s3025_s19 }
 0x152   : > { %v428_v16 = vmul.f32 0.3, %v396_v3 }
 0x153   : > { %v1123_v9 = vpop.permute.xlu1 %1122  ;;  %v1292_v43 = vpop.permute.xlu0 %1291 }
 0x154   : > { %1206 = vst.msk [vmem:[#allocation3 + $0x68] sm:$0xff] %vm1192_vm5, %v1123_v9  ;;  %v1822_v9 = vld [vmem:[#allocation2 + $0xf9] sm:$0xff]  ;;  %v460_v23 = vmax.f32 %v396_v3, %v428_v16 }
 0x155   : > { %1387 = vst.msk [vmem:[#allocation3 + $0x8] sm:$0xff] %vm1385_vm6, %v1292_v43  ;;  %1889 = vrot.lane.b32.xlu1 %v1237_v30, %s3028_s21  ;;  %2082 = vrot.lane.b32.xlu0 %v3577_v34, %s3029_s22  ;;  %v459_v30 = vmax.f32 %v395_v17, %v427_v38  ;;  %v1635_v17 = vld [vmem:[#allocation2 + $0x140] sm:$0xff] }
 0x156   : > { %549 = vst.msk [vmem:[#allocation2 + $0x189] sm:$0xff] %vm461_vm1, %v460_v23 }
 0x157   : > { %v1290_v36 = vpop.permute.xlu1 %1289  ;;  %v1485_v52 = vpop.permute.xlu0 %1484  ;;  %548 = vst.msk [vmem:[#allocation2 + $0x181] sm:$0xff] %vm461_vm1, %v459_v30  ;;  %v1828_v30 = vld [vmem:[#allocation2 + $0x141] sm:$0xff] }
 0x158   : > { %1386 = vst.msk [vmem:[#allocation3] sm:$0xff] %vm1385_vm6, %v1290_v36  ;;  %v2014_v36 = vld [vmem:[#allocation2 + $0xf2] sm:$0xff] }
 0x159   : > { %1580 = vst.msk [vmem:[#allocation3 + $0x8] sm:$0xff] %vm1578_vm7, %v1485_v52  ;;  %1891 = vrot.lane.b32.xlu1 %v1816_v19, %s3028_s21  ;;  %1506 = vrot.lane.b32.xlu0 %v3577_v34, %s3026_s26  ;;  %v2015_v52 = vld [vmem:[#allocation2 + $0xfa] sm:$0xff] }
 0x15b   : > { %v1483_v15 = vpop.permute.xlu1 %1482  ;;  %v1679_v11 = vpop.permute.xlu0 %1678 }
 0x15c   : > { %1579 = vst.msk [vmem:[#allocation3] sm:$0xff] %vm1578_vm7, %v1483_v15 }
 0x15d   : > { %1774 = vst.msk [vmem:[#allocation3 + $0x8] sm:$0xff] %vm1772_vm8, %v1679_v11  ;;  %1315 = vrot.lane.b32.xlu1 %v1816_v19, %s3025_s19  ;;  %1508 = vrot.lane.b32.xlu0 %v3591_v40, %s3026_s26 }
 0x15f   : > { %v1677_v8 = vpop.permute.xlu1 %1676  ;;  %v1294_v44 = vpop.permute.xlu0 %1293 }
 0x160   : > { %1773 = vst.msk [vmem:[#allocation3] sm:$0xff] %vm1772_vm8, %v1677_v8 }
 0x161   : > { %1388 = vst.msk [vmem:[#allocation3 + $0x10] sm:$0xff] %vm1385_vm6, %v1294_v44  ;;  %2084 = vrot.lane.b32.xlu1 %v3591_v40, %s3029_s22  ;;  %1702 = vrot.lane.b32.xlu0 %v3478_v21, %s3027_s11 }
 0x163   : > { %v1870_v34 = vpop.permute.xlu1 %1869  ;;  %v2063_v49 = vpop.permute.xlu0 %2062 }
 0x164   : > { %1966 = vst.msk [vmem:[#allocation3] sm:$0xff] %vm1965_vm9, %v1870_v34 }
 0x165   : > { %2159 = vst.msk [vmem:[#allocation3] sm:$0xff] %vm2158_vm10, %v2063_v49  ;;  %1700 = vrot.lane.b32.xlu1 %v3466_v18, %s3027_s11  ;;  %1126 = vrot.lane.b32.xlu0 %v3478_v21, %s3024_s27 }
 0x167   : > { %v1872_v40 = vpop.permute.xlu1 %1871  ;;  %v1487_v47 = vpop.permute.xlu0 %1486 }
 0x168   : > { %1967 = vst.msk [vmem:[#allocation3 + $0x8] sm:$0xff] %vm1965_vm9, %v1872_v40 }
 0x169   : > { %1581 = vst.msk [vmem:[#allocation3 + $0x10] sm:$0xff] %vm1578_vm7, %v1487_v47  ;;  %1893 = vrot.lane.b32.xlu1 %v1817_v46, %s3028_s21  ;;  %1895 = vrot.lane.b32.xlu0 %v1818_v5, %s3028_s21 }
 0x16b   : > { %v1296_v31 = vpop.permute.xlu1 %1295  ;;  %v1489_v37 = vpop.permute.xlu0 %1488 }
 0x16c   : > { %1389 = vst.msk [vmem:[#allocation3 + $0x18] sm:$0xff] %vm1385_vm6, %v1296_v31  ;;  %v2191_v18 = vld [vmem:[#allocation3] sm:$0xff] }
 0x16d   : > { %1582 = vst.msk [vmem:[#allocation3 + $0x18] sm:$0xff] %vm1578_vm7, %v1489_v37  ;;  %1317 = vrot.lane.b32.xlu1 %v1817_v46, %s3025_s19  ;;  %1319 = vrot.lane.b32.xlu0 %v1818_v5, %s3025_s19  ;;  %v1823_v31 = vld [vmem:[#allocation2 + $0x109] sm:$0xff]  ;;  %v1824_v37 = vld [vmem:[#allocation2 + $0x111] sm:$0xff] }
 0x16e   : > { %2894 = vmatprep.mubr.f32.mxu0 %v2191_v18 }
 0x16f   : > { %v2065_v21 = vpop.permute.xlu1 %2064  ;;  %v1683_v4 = vpop.permute.xlu0 %1682 }
 0x170   : > { %2160 = vst.msk [vmem:[#allocation3 + $0x8] sm:$0xff] %vm2158_vm10, %v2065_v21 }
 0x171   : > { %1776 = vst.msk [vmem:[#allocation3 + $0x18] sm:$0xff] %vm1772_vm8, %v1683_v4  ;;  %2086 = vrot.lane.b32.xlu1 %v3585_v39, %s3029_s22  ;;  %2088 = vrot.lane.b32.xlu0 %v3596_v42, %s3029_s22 }
 0x173   : > { %v1681_v24 = vpop.permute.xlu1 %1680  ;;  %v1298_v10 = vpop.permute.xlu0 %1297 }
 0x174   : > { %1775 = vst.msk [vmem:[#allocation3 + $0x10] sm:$0xff] %vm1772_vm8, %v1681_v24 }
 0x175   : > { %1390 = vst.msk [vmem:[#allocation3 + $0x20] sm:$0xff] %vm1385_vm6, %v1298_v10  ;;  %1510 = vrot.lane.b32.xlu1 %v1432_v0, %s3026_s26  ;;  %1704 = vrot.lane.b32.xlu0 %v3476_v20, %s3027_s11 }
 0x177   : > { %v1874_v50 = vpop.permute.xlu1 %1873  ;;  %v2067_v55 = vpop.permute.xlu0 %2066  ;;  %v2192_v12 = vld [vmem:[#allocation3 + $0x8] sm:$0xff] }
 0x178   : > { %1968 = vst.msk [vmem:[#allocation3 + $0x10] sm:$0xff] %vm1965_vm9, %v1874_v50  ;;  %2895 = vmatmul.mubr.f32.vlgmr.msra.gmra.mrb[0].mxu0 %v2192_v12  ;;  %v1632_v50 = vld [vmem:[#allocation2 + $0x120] sm:$0xff] }
 0x179   : > { %2161 = vst.msk [vmem:[#allocation3 + $0x10] sm:$0xff] %vm2158_vm10, %v2067_v55  ;;  %1512 = vrot.lane.b32.xlu1 %v1433_v51, %s3026_s26  ;;  %1706 = vrot.lane.b32.xlu0 %v3490_v26, %s3027_s11 }
 0x17b   : > { %v1876_v39 = vpop.permute.xlu1 %1875  ;;  %v1491_v42 = vpop.permute.xlu0 %1490 }
 0x17c   : > { %1969 = vst.msk [vmem:[#allocation3 + $0x18] sm:$0xff] %vm1965_vm9, %v1876_v39 }
 0x17d   : > { %1583 = vst.msk [vmem:[#allocation3 + $0x20] sm:$0xff] %vm1578_vm7, %v1491_v42  ;;  %1128 = vrot.lane.b32.xlu1 %v3476_v20, %s3024_s27  ;;  %1130 = vrot.lane.b32.xlu0 %v3490_v26, %s3024_s27  ;;  %v2012_v20 = vld [vmem:[#allocation2 + $0xda] sm:$0xff]  ;;  %v2013_v26 = vld [vmem:[#allocation2 + $0xe2] sm:$0xff] }
 0x17f   : > { %v1300_v54 = vpop.permute.xlu1 %1299  ;;  %v1493_v1 = vpop.permute.xlu0 %1492 }
 0x180   : > { %1391 = vst.msk [vmem:[#allocation3 + $0x28] sm:$0xff] %vm1385_vm6, %v1300_v54  ;;  %v2193_v14 = vld [vmem:[#allocation3 + $0x10] sm:$0xff] }
 0x181   : > { %1584 = vst.msk [vmem:[#allocation3 + $0x28] sm:$0xff] %vm1578_vm7, %v1493_v1  ;;  %1897 = vrot.lane.b32.xlu1 %v1819_v56, %s3028_s21  ;;  %1899 = vrot.lane.b32.xlu0 %v1820_v45, %s3028_s21 }
 0x182   : > { %2897 = vmatprep.mubr.f32.mxu0 %v2193_v14  ;;  %v1825_v14 = vld [vmem:[#allocation2 + $0x121] sm:$0xff] }
 0x183   : > { %v2069_v29 = vpop.permute.xlu1 %2068  ;;  %v1687_v57 = vpop.permute.xlu0 %1686 }
 0x184   : > { %2162 = vst.msk [vmem:[#allocation3 + $0x18] sm:$0xff] %vm2158_vm10, %v2069_v29  ;;  %v1826_v29 = vld [vmem:[#allocation2 + $0x129] sm:$0xff] }
 0x185   : > { %1778 = vst.msk [vmem:[#allocation3 + $0x28] sm:$0xff] %vm1772_vm8, %v1687_v57  ;;  %1321 = vrot.lane.b32.xlu1 %v1819_v56, %s3025_s19  ;;  %1323 = vrot.lane.b32.xlu0 %v1820_v45, %s3025_s19  ;;  %v1055_v45 = vld [vmem:[#allocation2 + $0x128] sm:$0xff] }
 0x187   : > { %v1685_v53 = vpop.permute.xlu1 %1684  ;;  %v1302_v63 = vpop.permute.xlu0 %1301 }
 0x188   : > { %1777 = vst.msk [vmem:[#allocation3 + $0x20] sm:$0xff] %vm1772_vm8, %v1685_v53 }
 0x189   : > { %1392 = vst.msk [vmem:[#allocation3 + $0x30] sm:$0xff] %vm1385_vm6, %v1302_v63  ;;  %2090 = vrot.lane.b32.xlu1 %v2012_v20, %s3029_s22  ;;  %2092 = vrot.lane.b32.xlu0 %v2013_v26, %s3029_s22  ;;  %v2018_v63 = vld [vmem:[#allocation2 + $0x122] sm:$0xff] }
 0x18b   : > { %v1878_v58 = vpop.permute.xlu1 %1877  ;;  %v2071_v6 = vpop.permute.xlu0 %2070  ;;  %v2194_v25 = vld [vmem:[#allocation3 + $0x18] sm:$0xff] }
 0x18c   : > { %1970 = vst.msk [vmem:[#allocation3 + $0x20] sm:$0xff] %vm1965_vm9, %v1878_v58  ;;  %2898 = vmatmul.mubr.f32.gmra.mrb[2].mxu0 %v2194_v25  ;;  %v2019_v58 = vld [vmem:[#allocation2 + $0x12a] sm:$0xff] }
 0x18d   : > { %2163 = vst.msk [vmem:[#allocation3 + $0x20] sm:$0xff] %vm2158_vm10, %v2071_v6  ;;  %1514 = vrot.lane.b32.xlu1 %v2012_v20, %s3026_s26  ;;  %1708 = vrot.lane.b32.xlu0 %v3480_v22, %s3027_s11 }
 0x18f   : > { %v1880_v7 = vpop.permute.xlu1 %1879  ;;  %v1495_v61 = vpop.permute.xlu0 %1494 }
 0x190   : > { %1971 = vst.msk [vmem:[#allocation3 + $0x28] sm:$0xff] %vm1965_vm9, %v1880_v7 }
 0x191   : > { %1585 = vst.msk [vmem:[#allocation3 + $0x30] sm:$0xff] %vm1578_vm7, %v1495_v61  ;;  %1516 = vrot.lane.b32.xlu1 %v2013_v26, %s3026_s26  ;;  %1710 = vrot.lane.b32.xlu0 %v3498_v28, %s3027_s11 }
 0x193   : > { %v1304_v62 = vpop.permute.xlu1 %1303  ;;  %v1497_v2 = vpop.permute.xlu0 %1496 }
 0x194   : > { %1393 = vst.msk [vmem:[#allocation3 + $0x38] sm:$0xff] %vm1385_vm6, %v1304_v62  ;;  %v2195_v41 = vld [vmem:[#allocation3 + $0x20] sm:$0xff] }
 0x195   : > { %1586 = vst.msk [vmem:[#allocation3 + $0x38] sm:$0xff] %vm1578_vm7, %v1497_v2  ;;  %1132 = vrot.lane.b32.xlu1 %v3480_v22, %s3024_s27  ;;  %1134 = vrot.lane.b32.xlu0 %v3498_v28, %s3024_s27 }
 0x196   : > { %2900 = vmatprep.mubr.f32.mxu0 %v2195_v41  ;;  %v1827_v41 = vld [vmem:[#allocation2 + $0x139] sm:$0xff] }
 0x197   : > { %v2073_v43 = vpop.permute.xlu1 %2072  ;;  %v1691_v19 = vpop.permute.xlu0 %1690 }
 0x198   : > { %2164 = vst.msk [vmem:[#allocation3 + $0x28] sm:$0xff] %vm2158_vm10, %v2073_v43  ;;  %v2020_v43 = vld [vmem:[#allocation2 + $0x13a] sm:$0xff] }
 0x199   : > { %1780 = vst.msk [vmem:[#allocation3 + $0x38] sm:$0xff] %vm1772_vm8, %v1691_v19  ;;  %1901 = vrot.lane.b32.xlu1 %v1821_v48, %s3028_s21  ;;  %1903 = vrot.lane.b32.xlu0 %v1822_v9, %s3028_s21  ;;  %v2021_v19 = vld [vmem:[#allocation2 + $0x142] sm:$0xff] }
 0x19b   : > { %v1689_v22 = vpop.permute.xlu1 %1688  ;;  %v1306_v28 = vpop.permute.xlu0 %1305 }
 0x19c   : > { %1779 = vst.msk [vmem:[#allocation3 + $0x30] sm:$0xff] %vm1772_vm8, %v1689_v22 }
 0x19d   : > { %1394 = vst.msk [vmem:[#allocation3 + $0x40] sm:$0xff] %vm1385_vm6, %v1306_v28  ;;  %1325 = vrot.lane.b32.xlu1 %v1821_v48, %s3025_s19  ;;  %1327 = vrot.lane.b32.xlu0 %v1822_v9, %s3025_s19 }
 0x19f   : > { %v1882_v15 = vpop.permute.xlu1 %1881  ;;  %v2075_v11 = vpop.permute.xlu0 %2074  ;;  %v2196_v8 = vld [vmem:[#allocation3 + $0x28] sm:$0xff] }
 0x1a0   : > { %1972 = vst.msk [vmem:[#allocation3 + $0x30] sm:$0xff] %vm1965_vm9, %v1882_v15  ;;  %2901 = vmatmul.mubr.f32.gmra.mrb[4].mxu0 %v2196_v8 }
 0x1a1   : > { %2165 = vst.msk [vmem:[#allocation3 + $0x30] sm:$0xff] %vm2158_vm10, %v2075_v11  ;;  %2094 = vrot.lane.b32.xlu1 %v2014_v36, %s3029_s22  ;;  %2096 = vrot.lane.b32.xlu0 %v2015_v52, %s3029_s22  ;;  %v1636_v11 = vld [vmem:[#allocation2 + $0x150] sm:$0xff] }
 0x1a3   : > { %v1884_v44 = vpop.permute.xlu1 %1883  ;;  %v1499_v34 = vpop.permute.xlu0 %1498 }
 0x1a4   : > { %1973 = vst.msk [vmem:[#allocation3 + $0x38] sm:$0xff] %vm1965_vm9, %v1884_v44 }
 0x1a5   : > { %1587 = vst.msk [vmem:[#allocation3 + $0x40] sm:$0xff] %vm1578_vm7, %v1499_v34  ;;  %1518 = vrot.lane.b32.xlu1 %v2014_v36, %s3026_s26  ;;  %1712 = vrot.lane.b32.xlu0 %v3496_v27, %s3027_s11  ;;  %v1637_v34 = vld [vmem:[#allocation2 + $0x158] sm:$0xff] }
 0x1a7   : > { %v1308_v49 = vpop.permute.xlu1 %1307  ;;  %v1501_v46 = vpop.permute.xlu0 %1500 }
 0x1a8   : > { %1395 = vst.msk [vmem:[#allocation3 + $0x48] sm:$0xff] %vm1385_vm6, %v1308_v49  ;;  %v2197_v5 = vld [vmem:[#allocation3 + $0x30] sm:$0xff] }
 0x1a9   : > { %1588 = vst.msk [vmem:[#allocation3 + $0x48] sm:$0xff] %vm1578_vm7, %v1501_v46  ;;  %1520 = vrot.lane.b32.xlu1 %v2015_v52, %s3026_s26  ;;  %1714 = vrot.lane.b32.xlu0 %v3505_v33, %s3027_s11 }
 0x1aa   : > { %2903 = vmatprep.mubr.f32.mxu0 %v2197_v5  ;;  %v1829_v5 = vld [vmem:[#allocation2 + $0x151] sm:$0xff] }
 0x1ab   : > { %v2077_v40 = vpop.permute.xlu1 %2076  ;;  %v1695_v47 = vpop.permute.xlu0 %1694 }
 0x1ac   : > { %2166 = vst.msk [vmem:[#allocation3 + $0x38] sm:$0xff] %vm2158_vm10, %v2077_v40 }
 0x1ad   : > { %1782 = vst.msk [vmem:[#allocation3 + $0x48] sm:$0xff] %vm1772_vm8, %v1695_v47  ;;  %1136 = vrot.lane.b32.xlu1 %v3496_v27, %s3024_s27  ;;  %1138 = vrot.lane.b32.xlu0 %v3505_v33, %s3024_s27  ;;  %v2016_v27 = vld [vmem:[#allocation2 + $0x10a] sm:$0xff]  ;;  %v2017_v33 = vld [vmem:[#allocation2 + $0x112] sm:$0xff] }
 0x1af   : > { %v1693_v18 = vpop.permute.xlu1 %1692  ;;  %v1310_v21 = vpop.permute.xlu0 %1309 }
 0x1b0   : > { %1781 = vst.msk [vmem:[#allocation3 + $0x40] sm:$0xff] %vm1772_vm8, %v1693_v18 }
 0x1b1   : > { %1396 = vst.msk [vmem:[#allocation3 + $0x50] sm:$0xff] %vm1385_vm6, %v1310_v21  ;;  %1905 = vrot.lane.b32.xlu1 %v1823_v31, %s3028_s21  ;;  %1907 = vrot.lane.b32.xlu0 %v1824_v37, %s3028_s21  ;;  %v2022_v21 = vld [vmem:[#allocation2 + $0x152] sm:$0xff] }
 0x1b3   : > { %v1886_v4 = vpop.permute.xlu1 %1885  ;;  %v2079_v0 = vpop.permute.xlu0 %2078  ;;  %v2198_v24 = vld [vmem:[#allocation3 + $0x38] sm:$0xff] }
 0x1b4   : > { %1974 = vst.msk [vmem:[#allocation3 + $0x40] sm:$0xff] %vm1965_vm9, %v1886_v4  ;;  %2904 = vmatmul.mubr.f32.gmra.mrb[6].mxu0 %v2198_v24  ;;  %v2023_v24 = vld [vmem:[#allocation2 + $0x15a] sm:$0xff] }
 0x1b5   : > { %2167 = vst.msk [vmem:[#allocation3 + $0x40] sm:$0xff] %vm2158_vm10, %v2079_v0  ;;  %1329 = vrot.lane.b32.xlu1 %v1823_v31, %s3025_s19  ;;  %1331 = vrot.lane.b32.xlu0 %v1824_v37, %s3025_s19  ;;  %v1830_v31 = vld [vmem:[#allocation2 + $0x159] sm:$0xff] }
 0x1b7   : > { %v1888_v10 = vpop.permute.xlu1 %1887  ;;  %v1503_v51 = vpop.permute.xlu0 %1502 }
 0x1b8   : > { %1975 = vst.msk [vmem:[#allocation3 + $0x48] sm:$0xff] %vm1965_vm9, %v1888_v10 }
 0x1b9   : > { %1589 = vst.msk [vmem:[#allocation3 + $0x50] sm:$0xff] %vm1578_vm7, %v1503_v51  ;;  %2098 = vrot.lane.b32.xlu1 %v2016_v27, %s3029_s22  ;;  %2100 = vrot.lane.b32.xlu0 %v2017_v33, %s3029_s22 }
 0x1bb   : > { %v1312_v55 = vpop.permute.xlu1 %1311  ;;  %v1505_v12 = vpop.permute.xlu0 %1504 }
 0x1bc   : > { %1397 = vst.msk [vmem:[#allocation3 + $0x58] sm:$0xff] %vm1385_vm6, %v1312_v55  ;;  %v2199_v39 = vld [vmem:[#allocation3 + $0x40] sm:$0xff] }
 0x1bd   : > { %1590 = vst.msk [vmem:[#allocation3 + $0x58] sm:$0xff] %vm1578_vm7, %v1505_v12  ;;  %1522 = vrot.lane.b32.xlu1 %v2016_v27, %s3026_s26  ;;  %1716 = vrot.lane.b32.xlu0 %v1632_v50, %s3027_s11 }
 0x1be   : > { %2906 = vmatprep.mubr.f32.mxu0 %v2199_v39  ;;  %v1639_v39 = vld [vmem:[#allocation2 + $0x170] sm:$0xff] }
 0x1bf   : > { %v2081_v42 = vpop.permute.xlu1 %2080  ;;  %v1699_v56 = vpop.permute.xlu0 %1698 }
 0x1c0   : > { %2168 = vst.msk [vmem:[#allocation3 + $0x48] sm:$0xff] %vm2158_vm10, %v2081_v42 }
 0x1c1   : > { %1784 = vst.msk [vmem:[#allocation3 + $0x58] sm:$0xff] %vm1772_vm8, %v1699_v56  ;;  %1524 = vrot.lane.b32.xlu1 %v2017_v33, %s3026_s26  ;;  %1718 = vrot.lane.b32.xlu0 %v3512_v35, %s3027_s11 }
 0x1c3   : > { %v1697_v54 = vpop.permute.xlu1 %1696  ;;  %v1314_v1 = vpop.permute.xlu0 %1313 }
 0x1c4   : > { %1783 = vst.msk [vmem:[#allocation3 + $0x50] sm:$0xff] %vm1772_vm8, %v1697_v54 }
 0x1c5   : > { %1398 = vst.msk [vmem:[#allocation3 + $0x60] sm:$0xff] %vm1385_vm6, %v1314_v1  ;;  %1140 = vrot.lane.b32.xlu1 %v1632_v50, %s3024_s27  ;;  %1142 = vrot.lane.b32.xlu0 %v1055_v45, %s3024_s27  ;;  %v1638_v50 = vld [vmem:[#allocation2 + $0x168] sm:$0xff] }
 0x1c6   : > { %v1831_v45 = vld [vmem:[#allocation2 + $0x169] sm:$0xff] }
 0x1c7   : > { %v1890_v57 = vpop.permute.xlu1 %1889  ;;  %v2083_v20 = vpop.permute.xlu0 %2082  ;;  %v2200_v26 = vld [vmem:[#allocation3 + $0x48] sm:$0xff] }
 0x1c8   : > { %1976 = vst.msk [vmem:[#allocation3 + $0x50] sm:$0xff] %vm1965_vm9, %v1890_v57  ;;  %2907 = vmatmul.mubr.f32.gmra.mrb[8].mxu0 %v2200_v26 }
 0x1c9   : > { %2169 = vst.msk [vmem:[#allocation3 + $0x50] sm:$0xff] %vm2158_vm10, %v2083_v20  ;;  %1909 = vrot.lane.b32.xlu1 %v1825_v14, %s3028_s21  ;;  %1911 = vrot.lane.b32.xlu0 %v1826_v29, %s3028_s21  ;;  %v2024_v20 = vld [vmem:[#allocation2 + $0x16a] sm:$0xff] }
 0x1cb   : > { %v1892_v35 = vpop.permute.xlu1 %1891  ;;  %v1507_v53 = vpop.permute.xlu0 %1506 }
 0x1cc   : > { %1977 = vst.msk [vmem:[#allocation3 + $0x58] sm:$0xff] %vm1965_vm9, %v1892_v35 }
 0x1cd   : > { %1591 = vst.msk [vmem:[#allocation3 + $0x60] sm:$0xff] %vm1578_vm7, %v1507_v53  ;;  %1333 = vrot.lane.b32.xlu1 %v1825_v14, %s3025_s19  ;;  %1335 = vrot.lane.b32.xlu0 %v1826_v29, %s3025_s19  ;;  %v1832_v14 = vld [vmem:[#allocation2 + $0x171] sm:$0xff] }
 0x1ce   : > { %v2025_v53 = vld [vmem:[#allocation2 + $0x172] sm:$0xff] }
 0x1cf   : > { %v1316_v6 = vpop.permute.xlu1 %1315  ;;  %v1509_v25 = vpop.permute.xlu0 %1508 }
 0x1d0   : > { %1399 = vst.msk [vmem:[#allocation3 + $0x68] sm:$0xff] %vm1385_vm6, %v1316_v6  ;;  %v2201_v59 = vld [vmem:[#allocation3 + $0x50] sm:$0xff] }
 0x1d1   : > { %1592 = vst.msk [vmem:[#allocation3 + $0x68] sm:$0xff] %vm1578_vm7, %v1509_v25  ;;  %2102 = vrot.lane.b32.xlu1 %v2018_v63, %s3029_s22  ;;  %2104 = vrot.lane.b32.xlu0 %v2019_v58, %s3029_s22 }
 0x1d2   : > { %2909 = vmatprep.mubr.f32.mxu0 %v2201_v59  ;;  %v1640_v59 = vld [vmem:[#allocation2 + $0x180] sm:$0xff] }
 0x1d3   : > { %v2085_v7 = vpop.permute.xlu1 %2084  ;;  %v1703_v61 = vpop.permute.xlu0 %1702 }
 0x1d4   : > { %2170 = vst.msk [vmem:[#allocation3 + $0x58] sm:$0xff] %vm2158_vm10, %v2085_v7 }
 0x1d5   : > { %1786 = vst.msk [vmem:[#allocation3 + $0x68] sm:$0xff] %vm1772_vm8, %v1703_v61  ;;  %1526 = vrot.lane.b32.xlu1 %v2018_v63, %s3026_s26  ;;  %1720 = vrot.lane.b32.xlu0 %v1634_v60, %s3027_s11  ;;  %v1641_v61 = vld [vmem:[#allocation2 + $0x188] sm:$0xff] }
 0x1d7   : > { %v1701_v32 = vpop.permute.xlu1 %1700  ;;  %v1127_v38 = vpop.permute.xlu0 %1126 }
 0x1d8   : > { %1785 = vst.msk [vmem:[#allocation3 + $0x60] sm:$0xff] %vm1772_vm8, %v1701_v32 }
 0x1d9   : > { %1208 = vst.msk [vmem:[#allocation3 + $0x78] sm:$0xff] %vm1192_vm5, %v1127_v38  ;;  %1528 = vrot.lane.b32.xlu1 %v2019_v58, %s3026_s26  ;;  %1722 = vrot.lane.b32.xlu0 %v1635_v17, %s3027_s11  ;;  %v1833_v38 = vld [vmem:[#allocation2 + $0x181] sm:$0xff] }
 0x1db   : > { %v1894_v13 = vpop.permute.xlu1 %1893  ;;  %v1896_v62 = vpop.permute.xlu0 %1895  ;;  %v2202_v2 = vld [vmem:[#allocation3 + $0x58] sm:$0xff] }
 0x1dc   : > { %1978 = vst.msk [vmem:[#allocation3 + $0x60] sm:$0xff] %vm1965_vm9, %v1894_v13  ;;  %1979 = vst.msk [vmem:[#allocation3 + $0x68] sm:$0xff] %vm1965_vm9, %v1896_v62  ;;  %2910 = vmatmul.mubr.f32.gmra.mrb[10].mxu0 %v2202_v2  ;;  %v1834_v2 = vld [vmem:[#allocation2 + $0x189] sm:$0xff] }
 0x1dd   : > { %1144 = vrot.lane.b32.xlu1 %v1634_v60, %s3024_s27  ;;  %1146 = vrot.lane.b32.xlu0 %v1635_v17, %s3024_s27 }
 0x1df   : > { %v1318_v3 = vpop.permute.xlu1 %1317  ;;  %v1320_v48 = vpop.permute.xlu0 %1319 }
 0x1e0   : > { %1400 = vst.msk [vmem:[#allocation3 + $0x70] sm:$0xff] %vm1385_vm6, %v1318_v3  ;;  %1401 = vst.msk [vmem:[#allocation3 + $0x78] sm:$0xff] %vm1385_vm6, %v1320_v48  ;;  %v2026_v3 = vld [vmem:[#allocation2 + $0x182] sm:$0xff] }
 0x1e1   : > { %1913 = vrot.lane.b32.xlu1 %v1827_v41, %s3028_s21  ;;  %1915 = vrot.lane.b32.xlu0 %v1828_v30, %s3028_s21 }
 0x1e3   : > { %v2087_v9 = vpop.permute.xlu1 %2086  ;;  %v2089_v16 = vpop.permute.xlu0 %2088 }
 0x1e4   : > { %2171 = vst.msk [vmem:[#allocation3 + $0x60] sm:$0xff] %vm2158_vm10, %v2087_v9  ;;  %2172 = vst.msk [vmem:[#allocation3 + $0x68] sm:$0xff] %vm2158_vm10, %v2089_v16  ;;  %v2027_v16 = vld [vmem:[#allocation2 + $0x18a] sm:$0xff] }
 0x1e5   : > { %1337 = vrot.lane.b32.xlu1 %v1827_v41, %s3025_s19  ;;  %1339 = vrot.lane.b32.xlu0 %v1828_v30, %s3025_s19 }
 0x1e7   : > { %v1511_v23 = vpop.permute.xlu1 %1510  ;;  %v1705_v22 = vpop.permute.xlu0 %1704 }
 0x1e8   : > { %1593 = vst.msk [vmem:[#allocation3 + $0x70] sm:$0xff] %vm1578_vm7, %v1511_v23 }
 0x1e9   : > { %1787 = vst.msk [vmem:[#allocation3 + $0x70] sm:$0xff] %vm1772_vm8, %v1705_v22  ;;  %2106 = vrot.lane.b32.xlu1 %v2020_v43, %s3029_s22  ;;  %2108 = vrot.lane.b32.xlu0 %v2021_v19, %s3029_s22 }
 0x1eb   : > { %v1513_v28 = vpop.permute.xlu1 %1512  ;;  %v1707_v36 = vpop.permute.xlu0 %1706  ;;  %v2203_v52 = vld [vmem:[#allocation3 + $0x60] sm:$0xff]  ;;  %v2204_v15 = vld [vmem:[#allocation3 + $0x68] sm:$0xff] }
 0x1ec   : > { %1594 = vst.msk [vmem:[#allocation3 + $0x78] sm:$0xff] %vm1578_vm7, %v1513_v28  ;;  %2912 = vmatprep.mubr.f32.mxu0 %v2203_v52  ;;  %v1642_v28 = vld [vmem:[#allocation2 + $0x198] sm:$0xff] }
 0x1ed   : > { %1788 = vst.msk [vmem:[#allocation3 + $0x78] sm:$0xff] %vm1772_vm8, %v1707_v36  ;;  %1530 = vrot.lane.b32.xlu1 %v2020_v43, %s3026_s26  ;;  %2913 = vmatmul.mubr.f32.gmra.mrb[12].mxu0 %v2204_v15  ;;  %v1835_v15 = vld [vmem:[#allocation2 + $0x199] sm:$0xff] }
 0x1ee   : > { %1724 = vrot.lane.b32.xlu0 %v1636_v11, %s3027_s11 }
 0x1ef   : > { %v1129_v8 = vpop.permute.xlu1 %1128  ;;  %v1131_v44 = vpop.permute.xlu0 %1130 }
 0x1f0   : > { %1209 = vst.msk [vmem:[#allocation3 + $0x80] sm:$0xff] %vm1192_vm5, %v1129_v8  ;;  %1210 = vst.msk [vmem:[#allocation3 + $0x88] sm:$0xff] %vm1192_vm5, %v1131_v44 }
 0x1f1   : > { %1532 = vrot.lane.b32.xlu1 %v2021_v19, %s3026_s26 }
 0x1f2   : > { %1726 = vrot.lane.b32.xlu0 %v1637_v34, %s3027_s11 }
 0x1f3   : > { %v1898_v49 = vpop.permute.xlu1 %1897  ;;  %v1900_v46 = vpop.permute.xlu0 %1899 }
 0x1f4   : > { %1980 = vst.msk [vmem:[#allocation3 + $0x70] sm:$0xff] %vm1965_vm9, %v1898_v49  ;;  %1981 = vst.msk [vmem:[#allocation3 + $0x78] sm:$0xff] %vm1965_vm9, %v1900_v46  ;;  %v1836_v49 = vld [vmem:[#allocation2 + $0x1a1] sm:$0xff] }
 0x1f5   : > { %1148 = vrot.lane.b32.xlu1 %v1636_v11, %s3024_s27  ;;  %v1643_v11 = vld [vmem:[#allocation2 + $0x1a0] sm:$0xff] }
 0x1f6   : > { %1150 = vrot.lane.b32.xlu0 %v1637_v34, %s3024_s27  ;;  %v2028_v34 = vld [vmem:[#allocation2 + $0x19a] sm:$0xff] }
 0x1f7   : > { %v1322_v40 = vpop.permute.xlu1 %1321  ;;  %v1324_v47 = vpop.permute.xlu0 %1323 }
 0x1f8   : > { %1402 = vst.msk [vmem:[#allocation3 + $0x80] sm:$0xff] %vm1385_vm6, %v1322_v40  ;;  %1403 = vst.msk [vmem:[#allocation3 + $0x88] sm:$0xff] %vm1385_vm6, %v1324_v47  ;;  %v2029_v40 = vld [vmem:[#allocation2 + $0x1a2] sm:$0xff] }
 0x1f9   : > { %1917 = vrot.lane.b32.xlu1 %v1829_v5, %s3028_s21 }
 0x1fa   : > { %1919 = vrot.lane.b32.xlu0 %v1830_v31, %s3028_s21 }
 0x1fb   : > { %v2091_v37 = vpop.permute.xlu1 %2090  ;;  %v2093_v18 = vpop.permute.xlu0 %2092 }
 0x1fc   : > { %2173 = vst.msk [vmem:[#allocation3 + $0x70] sm:$0xff] %vm2158_vm10, %v2091_v37  ;;  %2174 = vst.msk [vmem:[#allocation3 + $0x78] sm:$0xff] %vm2158_vm10, %v2093_v18 }
 0x1fd   : > { %1341 = vrot.lane.b32.xlu1 %v1829_v5, %s3025_s19 }
 0x1fe   : > { %1343 = vrot.lane.b32.xlu0 %v1830_v31, %s3025_s19 }
 0x1ff   : > { %v1515_v4 = vpop.permute.xlu1 %1514  ;;  %v1709_v0 = vpop.permute.xlu0 %1708 }
 0x200   : > { %1595 = vst.msk [vmem:[#allocation3 + $0x80] sm:$0xff] %vm1578_vm7, %v1515_v4 }
 0x201   : > { %1789 = vst.msk [vmem:[#allocation3 + $0x80] sm:$0xff] %vm1772_vm8, %v1709_v0  ;;  %2110 = vrot.lane.b32.xlu1 %v2022_v21, %s3029_s22 }
 0x202   : > { %2112 = vrot.lane.b32.xlu0 %v2023_v24, %s3029_s22 }
 0x203   : > { %v1517_v27 = vpop.permute.xlu1 %1516  ;;  %v1711_v33 = vpop.permute.xlu0 %1710  ;;  %v2205_v10 = vld [vmem:[#allocation3 + $0x70] sm:$0xff]  ;;  %v2206_v51 = vld [vmem:[#allocation3 + $0x78] sm:$0xff] }
 0x204   : > { %1596 = vst.msk [vmem:[#allocation3 + $0x88] sm:$0xff] %vm1578_vm7, %v1517_v27  ;;  %2915 = vmatprep.mubr.f32.mxu0 %v2205_v10 }
 0x205   : > { %1790 = vst.msk [vmem:[#allocation3 + $0x88] sm:$0xff] %vm1772_vm8, %v1711_v33  ;;  %1534 = vrot.lane.b32.xlu1 %v2022_v21, %s3026_s26  ;;  %2916 = vmatmul.mubr.f32.gmra.mrb[14].mxu0 %v2206_v51  ;;  %v4150_v21 = vld [vmem:[%s4404_s4] ss:$0 sm:$0xff] }
 0x206   : > { %1728 = vrot.lane.b32.xlu0 %v1638_v50, %s3027_s11 }
 0x207   : > { %v1133_v55 = vpop.permute.xlu1 %1132  ;;  %v1135_v12 = vpop.permute.xlu0 %1134 }
 0x208   : > { %1211 = vst.msk [vmem:[#allocation3 + $0x90] sm:$0xff] %vm1192_vm5, %v1133_v55  ;;  %1212 = vst.msk [vmem:[#allocation3 + $0x98] sm:$0xff] %vm1192_vm5, %v1135_v12 }
 0x209   : > { %1536 = vrot.lane.b32.xlu1 %v2023_v24, %s3026_s26 }
 0x20a   : > { %1730 = vrot.lane.b32.xlu0 %v1639_v39, %s3027_s11 }
 0x20b   : > { %v1902_v42 = vpop.permute.xlu1 %1901  ;;  %v1904_v56 = vpop.permute.xlu0 %1903 }
 0x20c   : > { %1982 = vst.msk [vmem:[#allocation3 + $0x80] sm:$0xff] %vm1965_vm9, %v1902_v42  ;;  %1983 = vst.msk [vmem:[#allocation3 + $0x88] sm:$0xff] %vm1965_vm9, %v1904_v56 }
 0x20d   : > { %1152 = vrot.lane.b32.xlu1 %v1638_v50, %s3024_s27 }
 0x20e   : > { %1154 = vrot.lane.b32.xlu0 %v1639_v39, %s3024_s27 }
 0x20f   : > { %v1326_v54 = vpop.permute.xlu1 %1325  ;;  %v1328_v1 = vpop.permute.xlu0 %1327 }
 0x210   : > { %1404 = vst.msk [vmem:[#allocation3 + $0x90] sm:$0xff] %vm1385_vm6, %v1326_v54  ;;  %1405 = vst.msk [vmem:[#allocation3 + $0x98] sm:$0xff] %vm1385_vm6, %v1328_v1 }
 0x211   : > { %1921 = vrot.lane.b32.xlu1 %v1831_v45, %s3028_s21 }
 0x212   : > { %1923 = vrot.lane.b32.xlu0 %v1832_v14, %s3028_s21 }
 0x213   : > { %v2095_v29 = vpop.permute.xlu1 %2094  ;;  %v2097_v57 = vpop.permute.xlu0 %2096 }
 0x214   : > { %2175 = vst.msk [vmem:[#allocation3 + $0x80] sm:$0xff] %vm2158_vm10, %v2095_v29  ;;  %2176 = vst.msk [vmem:[#allocation3 + $0x88] sm:$0xff] %vm2158_vm10, %v2097_v57 }
 0x215   : > { %1345 = vrot.lane.b32.xlu1 %v1831_v45, %s3025_s19 }
 0x216   : > { %1347 = vrot.lane.b32.xlu0 %v1832_v14, %s3025_s19 }
 0x217   : > { %v1519_v26 = vpop.permute.xlu1 %1518  ;;  %v1713_v35 = vpop.permute.xlu0 %1712 }
 0x218   : > { %1597 = vst.msk [vmem:[#allocation3 + $0x90] sm:$0xff] %vm1578_vm7, %v1519_v26 }
 0x219   : > { %1791 = vst.msk [vmem:[#allocation3 + $0x90] sm:$0xff] %vm1772_vm8, %v1713_v35  ;;  %2114 = vrot.lane.b32.xlu1 %v2024_v20, %s3029_s22 }
 0x21a   : > { %2116 = vrot.lane.b32.xlu0 %v2025_v53, %s3029_s22 }
 0x21b   : > { %v1521_v63 = vpop.permute.xlu1 %1520  ;;  %v1715_v58 = vpop.permute.xlu0 %1714  ;;  %v2207_v6 = vld [vmem:[#allocation3 + $0x80] sm:$0xff]  ;;  %v2208_v25 = vld [vmem:[#allocation3 + $0x88] sm:$0xff] }
 0x21c   : > { %1598 = vst.msk [vmem:[#allocation3 + $0x98] sm:$0xff] %vm1578_vm7, %v1521_v63  ;;  %2918 = vmatprep.mubr.f32.mxu1 %v2207_v6 }
 0x21d   : > { %1792 = vst.msk [vmem:[#allocation3 + $0x98] sm:$0xff] %vm1772_vm8, %v1715_v58  ;;  %1538 = vrot.lane.b32.xlu1 %v2024_v20, %s3026_s26  ;;  %2919 = vmatmul.mubr.f32.vlgmr.msra.gmra.mrb[0].mxu1 %v2208_v25 }
 0x21e   : > { %1732 = vrot.lane.b32.xlu0 %v1640_v59, %s3027_s11 }
 0x21f   : > { %v1137_v60 = vpop.permute.xlu1 %1136  ;;  %v1139_v7 = vpop.permute.xlu0 %1138 }
 0x220   : > { %1213 = vst.msk [vmem:[#allocation3 + $0xa0] sm:$0xff] %vm1192_vm5, %v1137_v60  ;;  %1214 = vst.msk [vmem:[#allocation3 + $0xa8] sm:$0xff] %vm1192_vm5, %v1139_v7 }
 0x221   : > { %1540 = vrot.lane.b32.xlu1 %v2025_v53, %s3026_s26 }
 0x222   : > { %1734 = vrot.lane.b32.xlu0 %v1641_v61, %s3027_s11 }
 0x223   : > { %v1906_v17 = vpop.permute.xlu1 %1905  ;;  %v1908_v32 = vpop.permute.xlu0 %1907 }
 0x224   : > { %1984 = vst.msk [vmem:[#allocation3 + $0x90] sm:$0xff] %vm1965_vm9, %v1906_v17  ;;  %1985 = vst.msk [vmem:[#allocation3 + $0x98] sm:$0xff] %vm1965_vm9, %v1908_v32 }
 0x225   : > { %1156 = vrot.lane.b32.xlu1 %v1640_v59, %s3024_s27 }
 0x226   : > { %1158 = vrot.lane.b32.xlu0 %v1641_v61, %s3024_s27 }
 0x227   : > { %v1330_v13 = vpop.permute.xlu1 %1329  ;;  %v1332_v62 = vpop.permute.xlu0 %1331 }
 0x228   : > { %1406 = vst.msk [vmem:[#allocation3 + $0xa0] sm:$0xff] %vm1385_vm6, %v1330_v13  ;;  %1407 = vst.msk [vmem:[#allocation3 + $0xa8] sm:$0xff] %vm1385_vm6, %v1332_v62 }
 0x229   : > { %1925 = vrot.lane.b32.xlu1 %v1833_v38, %s3028_s21 }
 0x22a   : > { %1927 = vrot.lane.b32.xlu0 %v1834_v2, %s3028_s21 }
 0x22b   : > { %v2099_v41 = vpop.permute.xlu1 %2098  ;;  %v2101_v30 = vpop.permute.xlu0 %2100 }
 0x22c   : > { %2177 = vst.msk [vmem:[#allocation3 + $0x90] sm:$0xff] %vm2158_vm10, %v2099_v41  ;;  %2178 = vst.msk [vmem:[#allocation3 + $0x98] sm:$0xff] %vm2158_vm10, %v2101_v30 }
 0x22d   : > { %1349 = vrot.lane.b32.xlu1 %v1833_v38, %s3025_s19 }
 0x22e   : > { %1351 = vrot.lane.b32.xlu0 %v1834_v2, %s3025_s19 }
 0x22f   : > { %v1523_v48 = vpop.permute.xlu1 %1522  ;;  %v1717_v9 = vpop.permute.xlu0 %1716 }
 0x230   : > { %1599 = vst.msk [vmem:[#allocation3 + $0xa0] sm:$0xff] %vm1578_vm7, %v1523_v48 }
 0x231   : > { %1793 = vst.msk [vmem:[#allocation3 + $0xa0] sm:$0xff] %vm1772_vm8, %v1717_v9  ;;  %2118 = vrot.lane.b32.xlu1 %v2026_v3, %s3029_s22 }
 0x232   : > { %2120 = vrot.lane.b32.xlu0 %v2027_v16, %s3029_s22 }
 0x233   : > { %v1525_v43 = vpop.permute.xlu1 %1524  ;;  %v1719_v19 = vpop.permute.xlu0 %1718  ;;  %v2209_v23 = vld [vmem:[#allocation3 + $0x90] sm:$0xff]  ;;  %v2210_v22 = vld [vmem:[#allocation3 + $0x98] sm:$0xff] }
 0x234   : > { %1600 = vst.msk [vmem:[#allocation3 + $0xa8] sm:$0xff] %vm1578_vm7, %v1525_v43  ;;  %2921 = vmatprep.mubr.f32.mxu1 %v2209_v23 }
 0x235   : > { %1794 = vst.msk [vmem:[#allocation3 + $0xa8] sm:$0xff] %vm1772_vm8, %v1719_v19  ;;  %1542 = vrot.lane.b32.xlu1 %v2026_v3, %s3026_s26  ;;  %2922 = vmatmul.mubr.f32.gmra.mrb[2].mxu1 %v2210_v22 }
 0x236   : > { %1736 = vrot.lane.b32.xlu0 %v1642_v28, %s3027_s11 }
 0x237   : > { %v1141_v36 = vpop.permute.xlu1 %1140  ;;  %v1143_v52 = vpop.permute.xlu0 %1142 }
 0x238   : > { %1215 = vst.msk [vmem:[#allocation3 + $0xb0] sm:$0xff] %vm1192_vm5, %v1141_v36  ;;  %1216 = vst.msk [vmem:[#allocation3 + $0xb8] sm:$0xff] %vm1192_vm5, %v1143_v52 }
 0x239   : > { %1544 = vrot.lane.b32.xlu1 %v2027_v16, %s3026_s26 }
 0x23a   : > { %1929 = vrot.lane.b32.xlu0 %v1835_v15, %s3028_s21 }
 0x23b   : > { %v1910_v8 = vpop.permute.xlu1 %1909  ;;  %v1912_v44 = vpop.permute.xlu0 %1911 }
 0x23c   : > { %1986 = vst.msk [vmem:[#allocation3 + $0xa0] sm:$0xff] %vm1965_vm9, %v1910_v8  ;;  %1987 = vst.msk [vmem:[#allocation3 + $0xa8] sm:$0xff] %vm1965_vm9, %v1912_v44 }
 0x23d   : > { %1738 = vrot.lane.b32.xlu1 %v1643_v11, %s3027_s11 }
 0x23e   : > { %2122 = vrot.lane.b32.xlu0 %v2028_v34, %s3029_s22 }
 0x23f   : > { %v1334_v46 = vpop.permute.xlu1 %1333  ;;  %v1336_v5 = vpop.permute.xlu0 %1335 }
 0x240   : > { %1408 = vst.msk [vmem:[#allocation3 + $0xb0] sm:$0xff] %vm1385_vm6, %v1334_v46  ;;  %1409 = vst.msk [vmem:[#allocation3 + $0xb8] sm:$0xff] %vm1385_vm6, %v1336_v5 }
 0x241   : > { %1931 = vrot.lane.b32.xlu1 %v1836_v49, %s3028_s21 }
 0x243   : > { %v2103_v47 = vpop.permute.xlu1 %2102  ;;  %v2105_v31 = vpop.permute.xlu0 %2104 }
 0x244   : > { %2179 = vst.msk [vmem:[#allocation3 + $0xa0] sm:$0xff] %vm2158_vm10, %v2103_v47  ;;  %2180 = vst.msk [vmem:[#allocation3 + $0xa8] sm:$0xff] %vm2158_vm10, %v2105_v31 }
 0x245   : > { %2124 = vrot.lane.b32.xlu1 %v2029_v40, %s3029_s22 }
 0x247   : > { %v1527_v37 = vpop.permute.xlu1 %1526  ;;  %v1721_v18 = vpop.permute.xlu0 %1720 }
 0x248   : > { %1601 = vst.msk [vmem:[#allocation3 + $0xb0] sm:$0xff] %vm1578_vm7, %v1527_v37 }
 0x249   : > { %1795 = vst.msk [vmem:[#allocation3 + $0xb0] sm:$0xff] %vm1772_vm8, %v1721_v18 }
 0x24b   : > { %v2896_v4 = vpop.f32.mrb[0].mxu0  ;;  %v1529_v0 = vpop.permute.xlu1 %1528  ;;  %v2211_v24 = vld [vmem:[#allocation3 + $0xa0] sm:$0xff]  ;;  %v2212_v27 = vld [vmem:[#allocation3 + $0xa8] sm:$0xff] }
 0x24c   : > { %v2472_v33 = vadd.f32 %v2896_v4, %v4150_v21  ;;  %1602 = vst.msk [vmem:[#allocation3 + $0xb8] sm:$0xff] %vm1578_vm7, %v1529_v0  ;;  %v1723_v10 = vpop.permute.xlu0 %1722  ;;  %v2305_v51 = vpop.f32.mrb[1].mxu0  ;;  %2924 = vmatprep.mubr.f32.mxu1 %v2211_v24 }
 0x24d   : > { %1796 = vst.msk [vmem:[#allocation3 + $0xb8] sm:$0xff] %vm1772_vm8, %v1723_v10  ;;  %v2471_v50 = vadd.f32 %v4150_v21, %v2305_v51  ;;  %2925 = vmatmul.mubr.f32.gmra.mrb[4].mxu1 %v2212_v27 }
 0x24e   : > { %2504 = vst.msk [vmem:[%s3090_s10 + $0x8] sm:$0xff] %vm461_vm1, %v2472_v33  ;;  %v2537_v55 = vsel %vm461_vm1, %v2472_v33, 0.0  ;;  %v2603_v12 = vmul.f32 %v2472_v33, %v2472_v33 }
 0x24f   : > { %2503 = vst.msk [vmem:[%s3090_s10] sm:$0xff] %vm461_vm1, %v2471_v50  ;;  %v2536_v39 = vsel %vm461_vm1, %v2471_v50, 0.0  ;;  %v2602_v42 = vmul.f32 %v2471_v50, %v2471_v50  ;;  %v1145_v56 = vpop.permute.xlu1 %1144 }
 0x250   : > { %v2635_v45 = vsel %vm461_vm1, %v2603_v12, 0.0  ;;  %v2538_v54 = vadd.f32 %v2537_v55, %v2536_v39  ;;  %1217 = vst.msk [vmem:[#allocation3 + $0xc0] sm:$0xff] %vm1192_vm5, %v1145_v56  ;;  %v1147_v1 = vpop.permute.xlu0 %1146 }
 0x251   : > { %v2634_v14 = vsel %vm461_vm1, %v2602_v42, 0.0  ;;  %1218 = vst.msk [vmem:[#allocation3 + $0xc8] sm:$0xff] %vm1192_vm5, %v1147_v1 }
 0x252   : > { %v2636_v29 = vadd.f32 %v2635_v45, %v2634_v14 }
 0x253   : > { %v1914_v57 = vpop.permute.xlu1 %1913 }
 0x254   : > { %1988 = vst.msk [vmem:[#allocation3 + $0xb0] sm:$0xff] %vm1965_vm9, %v1914_v57  ;;  %v1916_v20 = vpop.permute.xlu0 %1915 }
 0x255   : > { %1989 = vst.msk [vmem:[#allocation3 + $0xb8] sm:$0xff] %vm1965_vm9, %v1916_v20 }
 0x257   : > { %v1338_v26 = vpop.permute.xlu1 %1337 }
 0x258   : > { %1410 = vst.msk [vmem:[#allocation3 + $0xc0] sm:$0xff] %vm1385_vm6, %v1338_v26  ;;  %v1340_v35 = vpop.permute.xlu0 %1339 }
 0x259   : > { %1411 = vst.msk [vmem:[#allocation3 + $0xc8] sm:$0xff] %vm1385_vm6, %v1340_v35 }
 0x25b   : > { %v2107_v53 = vpop.permute.xlu1 %2106 }
 0x25c   : > { %2181 = vst.msk [vmem:[#allocation3 + $0xb0] sm:$0xff] %vm2158_vm10, %v2107_v53  ;;  %v2109_v63 = vpop.permute.xlu0 %2108 }
 0x25d   : > { %2182 = vst.msk [vmem:[#allocation3 + $0xb8] sm:$0xff] %vm2158_vm10, %v2109_v63 }
 0x25f   : > { %v1531_v58 = vpop.permute.xlu1 %1530  ;;  %v2899_v6 = vpop.f32.mrb[2].mxu0 }
 0x260   : > { %1603 = vst.msk [vmem:[#allocation3 + $0xc0] sm:$0xff] %vm1578_vm7, %v1531_v58  ;;  %v2474_v25 = vadd.f32 %v2899_v6, %v4150_v21  ;;  %v1725_v59 = vpop.permute.xlu0 %1724  ;;  %v2315_v60 = vpop.f32.mrb[3].mxu0 }
 0x261   : > { %1797 = vst.msk [vmem:[#allocation3 + $0xc0] sm:$0xff] %vm1772_vm8, %v1725_v59  ;;  %v2473_v7 = vadd.f32 %v4150_v21, %v2315_v60 }
 0x262   : > { %2506 = vst.msk [vmem:[%s3090_s10 + $0x18] sm:$0xff] %vm461_vm1, %v2474_v25  ;;  %v2605_v61 = vmul.f32 %v2474_v25, %v2474_v25  ;;  %v2541_v30 = vsel %vm461_vm1, %v2474_v25, 0.0 }
 0x263   : > { %2505 = vst.msk [vmem:[%s3090_s10 + $0x10] sm:$0xff] %vm461_vm1, %v2473_v7  ;;  %v2539_v17 = vsel %vm461_vm1, %v2473_v7, 0.0  ;;  %v2604_v32 = vmul.f32 %v2473_v7, %v2473_v7  ;;  %v1533_v38 = vpop.permute.xlu1 %1532  ;;  %v2213_v13 = vld [vmem:[#allocation3 + $0xb0] sm:$0xff] }
 0x264   : > { %v2540_v62 = vadd.f32 %v2539_v17, %v2538_v54  ;;  %1604 = vst.msk [vmem:[#allocation3 + $0xc8] sm:$0xff] %vm1578_vm7, %v1533_v38  ;;  %v1727_v2 = vpop.permute.xlu0 %1726  ;;  %2927 = vmatprep.mubr.f32.mxu1 %v2213_v13  ;;  %v2214_v41 = vld [vmem:[#allocation3 + $0xb8] sm:$0xff]  ;;  %v2639_v16 = vsel %vm461_vm1, %v2605_v61, 0.0 }
 0x265   : > { %v2637_v3 = vsel %vm461_vm1, %v2604_v32, 0.0  ;;  %1798 = vst.msk [vmem:[#allocation3 + $0xc8] sm:$0xff] %vm1772_vm8, %v1727_v2  ;;  %2928 = vmatmul.mubr.f32.gmra.mrb[6].mxu1 %v2214_v41 }
 0x266   : > { %v2638_v48 = vadd.f32 %v2637_v3, %v2636_v29  ;;  %v2542_v9 = vadd.f32 %v2541_v30, %v2540_v62 }
 0x267   : > { %v1149_v43 = vpop.permute.xlu1 %1148 }
 0x268   : > { %1219 = vst.msk [vmem:[#allocation3 + $0xd0] sm:$0xff] %vm1192_vm5, %v1149_v43  ;;  %v1151_v19 = vpop.permute.xlu0 %1150  ;;  %v2640_v23 = vadd.f32 %v2639_v16, %v2638_v48 }
 0x269   : > { %1220 = vst.msk [vmem:[#allocation3 + $0xd8] sm:$0xff] %vm1192_vm5, %v1151_v19 }
 0x26b   : > { %v1918_v22 = vpop.permute.xlu1 %1917 }
 0x26c   : > { %1990 = vst.msk [vmem:[#allocation3 + $0xc0] sm:$0xff] %vm1965_vm9, %v1918_v22  ;;  %v1920_v28 = vpop.permute.xlu0 %1919 }
 0x26d   : > { %1991 = vst.msk [vmem:[#allocation3 + $0xc8] sm:$0xff] %vm1965_vm9, %v1920_v28 }
 0x26f   : > { %v1342_v36 = vpop.permute.xlu1 %1341 }
 0x270   : > { %1412 = vst.msk [vmem:[#allocation3 + $0xd0] sm:$0xff] %vm1385_vm6, %v1342_v36  ;;  %v1344_v52 = vpop.permute.xlu0 %1343 }
 0x271   : > { %1413 = vst.msk [vmem:[#allocation3 + $0xd8] sm:$0xff] %vm1385_vm6, %v1344_v52 }
 0x273   : > { %v2111_v15 = vpop.permute.xlu1 %2110  ;;  %v2902_v11 = vpop.f32.mrb[4].mxu0 }
 0x274   : > { %2183 = vst.msk [vmem:[#allocation3 + $0xc0] sm:$0xff] %vm2158_vm10, %v2111_v15  ;;  %v2476_v8 = vadd.f32 %v2902_v11, %v4150_v21  ;;  %v2113_v44 = vpop.permute.xlu0 %2112  ;;  %v2325_v34 = vpop.f32.mrb[5].mxu0 }
 0x275   : > { %2184 = vst.msk [vmem:[#allocation3 + $0xc8] sm:$0xff] %vm2158_vm10, %v2113_v44  ;;  %v2475_v49 = vadd.f32 %v4150_v21, %v2325_v34 }
 0x276   : > { %2508 = vst.msk [vmem:[%s3090_s10 + $0x28] sm:$0xff] %vm461_vm1, %v2476_v8  ;;  %v2607_v46 = vmul.f32 %v2476_v8, %v2476_v8  ;;  %v2545_v18 = vsel %vm461_vm1, %v2476_v8, 0.0 }
 0x277   : > { %2507 = vst.msk [vmem:[%s3090_s10 + $0x20] sm:$0xff] %vm461_vm1, %v2475_v49  ;;  %v2543_v5 = vsel %vm461_vm1, %v2475_v49, 0.0  ;;  %v2606_v40 = vmul.f32 %v2475_v49, %v2475_v49  ;;  %v1535_v47 = vpop.permute.xlu1 %1534 }
 0x278   : > { %v2544_v31 = vadd.f32 %v2543_v5, %v2542_v9  ;;  %1605 = vst.msk [vmem:[#allocation3 + $0xd0] sm:$0xff] %vm1578_vm7, %v1535_v47  ;;  %v1729_v37 = vpop.permute.xlu0 %1728  ;;  %v2643_v27 = vsel %vm461_vm1, %v2607_v46, 0.0 }
 0x279   : > { %v2641_v4 = vsel %vm461_vm1, %v2606_v40, 0.0  ;;  %1799 = vst.msk [vmem:[#allocation3 + $0xd0] sm:$0xff] %vm1772_vm8, %v1729_v37 }
 0x27a   : > { %v2642_v0 = vadd.f32 %v2641_v4, %v2640_v23  ;;  %v2546_v24 = vadd.f32 %v2545_v18, %v2544_v31 }
 0x27b   : > { %v1537_v33 = vpop.permute.xlu1 %1536  ;;  %v2215_v10 = vld [vmem:[#allocation3 + $0xc0] sm:$0xff] }
 0x27c   : > { %1606 = vst.msk [vmem:[#allocation3 + $0xd8] sm:$0xff] %vm1578_vm7, %v1537_v33  ;;  %v1731_v51 = vpop.permute.xlu0 %1730  ;;  %2930 = vmatprep.mubr.f32.mxu1 %v2215_v10  ;;  %v2216_v50 = vld [vmem:[#allocation3 + $0xc8] sm:$0xff]  ;;  %v2644_v55 = vadd.f32 %v2643_v27, %v2642_v0 }
 0x27d   : > { %1800 = vst.msk [vmem:[#allocation3 + $0xd8] sm:$0xff] %vm1772_vm8, %v1731_v51  ;;  %2931 = vmatmul.mubr.f32.gmra.mrb[8].mxu1 %v2216_v50 }
 0x27f   : > { %v1153_v12 = vpop.permute.xlu1 %1152 }
 0x280   : > { %1221 = vst.msk [vmem:[#allocation3 + $0xe0] sm:$0xff] %vm1192_vm5, %v1153_v12  ;;  %v1155_v39 = vpop.permute.xlu0 %1154 }
 0x281   : > { %1222 = vst.msk [vmem:[#allocation3 + $0xe8] sm:$0xff] %vm1192_vm5, %v1155_v39 }
 0x283   : > { %v1922_v42 = vpop.permute.xlu1 %1921 }
 0x284   : > { %1992 = vst.msk [vmem:[#allocation3 + $0xd0] sm:$0xff] %vm1965_vm9, %v1922_v42  ;;  %v1924_v56 = vpop.permute.xlu0 %1923 }
 0x285   : > { %1993 = vst.msk [vmem:[#allocation3 + $0xd8] sm:$0xff] %vm1965_vm9, %v1924_v56 }
 0x287   : > { %v1346_v45 = vpop.permute.xlu1 %1345  ;;  %v2905_v54 = vpop.f32.mrb[6].mxu0 }
 0x288   : > { %1414 = vst.msk [vmem:[#allocation3 + $0xe0] sm:$0xff] %vm1385_vm6, %v1346_v45  ;;  %v2478_v1 = vadd.f32 %v2905_v54, %v4150_v21  ;;  %v1348_v14 = vpop.permute.xlu0 %1347  ;;  %v2335_v29 = vpop.f32.mrb[7].mxu0 }
 0x289   : > { %1415 = vst.msk [vmem:[#allocation3 + $0xe8] sm:$0xff] %vm1385_vm6, %v1348_v14  ;;  %v2477_v57 = vadd.f32 %v4150_v21, %v2335_v29 }
 0x28a   : > { %2510 = vst.msk [vmem:[%s3090_s10 + $0x38] sm:$0xff] %vm461_vm1, %v2478_v1  ;;  %v2609_v20 = vmul.f32 %v2478_v1, %v2478_v1  ;;  %v2549_v6 = vsel %vm461_vm1, %v2478_v1, 0.0 }
 0x28b   : > { %2509 = vst.msk [vmem:[%s3090_s10 + $0x30] sm:$0xff] %vm461_vm1, %v2477_v57  ;;  %v2547_v26 = vsel %vm461_vm1, %v2477_v57, 0.0  ;;  %v2608_v35 = vmul.f32 %v2477_v57, %v2477_v57  ;;  %v2115_v53 = vpop.permute.xlu1 %2114 }
 0x28c   : > { %v2548_v63 = vadd.f32 %v2547_v26, %v2546_v24  ;;  %2185 = vst.msk [vmem:[#allocation3 + $0xd0] sm:$0xff] %vm2158_vm10, %v2115_v53  ;;  %v2117_v58 = vpop.permute.xlu0 %2116  ;;  %v2647_v7 = vsel %vm461_vm1, %v2609_v20, 0.0 }
 0x28d   : > { %v2645_v25 = vsel %vm461_vm1, %v2608_v35, 0.0  ;;  %2186 = vst.msk [vmem:[#allocation3 + $0xd8] sm:$0xff] %vm2158_vm10, %v2117_v58 }
 0x28e   : > { %v2646_v59 = vadd.f32 %v2645_v25, %v2644_v55  ;;  %v2550_v60 = vadd.f32 %v2549_v6, %v2548_v63 }
 0x28f   : > { %v1539_v61 = vpop.permute.xlu1 %1538 }
 0x290   : > { %1607 = vst.msk [vmem:[#allocation3 + $0xe0] sm:$0xff] %vm1578_vm7, %v1539_v61  ;;  %v1733_v17 = vpop.permute.xlu0 %1732  ;;  %v2648_v32 = vadd.f32 %v2647_v7, %v2646_v59 }
 0x291   : > { %1801 = vst.msk [vmem:[#allocation3 + $0xe0] sm:$0xff] %vm1772_vm8, %v1733_v17 }
 0x293   : > { %v1541_v38 = vpop.permute.xlu1 %1540  ;;  %v2217_v13 = vld [vmem:[#allocation3 + $0xd0] sm:$0xff] }
 0x294   : > { %1608 = vst.msk [vmem:[#allocation3 + $0xe8] sm:$0xff] %vm1578_vm7, %v1541_v38  ;;  %v1735_v62 = vpop.permute.xlu0 %1734  ;;  %2933 = vmatprep.mubr.f32.mxu1 %v2217_v13  ;;  %v2218_v2 = vld [vmem:[#allocation3 + $0xd8] sm:$0xff] }
 0x295   : > { %1802 = vst.msk [vmem:[#allocation3 + $0xe8] sm:$0xff] %vm1772_vm8, %v1735_v62  ;;  %2934 = vmatmul.mubr.f32.gmra.mrb[10].mxu1 %v2218_v2 }
 0x297   : > { %v1157_v41 = vpop.permute.xlu1 %1156 }
 0x298   : > { %1223 = vst.msk [vmem:[#allocation3 + $0xf0] sm:$0xff] %vm1192_vm5, %v1157_v41  ;;  %v1159_v30 = vpop.permute.xlu0 %1158 }
 0x299   : > { %1224 = vst.msk [vmem:[#allocation3 + $0xf8] sm:$0xff] %vm1192_vm5, %v1159_v30 }
 0x29b   : > { %v1926_v3 = vpop.permute.xlu1 %1925  ;;  %v2908_v48 = vpop.f32.mrb[8].mxu0 }
 0x29c   : > { %1994 = vst.msk [vmem:[#allocation3 + $0xe0] sm:$0xff] %vm1965_vm9, %v1926_v3  ;;  %v2480_v9 = vadd.f32 %v2908_v48, %v4150_v21  ;;  %v1928_v16 = vpop.permute.xlu0 %1927  ;;  %v2345_v43 = vpop.f32.mrb[9].mxu0 }
 0x29d   : > { %1995 = vst.msk [vmem:[#allocation3 + $0xe8] sm:$0xff] %vm1965_vm9, %v1928_v16  ;;  %v2479_v19 = vadd.f32 %v4150_v21, %v2345_v43 }
 0x29e   : > { %2512 = vst.msk [vmem:[%s3090_s10 + $0x48] sm:$0xff] %vm461_vm1, %v2480_v9  ;;  %v2611_v23 = vmul.f32 %v2480_v9, %v2480_v9  ;;  %v2553_v11 = vsel %vm461_vm1, %v2480_v9, 0.0 }
 0x29f   : > { %2511 = vst.msk [vmem:[%s3090_s10 + $0x40] sm:$0xff] %vm461_vm1, %v2479_v19  ;;  %v2551_v22 = vsel %vm461_vm1, %v2479_v19, 0.0  ;;  %v2610_v28 = vmul.f32 %v2479_v19, %v2479_v19  ;;  %v1350_v36 = vpop.permute.xlu1 %1349 }
 0x2a0   : > { %v2552_v52 = vadd.f32 %v2551_v22, %v2550_v60  ;;  %1416 = vst.msk [vmem:[#allocation3 + $0xf0] sm:$0xff] %vm1385_vm6, %v1350_v36  ;;  %v1352_v15 = vpop.permute.xlu0 %1351  ;;  %v2651_v49 = vsel %vm461_vm1, %v2611_v23, 0.0 }
 0x2a1   : > { %v2649_v8 = vsel %vm461_vm1, %v2610_v28, 0.0  ;;  %1417 = vst.msk [vmem:[#allocation3 + $0xf8] sm:$0xff] %vm1385_vm6, %v1352_v15 }
 0x2a2   : > { %v2650_v44 = vadd.f32 %v2649_v8, %v2648_v32  ;;  %v2554_v34 = vadd.f32 %v2553_v11, %v2552_v52 }
 0x2a3   : > { %v2119_v46 = vpop.permute.xlu1 %2118 }
 0x2a4   : > { %2187 = vst.msk [vmem:[#allocation3 + $0xe0] sm:$0xff] %vm2158_vm10, %v2119_v46  ;;  %v2121_v5 = vpop.permute.xlu0 %2120  ;;  %v2652_v40 = vadd.f32 %v2651_v49, %v2650_v44 }
 0x2a5   : > { %2188 = vst.msk [vmem:[#allocation3 + $0xe8] sm:$0xff] %vm2158_vm10, %v2121_v5 }
 0x2a7   : > { %v1543_v47 = vpop.permute.xlu1 %1542 }
 0x2a8   : > { %1609 = vst.msk [vmem:[#allocation3 + $0xf0] sm:$0xff] %vm1578_vm7, %v1543_v47  ;;  %v1737_v31 = vpop.permute.xlu0 %1736 }
 0x2a9   : > { %1803 = vst.msk [vmem:[#allocation3 + $0xf0] sm:$0xff] %vm1772_vm8, %v1737_v31 }
 0x2ab   : > { %v1545_v37 = vpop.permute.xlu1 %1544  ;;  %v2219_v18 = vld [vmem:[#allocation3 + $0xe0] sm:$0xff] }
 0x2ac   : > { %1610 = vst.msk [vmem:[#allocation3 + $0xf8] sm:$0xff] %vm1578_vm7, %v1545_v37  ;;  %2936 = vmatprep.mubr.f32.mxu1 %v2219_v18  ;;  %v2220_v4 = vld [vmem:[#allocation3 + $0xe8] sm:$0xff]  ;;  %v1930_v0 = vpop.permute.xlu0 %1929 }
 0x2ad   : > { %2937 = vmatmul.mubr.f32.gmra.mrb[12].mxu1 %v2220_v4  ;;  %1996 = vst.msk [vmem:[#allocation3 + $0xf0] sm:$0xff] %vm1965_vm9, %v1930_v0 }
 0x2af   : > { %v1739_v24 = vpop.permute.xlu1 %1738  ;;  %v2911_v27 = vpop.f32.mrb[10].mxu0 }
 0x2b0   : > { %1804 = vst.msk [vmem:[#allocation3 + $0xf8] sm:$0xff] %vm1772_vm8, %v1739_v24  ;;  %v2482_v33 = vadd.f32 %v2911_v27, %v4150_v21  ;;  %v2355_v10 = vpop.f32.mrb[11].mxu0  ;;  %v2123_v51 = vpop.permute.xlu0 %2122 }
 0x2b1   : > { %v2481_v50 = vadd.f32 %v4150_v21, %v2355_v10  ;;  %2189 = vst.msk [vmem:[#allocation3 + $0xf0] sm:$0xff] %vm2158_vm10, %v2123_v51 }
 0x2b2   : > { %2514 = vst.msk [vmem:[%s3090_s10 + $0x58] sm:$0xff] %vm461_vm1, %v2482_v33  ;;  %v2613_v55 = vmul.f32 %v2482_v33, %v2482_v33  ;;  %v2557_v45 = vsel %vm461_vm1, %v2482_v33, 0.0 }
 0x2b3   : > { %2513 = vst.msk [vmem:[%s3090_s10 + $0x50] sm:$0xff] %vm461_vm1, %v2481_v50  ;;  %v2555_v12 = vsel %vm461_vm1, %v2481_v50, 0.0  ;;  %v2612_v39 = vmul.f32 %v2481_v50, %v2481_v50  ;;  %v1932_v42 = vpop.permute.xlu1 %1931 }
 0x2b4   : > { %v2556_v56 = vadd.f32 %v2555_v12, %v2554_v34  ;;  %1997 = vst.msk [vmem:[#allocation3 + $0xf8] sm:$0xff] %vm1965_vm9, %v1932_v42  ;;  %v2655_v29 = vsel %vm461_vm1, %v2613_v55, 0.0 }
 0x2b5   : > { %v2653_v54 = vsel %vm461_vm1, %v2612_v39, 0.0 }
 0x2b6   : > { %v2654_v1 = vadd.f32 %v2653_v54, %v2652_v40  ;;  %v2558_v14 = vadd.f32 %v2557_v45, %v2556_v56 }
 0x2b7   : > { %v2125_v57 = vpop.permute.xlu1 %2124 }
 0x2b8   : > { %2190 = vst.msk [vmem:[#allocation3 + $0xf8] sm:$0xff] %vm2158_vm10, %v2125_v57  ;;  %v2221_v20 = vld [vmem:[#allocation3 + $0xf0] sm:$0xff]  ;;  %v2656_v26 = vadd.f32 %v2655_v29, %v2654_v1 }
 0x2b9   : > { %2939 = vmatprep.mubr.f32.mxu1 %v2221_v20 }
 0x2bf   : > { %v2222_v35 = vld [vmem:[#allocation3 + $0xf8] sm:$0xff] }
 0x2c0   : > { %v2914_v53 = vpop.f32.mrb[12].mxu0  ;;  %2940 = vmatmul.mubr.f32.gmra.mrb[14].mxu1 %v2222_v35 }
 0x2c1   : > { %v2484_v63 = vadd.f32 %v2914_v53, %v4150_v21  ;;  %v2365_v58 = vpop.f32.mrb[13].mxu0 }
 0x2c2   : > { %v2483_v6 = vadd.f32 %v4150_v21, %v2365_v58 }
 0x2c3   : > { %2516 = vst.msk [vmem:[%s3090_s10 + $0x68] sm:$0xff] %vm461_vm1, %v2484_v63  ;;  %v2615_v25 = vmul.f32 %v2484_v63, %v2484_v63  ;;  %v2561_v59 = vsel %vm461_vm1, %v2484_v63, 0.0 }
 0x2c4   : > { %2515 = vst.msk [vmem:[%s3090_s10 + $0x60] sm:$0xff] %vm461_vm1, %v2483_v6  ;;  %v2559_v60 = vsel %vm461_vm1, %v2483_v6, 0.0  ;;  %v2614_v7 = vmul.f32 %v2483_v6, %v2483_v6 }
 0x2c5   : > { %v2560_v61 = vadd.f32 %v2559_v60, %v2558_v14  ;;  %v2659_v17 = vsel %vm461_vm1, %v2615_v25, 0.0 }
 0x2c6   : > { %v2657_v32 = vsel %vm461_vm1, %v2614_v7, 0.0 }
 0x2c7   : > { %v2658_v38 = vadd.f32 %v2657_v32, %v2656_v26  ;;  %v2562_v13 = vadd.f32 %v2561_v59, %v2560_v61 }
 0x2c9   : > { %v2660_v62 = vadd.f32 %v2659_v17, %v2658_v38 }
 0x2d8   : > { %v2917_v2 = vpop.f32.mrb[14].mxu0 }
 0x2d9   : > { %v2486_v41 = vadd.f32 %v2917_v2, %v4150_v21  ;;  %v2375_v30 = vpop.f32.mrb[15].mxu0 }
 0x2da   : > { %v2485_v3 = vadd.f32 %v4150_v21, %v2375_v30 }
 0x2db   : > { %2518 = vst.msk [vmem:[%s3090_s10 + $0x78] sm:$0xff] %vm461_vm1, %v2486_v41  ;;  %v2617_v48 = vmul.f32 %v2486_v41, %v2486_v41  ;;  %v2565_v9 = vsel %vm461_vm1, %v2486_v41, 0.0 }
 0x2dc   : > { %2517 = vst.msk [vmem:[%s3090_s10 + $0x70] sm:$0xff] %vm461_vm1, %v2485_v3  ;;  %v2563_v16 = vsel %vm461_vm1, %v2485_v3, 0.0  ;;  %v2616_v43 = vmul.f32 %v2485_v3, %v2485_v3 }
 0x2dd   : > { %v2564_v19 = vadd.f32 %v2563_v16, %v2562_v13  ;;  %v2663_v23 = vsel %vm461_vm1, %v2617_v48, 0.0 }
 0x2de   : > { %v2661_v22 = vsel %vm461_vm1, %v2616_v43, 0.0 }
 0x2df   : > { %v2662_v28 = vadd.f32 %v2661_v22, %v2660_v62  ;;  %v2566_v36 = vadd.f32 %v2565_v9, %v2564_v19 }
 0x2e1   : > { %v2664_v52 = vadd.f32 %v2663_v23, %v2662_v28 }
 0x2f0   : > { %v2920_v15 = vpop.f32.mrb[0].mxu1 }
 0x2f1   : > { %v2488_v11 = vadd.f32 %v2920_v15, %v4150_v21  ;;  %v2385_v8 = vpop.f32.mrb[1].mxu1 }
 0x2f2   : > { %v2487_v44 = vadd.f32 %v4150_v21, %v2385_v8 }
 0x2f3   : > { %2520 = vst.msk [vmem:[%s3090_s10 + $0x88] sm:$0xff] %vm461_vm1, %v2488_v11  ;;  %v2619_v34 = vmul.f32 %v2488_v11, %v2488_v11  ;;  %v2569_v49 = vsel %vm461_vm1, %v2488_v11, 0.0 }
 0x2f4   : > { %2519 = vst.msk [vmem:[%s3090_s10 + $0x80] sm:$0xff] %vm461_vm1, %v2487_v44  ;;  %v2567_v46 = vsel %vm461_vm1, %v2487_v44, 0.0  ;;  %v2618_v5 = vmul.f32 %v2487_v44, %v2487_v44 }
 0x2f5   : > { %v2568_v40 = vadd.f32 %v2567_v46, %v2566_v36  ;;  %v2667_v47 = vsel %vm461_vm1, %v2619_v34, 0.0 }
 0x2f6   : > { %v2665_v31 = vsel %vm461_vm1, %v2618_v5, 0.0 }
 0x2f7   : > { %v2666_v37 = vadd.f32 %v2665_v31, %v2664_v52  ;;  %v2570_v18 = vadd.f32 %v2569_v49, %v2568_v40 }
 0x2f9   : > { %v2668_v4 = vadd.f32 %v2667_v47, %v2666_v37 }
 0x308   : > { %v2923_v0 = vpop.f32.mrb[2].mxu1 }
 0x309   : > { %v2490_v24 = vadd.f32 %v2923_v0, %v4150_v21  ;;  %v2395_v27 = vpop.f32.mrb[3].mxu1 }
 0x30a   : > { %v2489_v33 = vadd.f32 %v4150_v21, %v2395_v27 }
 0x30b   : > { %2522 = vst.msk [vmem:[%s3090_s10 + $0x98] sm:$0xff] %vm461_vm1, %v2490_v24  ;;  %v2621_v10 = vmul.f32 %v2490_v24, %v2490_v24  ;;  %v2573_v51 = vsel %vm461_vm1, %v2490_v24, 0.0 }
 0x30c   : > { %2521 = vst.msk [vmem:[%s3090_s10 + $0x90] sm:$0xff] %vm461_vm1, %v2489_v33  ;;  %v2571_v50 = vsel %vm461_vm1, %v2489_v33, 0.0  ;;  %v2620_v55 = vmul.f32 %v2489_v33, %v2489_v33 }
 0x30d   : > { %v2572_v12 = vadd.f32 %v2571_v50, %v2570_v18  ;;  %v2671_v39 = vsel %vm461_vm1, %v2621_v10, 0.0 }
 0x30e   : > { %v2669_v42 = vsel %vm461_vm1, %v2620_v55, 0.0 }
 0x30f   : > { %v2670_v56 = vadd.f32 %v2669_v42, %v2668_v4  ;;  %v2574_v45 = vadd.f32 %v2573_v51, %v2572_v12 }
 0x311   : > { %v2672_v54 = vadd.f32 %v2671_v39, %v2670_v56 }
 0x320   : > { %v2926_v1 = vpop.f32.mrb[4].mxu1 }
 0x321   : > { %v2492_v14 = vadd.f32 %v2926_v1, %v4150_v21  ;;  %v2405_v29 = vpop.f32.mrb[5].mxu1 }
 0x322   : > { %v2491_v57 = vadd.f32 %v4150_v21, %v2405_v29 }
 0x323   : > { %2524 = vst.msk [vmem:[%s3090_s10 + $0xa8] sm:$0xff] %vm461_vm1, %v2492_v14  ;;  %v2623_v20 = vmul.f32 %v2492_v14, %v2492_v14  ;;  %v2577_v26 = vsel %vm461_vm1, %v2492_v14, 0.0 }
 0x324   : > { %2523 = vst.msk [vmem:[%s3090_s10 + $0xa0] sm:$0xff] %vm461_vm1, %v2491_v57  ;;  %v2575_v35 = vsel %vm461_vm1, %v2491_v57, 0.0  ;;  %v2622_v53 = vmul.f32 %v2491_v57, %v2491_v57 }
 0x325   : > { %v2576_v63 = vadd.f32 %v2575_v35, %v2574_v45  ;;  %v2675_v58 = vsel %vm461_vm1, %v2623_v20, 0.0 }
 0x326   : > { %v2673_v6 = vsel %vm461_vm1, %v2622_v53, 0.0 }
 0x327   : > { %v2674_v25 = vadd.f32 %v2673_v6, %v2672_v54  ;;  %v2578_v59 = vadd.f32 %v2577_v26, %v2576_v63 }
 0x329   : > { %v2676_v60 = vadd.f32 %v2675_v58, %v2674_v25 }
 0x338   : > { %v2929_v7 = vpop.f32.mrb[6].mxu1 }
 0x339   : > { %v2494_v61 = vadd.f32 %v2929_v7, %v4150_v21  ;;  %v2415_v17 = vpop.f32.mrb[7].mxu1 }
 0x33a   : > { %v2493_v32 = vadd.f32 %v4150_v21, %v2415_v17  ;;  %v2535_v17 = vld [vmem:[%s4407_s7] sm:$0xff] }
 0x33b   : > { %2526 = vst.msk [vmem:[%s3090_s10 + $0xb8] sm:$0xff] %vm461_vm1, %v2494_v61  ;;  %v2625_v38 = vmul.f32 %v2494_v61, %v2494_v61  ;;  %v2581_v13 = vsel %vm461_vm1, %v2494_v61, 0.0 }
 0x33c   : > { %2525 = vst.msk [vmem:[%s3090_s10 + $0xb0] sm:$0xff] %vm461_vm1, %v2493_v32  ;;  %v2579_v62 = vsel %vm461_vm1, %v2493_v32, 0.0  ;;  %v2624_v2 = vmul.f32 %v2493_v32, %v2493_v32 }
 0x33d   : > { %v2580_v41 = vadd.f32 %v2579_v62, %v2578_v59  ;;  %v2679_v30 = vsel %vm461_vm1, %v2625_v38, 0.0  ;;  %v2601_v62 = vld [vmem:[%s4407_s7 + $0x8] sm:$0xff] }
 0x33e   : > { %v2677_v3 = vsel %vm461_vm1, %v2624_v2, 0.0 }
 0x33f   : > { %v2678_v48 = vadd.f32 %v2677_v3, %v2676_v60  ;;  %v2582_v9 = vadd.f32 %v2581_v13, %v2580_v41 }
 0x341   : > { %v2680_v16 = vadd.f32 %v2679_v30, %v2678_v48 }
 0x350   : > { %v2932_v43 = vpop.f32.mrb[8].mxu1 }
 0x351   : > { %v2496_v19 = vadd.f32 %v2932_v43, %v4150_v21  ;;  %v2425_v23 = vpop.f32.mrb[9].mxu1 }
 0x352   : > { %v2495_v22 = vadd.f32 %v4150_v21, %v2425_v23 }
 0x353   : > { %2528 = vst.msk [vmem:[%s3090_s10 + $0xc8] sm:$0xff] %vm461_vm1, %v2496_v19  ;;  %v2627_v28 = vmul.f32 %v2496_v19, %v2496_v19  ;;  %v2585_v36 = vsel %vm461_vm1, %v2496_v19, 0.0 }
 0x354   : > { %2527 = vst.msk [vmem:[%s3090_s10 + $0xc0] sm:$0xff] %vm461_vm1, %v2495_v22  ;;  %v2583_v52 = vsel %vm461_vm1, %v2495_v22, 0.0  ;;  %v2626_v15 = vmul.f32 %v2495_v22, %v2495_v22 }
 0x355   : > { %v2584_v11 = vadd.f32 %v2583_v52, %v2582_v9  ;;  %v2683_v8 = vsel %vm461_vm1, %v2627_v28, 0.0 }
 0x356   : > { %v2681_v44 = vsel %vm461_vm1, %v2626_v15, 0.0 }
 0x357   : > { %v2682_v34 = vadd.f32 %v2681_v44, %v2680_v16  ;;  %v2586_v49 = vadd.f32 %v2585_v36, %v2584_v11 }
 0x359   : > { %v2684_v46 = vadd.f32 %v2683_v8, %v2682_v34 }
 0x368   : > { %v2935_v5 = vpop.f32.mrb[10].mxu1 }
 0x369   : > { %v2498_v40 = vadd.f32 %v2935_v5, %v4150_v21  ;;  %v2435_v47 = vpop.f32.mrb[11].mxu1 }
 0x36a   : > { %v2497_v31 = vadd.f32 %v4150_v21, %v2435_v47 }
 0x36b   : > { %2530 = vst.msk [vmem:[%s3090_s10 + $0xd8] sm:$0xff] %vm461_vm1, %v2498_v40  ;;  %v2629_v37 = vmul.f32 %v2498_v40, %v2498_v40  ;;  %v2589_v18 = vsel %vm461_vm1, %v2498_v40, 0.0 }
 0x36c   : > { %2529 = vst.msk [vmem:[%s3090_s10 + $0xd0] sm:$0xff] %vm461_vm1, %v2497_v31  ;;  %v2587_v4 = vsel %vm461_vm1, %v2497_v31, 0.0  ;;  %v2628_v0 = vmul.f32 %v2497_v31, %v2497_v31 }
 0x36d   : > { %v2588_v24 = vadd.f32 %v2587_v4, %v2586_v49  ;;  %v2687_v27 = vsel %vm461_vm1, %v2629_v37, 0.0 }
 0x36e   : > { %v2685_v33 = vsel %vm461_vm1, %v2628_v0, 0.0 }
 0x36f   : > { %v2686_v10 = vadd.f32 %v2685_v33, %v2684_v46  ;;  %v2590_v51 = vadd.f32 %v2589_v18, %v2588_v24 }
 0x371   : > { %v2688_v50 = vadd.f32 %v2687_v27, %v2686_v10 }
 0x380   : > { %v2938_v55 = vpop.f32.mrb[12].mxu1 }
 0x381   : > { %v2500_v12 = vadd.f32 %v2938_v55, %v4150_v21  ;;  %v2445_v39 = vpop.f32.mrb[13].mxu1 }
 0x382   : > { %v2499_v42 = vadd.f32 %v4150_v21, %v2445_v39 }
 0x383   : > { %2532 = vst.msk [vmem:[%s3090_s10 + $0xe8] sm:$0xff] %vm461_vm1, %v2500_v12  ;;  %v2631_v56 = vmul.f32 %v2500_v12, %v2500_v12  ;;  %v2593_v45 = vsel %vm461_vm1, %v2500_v12, 0.0 }
 0x384   : > { %2531 = vst.msk [vmem:[%s3090_s10 + $0xe0] sm:$0xff] %vm461_vm1, %v2499_v42  ;;  %v2591_v54 = vsel %vm461_vm1, %v2499_v42, 0.0  ;;  %v2630_v1 = vmul.f32 %v2499_v42, %v2499_v42 }
 0x385   : > { %v2592_v14 = vadd.f32 %v2591_v54, %v2590_v51  ;;  %v2691_v29 = vsel %vm461_vm1, %v2631_v56, 0.0 }
 0x386   : > { %v2689_v57 = vsel %vm461_vm1, %v2630_v1, 0.0 }
 0x387   : > { %v2690_v20 = vadd.f32 %v2689_v57, %v2688_v50  ;;  %v2594_v26 = vadd.f32 %v2593_v45, %v2592_v14 }
 0x389   : > { %v2692_v35 = vadd.f32 %v2691_v29, %v2690_v20 }
 0x393   : > { %v2941_v53 = vpop.f32.mrb[14].mxu1 }
 0x394   : > { %v2502_v63 = vadd.f32 %v2941_v53, %v4150_v21  ;;  %v2455_v58 = vpop.f32.mrb[15].mxu1 }
 0x395   : > { %v2501_v6 = vadd.f32 %v4150_v21, %v2455_v58 }
 0x396   : > { %2534 = vst.msk [vmem:[%s3090_s10 + $0xf8] sm:$0xff] %vm461_vm1, %v2502_v63  ;;  %v2633_v25 = vmul.f32 %v2502_v63, %v2502_v63  ;;  %v2597_v61 = vsel %vm461_vm1, %v2502_v63, 0.0 }
 0x397   : > { %2533 = vst.msk [vmem:[%s3090_s10 + $0xf0] sm:$0xff] %vm461_vm1, %v2501_v6  ;;  %v2595_v59 = vsel %vm461_vm1, %v2501_v6, 0.0  ;;  %v2632_v60 = vmul.f32 %v2501_v6, %v2501_v6 }
 0x398   : > { %v2596_v7 = vadd.f32 %v2595_v59, %v2594_v26  ;;  %v2695_v21 = vsel %vm461_vm1, %v2633_v25, 0.0 }
 0x399   : > { %v2693_v32 = vsel %vm461_vm1, %v2632_v60, 0.0 }
 0x39a   : > { %v2598_v38 = vadd.f32 %v2597_v61, %v2596_v7  ;;  %v2694_v13 = vadd.f32 %v2693_v32, %v2692_v35  ;;  %2702 = sbr.rel (%p2809_p5) target bundleno = 984 (0x3d8), region = 52 }
 0x39c   : > { %v2599_v2 = vadd.f32 %v2598_v38, %v2535_v17  ;;  %v2696_v41 = vadd.f32 %v2695_v21, %v2694_v13 }
 0x39e   : > { %2600 = vst.msk [vmem:[%s4407_s7] sm:$0xff] %vm461_vm1, %v2599_v2  ;;  %v2697_v30 = vadd.f32 %v2696_v41, %v2601_v62 }
 0x3a0   : > { %2698 = vst.msk [vmem:[%s4407_s7 + $0x8] sm:$0xff] %vm461_vm1, %v2697_v30 }
 0x3a5   : > { %v2703_v3 = vld [vmem:[%s4407_s7] sm:$0xff] }
 0x3a6   : > { %v2704_v9 = vsel %vm461_vm1, %v2703_v3, 0.0 }
 0x3a7   : > { %v2711_v48 = vld [vmem:[%s4407_s7 + $0x8] sm:$0xff]  ;;  %v2705_v43 = vrot.slane %v2704_v9, 4 }
 0x3a8   : > { %v2712_v16 = vsel %vm461_vm1, %v2711_v48, 0.0 }
 0x3a9   : > { %v2713_v19 = vrot.slane %v2712_v16, 4  ;;  %v2706_v23 = vadd.f32 %v2705_v43, %v2704_v9 }
 0x3ab   : > { %v2714_v22 = vadd.f32 %v2713_v19, %v2712_v16  ;;  %v2707_v28 = vrot.slane %v2706_v23, 2 }
 0x3ad   : > { %v2715_v36 = vrot.slane %v2714_v22, 2  ;;  %v2708_v52 = vadd.f32 %v2707_v28, %v2706_v23 }
 0x3af   : > { %v2716_v15 = vadd.f32 %v2715_v36, %v2714_v22  ;;  %v2709_v11 = vrot.slane %v2708_v52, 1 }
 0x3b1   : > { %v2717_v8 = vrot.slane %v2716_v15, 1  ;;  %v2710_v44 = vadd.f32 %v2709_v11, %v2708_v52 }
 0x3b3   : > { %v2718_v34 = vadd.f32 %v2717_v8, %v2716_v15  ;;  %v2719_v49 = vmul.f32 0.001953125, %v2710_v44 }
 0x3b5   : > { %v2720_v46 = vmul.f32 0.001953125, %v2718_v34  ;;  %v2721_v5 = vmul.f32 %v2719_v49, %v2719_v49  ;;  %2725 = vst.msk [vmem:[%s4407_s7] sm:$0x1] %vm2724_vm11, %v2719_v49 }
 0x3b7   : > { %v2722_v40 = vsub.f32 %v2720_v46, %v2721_v5 }
 0x3b9   : > { %v2723_v47 = vmax.f32 %v2722_v40, 0.0 }
 0x3bb   : > { %v2726_v31 = vadd.f32 1e-05, %v2723_v47 }
 0x3bd   : > { %3008 = vrsqrt.f32 %v2726_v31  ;;  %vm2729_vm12 = vcmp.eq.f32.partialorder %v2726_v31, inf  ;;  %v2732_v18 = vand.u32 2147483648, %v2726_v31  ;;  %vm2731_vm13 = vcmp.eq.f32.partialorder %v2726_v31, 0.0 }
 0x3c7   : > { %v3009_v37 = vpop.eup %3008 }
 0x3c8   : > { %v2728_v4 = vmul.f32 %v3009_v37, %v2726_v31 }
 0x3ca   : > { %v2730_v0 = vsel %vm2729_vm12, %v2726_v31, %v2728_v4 }
 0x3cb   : > { %v2733_v24 = vsel %vm2731_vm13, %v2732_v18, %v2730_v0 }
 0x3cc   : > { %3010 = vrcp.f32 %v2733_v24 }
 0x3d6   : > { %v3011_v27 = vpop.eup %3010 }
 0x3d7   : > { %2736 = vst.msk [vmem:[%s4407_s7 + $0x1] sm:$0x1] %vm2724_vm11, %v3011_v27 }
 0x3d8 PF: > { %s18_s24 = sadd.s32 1, %s3018_s24  }
 0x3d9   : > { %p15_p6 = scmp.ge.s32.totalorder %s18_s24, 4  }
 0x3db   :  { %17 = sbr.rel (!%p15_p6) target bundleno = 1 (0x1), region = 92 }

</bundles_post_ra>
